<compile_context>
chip_gen: v7x
topology: tpu7x:2x2x1
jax: 0.10.0
libtpu: 0.0.40
codegen_flags: <defaults>
</compile_context>

<pallas_src>
import functools

import numpy as np
import jax
import jax.numpy as jnp
from jax.experimental import pallas as pl
from jax.experimental.pallas import tpu as pltpu


# ------------------------------ fused kernel --------------------------------

def _femnist_kernel(x_ref, s1_ref, b1_ref, s2_ref, b2_ref, wf_ref, bf_ref,
                    o_ref):
    """Whole FEMNIST forward for one batch tile of TB images, all in VMEM.

    x_ref : (4, 7, TB, 28)    bf16  mod-4 row-deinterleaved images:
                                    x_ref[r, h, n, w] = img[n, 4*h + r, w]
    s1_ref: (10, 28, 12*C1)   bf16  conv1 structured RHS, slab index 2*i + dw
    b1_ref: (1, 12*C1)        f32   conv1 bias tiled over the 12 pooled cols
    s2_ref: (10, 12*C1, 4*C2) bf16  conv2 structured RHS, slab index 2*i + dw
    b2_ref: (1, 4*C2)         f32   conv2 bias tiled over the 4 pooled cols
    wf_ref: (4, 4*C2, NCO)    bf16  fc weight split by pooled row P2
    bf_ref: (1, NCO)          f32
    o_ref : (TB, NCO)         f32   logits (classes padded to NCO=128 lanes)
    """
    tb = x_ref.shape[2]
    f32 = jnp.float32

    # ---- conv1(5x5) + bias + maxpool(2x2) + relu ----------------------------
    # h1_par[rh] has rows (P, n) with pooled row ph = 2*P + rh (P in 0..5) and
    # lanes (pw, c1) with pw in 0..11 -- exactly the layout conv2 consumes.
    h1_par = []
    for rh in range(2):
        accs = []
        for dh in range(2):
            for dw in range(2):
                acc = None
                for i in range(5):
                    u = 2 * rh + dh + i           # raw image row offset, 0..7
                    lhs = x_ref[u % 4, u // 4:u // 4 + 6].reshape(6 * tb, 28)
                    t = jnp.dot(lhs, s1_ref[2 * i + dw],
                                preferred_element_type=f32)
                    acc = t if acc is None else acc + t
                accs.append(acc)
        pooled = jnp.maximum(jnp.maximum(accs[0], accs[1]),
                             jnp.maximum(accs[2], accs[3])) + b1_ref[...]
        h1_par.append(jnp.maximum(pooled, 0.0).astype(jnp.bfloat16))

    # ---- conv2(5x5) + bias + maxpool(2x2) + relu -----------------------------
    # Accumulator rows are (P2, n) (P2 in 0..3), lanes are (Q2, c2).
    accs2 = []
    for dh in range(2):
        for dw in range(2):
            acc = None
            for i in range(5):
                u = dh + i                        # h1 pooled-row offset, 0..5
                lhs = h1_par[u % 2][(u // 2) * tb:(u // 2 + 4) * tb]
                t = jnp.dot(lhs, s2_ref[2 * i + dw],
                            preferred_element_type=f32)
                acc = t if acc is None else acc + t
            accs2.append(acc)
    pooled2 = jnp.maximum(jnp.maximum(accs2[0], accs2[1]),
                          jnp.maximum(accs2[2], accs2[3])) + b2_ref[...]
    h2 = jnp.maximum(pooled2, 0.0).astype(jnp.bfloat16)     # (4*TB, 4*C2)

    # ---- fc ------------------------------------------------------------------
    acc3 = None
    for p2 in range(4):
        t = jnp.dot(h2[p2 * tb:(p2 + 1) * tb], wf_ref[p2],
                    preferred_element_type=f32)
        acc3 = t if acc3 is None else acc3 + t
    o_ref[...] = acc3 + bf_ref[...]


# ------------------------------ host wrappers --------------------------------

def _round_up(v, m):
    return (v + m - 1) // m * m


def _pick_batch_tile(n):
    """Images per grid step: a multiple of 8 (sublane pitch), capped at 64
    (VMEM per step ~10 MB), and chosen so the grid has >= 2 steps whenever the
    batch allows (keeps both v7x TensorCores busy; neutral on v5e/v6e)."""
    npad = _round_up(n, 8)
    if npad <= 8:
        return 8
    tb = _round_up((npad + 1) // 2, 8)
    return min(tb, 64)


@functools.partial(jax.jit, static_argnums=(2,))
def femnist_forward(x, kernel_params, num_classes=62):
    """x: (N, 1, 28, 28) float32 NCHW -> logits (N, num_classes) float32."""
    s1, b1t, s2, b2t, wfp, bfp = kernel_params
    n = x.shape[0]
    assert x.shape[1:] == (1, 28, 28)
    nco = wfp.shape[2]

    tb = _pick_batch_tile(n)
    npad = _round_up(n, tb)

    img = x.reshape(n, 28, 28)
    if npad != n:
        img = jnp.pad(img, ((0, npad - n), (0, 0), (0, 0)))
    # mod-4 row deinterleave so every in-kernel patch slice is contiguous:
    #   xph[r, h, n, w] = img[n, 4*h + r, w]
    xph = img.reshape(npad, 7, 4, 28).transpose(2, 1, 0, 3).astype(jnp.bfloat16)

    out = pl.pallas_call(
        _femnist_kernel,
        out_shape=jax.ShapeDtypeStruct((npad, nco), jnp.float32),
        grid=(npad // tb,),
        in_specs=[
            pl.BlockSpec((4, 7, tb, 28), lambda b: (0, 0, b, 0)),
            pl.BlockSpec(s1.shape, lambda b: (0, 0, 0)),
            pl.BlockSpec(b1t.shape, lambda b: (0, 0)),
            pl.BlockSpec(s2.shape, lambda b: (0, 0, 0)),
            pl.BlockSpec(b2t.shape, lambda b: (0, 0)),
            pl.BlockSpec(wfp.shape, lambda b: (0, 0, 0)),
            pl.BlockSpec(bfp.shape, lambda b: (0, 0)),
        ],
        out_specs=pl.BlockSpec((tb, nco), lambda b: (b, 0)),
        compiler_params=pltpu.CompilerParams(
            dimension_semantics=("parallel",),
            vmem_limit_bytes=48 * 1024 * 1024),
    )(xph, s1, b1t, s2, b2t, wfp, bfp)

    return out[:n, :num_classes]


# --------------------- one-time parameter preprocessing ----------------------

def _conv_rhs(w_oihw, in_w, pooled_w):
    """Structured conv RHS folding the horizontal geometry into the weight.

    S[2*i + dw, win*Cin + cin, q*Cout + cout] = W[cout, cin, i, j]
    with j = win - 2*q - dw (entries with j outside [0, KW) stay zero), so that
    (input rows at height 2*ph + dh + i, flattened as (win, cin)) @ S[2*i + dw]
    yields the conv outputs of pool tap (dh, dw) for every pooled column q."""
    cout, cin, kh, kw = w_oihw.shape
    w = np.asarray(w_oihw, np.float32)
    s = np.zeros((kh * 2, in_w, cin, pooled_w, cout), np.float32)
    for i in range(kh):
        for dw in range(2):
            for q in range(pooled_w):
                for j in range(kw):
                    s[2 * i + dw, 2 * q + dw + j, :, q, :] = w[:, :, i, j].T
    return s.reshape(kh * 2, in_w * cin, pooled_w * cout)


def preprocess_params(params):
    """One-time (outside the jitted forward) conversion of the PyTorch-layout
    parameters into the kernel's structured bf16 matmul operands."""
    w1, b1, w2, b2, wf, bf = [np.asarray(p, np.float32) for p in params]
    c1, c2, nc = w1.shape[0], w2.shape[0], wf.shape[0]
    nco = _round_up(nc, 128)                     # lane-dense logits stores

    s1 = _conv_rhs(w1, 28, 12)                   # (10, 28, 12*c1)
    s2 = _conv_rhs(w2, 12, 4)                    # (10, 12*c1, 4*c2)
    b1t = np.tile(b1, 12)[None, :]               # (1, 12*c1)
    b2t = np.tile(b2, 4)[None, :]                # (1, 4*c2)

    # fc: PyTorch flattens NCHW features f = c*16 + P2*4 + Q2; the kernel's h2
    # rows are (P2, n) and lanes are (Q2, c2), so split wf by P2 and permute.
    wf4 = wf.reshape(nc, c2, 4, 4).transpose(2, 3, 1, 0)   # (P2, Q2, c2, nc)
    wfp = np.zeros((4, 4 * c2, nco), np.float32)
    wfp[:, :, :nc] = wf4.reshape(4, 4 * c2, nc)
    bfp = np.zeros((1, nco), np.float32)
    bfp[0, :nc] = bf

    return (jnp.asarray(s1, jnp.bfloat16), jnp.asarray(b1t, jnp.float32),
            jnp.asarray(s2, jnp.bfloat16), jnp.asarray(b2t, jnp.float32),
            jnp.asarray(wfp, jnp.bfloat16), jnp.asarray(bfp, jnp.float32))


# ------------------------- init / pure-JAX reference -------------------------

def init_params(key, c1=32, c2=64, num_classes=62):
    ks = jax.random.split(key, 6)

    def u(k, shape, fan_in):
        bound = 1.0 / jnp.sqrt(float(fan_in))
        return jax.random.uniform(k, shape, jnp.float32, -bound, bound)

    w1 = u(ks[0], (c1, 1, 5, 5), 1 * 25)
    b1 = u(ks[1], (c1,), 1 * 25)
    w2 = u(ks[2], (c2, c1, 5, 5), c1 * 25)
    b2 = u(ks[3], (c2,), c1 * 25)
    wf = u(ks[4], (num_classes, 16 * c2), 16 * c2)
    bf = u(ks[5], (num_classes,), 16 * c2)
    return w1, b1, w2, b2, wf, bf


def reference_forward(x, params):
    """Pure-JAX (XLA, f32) reference matching the PyTorch forward."""
    w1, b1, w2, b2, wf, bf = params

    def conv(z, w, b):
        y = jax.lax.conv_general_dilated(
            z, w, window_strides=(1, 1), padding="VALID",
            dimension_numbers=("NCHW", "OIHW", "NCHW"))
        return y + b[None, :, None, None]

    def pool(z):
        return jax.lax.reduce_window(z, -jnp.inf, jax.lax.max,
                                     (1, 1, 2, 2), (1, 1, 2, 2), "VALID")

    h = jax.nn.relu(pool(conv(x, w1, b1)))
    h = jax.nn.relu(pool(conv(h, w2, b2)))
    return h.reshape(x.shape[0], -1) @ wf.T + bf


if __name__ == "__main__":
    key = jax.random.PRNGKey(0)
    kx, kp = jax.random.split(key)

    params = init_params(kp, c1=32, c2=64, num_classes=62)
    kparams = preprocess_params(params)

    # Small batch: single grid step.
    x = jax.random.normal(kx, (2, 1, 28, 28), jnp.float32)
    out = jax.block_until_ready(femnist_forward(x, kparams, 62))
    ref = reference_forward(x, params)
    assert out.shape == (2, 62)
    assert bool(jnp.allclose(out, ref, rtol=2e-2, atol=2e-2))

    # Batch that exercises batch padding and a 2-step "parallel" grid.
    x9 = jax.random.normal(kx, (9, 1, 28, 28), jnp.float32)
    out9 = jax.block_until_ready(femnist_forward(x9, kparams, 62))
    ref9 = reference_forward(x9, params)
    assert out9.shape == (9, 62)
    assert bool(jnp.allclose(out9, ref9, rtol=2e-2, atol=2e-2))

    print("KERNEL_OK")
</pallas_src>

<mosaic_0001>
module attributes {stable_mosaic.version = 11 : i64} {
  func.func @_femnist_kernel(%arg0: i32, %arg1: memref<4x7x8x28xbf16, #tpu.memory_space<vmem>>, %arg2: memref<10x28x384xbf16, #tpu.memory_space<vmem>>, %arg3: memref<1x384xf32, #tpu.memory_space<vmem>>, %arg4: memref<10x384x256xbf16, #tpu.memory_space<vmem>>, %arg5: memref<1x256xf32, #tpu.memory_space<vmem>>, %arg6: memref<4x256x128xbf16, #tpu.memory_space<vmem>>, %arg7: memref<1x128xf32, #tpu.memory_space<vmem>>, %arg8: memref<8x128xf32, #tpu.memory_space<vmem>>) attributes {dimension_semantics = [#tpu.dimension_semantics<parallel>], iteration_bounds = array<i64: 1>, scalar_prefetch = 0 : i64, scratch_operands = 0 : i64, tpu.core_type = #tpu.core_type<tc>, window_params = [{transform_indices = @transform_0, window_bounds = array<i64: 4, 7, 8, 28>}, {pipeline_mode = #tpu.pipeline_mode<synchronous>, transform_indices = @transform_1, window_bounds = array<i64: 10, 28, 384>}, {pipeline_mode = #tpu.pipeline_mode<synchronous>, transform_indices = @transform_2, window_bounds = array<i64: 1, 384>}, {pipeline_mode = #tpu.pipeline_mode<synchronous>, transform_indices = @transform_3, window_bounds = array<i64: 10, 384, 256>}, {pipeline_mode = #tpu.pipeline_mode<synchronous>, transform_indices = @transform_4, window_bounds = array<i64: 1, 256>}, {pipeline_mode = #tpu.pipeline_mode<synchronous>, transform_indices = @transform_5, window_bounds = array<i64: 4, 256, 128>}, {pipeline_mode = #tpu.pipeline_mode<synchronous>, transform_indices = @transform_6, window_bounds = array<i64: 1, 128>}, {transform_indices = @transform_7, window_bounds = array<i64: 8, 128>}]} {
    %c0 = arith.constant 0 : index
    %c0_0 = arith.constant 0 : index
    %c0_1 = arith.constant 0 : index
    %c0_2 = arith.constant 0 : index
    %0 = vector.load %arg1[%c0, %c0_0, %c0_1, %c0_2] : memref<4x7x8x28xbf16, #tpu.memory_space<vmem>>, vector<1x6x8x28xbf16>
    %1 = vector.shape_cast %0 : vector<1x6x8x28xbf16> to vector<6x8x28xbf16>
    %2 = vector.shape_cast %1 : vector<6x8x28xbf16> to vector<48x28xbf16>
    %c0_3 = arith.constant 0 : index
    %c0_4 = arith.constant 0 : index
    %c0_5 = arith.constant 0 : index
    %3 = vector.load %arg2[%c0_3, %c0_4, %c0_5] : memref<10x28x384xbf16, #tpu.memory_space<vmem>>, vector<1x28x384xbf16>
    %4 = vector.shape_cast %3 : vector<1x28x384xbf16> to vector<28x384xbf16>
    %cst = arith.constant dense<0.000000e+00> : vector<48x384xf32>
    %5 = tpu.matmul %2, %4, %cst {dimension_numbers = #tpu.dot_dimension_numbers<[1], [0], [0], [1], [0, 0, 1, 1], [], []>} : vector<48x28xbf16>, vector<28x384xbf16>, vector<48x384xf32> -> vector<48x384xf32>
    %c1 = arith.constant 1 : index
    %c0_6 = arith.constant 0 : index
    %c0_7 = arith.constant 0 : index
    %c0_8 = arith.constant 0 : index
    %6 = vector.load %arg1[%c1, %c0_6, %c0_7, %c0_8] : memref<4x7x8x28xbf16, #tpu.memory_space<vmem>>, vector<1x6x8x28xbf16>
    %7 = vector.shape_cast %6 : vector<1x6x8x28xbf16> to vector<6x8x28xbf16>
    %8 = vector.shape_cast %7 : vector<6x8x28xbf16> to vector<48x28xbf16>
    %c2 = arith.constant 2 : index
    %c0_9 = arith.constant 0 : index
    %c0_10 = arith.constant 0 : index
    %9 = vector.load %arg2[%c2, %c0_9, %c0_10] : memref<10x28x384xbf16, #tpu.memory_space<vmem>>, vector<1x28x384xbf16>
    %10 = vector.shape_cast %9 : vector<1x28x384xbf16> to vector<28x384xbf16>
    %cst_11 = arith.constant dense<0.000000e+00> : vector<48x384xf32>
    %11 = tpu.matmul %8, %10, %cst_11 {dimension_numbers = #tpu.dot_dimension_numbers<[1], [0], [0], [1], [0, 0, 1, 1], [], []>} : vector<48x28xbf16>, vector<28x384xbf16>, vector<48x384xf32> -> vector<48x384xf32>
    %12 = arith.addf %5, %11 : vector<48x384xf32>
    %c2_12 = arith.constant 2 : index
    %c0_13 = arith.constant 0 : index
    %c0_14 = arith.constant 0 : index
    %c0_15 = arith.constant 0 : index
    %13 = vector.load %arg1[%c2_12, %c0_13, %c0_14, %c0_15] : memref<4x7x8x28xbf16, #tpu.memory_space<vmem>>, vector<1x6x8x28xbf16>
    %14 = vector.shape_cast %13 : vector<1x6x8x28xbf16> to vector<6x8x28xbf16>
    %15 = vector.shape_cast %14 : vector<6x8x28xbf16> to vector<48x28xbf16>
    %c4 = arith.constant 4 : index
    %c0_16 = arith.constant 0 : index
    %c0_17 = arith.constant 0 : index
    %16 = vector.load %arg2[%c4, %c0_16, %c0_17] : memref<10x28x384xbf16, #tpu.memory_space<vmem>>, vector<1x28x384xbf16>
    %17 = vector.shape_cast %16 : vector<1x28x384xbf16> to vector<28x384xbf16>
    %cst_18 = arith.constant dense<0.000000e+00> : vector<48x384xf32>
    %18 = tpu.matmul %15, %17, %cst_18 {dimension_numbers = #tpu.dot_dimension_numbers<[1], [0], [0], [1], [0, 0, 1, 1], [], []>} : vector<48x28xbf16>, vector<28x384xbf16>, vector<48x384xf32> -> vector<48x384xf32>
    %19 = arith.addf %12, %18 : vector<48x384xf32>
    %c3 = arith.constant 3 : index
    %c0_19 = arith.constant 0 : index
    %c0_20 = arith.constant 0 : index
    %c0_21 = arith.constant 0 : index
    %20 = vector.load %arg1[%c3, %c0_19, %c0_20, %c0_21] : memref<4x7x8x28xbf16, #tpu.memory_space<vmem>>, vector<1x6x8x28xbf16>
    %21 = vector.shape_cast %20 : vector<1x6x8x28xbf16> to vector<6x8x28xbf16>
    %22 = vector.shape_cast %21 : vector<6x8x28xbf16> to vector<48x28xbf16>
    %c6 = arith.constant 6 : index
    %c0_22 = arith.constant 0 : index
    %c0_23 = arith.constant 0 : index
    %23 = vector.load %arg2[%c6, %c0_22, %c0_23] : memref<10x28x384xbf16, #tpu.memory_space<vmem>>, vector<1x28x384xbf16>
    %24 = vector.shape_cast %23 : vector<1x28x384xbf16> to vector<28x384xbf16>
    %cst_24 = arith.constant dense<0.000000e+00> : vector<48x384xf32>
    %25 = tpu.matmul %22, %24, %cst_24 {dimension_numbers = #tpu.dot_dimension_numbers<[1], [0], [0], [1], [0, 0, 1, 1], [], []>} : vector<48x28xbf16>, vector<28x384xbf16>, vector<48x384xf32> -> vector<48x384xf32>
    %26 = arith.addf %19, %25 : vector<48x384xf32>
    %c0_25 = arith.constant 0 : index
    %c1_26 = arith.constant 1 : index
    %c0_27 = arith.constant 0 : index
    %c0_28 = arith.constant 0 : index
    %27 = vector.load %arg1[%c0_25, %c1_26, %c0_27, %c0_28] : memref<4x7x8x28xbf16, #tpu.memory_space<vmem>>, vector<1x6x8x28xbf16>
    %28 = vector.shape_cast %27 : vector<1x6x8x28xbf16> to vector<6x8x28xbf16>
    %29 = vector.shape_cast %28 : vector<6x8x28xbf16> to vector<48x28xbf16>
    %c8 = arith.constant 8 : index
    %c0_29 = arith.constant 0 : index
    %c0_30 = arith.constant 0 : index
    %30 = vector.load %arg2[%c8, %c0_29, %c0_30] : memref<10x28x384xbf16, #tpu.memory_space<vmem>>, vector<1x28x384xbf16>
    %31 = vector.shape_cast %30 : vector<1x28x384xbf16> to vector<28x384xbf16>
    %cst_31 = arith.constant dense<0.000000e+00> : vector<48x384xf32>
    %32 = tpu.matmul %29, %31, %cst_31 {dimension_numbers = #tpu.dot_dimension_numbers<[1], [0], [0], [1], [0, 0, 1, 1], [], []>} : vector<48x28xbf16>, vector<28x384xbf16>, vector<48x384xf32> -> vector<48x384xf32>
    %33 = arith.addf %26, %32 : vector<48x384xf32>
    %c0_32 = arith.constant 0 : index
    %c0_33 = arith.constant 0 : index
    %c0_34 = arith.constant 0 : index
    %c0_35 = arith.constant 0 : index
    %34 = vector.load %arg1[%c0_32, %c0_33, %c0_34, %c0_35] : memref<4x7x8x28xbf16, #tpu.memory_space<vmem>>, vector<1x6x8x28xbf16>
    %35 = vector.shape_cast %34 : vector<1x6x8x28xbf16> to vector<6x8x28xbf16>
    %36 = vector.shape_cast %35 : vector<6x8x28xbf16> to vector<48x28xbf16>
    %c1_36 = arith.constant 1 : index
    %c0_37 = arith.constant 0 : index
    %c0_38 = arith.constant 0 : index
    %37 = vector.load %arg2[%c1_36, %c0_37, %c0_38] : memref<10x28x384xbf16, #tpu.memory_space<vmem>>, vector<1x28x384xbf16>
    %38 = vector.shape_cast %37 : vector<1x28x384xbf16> to vector<28x384xbf16>
    %cst_39 = arith.constant dense<0.000000e+00> : vector<48x384xf32>
    %39 = tpu.matmul %36, %38, %cst_39 {dimension_numbers = #tpu.dot_dimension_numbers<[1], [0], [0], [1], [0, 0, 1, 1], [], []>} : vector<48x28xbf16>, vector<28x384xbf16>, vector<48x384xf32> -> vector<48x384xf32>
    %c1_40 = arith.constant 1 : index
    %c0_41 = arith.constant 0 : index
    %c0_42 = arith.constant 0 : index
    %c0_43 = arith.constant 0 : index
    %40 = vector.load %arg1[%c1_40, %c0_41, %c0_42, %c0_43] : memref<4x7x8x28xbf16, #tpu.memory_space<vmem>>, vector<1x6x8x28xbf16>
    %41 = vector.shape_cast %40 : vector<1x6x8x28xbf16> to vector<6x8x28xbf16>
    %42 = vector.shape_cast %41 : vector<6x8x28xbf16> to vector<48x28xbf16>
    %c3_44 = arith.constant 3 : index
    %c0_45 = arith.constant 0 : index
    %c0_46 = arith.constant 0 : index
    %43 = vector.load %arg2[%c3_44, %c0_45, %c0_46] : memref<10x28x384xbf16, #tpu.memory_space<vmem>>, vector<1x28x384xbf16>
    %44 = vector.shape_cast %43 : vector<1x28x384xbf16> to vector<28x384xbf16>
    %cst_47 = arith.constant dense<0.000000e+00> : vector<48x384xf32>
    %45 = tpu.matmul %42, %44, %cst_47 {dimension_numbers = #tpu.dot_dimension_numbers<[1], [0], [0], [1], [0, 0, 1, 1], [], []>} : vector<48x28xbf16>, vector<28x384xbf16>, vector<48x384xf32> -> vector<48x384xf32>
    %46 = arith.addf %39, %45 : vector<48x384xf32>
    %c2_48 = arith.constant 2 : index
    %c0_49 = arith.constant 0 : index
    %c0_50 = arith.constant 0 : index
    %c0_51 = arith.constant 0 : index
    %47 = vector.load %arg1[%c2_48, %c0_49, %c0_50, %c0_51] : memref<4x7x8x28xbf16, #tpu.memory_space<vmem>>, vector<1x6x8x28xbf16>
    %48 = vector.shape_cast %47 : vector<1x6x8x28xbf16> to vector<6x8x28xbf16>
    %49 = vector.shape_cast %48 : vector<6x8x28xbf16> to vector<48x28xbf16>
    %c5 = arith.constant 5 : index
    %c0_52 = arith.constant 0 : index
    %c0_53 = arith.constant 0 : index
    %50 = vector.load %arg2[%c5, %c0_52, %c0_53] : memref<10x28x384xbf16, #tpu.memory_space<vmem>>, vector<1x28x384xbf16>
    %51 = vector.shape_cast %50 : vector<1x28x384xbf16> to vector<28x384xbf16>
    %cst_54 = arith.constant dense<0.000000e+00> : vector<48x384xf32>
    %52 = tpu.matmul %49, %51, %cst_54 {dimension_numbers = #tpu.dot_dimension_numbers<[1], [0], [0], [1], [0, 0, 1, 1], [], []>} : vector<48x28xbf16>, vector<28x384xbf16>, vector<48x384xf32> -> vector<48x384xf32>
    %53 = arith.addf %46, %52 : vector<48x384xf32>
    %c3_55 = arith.constant 3 : index
    %c0_56 = arith.constant 0 : index
    %c0_57 = arith.constant 0 : index
    %c0_58 = arith.constant 0 : index
    %54 = vector.load %arg1[%c3_55, %c0_56, %c0_57, %c0_58] : memref<4x7x8x28xbf16, #tpu.memory_space<vmem>>, vector<1x6x8x28xbf16>
    %55 = vector.shape_cast %54 : vector<1x6x8x28xbf16> to vector<6x8x28xbf16>
    %56 = vector.shape_cast %55 : vector<6x8x28xbf16> to vector<48x28xbf16>
    %c7 = arith.constant 7 : index
    %c0_59 = arith.constant 0 : index
    %c0_60 = arith.constant 0 : index
    %57 = vector.load %arg2[%c7, %c0_59, %c0_60] : memref<10x28x384xbf16, #tpu.memory_space<vmem>>, vector<1x28x384xbf16>
    %58 = vector.shape_cast %57 : vector<1x28x384xbf16> to vector<28x384xbf16>
    %cst_61 = arith.constant dense<0.000000e+00> : vector<48x384xf32>
    %59 = tpu.matmul %56, %58, %cst_61 {dimension_numbers = #tpu.dot_dimension_numbers<[1], [0], [0], [1], [0, 0, 1, 1], [], []>} : vector<48x28xbf16>, vector<28x384xbf16>, vector<48x384xf32> -> vector<48x384xf32>
    %60 = arith.addf %53, %59 : vector<48x384xf32>
    %c0_62 = arith.constant 0 : index
    %c1_63 = arith.constant 1 : index
    %c0_64 = arith.constant 0 : index
    %c0_65 = arith.constant 0 : index
    %61 = vector.load %arg1[%c0_62, %c1_63, %c0_64, %c0_65] : memref<4x7x8x28xbf16, #tpu.memory_space<vmem>>, vector<1x6x8x28xbf16>
    %62 = vector.shape_cast %61 : vector<1x6x8x28xbf16> to vector<6x8x28xbf16>
    %63 = vector.shape_cast %62 : vector<6x8x28xbf16> to vector<48x28xbf16>
    %c9 = arith.constant 9 : index
    %c0_66 = arith.constant 0 : index
    %c0_67 = arith.constant 0 : index
    %64 = vector.load %arg2[%c9, %c0_66, %c0_67] : memref<10x28x384xbf16, #tpu.memory_space<vmem>>, vector<1x28x384xbf16>
    %65 = vector.shape_cast %64 : vector<1x28x384xbf16> to vector<28x384xbf16>
    %cst_68 = arith.constant dense<0.000000e+00> : vector<48x384xf32>
    %66 = tpu.matmul %63, %65, %cst_68 {dimension_numbers = #tpu.dot_dimension_numbers<[1], [0], [0], [1], [0, 0, 1, 1], [], []>} : vector<48x28xbf16>, vector<28x384xbf16>, vector<48x384xf32> -> vector<48x384xf32>
    %67 = arith.addf %60, %66 : vector<48x384xf32>
    %c1_69 = arith.constant 1 : index
    %c0_70 = arith.constant 0 : index
    %c0_71 = arith.constant 0 : index
    %c0_72 = arith.constant 0 : index
    %68 = vector.load %arg1[%c1_69, %c0_70, %c0_71, %c0_72] : memref<4x7x8x28xbf16, #tpu.memory_space<vmem>>, vector<1x6x8x28xbf16>
    %69 = vector.shape_cast %68 : vector<1x6x8x28xbf16> to vector<6x8x28xbf16>
    %70 = vector.shape_cast %69 : vector<6x8x28xbf16> to vector<48x28xbf16>
    %c0_73 = arith.constant 0 : index
    %c0_74 = arith.constant 0 : index
    %c0_75 = arith.constant 0 : index
    %71 = vector.load %arg2[%c0_73, %c0_74, %c0_75] : memref<10x28x384xbf16, #tpu.memory_space<vmem>>, vector<1x28x384xbf16>
    %72 = vector.shape_cast %71 : vector<1x28x384xbf16> to vector<28x384xbf16>
    %cst_76 = arith.constant dense<0.000000e+00> : vector<48x384xf32>
    %73 = tpu.matmul %70, %72, %cst_76 {dimension_numbers = #tpu.dot_dimension_numbers<[1], [0], [0], [1], [0, 0, 1, 1], [], []>} : vector<48x28xbf16>, vector<28x384xbf16>, vector<48x384xf32> -> vector<48x384xf32>
    %c2_77 = arith.constant 2 : index
    %c0_78 = arith.constant 0 : index
    %c0_79 = arith.constant 0 : index
    %c0_80 = arith.constant 0 : index
    %74 = vector.load %arg1[%c2_77, %c0_78, %c0_79, %c0_80] : memref<4x7x8x28xbf16, #tpu.memory_space<vmem>>, vector<1x6x8x28xbf16>
    %75 = vector.shape_cast %74 : vector<1x6x8x28xbf16> to vector<6x8x28xbf16>
    %76 = vector.shape_cast %75 : vector<6x8x28xbf16> to vector<48x28xbf16>
    %c2_81 = arith.constant 2 : index
    %c0_82 = arith.constant 0 : index
    %c0_83 = arith.constant 0 : index
    %77 = vector.load %arg2[%c2_81, %c0_82, %c0_83] : memref<10x28x384xbf16, #tpu.memory_space<vmem>>, vector<1x28x384xbf16>
    %78 = vector.shape_cast %77 : vector<1x28x384xbf16> to vector<28x384xbf16>
    %cst_84 = arith.constant dense<0.000000e+00> : vector<48x384xf32>
    %79 = tpu.matmul %76, %78, %cst_84 {dimension_numbers = #tpu.dot_dimension_numbers<[1], [0], [0], [1], [0, 0, 1, 1], [], []>} : vector<48x28xbf16>, vector<28x384xbf16>, vector<48x384xf32> -> vector<48x384xf32>
    %80 = arith.addf %73, %79 : vector<48x384xf32>
    %c3_85 = arith.constant 3 : index
    %c0_86 = arith.constant 0 : index
    %c0_87 = arith.constant 0 : index
    %c0_88 = arith.constant 0 : index
    %81 = vector.load %arg1[%c3_85, %c0_86, %c0_87, %c0_88] : memref<4x7x8x28xbf16, #tpu.memory_space<vmem>>, vector<1x6x8x28xbf16>
    %82 = vector.shape_cast %81 : vector<1x6x8x28xbf16> to vector<6x8x28xbf16>
    %83 = vector.shape_cast %82 : vector<6x8x28xbf16> to vector<48x28xbf16>
    %c4_89 = arith.constant 4 : index
    %c0_90 = arith.constant 0 : index
    %c0_91 = arith.constant 0 : index
    %84 = vector.load %arg2[%c4_89, %c0_90, %c0_91] : memref<10x28x384xbf16, #tpu.memory_space<vmem>>, vector<1x28x384xbf16>
    %85 = vector.shape_cast %84 : vector<1x28x384xbf16> to vector<28x384xbf16>
    %cst_92 = arith.constant dense<0.000000e+00> : vector<48x384xf32>
    %86 = tpu.matmul %83, %85, %cst_92 {dimension_numbers = #tpu.dot_dimension_numbers<[1], [0], [0], [1], [0, 0, 1, 1], [], []>} : vector<48x28xbf16>, vector<28x384xbf16>, vector<48x384xf32> -> vector<48x384xf32>
    %87 = arith.addf %80, %86 : vector<48x384xf32>
    %c0_93 = arith.constant 0 : index
    %c1_94 = arith.constant 1 : index
    %c0_95 = arith.constant 0 : index
    %c0_96 = arith.constant 0 : index
    %88 = vector.load %arg1[%c0_93, %c1_94, %c0_95, %c0_96] : memref<4x7x8x28xbf16, #tpu.memory_space<vmem>>, vector<1x6x8x28xbf16>
    %89 = vector.shape_cast %88 : vector<1x6x8x28xbf16> to vector<6x8x28xbf16>
    %90 = vector.shape_cast %89 : vector<6x8x28xbf16> to vector<48x28xbf16>
    %c6_97 = arith.constant 6 : index
    %c0_98 = arith.constant 0 : index
    %c0_99 = arith.constant 0 : index
    %91 = vector.load %arg2[%c6_97, %c0_98, %c0_99] : memref<10x28x384xbf16, #tpu.memory_space<vmem>>, vector<1x28x384xbf16>
    %92 = vector.shape_cast %91 : vector<1x28x384xbf16> to vector<28x384xbf16>
    %cst_100 = arith.constant dense<0.000000e+00> : vector<48x384xf32>
    %93 = tpu.matmul %90, %92, %cst_100 {dimension_numbers = #tpu.dot_dimension_numbers<[1], [0], [0], [1], [0, 0, 1, 1], [], []>} : vector<48x28xbf16>, vector<28x384xbf16>, vector<48x384xf32> -> vector<48x384xf32>
    %94 = arith.addf %87, %93 : vector<48x384xf32>
    %c1_101 = arith.constant 1 : index
    %c1_102 = arith.constant 1 : index
    %c0_103 = arith.constant 0 : index
    %c0_104 = arith.constant 0 : index
    %95 = vector.load %arg1[%c1_101, %c1_102, %c0_103, %c0_104] : memref<4x7x8x28xbf16, #tpu.memory_space<vmem>>, vector<1x6x8x28xbf16>
    %96 = vector.shape_cast %95 : vector<1x6x8x28xbf16> to vector<6x8x28xbf16>
    %97 = vector.shape_cast %96 : vector<6x8x28xbf16> to vector<48x28xbf16>
    %c8_105 = arith.constant 8 : index
    %c0_106 = arith.constant 0 : index
    %c0_107 = arith.constant 0 : index
    %98 = vector.load %arg2[%c8_105, %c0_106, %c0_107] : memref<10x28x384xbf16, #tpu.memory_space<vmem>>, vector<1x28x384xbf16>
    %99 = vector.shape_cast %98 : vector<1x28x384xbf16> to vector<28x384xbf16>
    %cst_108 = arith.constant dense<0.000000e+00> : vector<48x384xf32>
    %100 = tpu.matmul %97, %99, %cst_108 {dimension_numbers = #tpu.dot_dimension_numbers<[1], [0], [0], [1], [0, 0, 1, 1], [], []>} : vector<48x28xbf16>, vector<28x384xbf16>, vector<48x384xf32> -> vector<48x384xf32>
    %101 = arith.addf %94, %100 : vector<48x384xf32>
    %c1_109 = arith.constant 1 : index
    %c0_110 = arith.constant 0 : index
    %c0_111 = arith.constant 0 : index
    %c0_112 = arith.constant 0 : index
    %102 = vector.load %arg1[%c1_109, %c0_110, %c0_111, %c0_112] : memref<4x7x8x28xbf16, #tpu.memory_space<vmem>>, vector<1x6x8x28xbf16>
    %103 = vector.shape_cast %102 : vector<1x6x8x28xbf16> to vector<6x8x28xbf16>
    %104 = vector.shape_cast %103 : vector<6x8x28xbf16> to vector<48x28xbf16>
    %c1_113 = arith.constant 1 : index
    %c0_114 = arith.constant 0 : index
    %c0_115 = arith.constant 0 : index
    %105 = vector.load %arg2[%c1_113, %c0_114, %c0_115] : memref<10x28x384xbf16, #tpu.memory_space<vmem>>, vector<1x28x384xbf16>
    %106 = vector.shape_cast %105 : vector<1x28x384xbf16> to vector<28x384xbf16>
    %cst_116 = arith.constant dense<0.000000e+00> : vector<48x384xf32>
    %107 = tpu.matmul %104, %106, %cst_116 {dimension_numbers = #tpu.dot_dimension_numbers<[1], [0], [0], [1], [0, 0, 1, 1], [], []>} : vector<48x28xbf16>, vector<28x384xbf16>, vector<48x384xf32> -> vector<48x384xf32>
    %c2_117 = arith.constant 2 : index
    %c0_118 = arith.constant 0 : index
    %c0_119 = arith.constant 0 : index
    %c0_120 = arith.constant 0 : index
    %108 = vector.load %arg1[%c2_117, %c0_118, %c0_119, %c0_120] : memref<4x7x8x28xbf16, #tpu.memory_space<vmem>>, vector<1x6x8x28xbf16>
    %109 = vector.shape_cast %108 : vector<1x6x8x28xbf16> to vector<6x8x28xbf16>
    %110 = vector.shape_cast %109 : vector<6x8x28xbf16> to vector<48x28xbf16>
    %c3_121 = arith.constant 3 : index
    %c0_122 = arith.constant 0 : index
    %c0_123 = arith.constant 0 : index
    %111 = vector.load %arg2[%c3_121, %c0_122, %c0_123] : memref<10x28x384xbf16, #tpu.memory_space<vmem>>, vector<1x28x384xbf16>
    %112 = vector.shape_cast %111 : vector<1x28x384xbf16> to vector<28x384xbf16>
    %cst_124 = arith.constant dense<0.000000e+00> : vector<48x384xf32>
    %113 = tpu.matmul %110, %112, %cst_124 {dimension_numbers = #tpu.dot_dimension_numbers<[1], [0], [0], [1], [0, 0, 1, 1], [], []>} : vector<48x28xbf16>, vector<28x384xbf16>, vector<48x384xf32> -> vector<48x384xf32>
    %114 = arith.addf %107, %113 : vector<48x384xf32>
    %c3_125 = arith.constant 3 : index
    %c0_126 = arith.constant 0 : index
    %c0_127 = arith.constant 0 : index
    %c0_128 = arith.constant 0 : index
    %115 = vector.load %arg1[%c3_125, %c0_126, %c0_127, %c0_128] : memref<4x7x8x28xbf16, #tpu.memory_space<vmem>>, vector<1x6x8x28xbf16>
    %116 = vector.shape_cast %115 : vector<1x6x8x28xbf16> to vector<6x8x28xbf16>
    %117 = vector.shape_cast %116 : vector<6x8x28xbf16> to vector<48x28xbf16>
    %c5_129 = arith.constant 5 : index
    %c0_130 = arith.constant 0 : index
    %c0_131 = arith.constant 0 : index
    %118 = vector.load %arg2[%c5_129, %c0_130, %c0_131] : memref<10x28x384xbf16, #tpu.memory_space<vmem>>, vector<1x28x384xbf16>
    %119 = vector.shape_cast %118 : vector<1x28x384xbf16> to vector<28x384xbf16>
    %cst_132 = arith.constant dense<0.000000e+00> : vector<48x384xf32>
    %120 = tpu.matmul %117, %119, %cst_132 {dimension_numbers = #tpu.dot_dimension_numbers<[1], [0], [0], [1], [0, 0, 1, 1], [], []>} : vector<48x28xbf16>, vector<28x384xbf16>, vector<48x384xf32> -> vector<48x384xf32>
    %121 = arith.addf %114, %120 : vector<48x384xf32>
    %c0_133 = arith.constant 0 : index
    %c1_134 = arith.constant 1 : index
    %c0_135 = arith.constant 0 : index
    %c0_136 = arith.constant 0 : index
    %122 = vector.load %arg1[%c0_133, %c1_134, %c0_135, %c0_136] : memref<4x7x8x28xbf16, #tpu.memory_space<vmem>>, vector<1x6x8x28xbf16>
    %123 = vector.shape_cast %122 : vector<1x6x8x28xbf16> to vector<6x8x28xbf16>
    %124 = vector.shape_cast %123 : vector<6x8x28xbf16> to vector<48x28xbf16>
    %c7_137 = arith.constant 7 : index
    %c0_138 = arith.constant 0 : index
    %c0_139 = arith.constant 0 : index
    %125 = vector.load %arg2[%c7_137, %c0_138, %c0_139] : memref<10x28x384xbf16, #tpu.memory_space<vmem>>, vector<1x28x384xbf16>
    %126 = vector.shape_cast %125 : vector<1x28x384xbf16> to vector<28x384xbf16>
    %cst_140 = arith.constant dense<0.000000e+00> : vector<48x384xf32>
    %127 = tpu.matmul %124, %126, %cst_140 {dimension_numbers = #tpu.dot_dimension_numbers<[1], [0], [0], [1], [0, 0, 1, 1], [], []>} : vector<48x28xbf16>, vector<28x384xbf16>, vector<48x384xf32> -> vector<48x384xf32>
    %128 = arith.addf %121, %127 : vector<48x384xf32>
    %c1_141 = arith.constant 1 : index
    %c1_142 = arith.constant 1 : index
    %c0_143 = arith.constant 0 : index
    %c0_144 = arith.constant 0 : index
    %129 = vector.load %arg1[%c1_141, %c1_142, %c0_143, %c0_144] : memref<4x7x8x28xbf16, #tpu.memory_space<vmem>>, vector<1x6x8x28xbf16>
    %130 = vector.shape_cast %129 : vector<1x6x8x28xbf16> to vector<6x8x28xbf16>
    %131 = vector.shape_cast %130 : vector<6x8x28xbf16> to vector<48x28xbf16>
    %c9_145 = arith.constant 9 : index
    %c0_146 = arith.constant 0 : index
    %c0_147 = arith.constant 0 : index
    %132 = vector.load %arg2[%c9_145, %c0_146, %c0_147] : memref<10x28x384xbf16, #tpu.memory_space<vmem>>, vector<1x28x384xbf16>
    %133 = vector.shape_cast %132 : vector<1x28x384xbf16> to vector<28x384xbf16>
    %cst_148 = arith.constant dense<0.000000e+00> : vector<48x384xf32>
    %134 = tpu.matmul %131, %133, %cst_148 {dimension_numbers = #tpu.dot_dimension_numbers<[1], [0], [0], [1], [0, 0, 1, 1], [], []>} : vector<48x28xbf16>, vector<28x384xbf16>, vector<48x384xf32> -> vector<48x384xf32>
    %135 = arith.addf %128, %134 : vector<48x384xf32>
    %136 = arith.maximumf %33, %67 : vector<48x384xf32>
    %137 = arith.maximumf %101, %135 : vector<48x384xf32>
    %138 = arith.maximumf %136, %137 : vector<48x384xf32>
    %c0_149 = arith.constant 0 : index
    %c0_150 = arith.constant 0 : index
    %139 = vector.load %arg3[%c0_149, %c0_150] : memref<1x384xf32, #tpu.memory_space<vmem>>, vector<1x384xf32>
    %140 = vector.broadcast %139 : vector<1x384xf32> to vector<48x384xf32>
    %141 = arith.addf %138, %140 : vector<48x384xf32>
    %cst_151 = arith.constant 0.000000e+00 : f32
    %142 = vector.broadcast %cst_151 : f32 to vector<48x384xf32>
    %143 = arith.maximumf %141, %142 : vector<48x384xf32>
    %144 = arith.truncf %143 : vector<48x384xf32> to vector<48x384xbf16>
    %c2_152 = arith.constant 2 : index
    %c0_153 = arith.constant 0 : index
    %c0_154 = arith.constant 0 : index
    %c0_155 = arith.constant 0 : index
    %145 = vector.load %arg1[%c2_152, %c0_153, %c0_154, %c0_155] : memref<4x7x8x28xbf16, #tpu.memory_space<vmem>>, vector<1x6x8x28xbf16>
    %146 = vector.shape_cast %145 : vector<1x6x8x28xbf16> to vector<6x8x28xbf16>
    %147 = vector.shape_cast %146 : vector<6x8x28xbf16> to vector<48x28xbf16>
    %c0_156 = arith.constant 0 : index
    %c0_157 = arith.constant 0 : index
    %c0_158 = arith.constant 0 : index
    %148 = vector.load %arg2[%c0_156, %c0_157, %c0_158] : memref<10x28x384xbf16, #tpu.memory_space<vmem>>, vector<1x28x384xbf16>
    %149 = vector.shape_cast %148 : vector<1x28x384xbf16> to vector<28x384xbf16>
    %cst_159 = arith.constant dense<0.000000e+00> : vector<48x384xf32>
    %150 = tpu.matmul %147, %149, %cst_159 {dimension_numbers = #tpu.dot_dimension_numbers<[1], [0], [0], [1], [0, 0, 1, 1], [], []>} : vector<48x28xbf16>, vector<28x384xbf16>, vector<48x384xf32> -> vector<48x384xf32>
    %c3_160 = arith.constant 3 : index
    %c0_161 = arith.constant 0 : index
    %c0_162 = arith.constant 0 : index
    %c0_163 = arith.constant 0 : index
    %151 = vector.load %arg1[%c3_160, %c0_161, %c0_162, %c0_163] : memref<4x7x8x28xbf16, #tpu.memory_space<vmem>>, vector<1x6x8x28xbf16>
    %152 = vector.shape_cast %151 : vector<1x6x8x28xbf16> to vector<6x8x28xbf16>
    %153 = vector.shape_cast %152 : vector<6x8x28xbf16> to vector<48x28xbf16>
    %c2_164 = arith.constant 2 : index
    %c0_165 = arith.constant 0 : index
    %c0_166 = arith.constant 0 : index
    %154 = vector.load %arg2[%c2_164, %c0_165, %c0_166] : memref<10x28x384xbf16, #tpu.memory_space<vmem>>, vector<1x28x384xbf16>
    %155 = vector.shape_cast %154 : vector<1x28x384xbf16> to vector<28x384xbf16>
    %cst_167 = arith.constant dense<0.000000e+00> : vector<48x384xf32>
    %156 = tpu.matmul %153, %155, %cst_167 {dimension_numbers = #tpu.dot_dimension_numbers<[1], [0], [0], [1], [0, 0, 1, 1], [], []>} : vector<48x28xbf16>, vector<28x384xbf16>, vector<48x384xf32> -> vector<48x384xf32>
    %157 = arith.addf %150, %156 : vector<48x384xf32>
    %c0_168 = arith.constant 0 : index
    %c1_169 = arith.constant 1 : index
    %c0_170 = arith.constant 0 : index
    %c0_171 = arith.constant 0 : index
    %158 = vector.load %arg1[%c0_168, %c1_169, %c0_170, %c0_171] : memref<4x7x8x28xbf16, #tpu.memory_space<vmem>>, vector<1x6x8x28xbf16>
    %159 = vector.shape_cast %158 : vector<1x6x8x28xbf16> to vector<6x8x28xbf16>
    %160 = vector.shape_cast %159 : vector<6x8x28xbf16> to vector<48x28xbf16>
    %c4_172 = arith.constant 4 : index
    %c0_173 = arith.constant 0 : index
    %c0_174 = arith.constant 0 : index
    %161 = vector.load %arg2[%c4_172, %c0_173, %c0_174] : memref<10x28x384xbf16, #tpu.memory_space<vmem>>, vector<1x28x384xbf16>
    %162 = vector.shape_cast %161 : vector<1x28x384xbf16> to vector<28x384xbf16>
    %cst_175 = arith.constant dense<0.000000e+00> : vector<48x384xf32>
    %163 = tpu.matmul %160, %162, %cst_175 {dimension_numbers = #tpu.dot_dimension_numbers<[1], [0], [0], [1], [0, 0, 1, 1], [], []>} : vector<48x28xbf16>, vector<28x384xbf16>, vector<48x384xf32> -> vector<48x384xf32>
    %164 = arith.addf %157, %163 : vector<48x384xf32>
    %c1_176 = arith.constant 1 : index
    %c1_177 = arith.constant 1 : index
    %c0_178 = arith.constant 0 : index
    %c0_179 = arith.constant 0 : index
    %165 = vector.load %arg1[%c1_176, %c1_177, %c0_178, %c0_179] : memref<4x7x8x28xbf16, #tpu.memory_space<vmem>>, vector<1x6x8x28xbf16>
    %166 = vector.shape_cast %165 : vector<1x6x8x28xbf16> to vector<6x8x28xbf16>
    %167 = vector.shape_cast %166 : vector<6x8x28xbf16> to vector<48x28xbf16>
    %c6_180 = arith.constant 6 : index
    %c0_181 = arith.constant 0 : index
    %c0_182 = arith.constant 0 : index
    %168 = vector.load %arg2[%c6_180, %c0_181, %c0_182] : memref<10x28x384xbf16, #tpu.memory_space<vmem>>, vector<1x28x384xbf16>
    %169 = vector.shape_cast %168 : vector<1x28x384xbf16> to vector<28x384xbf16>
    %cst_183 = arith.constant dense<0.000000e+00> : vector<48x384xf32>
    %170 = tpu.matmul %167, %169, %cst_183 {dimension_numbers = #tpu.dot_dimension_numbers<[1], [0], [0], [1], [0, 0, 1, 1], [], []>} : vector<48x28xbf16>, vector<28x384xbf16>, vector<48x384xf32> -> vector<48x384xf32>
    %171 = arith.addf %164, %170 : vector<48x384xf32>
    %c2_184 = arith.constant 2 : index
    %c1_185 = arith.constant 1 : index
    %c0_186 = arith.constant 0 : index
    %c0_187 = arith.constant 0 : index
    %172 = vector.load %arg1[%c2_184, %c1_185, %c0_186, %c0_187] : memref<4x7x8x28xbf16, #tpu.memory_space<vmem>>, vector<1x6x8x28xbf16>
    %173 = vector.shape_cast %172 : vector<1x6x8x28xbf16> to vector<6x8x28xbf16>
    %174 = vector.shape_cast %173 : vector<6x8x28xbf16> to vector<48x28xbf16>
    %c8_188 = arith.constant 8 : index
    %c0_189 = arith.constant 0 : index
    %c0_190 = arith.constant 0 : index
    %175 = vector.load %arg2[%c8_188, %c0_189, %c0_190] : memref<10x28x384xbf16, #tpu.memory_space<vmem>>, vector<1x28x384xbf16>
    %176 = vector.shape_cast %175 : vector<1x28x384xbf16> to vector<28x384xbf16>
    %cst_191 = arith.constant dense<0.000000e+00> : vector<48x384xf32>
    %177 = tpu.matmul %174, %176, %cst_191 {dimension_numbers = #tpu.dot_dimension_numbers<[1], [0], [0], [1], [0, 0, 1, 1], [], []>} : vector<48x28xbf16>, vector<28x384xbf16>, vector<48x384xf32> -> vector<48x384xf32>
    %178 = arith.addf %171, %177 : vector<48x384xf32>
    %c2_192 = arith.constant 2 : index
    %c0_193 = arith.constant 0 : index
    %c0_194 = arith.constant 0 : index
    %c0_195 = arith.constant 0 : index
    %179 = vector.load %arg1[%c2_192, %c0_193, %c0_194, %c0_195] : memref<4x7x8x28xbf16, #tpu.memory_space<vmem>>, vector<1x6x8x28xbf16>
    %180 = vector.shape_cast %179 : vector<1x6x8x28xbf16> to vector<6x8x28xbf16>
    %181 = vector.shape_cast %180 : vector<6x8x28xbf16> to vector<48x28xbf16>
    %c1_196 = arith.constant 1 : index
    %c0_197 = arith.constant 0 : index
    %c0_198 = arith.constant 0 : index
    %182 = vector.load %arg2[%c1_196, %c0_197, %c0_198] : memref<10x28x384xbf16, #tpu.memory_space<vmem>>, vector<1x28x384xbf16>
    %183 = vector.shape_cast %182 : vector<1x28x384xbf16> to vector<28x384xbf16>
    %cst_199 = arith.constant dense<0.000000e+00> : vector<48x384xf32>
    %184 = tpu.matmul %181, %183, %cst_199 {dimension_numbers = #tpu.dot_dimension_numbers<[1], [0], [0], [1], [0, 0, 1, 1], [], []>} : vector<48x28xbf16>, vector<28x384xbf16>, vector<48x384xf32> -> vector<48x384xf32>
    %c3_200 = arith.constant 3 : index
    %c0_201 = arith.constant 0 : index
    %c0_202 = arith.constant 0 : index
    %c0_203 = arith.constant 0 : index
    %185 = vector.load %arg1[%c3_200, %c0_201, %c0_202, %c0_203] : memref<4x7x8x28xbf16, #tpu.memory_space<vmem>>, vector<1x6x8x28xbf16>
    %186 = vector.shape_cast %185 : vector<1x6x8x28xbf16> to vector<6x8x28xbf16>
    %187 = vector.shape_cast %186 : vector<6x8x28xbf16> to vector<48x28xbf16>
    %c3_204 = arith.constant 3 : index
    %c0_205 = arith.constant 0 : index
    %c0_206 = arith.constant 0 : index
    %188 = vector.load %arg2[%c3_204, %c0_205, %c0_206] : memref<10x28x384xbf16, #tpu.memory_space<vmem>>, vector<1x28x384xbf16>
    %189 = vector.shape_cast %188 : vector<1x28x384xbf16> to vector<28x384xbf16>
    %cst_207 = arith.constant dense<0.000000e+00> : vector<48x384xf32>
    %190 = tpu.matmul %187, %189, %cst_207 {dimension_numbers = #tpu.dot_dimension_numbers<[1], [0], [0], [1], [0, 0, 1, 1], [], []>} : vector<48x28xbf16>, vector<28x384xbf16>, vector<48x384xf32> -> vector<48x384xf32>
    %191 = arith.addf %184, %190 : vector<48x384xf32>
    %c0_208 = arith.constant 0 : index
    %c1_209 = arith.constant 1 : index
    %c0_210 = arith.constant 0 : index
    %c0_211 = arith.constant 0 : index
    %192 = vector.load %arg1[%c0_208, %c1_209, %c0_210, %c0_211] : memref<4x7x8x28xbf16, #tpu.memory_space<vmem>>, vector<1x6x8x28xbf16>
    %193 = vector.shape_cast %192 : vector<1x6x8x28xbf16> to vector<6x8x28xbf16>
    %194 = vector.shape_cast %193 : vector<6x8x28xbf16> to vector<48x28xbf16>
    %c5_212 = arith.constant 5 : index
    %c0_213 = arith.constant 0 : index
    %c0_214 = arith.constant 0 : index
    %195 = vector.load %arg2[%c5_212, %c0_213, %c0_214] : memref<10x28x384xbf16, #tpu.memory_space<vmem>>, vector<1x28x384xbf16>
    %196 = vector.shape_cast %195 : vector<1x28x384xbf16> to vector<28x384xbf16>
    %cst_215 = arith.constant dense<0.000000e+00> : vector<48x384xf32>
    %197 = tpu.matmul %194, %196, %cst_215 {dimension_numbers = #tpu.dot_dimension_numbers<[1], [0], [0], [1], [0, 0, 1, 1], [], []>} : vector<48x28xbf16>, vector<28x384xbf16>, vector<48x384xf32> -> vector<48x384xf32>
    %198 = arith.addf %191, %197 : vector<48x384xf32>
    %c1_216 = arith.constant 1 : index
    %c1_217 = arith.constant 1 : index
    %c0_218 = arith.constant 0 : index
    %c0_219 = arith.constant 0 : index
    %199 = vector.load %arg1[%c1_216, %c1_217, %c0_218, %c0_219] : memref<4x7x8x28xbf16, #tpu.memory_space<vmem>>, vector<1x6x8x28xbf16>
    %200 = vector.shape_cast %199 : vector<1x6x8x28xbf16> to vector<6x8x28xbf16>
    %201 = vector.shape_cast %200 : vector<6x8x28xbf16> to vector<48x28xbf16>
    %c7_220 = arith.constant 7 : index
    %c0_221 = arith.constant 0 : index
    %c0_222 = arith.constant 0 : index
    %202 = vector.load %arg2[%c7_220, %c0_221, %c0_222] : memref<10x28x384xbf16, #tpu.memory_space<vmem>>, vector<1x28x384xbf16>
    %203 = vector.shape_cast %202 : vector<1x28x384xbf16> to vector<28x384xbf16>
    %cst_223 = arith.constant dense<0.000000e+00> : vector<48x384xf32>
    %204 = tpu.matmul %201, %203, %cst_223 {dimension_numbers = #tpu.dot_dimension_numbers<[1], [0], [0], [1], [0, 0, 1, 1], [], []>} : vector<48x28xbf16>, vector<28x384xbf16>, vector<48x384xf32> -> vector<48x384xf32>
    %205 = arith.addf %198, %204 : vector<48x384xf32>
    %c2_224 = arith.constant 2 : index
    %c1_225 = arith.constant 1 : index
    %c0_226 = arith.constant 0 : index
    %c0_227 = arith.constant 0 : index
    %206 = vector.load %arg1[%c2_224, %c1_225, %c0_226, %c0_227] : memref<4x7x8x28xbf16, #tpu.memory_space<vmem>>, vector<1x6x8x28xbf16>
    %207 = vector.shape_cast %206 : vector<1x6x8x28xbf16> to vector<6x8x28xbf16>
    %208 = vector.shape_cast %207 : vector<6x8x28xbf16> to vector<48x28xbf16>
    %c9_228 = arith.constant 9 : index
    %c0_229 = arith.constant 0 : index
    %c0_230 = arith.constant 0 : index
    %209 = vector.load %arg2[%c9_228, %c0_229, %c0_230] : memref<10x28x384xbf16, #tpu.memory_space<vmem>>, vector<1x28x384xbf16>
    %210 = vector.shape_cast %209 : vector<1x28x384xbf16> to vector<28x384xbf16>
    %cst_231 = arith.constant dense<0.000000e+00> : vector<48x384xf32>
    %211 = tpu.matmul %208, %210, %cst_231 {dimension_numbers = #tpu.dot_dimension_numbers<[1], [0], [0], [1], [0, 0, 1, 1], [], []>} : vector<48x28xbf16>, vector<28x384xbf16>, vector<48x384xf32> -> vector<48x384xf32>
    %212 = arith.addf %205, %211 : vector<48x384xf32>
    %c3_232 = arith.constant 3 : index
    %c0_233 = arith.constant 0 : index
    %c0_234 = arith.constant 0 : index
    %c0_235 = arith.constant 0 : index
    %213 = vector.load %arg1[%c3_232, %c0_233, %c0_234, %c0_235] : memref<4x7x8x28xbf16, #tpu.memory_space<vmem>>, vector<1x6x8x28xbf16>
    %214 = vector.shape_cast %213 : vector<1x6x8x28xbf16> to vector<6x8x28xbf16>
    %215 = vector.shape_cast %214 : vector<6x8x28xbf16> to vector<48x28xbf16>
    %c0_236 = arith.constant 0 : index
    %c0_237 = arith.constant 0 : index
    %c0_238 = arith.constant 0 : index
    %216 = vector.load %arg2[%c0_236, %c0_237, %c0_238] : memref<10x28x384xbf16, #tpu.memory_space<vmem>>, vector<1x28x384xbf16>
    %217 = vector.shape_cast %216 : vector<1x28x384xbf16> to vector<28x384xbf16>
    %cst_239 = arith.constant dense<0.000000e+00> : vector<48x384xf32>
    %218 = tpu.matmul %215, %217, %cst_239 {dimension_numbers = #tpu.dot_dimension_numbers<[1], [0], [0], [1], [0, 0, 1, 1], [], []>} : vector<48x28xbf16>, vector<28x384xbf16>, vector<48x384xf32> -> vector<48x384xf32>
    %c0_240 = arith.constant 0 : index
    %c1_241 = arith.constant 1 : index
    %c0_242 = arith.constant 0 : index
    %c0_243 = arith.constant 0 : index
    %219 = vector.load %arg1[%c0_240, %c1_241, %c0_242, %c0_243] : memref<4x7x8x28xbf16, #tpu.memory_space<vmem>>, vector<1x6x8x28xbf16>
    %220 = vector.shape_cast %219 : vector<1x6x8x28xbf16> to vector<6x8x28xbf16>
    %221 = vector.shape_cast %220 : vector<6x8x28xbf16> to vector<48x28xbf16>
    %c2_244 = arith.constant 2 : index
    %c0_245 = arith.constant 0 : index
    %c0_246 = arith.constant 0 : index
    %222 = vector.load %arg2[%c2_244, %c0_245, %c0_246] : memref<10x28x384xbf16, #tpu.memory_space<vmem>>, vector<1x28x384xbf16>
    %223 = vector.shape_cast %222 : vector<1x28x384xbf16> to vector<28x384xbf16>
    %cst_247 = arith.constant dense<0.000000e+00> : vector<48x384xf32>
    %224 = tpu.matmul %221, %223, %cst_247 {dimension_numbers = #tpu.dot_dimension_numbers<[1], [0], [0], [1], [0, 0, 1, 1], [], []>} : vector<48x28xbf16>, vector<28x384xbf16>, vector<48x384xf32> -> vector<48x384xf32>
    %225 = arith.addf %218, %224 : vector<48x384xf32>
    %c1_248 = arith.constant 1 : index
    %c1_249 = arith.constant 1 : index
    %c0_250 = arith.constant 0 : index
    %c0_251 = arith.constant 0 : index
    %226 = vector.load %arg1[%c1_248, %c1_249, %c0_250, %c0_251] : memref<4x7x8x28xbf16, #tpu.memory_space<vmem>>, vector<1x6x8x28xbf16>
    %227 = vector.shape_cast %226 : vector<1x6x8x28xbf16> to vector<6x8x28xbf16>
    %228 = vector.shape_cast %227 : vector<6x8x28xbf16> to vector<48x28xbf16>
    %c4_252 = arith.constant 4 : index
    %c0_253 = arith.constant 0 : index
    %c0_254 = arith.constant 0 : index
    %229 = vector.load %arg2[%c4_252, %c0_253, %c0_254] : memref<10x28x384xbf16, #tpu.memory_space<vmem>>, vector<1x28x384xbf16>
    %230 = vector.shape_cast %229 : vector<1x28x384xbf16> to vector<28x384xbf16>
    %cst_255 = arith.constant dense<0.000000e+00> : vector<48x384xf32>
    %231 = tpu.matmul %228, %230, %cst_255 {dimension_numbers = #tpu.dot_dimension_numbers<[1], [0], [0], [1], [0, 0, 1, 1], [], []>} : vector<48x28xbf16>, vector<28x384xbf16>, vector<48x384xf32> -> vector<48x384xf32>
    %232 = arith.addf %225, %231 : vector<48x384xf32>
    %c2_256 = arith.constant 2 : index
    %c1_257 = arith.constant 1 : index
    %c0_258 = arith.constant 0 : index
    %c0_259 = arith.constant 0 : index
    %233 = vector.load %arg1[%c2_256, %c1_257, %c0_258, %c0_259] : memref<4x7x8x28xbf16, #tpu.memory_space<vmem>>, vector<1x6x8x28xbf16>
    %234 = vector.shape_cast %233 : vector<1x6x8x28xbf16> to vector<6x8x28xbf16>
    %235 = vector.shape_cast %234 : vector<6x8x28xbf16> to vector<48x28xbf16>
    %c6_260 = arith.constant 6 : index
    %c0_261 = arith.constant 0 : index
    %c0_262 = arith.constant 0 : index
    %236 = vector.load %arg2[%c6_260, %c0_261, %c0_262] : memref<10x28x384xbf16, #tpu.memory_space<vmem>>, vector<1x28x384xbf16>
    %237 = vector.shape_cast %236 : vector<1x28x384xbf16> to vector<28x384xbf16>
    %cst_263 = arith.constant dense<0.000000e+00> : vector<48x384xf32>
    %238 = tpu.matmul %235, %237, %cst_263 {dimension_numbers = #tpu.dot_dimension_numbers<[1], [0], [0], [1], [0, 0, 1, 1], [], []>} : vector<48x28xbf16>, vector<28x384xbf16>, vector<48x384xf32> -> vector<48x384xf32>
    %239 = arith.addf %232, %238 : vector<48x384xf32>
    %c3_264 = arith.constant 3 : index
    %c1_265 = arith.constant 1 : index
    %c0_266 = arith.constant 0 : index
    %c0_267 = arith.constant 0 : index
    %240 = vector.load %arg1[%c3_264, %c1_265, %c0_266, %c0_267] : memref<4x7x8x28xbf16, #tpu.memory_space<vmem>>, vector<1x6x8x28xbf16>
    %241 = vector.shape_cast %240 : vector<1x6x8x28xbf16> to vector<6x8x28xbf16>
    %242 = vector.shape_cast %241 : vector<6x8x28xbf16> to vector<48x28xbf16>
    %c8_268 = arith.constant 8 : index
    %c0_269 = arith.constant 0 : index
    %c0_270 = arith.constant 0 : index
    %243 = vector.load %arg2[%c8_268, %c0_269, %c0_270] : memref<10x28x384xbf16, #tpu.memory_space<vmem>>, vector<1x28x384xbf16>
    %244 = vector.shape_cast %243 : vector<1x28x384xbf16> to vector<28x384xbf16>
    %cst_271 = arith.constant dense<0.000000e+00> : vector<48x384xf32>
    %245 = tpu.matmul %242, %244, %cst_271 {dimension_numbers = #tpu.dot_dimension_numbers<[1], [0], [0], [1], [0, 0, 1, 1], [], []>} : vector<48x28xbf16>, vector<28x384xbf16>, vector<48x384xf32> -> vector<48x384xf32>
    %246 = arith.addf %239, %245 : vector<48x384xf32>
    %c3_272 = arith.constant 3 : index
    %c0_273 = arith.constant 0 : index
    %c0_274 = arith.constant 0 : index
    %c0_275 = arith.constant 0 : index
    %247 = vector.load %arg1[%c3_272, %c0_273, %c0_274, %c0_275] : memref<4x7x8x28xbf16, #tpu.memory_space<vmem>>, vector<1x6x8x28xbf16>
    %248 = vector.shape_cast %247 : vector<1x6x8x28xbf16> to vector<6x8x28xbf16>
    %249 = vector.shape_cast %248 : vector<6x8x28xbf16> to vector<48x28xbf16>
    %c1_276 = arith.constant 1 : index
    %c0_277 = arith.constant 0 : index
    %c0_278 = arith.constant 0 : index
    %250 = vector.load %arg2[%c1_276, %c0_277, %c0_278] : memref<10x28x384xbf16, #tpu.memory_space<vmem>>, vector<1x28x384xbf16>
    %251 = vector.shape_cast %250 : vector<1x28x384xbf16> to vector<28x384xbf16>
    %cst_279 = arith.constant dense<0.000000e+00> : vector<48x384xf32>
    %252 = tpu.matmul %249, %251, %cst_279 {dimension_numbers = #tpu.dot_dimension_numbers<[1], [0], [0], [1], [0, 0, 1, 1], [], []>} : vector<48x28xbf16>, vector<28x384xbf16>, vector<48x384xf32> -> vector<48x384xf32>
    %c0_280 = arith.constant 0 : index
    %c1_281 = arith.constant 1 : index
    %c0_282 = arith.constant 0 : index
    %c0_283 = arith.constant 0 : index
    %253 = vector.load %arg1[%c0_280, %c1_281, %c0_282, %c0_283] : memref<4x7x8x28xbf16, #tpu.memory_space<vmem>>, vector<1x6x8x28xbf16>
    %254 = vector.shape_cast %253 : vector<1x6x8x28xbf16> to vector<6x8x28xbf16>
    %255 = vector.shape_cast %254 : vector<6x8x28xbf16> to vector<48x28xbf16>
    %c3_284 = arith.constant 3 : index
    %c0_285 = arith.constant 0 : index
    %c0_286 = arith.constant 0 : index
    %256 = vector.load %arg2[%c3_284, %c0_285, %c0_286] : memref<10x28x384xbf16, #tpu.memory_space<vmem>>, vector<1x28x384xbf16>
    %257 = vector.shape_cast %256 : vector<1x28x384xbf16> to vector<28x384xbf16>
    %cst_287 = arith.constant dense<0.000000e+00> : vector<48x384xf32>
    %258 = tpu.matmul %255, %257, %cst_287 {dimension_numbers = #tpu.dot_dimension_numbers<[1], [0], [0], [1], [0, 0, 1, 1], [], []>} : vector<48x28xbf16>, vector<28x384xbf16>, vector<48x384xf32> -> vector<48x384xf32>
    %259 = arith.addf %252, %258 : vector<48x384xf32>
    %c1_288 = arith.constant 1 : index
    %c1_289 = arith.constant 1 : index
    %c0_290 = arith.constant 0 : index
    %c0_291 = arith.constant 0 : index
    %260 = vector.load %arg1[%c1_288, %c1_289, %c0_290, %c0_291] : memref<4x7x8x28xbf16, #tpu.memory_space<vmem>>, vector<1x6x8x28xbf16>
    %261 = vector.shape_cast %260 : vector<1x6x8x28xbf16> to vector<6x8x28xbf16>
    %262 = vector.shape_cast %261 : vector<6x8x28xbf16> to vector<48x28xbf16>
    %c5_292 = arith.constant 5 : index
    %c0_293 = arith.constant 0 : index
    %c0_294 = arith.constant 0 : index
    %263 = vector.load %arg2[%c5_292, %c0_293, %c0_294] : memref<10x28x384xbf16, #tpu.memory_space<vmem>>, vector<1x28x384xbf16>
    %264 = vector.shape_cast %263 : vector<1x28x384xbf16> to vector<28x384xbf16>
    %cst_295 = arith.constant dense<0.000000e+00> : vector<48x384xf32>
    %265 = tpu.matmul %262, %264, %cst_295 {dimension_numbers = #tpu.dot_dimension_numbers<[1], [0], [0], [1], [0, 0, 1, 1], [], []>} : vector<48x28xbf16>, vector<28x384xbf16>, vector<48x384xf32> -> vector<48x384xf32>
    %266 = arith.addf %259, %265 : vector<48x384xf32>
    %c2_296 = arith.constant 2 : index
    %c1_297 = arith.constant 1 : index
    %c0_298 = arith.constant 0 : index
    %c0_299 = arith.constant 0 : index
    %267 = vector.load %arg1[%c2_296, %c1_297, %c0_298, %c0_299] : memref<4x7x8x28xbf16, #tpu.memory_space<vmem>>, vector<1x6x8x28xbf16>
    %268 = vector.shape_cast %267 : vector<1x6x8x28xbf16> to vector<6x8x28xbf16>
    %269 = vector.shape_cast %268 : vector<6x8x28xbf16> to vector<48x28xbf16>
    %c7_300 = arith.constant 7 : index
    %c0_301 = arith.constant 0 : index
    %c0_302 = arith.constant 0 : index
    %270 = vector.load %arg2[%c7_300, %c0_301, %c0_302] : memref<10x28x384xbf16, #tpu.memory_space<vmem>>, vector<1x28x384xbf16>
    %271 = vector.shape_cast %270 : vector<1x28x384xbf16> to vector<28x384xbf16>
    %cst_303 = arith.constant dense<0.000000e+00> : vector<48x384xf32>
    %272 = tpu.matmul %269, %271, %cst_303 {dimension_numbers = #tpu.dot_dimension_numbers<[1], [0], [0], [1], [0, 0, 1, 1], [], []>} : vector<48x28xbf16>, vector<28x384xbf16>, vector<48x384xf32> -> vector<48x384xf32>
    %273 = arith.addf %266, %272 : vector<48x384xf32>
    %c3_304 = arith.constant 3 : index
    %c1_305 = arith.constant 1 : index
    %c0_306 = arith.constant 0 : index
    %c0_307 = arith.constant 0 : index
    %274 = vector.load %arg1[%c3_304, %c1_305, %c0_306, %c0_307] : memref<4x7x8x28xbf16, #tpu.memory_space<vmem>>, vector<1x6x8x28xbf16>
    %275 = vector.shape_cast %274 : vector<1x6x8x28xbf16> to vector<6x8x28xbf16>
    %276 = vector.shape_cast %275 : vector<6x8x28xbf16> to vector<48x28xbf16>
    %c9_308 = arith.constant 9 : index
    %c0_309 = arith.constant 0 : index
    %c0_310 = arith.constant 0 : index
    %277 = vector.load %arg2[%c9_308, %c0_309, %c0_310] : memref<10x28x384xbf16, #tpu.memory_space<vmem>>, vector<1x28x384xbf16>
    %278 = vector.shape_cast %277 : vector<1x28x384xbf16> to vector<28x384xbf16>
    %cst_311 = arith.constant dense<0.000000e+00> : vector<48x384xf32>
    %279 = tpu.matmul %276, %278, %cst_311 {dimension_numbers = #tpu.dot_dimension_numbers<[1], [0], [0], [1], [0, 0, 1, 1], [], []>} : vector<48x28xbf16>, vector<28x384xbf16>, vector<48x384xf32> -> vector<48x384xf32>
    %280 = arith.addf %273, %279 : vector<48x384xf32>
    %281 = arith.maximumf %178, %212 : vector<48x384xf32>
    %282 = arith.maximumf %246, %280 : vector<48x384xf32>
    %283 = arith.maximumf %281, %282 : vector<48x384xf32>
    %c0_312 = arith.constant 0 : index
    %c0_313 = arith.constant 0 : index
    %284 = vector.load %arg3[%c0_312, %c0_313] : memref<1x384xf32, #tpu.memory_space<vmem>>, vector<1x384xf32>
    %285 = vector.broadcast %284 : vector<1x384xf32> to vector<48x384xf32>
    %286 = arith.addf %283, %285 : vector<48x384xf32>
    %cst_314 = arith.constant 0.000000e+00 : f32
    %287 = vector.broadcast %cst_314 : f32 to vector<48x384xf32>
    %288 = arith.maximumf %286, %287 : vector<48x384xf32>
    %289 = arith.truncf %288 : vector<48x384xf32> to vector<48x384xbf16>
    %290 = vector.extract_strided_slice %144 {offsets = [0, 0], sizes = [32, 384], strides = [1, 1]} : vector<48x384xbf16> to vector<32x384xbf16>
    %c0_315 = arith.constant 0 : index
    %c0_316 = arith.constant 0 : index
    %c0_317 = arith.constant 0 : index
    %291 = vector.load %arg4[%c0_315, %c0_316, %c0_317] : memref<10x384x256xbf16, #tpu.memory_space<vmem>>, vector<1x384x256xbf16>
    %292 = vector.shape_cast %291 : vector<1x384x256xbf16> to vector<384x256xbf16>
    %cst_318 = arith.constant dense<0.000000e+00> : vector<32x256xf32>
    %293 = tpu.matmul %290, %292, %cst_318 {dimension_numbers = #tpu.dot_dimension_numbers<[1], [0], [0], [1], [0, 0, 1, 1], [], []>} : vector<32x384xbf16>, vector<384x256xbf16>, vector<32x256xf32> -> vector<32x256xf32>
    %294 = vector.extract_strided_slice %289 {offsets = [0, 0], sizes = [32, 384], strides = [1, 1]} : vector<48x384xbf16> to vector<32x384xbf16>
    %c2_319 = arith.constant 2 : index
    %c0_320 = arith.constant 0 : index
    %c0_321 = arith.constant 0 : index
    %295 = vector.load %arg4[%c2_319, %c0_320, %c0_321] : memref<10x384x256xbf16, #tpu.memory_space<vmem>>, vector<1x384x256xbf16>
    %296 = vector.shape_cast %295 : vector<1x384x256xbf16> to vector<384x256xbf16>
    %cst_322 = arith.constant dense<0.000000e+00> : vector<32x256xf32>
    %297 = tpu.matmul %294, %296, %cst_322 {dimension_numbers = #tpu.dot_dimension_numbers<[1], [0], [0], [1], [0, 0, 1, 1], [], []>} : vector<32x384xbf16>, vector<384x256xbf16>, vector<32x256xf32> -> vector<32x256xf32>
    %298 = arith.addf %293, %297 : vector<32x256xf32>
    %299 = vector.extract_strided_slice %144 {offsets = [8, 0], sizes = [32, 384], strides = [1, 1]} : vector<48x384xbf16> to vector<32x384xbf16>
    %c4_323 = arith.constant 4 : index
    %c0_324 = arith.constant 0 : index
    %c0_325 = arith.constant 0 : index
    %300 = vector.load %arg4[%c4_323, %c0_324, %c0_325] : memref<10x384x256xbf16, #tpu.memory_space<vmem>>, vector<1x384x256xbf16>
    %301 = vector.shape_cast %300 : vector<1x384x256xbf16> to vector<384x256xbf16>
    %cst_326 = arith.constant dense<0.000000e+00> : vector<32x256xf32>
    %302 = tpu.matmul %299, %301, %cst_326 {dimension_numbers = #tpu.dot_dimension_numbers<[1], [0], [0], [1], [0, 0, 1, 1], [], []>} : vector<32x384xbf16>, vector<384x256xbf16>, vector<32x256xf32> -> vector<32x256xf32>
    %303 = arith.addf %298, %302 : vector<32x256xf32>
    %304 = vector.extract_strided_slice %289 {offsets = [8, 0], sizes = [32, 384], strides = [1, 1]} : vector<48x384xbf16> to vector<32x384xbf16>
    %c6_327 = arith.constant 6 : index
    %c0_328 = arith.constant 0 : index
    %c0_329 = arith.constant 0 : index
    %305 = vector.load %arg4[%c6_327, %c0_328, %c0_329] : memref<10x384x256xbf16, #tpu.memory_space<vmem>>, vector<1x384x256xbf16>
    %306 = vector.shape_cast %305 : vector<1x384x256xbf16> to vector<384x256xbf16>
    %cst_330 = arith.constant dense<0.000000e+00> : vector<32x256xf32>
    %307 = tpu.matmul %304, %306, %cst_330 {dimension_numbers = #tpu.dot_dimension_numbers<[1], [0], [0], [1], [0, 0, 1, 1], [], []>} : vector<32x384xbf16>, vector<384x256xbf16>, vector<32x256xf32> -> vector<32x256xf32>
    %308 = arith.addf %303, %307 : vector<32x256xf32>
    %309 = vector.extract_strided_slice %144 {offsets = [16, 0], sizes = [32, 384], strides = [1, 1]} : vector<48x384xbf16> to vector<32x384xbf16>
    %c8_331 = arith.constant 8 : index
    %c0_332 = arith.constant 0 : index
    %c0_333 = arith.constant 0 : index
    %310 = vector.load %arg4[%c8_331, %c0_332, %c0_333] : memref<10x384x256xbf16, #tpu.memory_space<vmem>>, vector<1x384x256xbf16>
    %311 = vector.shape_cast %310 : vector<1x384x256xbf16> to vector<384x256xbf16>
    %cst_334 = arith.constant dense<0.000000e+00> : vector<32x256xf32>
    %312 = tpu.matmul %309, %311, %cst_334 {dimension_numbers = #tpu.dot_dimension_numbers<[1], [0], [0], [1], [0, 0, 1, 1], [], []>} : vector<32x384xbf16>, vector<384x256xbf16>, vector<32x256xf32> -> vector<32x256xf32>
    %313 = arith.addf %308, %312 : vector<32x256xf32>
    %314 = vector.extract_strided_slice %144 {offsets = [0, 0], sizes = [32, 384], strides = [1, 1]} : vector<48x384xbf16> to vector<32x384xbf16>
    %c1_335 = arith.constant 1 : index
    %c0_336 = arith.constant 0 : index
    %c0_337 = arith.constant 0 : index
    %315 = vector.load %arg4[%c1_335, %c0_336, %c0_337] : memref<10x384x256xbf16, #tpu.memory_space<vmem>>, vector<1x384x256xbf16>
    %316 = vector.shape_cast %315 : vector<1x384x256xbf16> to vector<384x256xbf16>
    %cst_338 = arith.constant dense<0.000000e+00> : vector<32x256xf32>
    %317 = tpu.matmul %314, %316, %cst_338 {dimension_numbers = #tpu.dot_dimension_numbers<[1], [0], [0], [1], [0, 0, 1, 1], [], []>} : vector<32x384xbf16>, vector<384x256xbf16>, vector<32x256xf32> -> vector<32x256xf32>
    %318 = vector.extract_strided_slice %289 {offsets = [0, 0], sizes = [32, 384], strides = [1, 1]} : vector<48x384xbf16> to vector<32x384xbf16>
    %c3_339 = arith.constant 3 : index
    %c0_340 = arith.constant 0 : index
    %c0_341 = arith.constant 0 : index
    %319 = vector.load %arg4[%c3_339, %c0_340, %c0_341] : memref<10x384x256xbf16, #tpu.memory_space<vmem>>, vector<1x384x256xbf16>
    %320 = vector.shape_cast %319 : vector<1x384x256xbf16> to vector<384x256xbf16>
    %cst_342 = arith.constant dense<0.000000e+00> : vector<32x256xf32>
    %321 = tpu.matmul %318, %320, %cst_342 {dimension_numbers = #tpu.dot_dimension_numbers<[1], [0], [0], [1], [0, 0, 1, 1], [], []>} : vector<32x384xbf16>, vector<384x256xbf16>, vector<32x256xf32> -> vector<32x256xf32>
    %322 = arith.addf %317, %321 : vector<32x256xf32>
    %323 = vector.extract_strided_slice %144 {offsets = [8, 0], sizes = [32, 384], strides = [1, 1]} : vector<48x384xbf16> to vector<32x384xbf16>
    %c5_343 = arith.constant 5 : index
    %c0_344 = arith.constant 0 : index
    %c0_345 = arith.constant 0 : index
    %324 = vector.load %arg4[%c5_343, %c0_344, %c0_345] : memref<10x384x256xbf16, #tpu.memory_space<vmem>>, vector<1x384x256xbf16>
    %325 = vector.shape_cast %324 : vector<1x384x256xbf16> to vector<384x256xbf16>
    %cst_346 = arith.constant dense<0.000000e+00> : vector<32x256xf32>
    %326 = tpu.matmul %323, %325, %cst_346 {dimension_numbers = #tpu.dot_dimension_numbers<[1], [0], [0], [1], [0, 0, 1, 1], [], []>} : vector<32x384xbf16>, vector<384x256xbf16>, vector<32x256xf32> -> vector<32x256xf32>
    %327 = arith.addf %322, %326 : vector<32x256xf32>
    %328 = vector.extract_strided_slice %289 {offsets = [8, 0], sizes = [32, 384], strides = [1, 1]} : vector<48x384xbf16> to vector<32x384xbf16>
    %c7_347 = arith.constant 7 : index
    %c0_348 = arith.constant 0 : index
    %c0_349 = arith.constant 0 : index
    %329 = vector.load %arg4[%c7_347, %c0_348, %c0_349] : memref<10x384x256xbf16, #tpu.memory_space<vmem>>, vector<1x384x256xbf16>
    %330 = vector.shape_cast %329 : vector<1x384x256xbf16> to vector<384x256xbf16>
    %cst_350 = arith.constant dense<0.000000e+00> : vector<32x256xf32>
    %331 = tpu.matmul %328, %330, %cst_350 {dimension_numbers = #tpu.dot_dimension_numbers<[1], [0], [0], [1], [0, 0, 1, 1], [], []>} : vector<32x384xbf16>, vector<384x256xbf16>, vector<32x256xf32> -> vector<32x256xf32>
    %332 = arith.addf %327, %331 : vector<32x256xf32>
    %333 = vector.extract_strided_slice %144 {offsets = [16, 0], sizes = [32, 384], strides = [1, 1]} : vector<48x384xbf16> to vector<32x384xbf16>
    %c9_351 = arith.constant 9 : index
    %c0_352 = arith.constant 0 : index
    %c0_353 = arith.constant 0 : index
    %334 = vector.load %arg4[%c9_351, %c0_352, %c0_353] : memref<10x384x256xbf16, #tpu.memory_space<vmem>>, vector<1x384x256xbf16>
    %335 = vector.shape_cast %334 : vector<1x384x256xbf16> to vector<384x256xbf16>
    %cst_354 = arith.constant dense<0.000000e+00> : vector<32x256xf32>
    %336 = tpu.matmul %333, %335, %cst_354 {dimension_numbers = #tpu.dot_dimension_numbers<[1], [0], [0], [1], [0, 0, 1, 1], [], []>} : vector<32x384xbf16>, vector<384x256xbf16>, vector<32x256xf32> -> vector<32x256xf32>
    %337 = arith.addf %332, %336 : vector<32x256xf32>
    %338 = vector.extract_strided_slice %289 {offsets = [0, 0], sizes = [32, 384], strides = [1, 1]} : vector<48x384xbf16> to vector<32x384xbf16>
    %c0_355 = arith.constant 0 : index
    %c0_356 = arith.constant 0 : index
    %c0_357 = arith.constant 0 : index
    %339 = vector.load %arg4[%c0_355, %c0_356, %c0_357] : memref<10x384x256xbf16, #tpu.memory_space<vmem>>, vector<1x384x256xbf16>
    %340 = vector.shape_cast %339 : vector<1x384x256xbf16> to vector<384x256xbf16>
    %cst_358 = arith.constant dense<0.000000e+00> : vector<32x256xf32>
    %341 = tpu.matmul %338, %340, %cst_358 {dimension_numbers = #tpu.dot_dimension_numbers<[1], [0], [0], [1], [0, 0, 1, 1], [], []>} : vector<32x384xbf16>, vector<384x256xbf16>, vector<32x256xf32> -> vector<32x256xf32>
    %342 = vector.extract_strided_slice %144 {offsets = [8, 0], sizes = [32, 384], strides = [1, 1]} : vector<48x384xbf16> to vector<32x384xbf16>
    %c2_359 = arith.constant 2 : index
    %c0_360 = arith.constant 0 : index
    %c0_361 = arith.constant 0 : index
    %343 = vector.load %arg4[%c2_359, %c0_360, %c0_361] : memref<10x384x256xbf16, #tpu.memory_space<vmem>>, vector<1x384x256xbf16>
    %344 = vector.shape_cast %343 : vector<1x384x256xbf16> to vector<384x256xbf16>
    %cst_362 = arith.constant dense<0.000000e+00> : vector<32x256xf32>
    %345 = tpu.matmul %342, %344, %cst_362 {dimension_numbers = #tpu.dot_dimension_numbers<[1], [0], [0], [1], [0, 0, 1, 1], [], []>} : vector<32x384xbf16>, vector<384x256xbf16>, vector<32x256xf32> -> vector<32x256xf32>
    %346 = arith.addf %341, %345 : vector<32x256xf32>
    %347 = vector.extract_strided_slice %289 {offsets = [8, 0], sizes = [32, 384], strides = [1, 1]} : vector<48x384xbf16> to vector<32x384xbf16>
    %c4_363 = arith.constant 4 : index
    %c0_364 = arith.constant 0 : index
    %c0_365 = arith.constant 0 : index
    %348 = vector.load %arg4[%c4_363, %c0_364, %c0_365] : memref<10x384x256xbf16, #tpu.memory_space<vmem>>, vector<1x384x256xbf16>
    %349 = vector.shape_cast %348 : vector<1x384x256xbf16> to vector<384x256xbf16>
    %cst_366 = arith.constant dense<0.000000e+00> : vector<32x256xf32>
    %350 = tpu.matmul %347, %349, %cst_366 {dimension_numbers = #tpu.dot_dimension_numbers<[1], [0], [0], [1], [0, 0, 1, 1], [], []>} : vector<32x384xbf16>, vector<384x256xbf16>, vector<32x256xf32> -> vector<32x256xf32>
    %351 = arith.addf %346, %350 : vector<32x256xf32>
    %352 = vector.extract_strided_slice %144 {offsets = [16, 0], sizes = [32, 384], strides = [1, 1]} : vector<48x384xbf16> to vector<32x384xbf16>
    %c6_367 = arith.constant 6 : index
    %c0_368 = arith.constant 0 : index
    %c0_369 = arith.constant 0 : index
    %353 = vector.load %arg4[%c6_367, %c0_368, %c0_369] : memref<10x384x256xbf16, #tpu.memory_space<vmem>>, vector<1x384x256xbf16>
    %354 = vector.shape_cast %353 : vector<1x384x256xbf16> to vector<384x256xbf16>
    %cst_370 = arith.constant dense<0.000000e+00> : vector<32x256xf32>
    %355 = tpu.matmul %352, %354, %cst_370 {dimension_numbers = #tpu.dot_dimension_numbers<[1], [0], [0], [1], [0, 0, 1, 1], [], []>} : vector<32x384xbf16>, vector<384x256xbf16>, vector<32x256xf32> -> vector<32x256xf32>
    %356 = arith.addf %351, %355 : vector<32x256xf32>
    %357 = vector.extract_strided_slice %289 {offsets = [16, 0], sizes = [32, 384], strides = [1, 1]} : vector<48x384xbf16> to vector<32x384xbf16>
    %c8_371 = arith.constant 8 : index
    %c0_372 = arith.constant 0 : index
    %c0_373 = arith.constant 0 : index
    %358 = vector.load %arg4[%c8_371, %c0_372, %c0_373] : memref<10x384x256xbf16, #tpu.memory_space<vmem>>, vector<1x384x256xbf16>
    %359 = vector.shape_cast %358 : vector<1x384x256xbf16> to vector<384x256xbf16>
    %cst_374 = arith.constant dense<0.000000e+00> : vector<32x256xf32>
    %360 = tpu.matmul %357, %359, %cst_374 {dimension_numbers = #tpu.dot_dimension_numbers<[1], [0], [0], [1], [0, 0, 1, 1], [], []>} : vector<32x384xbf16>, vector<384x256xbf16>, vector<32x256xf32> -> vector<32x256xf32>
    %361 = arith.addf %356, %360 : vector<32x256xf32>
    %362 = vector.extract_strided_slice %289 {offsets = [0, 0], sizes = [32, 384], strides = [1, 1]} : vector<48x384xbf16> to vector<32x384xbf16>
    %c1_375 = arith.constant 1 : index
    %c0_376 = arith.constant 0 : index
    %c0_377 = arith.constant 0 : index
    %363 = vector.load %arg4[%c1_375, %c0_376, %c0_377] : memref<10x384x256xbf16, #tpu.memory_space<vmem>>, vector<1x384x256xbf16>
    %364 = vector.shape_cast %363 : vector<1x384x256xbf16> to vector<384x256xbf16>
    %cst_378 = arith.constant dense<0.000000e+00> : vector<32x256xf32>
    %365 = tpu.matmul %362, %364, %cst_378 {dimension_numbers = #tpu.dot_dimension_numbers<[1], [0], [0], [1], [0, 0, 1, 1], [], []>} : vector<32x384xbf16>, vector<384x256xbf16>, vector<32x256xf32> -> vector<32x256xf32>
    %366 = vector.extract_strided_slice %144 {offsets = [8, 0], sizes = [32, 384], strides = [1, 1]} : vector<48x384xbf16> to vector<32x384xbf16>
    %c3_379 = arith.constant 3 : index
    %c0_380 = arith.constant 0 : index
    %c0_381 = arith.constant 0 : index
    %367 = vector.load %arg4[%c3_379, %c0_380, %c0_381] : memref<10x384x256xbf16, #tpu.memory_space<vmem>>, vector<1x384x256xbf16>
    %368 = vector.shape_cast %367 : vector<1x384x256xbf16> to vector<384x256xbf16>
    %cst_382 = arith.constant dense<0.000000e+00> : vector<32x256xf32>
    %369 = tpu.matmul %366, %368, %cst_382 {dimension_numbers = #tpu.dot_dimension_numbers<[1], [0], [0], [1], [0, 0, 1, 1], [], []>} : vector<32x384xbf16>, vector<384x256xbf16>, vector<32x256xf32> -> vector<32x256xf32>
    %370 = arith.addf %365, %369 : vector<32x256xf32>
    %371 = vector.extract_strided_slice %289 {offsets = [8, 0], sizes = [32, 384], strides = [1, 1]} : vector<48x384xbf16> to vector<32x384xbf16>
    %c5_383 = arith.constant 5 : index
    %c0_384 = arith.constant 0 : index
    %c0_385 = arith.constant 0 : index
    %372 = vector.load %arg4[%c5_383, %c0_384, %c0_385] : memref<10x384x256xbf16, #tpu.memory_space<vmem>>, vector<1x384x256xbf16>
    %373 = vector.shape_cast %372 : vector<1x384x256xbf16> to vector<384x256xbf16>
    %cst_386 = arith.constant dense<0.000000e+00> : vector<32x256xf32>
    %374 = tpu.matmul %371, %373, %cst_386 {dimension_numbers = #tpu.dot_dimension_numbers<[1], [0], [0], [1], [0, 0, 1, 1], [], []>} : vector<32x384xbf16>, vector<384x256xbf16>, vector<32x256xf32> -> vector<32x256xf32>
    %375 = arith.addf %370, %374 : vector<32x256xf32>
    %376 = vector.extract_strided_slice %144 {offsets = [16, 0], sizes = [32, 384], strides = [1, 1]} : vector<48x384xbf16> to vector<32x384xbf16>
    %c7_387 = arith.constant 7 : index
    %c0_388 = arith.constant 0 : index
    %c0_389 = arith.constant 0 : index
    %377 = vector.load %arg4[%c7_387, %c0_388, %c0_389] : memref<10x384x256xbf16, #tpu.memory_space<vmem>>, vector<1x384x256xbf16>
    %378 = vector.shape_cast %377 : vector<1x384x256xbf16> to vector<384x256xbf16>
    %cst_390 = arith.constant dense<0.000000e+00> : vector<32x256xf32>
    %379 = tpu.matmul %376, %378, %cst_390 {dimension_numbers = #tpu.dot_dimension_numbers<[1], [0], [0], [1], [0, 0, 1, 1], [], []>} : vector<32x384xbf16>, vector<384x256xbf16>, vector<32x256xf32> -> vector<32x256xf32>
    %380 = arith.addf %375, %379 : vector<32x256xf32>
    %381 = vector.extract_strided_slice %289 {offsets = [16, 0], sizes = [32, 384], strides = [1, 1]} : vector<48x384xbf16> to vector<32x384xbf16>
    %c9_391 = arith.constant 9 : index
    %c0_392 = arith.constant 0 : index
    %c0_393 = arith.constant 0 : index
    %382 = vector.load %arg4[%c9_391, %c0_392, %c0_393] : memref<10x384x256xbf16, #tpu.memory_space<vmem>>, vector<1x384x256xbf16>
    %383 = vector.shape_cast %382 : vector<1x384x256xbf16> to vector<384x256xbf16>
    %cst_394 = arith.constant dense<0.000000e+00> : vector<32x256xf32>
    %384 = tpu.matmul %381, %383, %cst_394 {dimension_numbers = #tpu.dot_dimension_numbers<[1], [0], [0], [1], [0, 0, 1, 1], [], []>} : vector<32x384xbf16>, vector<384x256xbf16>, vector<32x256xf32> -> vector<32x256xf32>
    %385 = arith.addf %380, %384 : vector<32x256xf32>
    %386 = arith.maximumf %313, %337 : vector<32x256xf32>
    %387 = arith.maximumf %361, %385 : vector<32x256xf32>
    %388 = arith.maximumf %386, %387 : vector<32x256xf32>
    %c0_395 = arith.constant 0 : index
    %c0_396 = arith.constant 0 : index
    %389 = vector.load %arg5[%c0_395, %c0_396] : memref<1x256xf32, #tpu.memory_space<vmem>>, vector<1x256xf32>
    %390 = vector.broadcast %389 : vector<1x256xf32> to vector<32x256xf32>
    %391 = arith.addf %388, %390 : vector<32x256xf32>
    %cst_397 = arith.constant 0.000000e+00 : f32
    %392 = vector.broadcast %cst_397 : f32 to vector<32x256xf32>
    %393 = arith.maximumf %391, %392 : vector<32x256xf32>
    %394 = arith.truncf %393 : vector<32x256xf32> to vector<32x256xbf16>
    %395 = vector.extract_strided_slice %394 {offsets = [0, 0], sizes = [8, 256], strides = [1, 1]} : vector<32x256xbf16> to vector<8x256xbf16>
    %c0_398 = arith.constant 0 : index
    %c0_399 = arith.constant 0 : index
    %c0_400 = arith.constant 0 : index
    %396 = vector.load %arg6[%c0_398, %c0_399, %c0_400] : memref<4x256x128xbf16, #tpu.memory_space<vmem>>, vector<1x256x128xbf16>
    %397 = vector.shape_cast %396 : vector<1x256x128xbf16> to vector<256x128xbf16>
    %cst_401 = arith.constant dense<0.000000e+00> : vector<8x128xf32>
    %398 = tpu.matmul %395, %397, %cst_401 {dimension_numbers = #tpu.dot_dimension_numbers<[1], [0], [0], [1], [0, 0, 1, 1], [], []>} : vector<8x256xbf16>, vector<256x128xbf16>, vector<8x128xf32> -> vector<8x128xf32>
    %399 = vector.extract_strided_slice %394 {offsets = [8, 0], sizes = [8, 256], strides = [1, 1]} : vector<32x256xbf16> to vector<8x256xbf16>
    %c1_402 = arith.constant 1 : index
    %c0_403 = arith.constant 0 : index
    %c0_404 = arith.constant 0 : index
    %400 = vector.load %arg6[%c1_402, %c0_403, %c0_404] : memref<4x256x128xbf16, #tpu.memory_space<vmem>>, vector<1x256x128xbf16>
    %401 = vector.shape_cast %400 : vector<1x256x128xbf16> to vector<256x128xbf16>
    %cst_405 = arith.constant dense<0.000000e+00> : vector<8x128xf32>
    %402 = tpu.matmul %399, %401, %cst_405 {dimension_numbers = #tpu.dot_dimension_numbers<[1], [0], [0], [1], [0, 0, 1, 1], [], []>} : vector<8x256xbf16>, vector<256x128xbf16>, vector<8x128xf32> -> vector<8x128xf32>
    %403 = arith.addf %398, %402 : vector<8x128xf32>
    %404 = vector.extract_strided_slice %394 {offsets = [16, 0], sizes = [8, 256], strides = [1, 1]} : vector<32x256xbf16> to vector<8x256xbf16>
    %c2_406 = arith.constant 2 : index
    %c0_407 = arith.constant 0 : index
    %c0_408 = arith.constant 0 : index
    %405 = vector.load %arg6[%c2_406, %c0_407, %c0_408] : memref<4x256x128xbf16, #tpu.memory_space<vmem>>, vector<1x256x128xbf16>
    %406 = vector.shape_cast %405 : vector<1x256x128xbf16> to vector<256x128xbf16>
    %cst_409 = arith.constant dense<0.000000e+00> : vector<8x128xf32>
    %407 = tpu.matmul %404, %406, %cst_409 {dimension_numbers = #tpu.dot_dimension_numbers<[1], [0], [0], [1], [0, 0, 1, 1], [], []>} : vector<8x256xbf16>, vector<256x128xbf16>, vector<8x128xf32> -> vector<8x128xf32>
    %408 = arith.addf %403, %407 : vector<8x128xf32>
    %409 = vector.extract_strided_slice %394 {offsets = [24, 0], sizes = [8, 256], strides = [1, 1]} : vector<32x256xbf16> to vector<8x256xbf16>
    %c3_410 = arith.constant 3 : index
    %c0_411 = arith.constant 0 : index
    %c0_412 = arith.constant 0 : index
    %410 = vector.load %arg6[%c3_410, %c0_411, %c0_412] : memref<4x256x128xbf16, #tpu.memory_space<vmem>>, vector<1x256x128xbf16>
    %411 = vector.shape_cast %410 : vector<1x256x128xbf16> to vector<256x128xbf16>
    %cst_413 = arith.constant dense<0.000000e+00> : vector<8x128xf32>
    %412 = tpu.matmul %409, %411, %cst_413 {dimension_numbers = #tpu.dot_dimension_numbers<[1], [0], [0], [1], [0, 0, 1, 1], [], []>} : vector<8x256xbf16>, vector<256x128xbf16>, vector<8x128xf32> -> vector<8x128xf32>
    %413 = arith.addf %408, %412 : vector<8x128xf32>
    %c0_414 = arith.constant 0 : index
    %c0_415 = arith.constant 0 : index
    %414 = vector.load %arg7[%c0_414, %c0_415] : memref<1x128xf32, #tpu.memory_space<vmem>>, vector<1x128xf32>
    %415 = vector.broadcast %414 : vector<1x128xf32> to vector<8x128xf32>
    %416 = arith.addf %413, %415 : vector<8x128xf32>
    %c0_416 = arith.constant 0 : index
    %c0_417 = arith.constant 0 : index
    %417 = vector.load %arg8[%c0_416, %c0_417] : memref<8x128xf32, #tpu.memory_space<vmem>>, vector<8x128xf32>
    tpu.vector_store %arg8[%c0_416, %c0_417], %416 {strides = array<i32>} : memref<8x128xf32, #tpu.memory_space<vmem>>, vector<8x128xf32>,
    return
  }
  func.func @transform_0(%arg0: i32) -> (i32, i32, i32, i32) {
    %c0_i32 = arith.constant 0 : i32
    %c0_i32_0 = arith.constant 0 : i32
    %c0_i32_1 = arith.constant 0 : i32
    %c0_i32_2 = arith.constant 0 : i32
    return %c0_i32, %c0_i32_0, %arg0, %c0_i32_1 : i32, i32, i32, i32
  }
  func.func @transform_1(%arg0: i32) -> (i32, i32, i32) {
    %c0_i32 = arith.constant 0 : i32
    %c0_i32_0 = arith.constant 0 : i32
    %c0_i32_1 = arith.constant 0 : i32
    %c0_i32_2 = arith.constant 0 : i32
    return %c0_i32, %c0_i32_0, %c0_i32_1 : i32, i32, i32
  }
  func.func @transform_2(%arg0: i32) -> (i32, i32) {
    %c0_i32 = arith.constant 0 : i32
    %c0_i32_0 = arith.constant 0 : i32
    %c0_i32_1 = arith.constant 0 : i32
    return %c0_i32, %c0_i32_0 : i32, i32
  }
  func.func @transform_3(%arg0: i32) -> (i32, i32, i32) {
    %c0_i32 = arith.constant 0 : i32
    %c0_i32_0 = arith.constant 0 : i32
    %c0_i32_1 = arith.constant 0 : i32
    %c0_i32_2 = arith.constant 0 : i32
    return %c0_i32, %c0_i32_0, %c0_i32_1 : i32, i32, i32
  }
  func.func @transform_4(%arg0: i32) -> (i32, i32) {
    %c0_i32 = arith.constant 0 : i32
    %c0_i32_0 = arith.constant 0 : i32
    %c0_i32_1 = arith.constant 0 : i32
    return %c0_i32, %c0_i32_0 : i32, i32
  }
  func.func @transform_5(%arg0: i32) -> (i32, i32, i32) {
    %c0_i32 = arith.constant 0 : i32
    %c0_i32_0 = arith.constant 0 : i32
    %c0_i32_1 = arith.constant 0 : i32
    %c0_i32_2 = arith.constant 0 : i32
    return %c0_i32, %c0_i32_0, %c0_i32_1 : i32, i32, i32
  }
  func.func @transform_6(%arg0: i32) -> (i32, i32) {
    %c0_i32 = arith.constant 0 : i32
    %c0_i32_0 = arith.constant 0 : i32
    %c0_i32_1 = arith.constant 0 : i32
    return %c0_i32, %c0_i32_0 : i32, i32
  }
  func.func @transform_7(%arg0: i32) -> (i32, i32) {
    %c0_i32 = arith.constant 0 : i32
    %c0_i32_0 = arith.constant 0 : i32
    return %arg0, %c0_i32 : i32, i32
  }
}

</mosaic_0001>

<bundles_post_ra>
// kernel: femnist_forward.1
= control target key start
LH: loop header
LB: loop body
LE: loop exit
PB: predicated region body
PF: predicated region fallthrough
CT: control target
= control target key end

     0   :  { %12 = vsyncpa [#allocation3], 0  ;;  %s19158_s0 = inlined_call_operand.vmem [shape: bf16[4,7,8,28], index: 0, kind: input, shape index: {}]   ;;  %s19159_s1 = inlined_call_operand.hbm [shape: bf16[10,28,384], index: 1, kind: input, shape index: {}]   ;;  %s19160_s2 = inlined_call_operand.hbm [shape: f32[1,384], index: 2, kind: input, shape index: {}]   ;;  %s19161_s3 = inlined_call_operand.hbm [shape: bf16[10,384,256], index: 3, kind: input, shape index: {}]   ;;  %s19162_s4 = inlined_call_operand.hbm [shape: f32[1,256], index: 4, kind: input, shape index: {}]   ;;  %s19163_s5 = inlined_call_operand.hbm [shape: bf16[4,256,128], index: 5, kind: input, shape index: {}]   ;;  %s19164_s6 = inlined_call_operand.hbm [shape: f32[1,128], index: 6, kind: input, shape index: {}]   ;;  %s19165_s7 = inlined_call_operand.vmem [shape: f32[8,128], index: 7, kind: output, shape index: {}]  }
   0x1   :  { %13 = vsyncpa [#allocation5], 0 }
   0x2   :  { %14 = vsyncpa [#allocation8], 0 }
   0x3   :  { %15 = vsyncpa [#allocation11], 0  ;;  %s16755_s24 = smov [#allocation4]   ;;  %s16756_s26 = smov [#allocation7]  }
   0x4   :  { %s36_s25 = sshll.u32 %s16755_s24, 4  ;;  %s58_s27 = sshll.u32 %s16756_s26, 4  ;;  %s37_s25 = int_to_ptr.vmem [resolvable:$true] %s36_s25  ;;  %s59_s27 = int_to_ptr.vmem [resolvable:$true] %s58_s27 }
   0x5   :  { %s16615_s30 = scalar_lea.hbm %s19160_s2, 48 }
   0x6   :  { %p16616_p0 = scmp.ne.s32.totalorder %s19160_s2, %s16615_s30  ;;  %p16619_p1 = scmp.lt.u32.totalorder %s16615_s30, %s19160_s2 }
   0x8   :  { %p16621_p2 = pnand %p16619_p1, %p16616_p0 }
   0xa   :  { %16624 = shalt.err (!%p16621_p2)
}
   0xb   :  { %s16625_s12 = scalar_lea.vmem %s37_s25, 48  ;;  %s16629_s13 = scalar_lea.vmem %s37_s25, 64 }
   0xc   :  { %p16626_p3 = scmp.ne.s32.totalorder %s37_s25, %s16625_s12  ;;  %p16630_p4 = scmp.lt.s32.totalorder %s37_s25, %s37_s25 }
   0xd   :  { %p16631_p5 = scmp.lt.s32.totalorder %s16629_s13, %s16625_s12 }
   0xf   :  { %p16632_p6 = por %p16631_p5, %p16630_p4 }
  0x11   :  { %p16633_p7 = pnand %p16632_p6, %p16626_p3 }
  0x13   :  { %16636 = shalt.err (!%p16633_p7)
}
  0x14   :  { %39 = dma.hbm_to_vmem [thread:$0]  %s19160_s2, 48, %s37_s25, [#allocation5]  }
  0x15   :  { %s16637_s18 = scalar_lea.hbm %s19162_s4, 32 }
  0x16   :  { %p16638_p8 = scmp.ne.s32.totalorder %s19162_s4, %s16637_s18  ;;  %p16641_p9 = scmp.lt.u32.totalorder %s16637_s18, %s19162_s4 }
  0x18   :  { %p16643_p10 = pnand %p16641_p9, %p16638_p8 }
  0x1a   :  { %16646 = shalt.err (!%p16643_p10)
}
  0x1b   :  { %s16647_s23 = scalar_lea.vmem %s59_s27, 32  ;;  %p16652_p12 = scmp.lt.s32.totalorder %s59_s27, %s59_s27 }
  0x1c   :  { %p16648_p11 = scmp.ne.s32.totalorder %s59_s27, %s16647_s23  ;;  %p16653_p13 = scmp.lt.s32.totalorder %s16647_s23, %s16647_s23 }
  0x1e   :  { %p16654_p0 = por %p16653_p13, %p16652_p12 }
  0x20   :  { %p16655_p1 = pnand %p16654_p0, %p16648_p11 }
  0x22   :  { %16658 = shalt.err (!%p16655_p1)
}
  0x23   :  { %61 = dma.hbm_to_vmem [thread:$0]  %s19162_s4, 32, %s59_s27, [#allocation8]  }
  0x24   :  { %s16757_s25 = smov [#allocation2]   ;;  %s16659_s30 = scalar_lea.hbm %s19159_s1, 7680 }
  0x25   :  { %s23_s26 = sshll.u32 %s16757_s25, 4  ;;  %p16660_p2 = scmp.ne.s32.totalorder %s19159_s1, %s16659_s30  ;;  %s24_s26 = int_to_ptr.vmem [resolvable:$true] %s23_s26 }
  0x26   :  { %p16663_p3 = scmp.lt.u32.totalorder %s16659_s30, %s19159_s1 }
  0x28   :  { %p16665_p4 = pnand %p16663_p3, %p16660_p2 }
  0x2a   :  { %16668 = shalt.err (!%p16665_p4)
}
  0x2b   :  { %s16669_s12 = scalar_lea.vmem %s24_s26, 7680  ;;  %p16674_p6 = scmp.lt.s32.totalorder %s24_s26, %s24_s26 }
  0x2c   :  { %p16670_p5 = scmp.ne.s32.totalorder %s24_s26, %s16669_s12  ;;  %p16675_p7 = scmp.lt.s32.totalorder %s16669_s12, %s16669_s12 }
  0x2e   :  { %p16676_p8 = por %p16675_p7, %p16674_p6 }
  0x30   :  { %p16677_p9 = pnand %p16676_p8, %p16670_p5 }
  0x32   :  { %16680 = shalt.err (!%p16677_p9)
}
  0x33   :  { %s16758_s4 = smov 192   ;;  %s16759_s27 = smov 12  }
  0x34   :  { %29 = dma.hbm_to_vmem [thread:$0]  %s19159_s1, 7680, %s24_s26, [#allocation3], %s16758_s4, %s16758_s4, %s16759_s27  }
  0x35   :  { %s16760_s15 = smov [#allocation6]   ;;  %s16681_s19 = scalar_lea.hbm %s19161_s3, 61440 }
  0x36   :  { %s45_s16 = sshll.u32 %s16760_s15, 4  ;;  %p16682_p10 = scmp.ne.s32.totalorder %s19161_s3, %s16681_s19  ;;  %s46_s16 = int_to_ptr.vmem [resolvable:$true] %s45_s16 }
  0x37   :  { %p16685_p11 = scmp.lt.u32.totalorder %s16681_s19, %s19161_s3 }
  0x39   :  { %p16687_p12 = pnand %p16685_p11, %p16682_p10 }
  0x3b   :  { %16690 = shalt.err (!%p16687_p12)
}
  0x3c   :  { %s16691_s2 = scalar_lea.vmem %s46_s16, 61440  ;;  %p16696_p0 = scmp.lt.s32.totalorder %s46_s16, %s46_s16 }
  0x3d   :  { %p16692_p13 = scmp.ne.s32.totalorder %s46_s16, %s16691_s2  ;;  %p16697_p1 = scmp.lt.s32.totalorder %s16691_s2, %s16691_s2 }
  0x3f   :  { %p16698_p2 = por %p16697_p1, %p16696_p0 }
  0x41   :  { %p16699_p3 = pnand %p16698_p2, %p16692_p13 }
  0x43   :  { %16702 = shalt.err (!%p16699_p3)
}
  0x44   :  { %s16761_s1 = smov 128   ;;  %s16762_s24 = smov 8  }
  0x45   :  { %51 = dma.hbm_to_vmem [thread:$0]  %s19161_s3, 61440, %s46_s16, [#allocation5], %s16761_s1, %s16761_s1, %s16762_s24  }
  0x46   :  { %s16763_s28 = smov [#allocation9]   ;;  %s16703_s9 = scalar_lea.hbm %s19163_s5, 8192 }
  0x47   :  { %s67_s29 = sshll.u32 %s16763_s28, 4  ;;  %p16704_p4 = scmp.ne.s32.totalorder %s19163_s5, %s16703_s9  ;;  %s68_s29 = int_to_ptr.vmem [resolvable:$true] %s67_s29 }
  0x48   :  { %p16707_p5 = scmp.lt.u32.totalorder %s16703_s9, %s19163_s5 }
  0x4a   :  { %p16709_p6 = pnand %p16707_p5, %p16704_p4 }
  0x4c   :  { %16712 = shalt.err (!%p16709_p6)
}
  0x4d   :  { %s16713_s27 = scalar_lea.vmem %s68_s29, 8192  ;;  %p16718_p8 = scmp.lt.s32.totalorder %s68_s29, %s68_s29 }
  0x4e   :  { %p16714_p7 = scmp.ne.s32.totalorder %s68_s29, %s16713_s27  ;;  %p16719_p9 = scmp.lt.s32.totalorder %s16713_s27, %s16713_s27 }
  0x50   :  { %p16720_p10 = por %p16719_p9, %p16718_p8 }
  0x52   :  { %p16721_p11 = pnand %p16720_p10, %p16714_p7 }
  0x54   :  { %16724 = shalt.err (!%p16721_p11)
}
  0x55   :  { %s16764_s3 = smov 64   ;;  %s16765_s13 = smov 4  }
  0x56   :  { %73 = dma.hbm_to_vmem [thread:$0]  %s19163_s5, 8192, %s68_s29, [#allocation8], %s16764_s3, %s16764_s3, %s16765_s13  }
  0x57   :  { %s16766_s16 = smov [#allocation10]   ;;  %s16725_s20 = scalar_lea.hbm %s19164_s6, 16 }
  0x58   :  { %s80_s17 = sshll.u32 %s16766_s16, 4  ;;  %p16726_p12 = scmp.ne.s32.totalorder %s19164_s6, %s16725_s20  ;;  %s81_s17 = int_to_ptr.vmem [resolvable:$true] %s80_s17 }
  0x59   :  { %p16729_p13 = scmp.lt.u32.totalorder %s16725_s20, %s19164_s6 }
  0x5b   :  { %p16731_p0 = pnand %p16729_p13, %p16726_p12 }
  0x5d   :  { %16734 = shalt.err (!%p16731_p0)
}
  0x5e   :  { %s16735_s1 = scalar_lea.vmem %s81_s17, 16  ;;  %s16739_s5 = scalar_lea.vmem %s81_s17, 32 }
  0x5f   :  { %p16736_p1 = scmp.ne.s32.totalorder %s81_s17, %s16735_s1  ;;  %p16740_p2 = scmp.lt.s32.totalorder %s81_s17, %s81_s17 }
  0x60   :  { %p16741_p3 = scmp.lt.s32.totalorder %s16739_s5, %s16735_s1 }
  0x62   :  { %p16742_p4 = por %p16741_p3, %p16740_p2 }
  0x64   :  { %p16743_p5 = pnand %p16742_p4, %p16736_p1 }
  0x66   :  { %16746 = shalt.err (!%p16743_p5)
}
  0x67   :  { %83 = dma.hbm_to_vmem [thread:$0]  %s19164_s6, 16, %s81_s17, [#allocation11]  }
  0x68   :  { %16747 = dma.done.wait [#allocation3], 7680  }
  0x69   :  { %16748 = vsyncadd [#allocation3], 4294959616 }
  0x6a   :  { %16749 = dma.done.wait [#allocation5], 61488  }
  0x6b   :  { %16750 = vsyncadd [#allocation5], 4294905808 }
  0x6c   :  { %16751 = dma.done.wait [#allocation8], 8224  }
  0x6d   :  { %16752 = vsyncadd [#allocation8], 4294959072 }
  0x6e   :  { %16753 = dma.done.wait [#allocation11], 16  }
  0x6f   :  { %16754 = vsyncadd [#allocation11], 4294967280  ;;  %v19166_v0 = vmov 0.0   ;;  %vm16768_vm0 = vmmov 0   ;;  %v19172_v1 = vmov 0   ;;  %vm187_vm1 = vcmask 1045504  }
  0x70   :  { %13435 = vmatprep.subr.bf16.mxu1 %v19166_v0  ;;  %13439 = vmatprep.mubr.msk.bf16.mxu1 %vm16768_vm0, %v19166_v0  ;;  %v15146_v2 = vld [vmem:[#allocation2 + $0x64] ss:$12 sps:$4 sm:$0xff]   ;;  %v15148_v3 = vld [vmem:[#allocation2 + $0x68] ss:$12 sps:$4 sm:$0xff]   ;;  %v15149_v4 = vld [vmem:[#allocation2 + $0x60] ss:$12 sps:$4 sm:$0xff]  }
  0x71   :  { %229 = vmatprep.mubr.bf16.mxu0 %v19172_v1  ;;  %197 = vmatprep.subr.bf16.mxu0 %v15146_v2  ;;  %v15150_v5 = vld [vmem:[#allocation2 + $0x7c] ss:$12 sps:$4 sm:$0x3f]   ;;  %vm177_vm2 = vcmask 228352   ;;  %v15155_v10 = vld [vmem:[#allocation2 + $0x4] ss:$12 sps:$4 sm:$0xff]  }
  0x72   :  { %13436 = vmatpush3.bf16.msra.mxu1 %v15148_v3  ;;  %198 = vmatpush1.bf16.msra.mxu0 %v15149_v4  ;;  %v15152_v6 = vld [vmem:[#allocation2 + $0x80] ss:$12 sps:$4 sm:$0x3f]   ;;  %v15153_v7 = vld [vmem:[#allocation2 + $0x78] ss:$12 sps:$4 sm:$0x3f]  }
  0x73   :  { %13437 = vmatprep.subr.bf16.mxu1 %v19166_v0  ;;  %12211 = vmatprep.subr.msk.bf16.mxu0 %vm187_vm1, %v15150_v5  ;;  %v16889_v8 = vsel %vm187_vm1, %v15152_v6, 0  ;;  %v16894_v9 = vld [vmem:[%s19158_s0 + $0x1c] sm:$0xff]   ;;  %v16898_v11 = vsel %vm187_vm1, %v15153_v7, 0  ;;  %v15161_v14 = vld [vmem:[#allocation2 + $0x18] ss:$12 sps:$4 sm:$0x3f]  }
  0x74   :  { %19275 = vst [vmem:[#allocation16_spill] sm:$0xff] %v16889_v8  ;;  %19276 = vst [vmem:[#allocation17_spill] sm:$0xff] %v16898_v11  ;;  %v15157_v12 = vld [vmem:[#allocation2] ss:$12 sps:$4 sm:$0xff]   ;;  %v16909_v15 = vsel %vm187_vm1, %v15161_v14, 0  ;;  %v16916_v18 = vld [vmem:[%s19158_s0 + $0x24] sm:$0xff]  }
  0x75   :  { %v15159_v13 = vld [vmem:[#allocation2 + $0x1c] ss:$12 sps:$4 sm:$0x3f]   ;;  %19277 = vst [vmem:[#allocation18_spill] sm:$0xff] %v16909_v15  ;;  %v15166_v19 = vld [vmem:[#allocation2 + $0xc4] ss:$12 sps:$4 sm:$0xff]  }
  0x76   :  { %13438 = vmatpush3.bf16.msra.mxu1 %v16889_v8  ;;  %200 = vmatpush1.bf16.msra.mxu0 %v16898_v11  ;;  %v15163_v16 = vld [vmem:[#allocation2 + $0x8] ss:$12 sps:$4 sm:$0xff]   ;;  %v15164_v17 = vld [vmem:[#allocation2 + $0x20] ss:$12 sps:$4 sm:$0x3f]   ;;  %v15176_v33 = vld [vmem:[%s19158_s0 + $0x38] sm:$0xff]  }
  0x77   :  { %13451 = vmatprep.subr.bf16.mxu1 %v19166_v0  ;;  %379 = vmatprep.subr.bf16.mxu0 %v15155_v10  ;;  %v16920_v20 = vsel %vm187_vm1, %v15164_v17, 0  ;;  %v16935_v21 = vld [vmem:[%s19158_s0 + $0x2c] sm:$0xff]   ;;  %v16947_v22 = vld [vmem:[%s19158_s0] sm:$0xff]   ;;  %v15170_v24 = vld [vmem:[#allocation2 + $0xdc] ss:$12 sps:$4 sm:$0x3f]  }
  0x78   :  { %19278 = vst [vmem:[#allocation19_spill] sm:$0xff] %v16920_v20  ;;  %v15168_v23 = vld [vmem:[#allocation2 + $0xc0] ss:$12 sps:$4 sm:$0xff]   ;;  %v15172_v25 = vld [vmem:[#allocation2 + $0xd8] ss:$12 sps:$4 sm:$0x3f]  }
  0x79   :  { %13440 = vmatmul.mubr.msk.bf16.vlgmr.msra.gmra.mrb[0].mxu1 %vm177_vm2, %v16894_v9  ;;  %12212 = vmatmul.mubr.msk.bf16.vlgmr.msra.gmra.mrb[0].mxu0 %vm177_vm2, %v16894_v9  ;;  %v15175_v26 = vld [vmem:[#allocation2 + $0xe0] ss:$12 sps:$4 sm:$0x3f]   ;;  %v15174_v27 = vld [vmem:[#allocation2 + $0xc8] ss:$12 sps:$4 sm:$0xff]   ;;  %v16958_v28 = vsel %vm187_vm1, %v15172_v25, 0 }
  0x7a   :  { %13443 = vmatprep.mubr.msk.bf16.mxu1 %vm16768_vm0, %v19166_v0  ;;  %380 = vmatpush1.bf16.msra.mxu0 %v15157_v12  ;;  %19279 = vst [vmem:[#allocation20_spill] sm:$0xff] %v16958_v28  ;;  %v15177_v29 = vld [vmem:[#allocation2 + $0x124] ss:$12 sps:$4 sm:$0xff]   ;;  %v16963_v30 = vld [vmem:[%s19158_s0 + $0x8] sm:$0xff]   ;;  %v16967_v31 = vsel %vm187_vm1, %v15175_v26, 0  ;;  %v15187_v44 = vld [vmem:[%s19158_s0 + $0x54] sm:$0xff]  }
  0x7b   :  { %239 = vmatprep.mubr.bf16.mxu0 %v19172_v1  ;;  %12227 = vmatprep.subr.msk.bf16.mxu0 %vm187_vm1, %v15159_v13  ;;  %19280 = vst [vmem:[#allocation21_spill] sm:$0xff] %v16967_v31  ;;  %v16982_v32 = vld [vmem:[%s19158_s0 + $0x10] sm:$0xff]   ;;  %v15179_v34 = vld [vmem:[#allocation2 + $0x120] ss:$12 sps:$4 sm:$0xff]   ;;  %v15195_v54 = vld [vmem:[%s19158_s0 + $0x64] sm:$0xff]   ;;  %vm7115_vm3 = vcmask 1043456  }
  0x7c   :  { %13452 = vmatpush3.bf16.msra.mxu1 %v15163_v16  ;;  %v15183_v35 = vld [vmem:[#allocation2 + $0x138] ss:$12 sps:$4 sm:$0x3f]   ;;  %v15181_v36 = vld [vmem:[#allocation2 + $0x13c] ss:$12 sps:$4 sm:$0x3f]  }
  0x7d   :  { %13453 = vmatprep.subr.bf16.mxu1 %v19166_v0  ;;  %v15185_v37 = vld [vmem:[#allocation2 + $0x128] ss:$12 sps:$4 sm:$0xff]   ;;  %v15186_v38 = vld [vmem:[#allocation2 + $0x140] ss:$12 sps:$4 sm:$0x3f]   ;;  %v16999_v39 = vsel %vm187_vm1, %v15183_v35, 0 }
  0x7e   :  { %382 = vmatpush1.bf16.msra.mxu0 %v16909_v15  ;;  %19281 = vst [vmem:[#allocation22_spill] sm:$0xff] %v16999_v39  ;;  %v15188_v40 = vld [vmem:[#allocation2 + $0x184] ss:$12 sps:$4 sm:$0xff]   ;;  %v17007_v42 = vsel %vm187_vm1, %v15186_v38, 0  ;;  %v15184_v43 = vld [vmem:[%s19158_s0 + $0x48] sm:$0xff]   ;;  %v15191_v51 = vld [vmem:[%s19158_s0 + $0x5c] sm:$0xff]  }
  0x7f   :  { %577 = vmatprep.subr.bf16.mxu0 %v15166_v19  ;;  %v15180_v41 = vld [vmem:[%s19158_s0 + $0x40] sm:$0xff]   ;;  %19282 = vst [vmem:[#allocation23_spill] sm:$0xff] %v17007_v42  ;;  %v15192_v46 = vld [vmem:[#allocation2 + $0x19c] ss:$12 sps:$4 sm:$0x3f]   ;;  %v15202_v62 = vld [vmem:[%s19158_s0 + $0xc] sm:$0xff]  }
  0x80   :  { %13454 = vmatpush3.bf16.msra.mxu1 %v16920_v20  ;;  %v15190_v45 = vld [vmem:[#allocation2 + $0x180] ss:$12 sps:$4 sm:$0xff]   ;;  %v15194_v47 = vld [vmem:[#allocation2 + $0x198] ss:$12 sps:$4 sm:$0x3f]  }
  0x81   :  { %13444 = vmatmul.mubr.msk.bf16.gmra.mrb[4].mxu1 %vm177_vm2, %v16916_v18  ;;  %13467 = vmatprep.subr.bf16.mxu1 %v19166_v0  ;;  %v15196_v48 = vld [vmem:[#allocation2 + $0x188] ss:$12 sps:$4 sm:$0xff]   ;;  %v15197_v49 = vld [vmem:[#allocation2 + $0x1a0] ss:$12 sps:$4 sm:$0x3f]   ;;  %v17039_v52 = vsel %vm187_vm1, %v15194_v47, 0 }
  0x82   :  { %12213 = vmatmul.mubr.msk.bf16.gmra.mrb[4].mxu0 %vm177_vm2, %v16916_v18  ;;  %13447 = vmatprep.mubr.msk.bf16.mxu1 %vm16768_vm0, %v19166_v0  ;;  %v15199_v50 = vld [vmem:[#allocation2 + $0x94] ss:$12 sps:$4 sm:$0xff]   ;;  %19283 = vst [vmem:[#allocation24_spill] sm:$0xff] %v17039_v52  ;;  %v17043_v53 = vsel %vm187_vm1, %v15197_v49, 0  ;;  %v15198_v55 = vld [vmem:[%s19158_s0 + $0x4] sm:$0xff]  }
  0x83   :  { %249 = vmatprep.mubr.bf16.mxu0 %v19172_v1  ;;  %19284 = vst [vmem:[#allocation25_spill] sm:$0xff] %v17043_v53  ;;  %v15201_v56 = vld [vmem:[#allocation2 + $0x90] ss:$12 sps:$4 sm:$0xff]   ;;  %v15203_v57 = vld [vmem:[#allocation2 + $0xac] ss:$12 sps:$4 sm:$0x3f]  }
  0x84   :  { %v15205_v58 = vld [vmem:[#allocation2 + $0xa8] ss:$12 sps:$4 sm:$0x3f]   ;;  %v15207_v59 = vld [vmem:[#allocation2 + $0x98] ss:$12 sps:$4 sm:$0xff]  }
  0x85   :  { %v15208_v60 = vld [vmem:[#allocation2 + $0xb0] ss:$12 sps:$4 sm:$0x3f]   ;;  %v15209_v61 = vld [vmem:[#allocation2 + $0x34] ss:$12 sps:$4 sm:$0xff]   ;;  %v17074_v63 = vsel %vm187_vm1, %v15205_v58, 0 }
  0x86   :  { %19285 = vst [vmem:[#allocation26_spill] sm:$0xff] %v17074_v63  ;;  %v17078_v2 = vsel %vm187_vm1, %v15208_v60, 0  ;;  %v17091_v3 = vld [vmem:[%s19158_s0 + $0x14] sm:$0xff]   ;;  %v15211_v4 = vld [vmem:[#allocation2 + $0x30] ss:$12 sps:$4 sm:$0xff]   ;;  %v17189_v35 = vld [vmem:[%s19158_s0 + $0x40] sm:$0xff]  }
  0x87   :  { %19286 = vst [vmem:[#allocation27_spill] sm:$0xff] %v17078_v2  ;;  %v15212_v5 = vld [vmem:[#allocation2 + $0x4c] ss:$12 sps:$4 sm:$0x3f]   ;;  %v15217_v12 = vld [vmem:[#allocation2 + $0xf4] ss:$12 sps:$4 sm:$0xff]  }
  0x88   :  { %v15214_v6 = vld [vmem:[#allocation2 + $0x48] ss:$12 sps:$4 sm:$0x3f]   ;;  %v15215_v7 = vld [vmem:[#allocation2 + $0x38] ss:$12 sps:$4 sm:$0xff]  }
  0x89   :  { %13448 = vmatmul.mubr.msk.bf16.gmra.mrb[8].mxu1 %vm177_vm2, %v16935_v21  ;;  %v15216_v10 = vld [vmem:[#allocation2 + $0x50] ss:$12 sps:$4 sm:$0x3f]   ;;  %v17109_v13 = vsel %vm187_vm1, %v15214_v6, 0  ;;  %v17261_v49 = vld [vmem:[%s19158_s0 + $0x64] sm:$0xff]  }
  0x8a   :  { %12214 = vmatmul.mubr.msk.bf16.gmra.mrb[8].mxu0 %vm177_vm2, %v16935_v21  ;;  %13455 = vmatprep.mubr.msk.bf16.mxu1 %vm16768_vm0, %v19166_v0  ;;  %19287 = vst [vmem:[#allocation28_spill] sm:$0xff] %v17109_v13  ;;  %v17113_v14 = vsel %vm187_vm1, %v15216_v10, 0  ;;  %v15220_v16 = vld [vmem:[#allocation2 + $0x10c] ss:$12 sps:$4 sm:$0x3f]  }
  0x8b   :  { %411 = vmatprep.mubr.bf16.mxu0 %v19172_v1  ;;  %19288 = vst [vmem:[#allocation29_spill] sm:$0xff] %v17113_v14  ;;  %v15222_v17 = vld [vmem:[#allocation2 + $0x108] ss:$12 sps:$4 sm:$0x3f]   ;;  %v17242_v47 = vld [vmem:[#allocation2 + $0x64] ss:$12 sps:$4 sm:$0xff]  }
  0x8c   :  { %v15224_v19 = vld [vmem:[#allocation2 + $0x110] ss:$12 sps:$4 sm:$0x3f]   ;;  %v15228_v25 = vld [vmem:[#allocation2 + $0x16c] ss:$12 sps:$4 sm:$0x3f]  }
  0x8d   :  { %v15230_v26 = vld [vmem:[#allocation2 + $0x168] ss:$12 sps:$4 sm:$0x3f]   ;;  %v17213_v38 = vld [vmem:[#allocation2 + $0x1cc] ss:$12 sps:$4 sm:$0x3f]  }
  0x8e   :  { %v17324_v58 = vld [vmem:[#allocation2] ss:$12 sps:$4 sm:$0xff]   ;;  %v17332_v60 = vld [vmem:[#allocation2 + $0x8] ss:$12 sps:$4 sm:$0xff]   ;;  %v17381_v6 = vld [vmem:[#allocation2 + $0x124] ss:$12 sps:$4 sm:$0xff]  }
  0x8f   :  { %19295 = vst [vmem:[#allocation36_spill] sm:$0xff] %v17381_v6  ;;  %v17400_v10 = vld [vmem:[%s19158_s0 + $0x2c] sm:$0xff]  }
  0x91   :  { %13456 = vmatmul.mubr.msk.bf16.vlgmr.msra.gmra.mrb[0].mxu1 %vm177_vm2, %v16947_v22 }
  0x92   :  { %12228 = vmatmul.mubr.msk.bf16.vlgmr.msra.gmra.mrb[0].mxu0 %vm177_vm2, %v16947_v22  ;;  %13459 = vmatprep.mubr.msk.bf16.mxu1 %vm16768_vm0, %v19166_v0 }
  0x93   :  { %578 = vmatpush1.bf16.msra.mxu0 %v15168_v23  ;;  %421 = vmatprep.mubr.bf16.mxu0 %v19172_v1  ;;  %v17141_v23 = vsel %vm187_vm1, %v15222_v17, 0  ;;  %v17429_v17 = vld [vmem:[#allocation2 + $0x184] ss:$12 sps:$4 sm:$0xff]  }
  0x94   :  { %12249 = vmatprep.subr.msk.bf16.mxu0 %vm187_vm1, %v15170_v24  ;;  %13468 = vmatpush3.bf16.msra.mxu1 %v15174_v27  ;;  %19289 = vst [vmem:[#allocation30_spill] sm:$0xff] %v17141_v23  ;;  %v17145_v24 = vsel %vm187_vm1, %v15224_v19, 0  ;;  %v15231_v27 = vld [vmem:[#allocation2 + $0x158] ss:$12 sps:$4 sm:$0xff]   ;;  %19299 = vst [vmem:[#allocation40_spill] sm:$0xff] %v17429_v17 }
  0x95   :  { %13469 = vmatprep.subr.bf16.mxu1 %v19166_v0  ;;  %19290 = vst [vmem:[#allocation31_spill] sm:$0xff] %v17145_v24 }
  0x97   :  { %580 = vmatpush1.bf16.msra.mxu0 %v16958_v28 }
  0x98   :  { %13470 = vmatpush3.bf16.msra.mxu1 %v16967_v31  ;;  %793 = vmatprep.subr.bf16.mxu0 %v15177_v29  ;;  %v15232_v29 = vld [vmem:[#allocation2 + $0x170] ss:$12 sps:$4 sm:$0x3f]  }
  0x99   :  { %13460 = vmatmul.mubr.msk.bf16.gmra.mrb[4].mxu1 %vm177_vm2, %v16963_v30  ;;  %13483 = vmatprep.subr.bf16.mxu1 %v19166_v0 }
  0x9a   :  { %12229 = vmatmul.mubr.msk.bf16.gmra.mrb[4].mxu0 %vm177_vm2, %v16963_v30  ;;  %13463 = vmatprep.mubr.msk.bf16.mxu1 %vm16768_vm0, %v19166_v0 }
  0x9b   :  { %431 = vmatprep.mubr.bf16.mxu0 %v19172_v1 }
  0xa1   :  { %13464 = vmatmul.mubr.msk.bf16.gmra.mrb[8].mxu1 %vm177_vm2, %v16982_v32 }
  0xa2   :  { %12230 = vmatmul.mubr.msk.bf16.gmra.mrb[8].mxu0 %vm177_vm2, %v16982_v32  ;;  %13471 = vmatprep.mubr.msk.bf16.mxu1 %vm16768_vm0, %v19166_v0 }
  0xa3   :  { %609 = vmatprep.mubr.bf16.mxu0 %v19172_v1 }
  0xa9   :  { %13472 = vmatmul.mubr.msk.bf16.vlgmr.msra.gmra.mrb[0].mxu1 %vm177_vm2, %v15176_v33 }
  0xaa   :  { %12250 = vmatmul.mubr.msk.bf16.vlgmr.msra.gmra.mrb[0].mxu0 %vm177_vm2, %v15176_v33  ;;  %13475 = vmatprep.mubr.msk.bf16.mxu1 %vm16768_vm0, %v19166_v0  ;;  %v17178_v33 = vsel %vm187_vm1, %v15230_v26, 0 }
  0xab   :  { %794 = vmatpush1.bf16.msra.mxu0 %v15179_v34  ;;  %619 = vmatprep.mubr.bf16.mxu0 %v19172_v1  ;;  %19291 = vst [vmem:[#allocation32_spill] sm:$0xff] %v17178_v33  ;;  %v17182_v34 = vsel %vm187_vm1, %v15232_v29, 0 }
  0xac   :  { %12271 = vmatprep.subr.msk.bf16.mxu0 %vm187_vm1, %v15181_v36  ;;  %13484 = vmatpush3.bf16.msra.mxu1 %v15185_v37  ;;  %19292 = vst [vmem:[#allocation33_spill] sm:$0xff] %v17182_v34  ;;  %v17202_v36 = vld [vmem:[%s19158_s0 + $0x48] sm:$0xff]   ;;  %v17211_v37 = vld [vmem:[#allocation2 + $0x1b0] ss:$12 sps:$4 sm:$0xff]  }
  0xad   :  { %13485 = vmatprep.subr.bf16.mxu1 %v19166_v0 }
  0xaf   :  { %796 = vmatpush1.bf16.msra.mxu0 %v16999_v39 }
  0xb0   :  { %13486 = vmatpush3.bf16.msra.mxu1 %v17007_v42  ;;  %1009 = vmatprep.subr.bf16.mxu0 %v15188_v40  ;;  %v15238_v40 = vld [vmem:[#allocation2 + $0x1c8] ss:$12 sps:$4 sm:$0x3f]  }
  0xb1   :  { %13476 = vmatmul.mubr.msk.bf16.gmra.mrb[4].mxu1 %vm177_vm2, %v15180_v41  ;;  %13499 = vmatprep.subr.bf16.mxu1 %v19166_v0 }
  0xb2   :  { %12251 = vmatmul.mubr.msk.bf16.gmra.mrb[4].mxu0 %vm177_vm2, %v15180_v41  ;;  %13479 = vmatprep.mubr.msk.bf16.mxu1 %vm16768_vm0, %v19166_v0  ;;  %v17215_v41 = vld [vmem:[#allocation2 + $0x1b8] ss:$12 sps:$4 sm:$0xff]  }
  0xb3   :  { %629 = vmatprep.mubr.bf16.mxu0 %v19172_v1 }
  0xb9   :  { %13480 = vmatmul.mubr.msk.bf16.gmra.mrb[8].mxu1 %vm177_vm2, %v15184_v43 }
  0xba   :  { %12252 = vmatmul.mubr.msk.bf16.gmra.mrb[8].mxu0 %vm177_vm2, %v15184_v43  ;;  %13487 = vmatprep.mubr.msk.bf16.mxu1 %vm16768_vm0, %v19166_v0  ;;  %v15240_v43 = vld [vmem:[#allocation2 + $0x1d0] ss:$12 sps:$4 sm:$0x3f]  }
  0xbb   :  { %825 = vmatprep.mubr.bf16.mxu0 %v19172_v1 }
  0xc1   :  { %13488 = vmatmul.mubr.msk.bf16.vlgmr.msra.gmra.mrb[0].mxu1 %vm177_vm2, %v15187_v44 }
  0xc2   :  { %12272 = vmatmul.mubr.msk.bf16.vlgmr.msra.gmra.mrb[0].mxu0 %vm177_vm2, %v15187_v44  ;;  %13491 = vmatprep.mubr.msk.bf16.mxu1 %vm16768_vm0, %v19166_v0  ;;  %v17220_v44 = vld [vmem:[%s19158_s0 + $0x54] sm:$0xff]  }
  0xc3   :  { %1010 = vmatpush1.bf16.msra.mxu0 %v15190_v45  ;;  %835 = vmatprep.mubr.bf16.mxu0 %v19172_v1  ;;  %v17233_v45 = vsel %vm187_vm1, %v15238_v40, 0 }
  0xc4   :  { %12293 = vmatprep.subr.msk.bf16.mxu0 %vm187_vm1, %v15192_v46  ;;  %13500 = vmatpush3.bf16.msra.mxu1 %v15196_v48  ;;  %v17238_v46 = vsel %vm187_vm1, %v15240_v43, 0  ;;  %v17248_v48 = vld [vmem:[%s19158_s0 + $0x5c] sm:$0xff]  }
  0xc5   :  { %13501 = vmatprep.subr.bf16.mxu1 %v19166_v0  ;;  %v17471_v43 = vld [vmem:[#allocation2 + $0x19c] ss:$12 sps:$4 sm:$0x3f]  }
  0xc6   :  { %19302 = vst [vmem:[#allocation43_spill] sm:$0xff] %v17471_v43 }
  0xc7   :  { %1012 = vmatpush1.bf16.msra.mxu0 %v17039_v52 }
  0xc8   :  { %13502 = vmatpush3.bf16.msra.mxu1 %v17043_v53  ;;  %1203 = vmatprep.subr.bf16.mxu0 %v15199_v50  ;;  %v17273_v50 = vld [vmem:[%s19158_s0 + $0x4] sm:$0xff]  }
  0xc9   :  { %13492 = vmatmul.mubr.msk.bf16.gmra.mrb[4].mxu1 %vm177_vm2, %v15191_v51  ;;  %13515 = vmatprep.subr.bf16.mxu1 %v19166_v0 }
  0xca   :  { %12273 = vmatmul.mubr.msk.bf16.gmra.mrb[4].mxu0 %vm177_vm2, %v15191_v51  ;;  %13495 = vmatprep.mubr.msk.bf16.mxu1 %vm16768_vm0, %v19166_v0  ;;  %v17281_v51 = vld [vmem:[#allocation2 + $0x60] ss:$12 sps:$4 sm:$0xff]  }
  0xcb   :  { %845 = vmatprep.mubr.bf16.mxu0 %v19172_v1 }
  0xd1   :  { %13496 = vmatmul.mubr.msk.bf16.gmra.mrb[8].mxu1 %vm177_vm2, %v15195_v54 }
  0xd2   :  { %12274 = vmatmul.mubr.msk.bf16.gmra.mrb[8].mxu0 %vm177_vm2, %v15195_v54  ;;  %13503 = vmatprep.mubr.msk.bf16.mxu1 %vm16768_vm0, %v19166_v0  ;;  %v17285_v54 = vld [vmem:[#allocation2 + $0x7c] ss:$12 sps:$4 sm:$0x3f]  }
  0xd3   :  { %1041 = vmatprep.mubr.bf16.mxu0 %v19172_v1 }
  0xd9   :  { %13504 = vmatmul.mubr.msk.bf16.vlgmr.msra.gmra.mrb[0].mxu1 %vm177_vm2, %v15198_v55 }
  0xda   :  { %12294 = vmatmul.mubr.msk.bf16.vlgmr.msra.gmra.mrb[0].mxu0 %vm177_vm2, %v15198_v55  ;;  %13507 = vmatprep.mubr.msk.bf16.mxu1 %vm16768_vm0, %v19166_v0  ;;  %v17289_v55 = vld [vmem:[#allocation2 + $0x68] ss:$12 sps:$4 sm:$0xff]  }
  0xdb   :  { %1204 = vmatpush1.bf16.msra.mxu0 %v15201_v56  ;;  %1051 = vmatprep.mubr.bf16.mxu0 %v19172_v1  ;;  %v17295_v56 = vld [vmem:[#allocation2 + $0x4] ss:$12 sps:$4 sm:$0xff]  }
  0xdc   :  { %12306 = vmatprep.subr.msk.bf16.mxu0 %vm187_vm1, %v15203_v57  ;;  %13516 = vmatpush3.bf16.msra.mxu1 %v15207_v59  ;;  %v17301_v57 = vld [vmem:[%s19158_s0 + $0xc] sm:$0xff]   ;;  %v17328_v59 = vld [vmem:[#allocation2 + $0x1c] ss:$12 sps:$4 sm:$0x3f]  }
  0xdd   :  { %13517 = vmatprep.subr.bf16.mxu1 %v19166_v0 }
  0xdf   :  { %1206 = vmatpush1.bf16.msra.mxu0 %v17074_v63 }
  0xe0   :  { %13518 = vmatpush3.bf16.msra.mxu1 %v17078_v2  ;;  %1361 = vmatprep.subr.bf16.mxu0 %v15209_v61  ;;  %v17338_v61 = vld [vmem:[#allocation2 + $0xc4] ss:$12 sps:$4 sm:$0xff]  }
  0xe1   :  { %13508 = vmatmul.mubr.msk.bf16.gmra.mrb[4].mxu1 %vm177_vm2, %v15202_v62  ;;  %13531 = vmatprep.subr.bf16.mxu1 %v19166_v0 }
  0xe2   :  { %12295 = vmatmul.mubr.msk.bf16.gmra.mrb[4].mxu0 %vm177_vm2, %v15202_v62  ;;  %13511 = vmatprep.mubr.msk.bf16.mxu1 %vm16768_vm0, %v19166_v0  ;;  %v17359_v62 = vld [vmem:[%s19158_s0 + $0x1c] sm:$0xff]  }
  0xe3   :  { %1061 = vmatprep.mubr.bf16.mxu0 %v19172_v1 }
  0xe9   :  { %13512 = vmatmul.mubr.msk.bf16.gmra.mrb[8].mxu1 %vm177_vm2, %v17091_v3 }
  0xea   :  { %12296 = vmatmul.mubr.msk.bf16.gmra.mrb[8].mxu0 %vm177_vm2, %v17091_v3  ;;  %13519 = vmatprep.mubr.msk.bf16.mxu1 %vm16768_vm0, %v19166_v0 }
  0xeb   :  { %1235 = vmatprep.mubr.bf16.mxu0 %v19172_v1 }
  0xf1   :  { %13520 = vmatmul.mubr.msk.bf16.vlgmr.msra.gmra.mrb[12].mxu1 %vm177_vm2, %v16894_v9 }
  0xf2   :  { %12307 = vmatmul.mubr.msk.bf16.vlgmr.msra.gmra.mrb[12].mxu0 %vm177_vm2, %v16894_v9  ;;  %13523 = vmatprep.mubr.msk.bf16.mxu1 %vm16768_vm0, %v19166_v0  ;;  %v15219_v9 = vld [vmem:[#allocation2 + $0xf0] ss:$12 sps:$4 sm:$0xff]  }
  0xf3   :  { %1362 = vmatpush1.bf16.msra.mxu0 %v15211_v4  ;;  %1245 = vmatprep.mubr.bf16.mxu0 %v19172_v1  ;;  %v17371_v4 = vld [vmem:[#allocation2 + $0xdc] ss:$12 sps:$4 sm:$0x3f]  }
  0xf4   :  { %12319 = vmatprep.subr.msk.bf16.mxu0 %vm187_vm1, %v15212_v5  ;;  %13532 = vmatpush3.bf16.msra.mxu1 %v15215_v7  ;;  %19293 = vst [vmem:[#allocation34_spill] sm:$0xff] %v17371_v4  ;;  %v17375_v5 = vld [vmem:[#allocation2 + $0xc8] ss:$12 sps:$4 sm:$0xff]  }
  0xf5   :  { %13533 = vmatprep.subr.bf16.mxu1 %v19166_v0  ;;  %19294 = vst [vmem:[#allocation35_spill] sm:$0xff] %v17375_v5  ;;  %v17387_v7 = vld [vmem:[%s19158_s0 + $0x24] sm:$0xff]  }
  0xf7   :  { %1364 = vmatpush1.bf16.msra.mxu0 %v17109_v13 }
  0xf8   :  { %13534 = vmatpush3.bf16.msra.mxu1 %v17113_v14  ;;  %1528 = vmatprep.subr.bf16.mxu0 %v15217_v12  ;;  %v17415_v12 = vld [vmem:[#allocation2 + $0x120] ss:$12 sps:$4 sm:$0xff]  }
  0xf9   :  { %13524 = vmatmul.mubr.msk.bf16.gmra.mrb[16].mxu1 %vm177_vm2, %v16916_v18  ;;  %13547 = vmatprep.subr.bf16.mxu1 %v19166_v0  ;;  %19296 = vst [vmem:[#allocation37_spill] sm:$0xff] %v17415_v12 }
  0xfa   :  { %12308 = vmatmul.mubr.msk.bf16.gmra.mrb[16].mxu0 %vm177_vm2, %v16916_v18  ;;  %13527 = vmatprep.mubr.msk.bf16.mxu1 %vm16768_vm0, %v19166_v0  ;;  %v15223_v18 = vld [vmem:[#allocation2 + $0xf8] ss:$12 sps:$4 sm:$0xff]  }
  0xfb   :  { %1255 = vmatprep.mubr.bf16.mxu0 %v19172_v1 }
 0x101   :  { %13528 = vmatmul.mubr.msk.bf16.gmra.mrb[20].mxu1 %vm177_vm2, %v16935_v21 }
 0x102   :  { %12309 = vmatmul.mubr.msk.bf16.gmra.mrb[20].mxu0 %vm177_vm2, %v16935_v21  ;;  %13535 = vmatprep.mubr.msk.bf16.mxu1 %vm16768_vm0, %v19166_v0  ;;  %v15225_v21 = vld [vmem:[#allocation2 + $0x154] ss:$12 sps:$4 sm:$0xff]  }
 0x103   :  { %1393 = vmatprep.mubr.bf16.mxu0 %v19172_v1 }
 0x109   :  { %13536 = vmatmul.mubr.msk.bf16.vlgmr.msra.gmra.mrb[12].mxu1 %vm177_vm2, %v16947_v22 }
 0x10a   :  { %12320 = vmatmul.mubr.msk.bf16.vlgmr.msra.gmra.mrb[12].mxu0 %vm177_vm2, %v16947_v22  ;;  %13539 = vmatprep.mubr.msk.bf16.mxu1 %vm16768_vm0, %v19166_v0  ;;  %v15227_v22 = vld [vmem:[#allocation2 + $0x150] ss:$12 sps:$4 sm:$0xff]  }
 0x10b   :  { %1529 = vmatpush1.bf16.msra.mxu0 %v15219_v9  ;;  %1403 = vmatprep.mubr.bf16.mxu0 %v19172_v1  ;;  %v17419_v9 = vld [vmem:[#allocation2 + $0x13c] ss:$12 sps:$4 sm:$0x3f]  }
 0x10c   :  { %12332 = vmatprep.subr.msk.bf16.mxu0 %vm187_vm1, %v15220_v16  ;;  %13548 = vmatpush3.bf16.msra.mxu1 %v15223_v18  ;;  %19297 = vst [vmem:[#allocation38_spill] sm:$0xff] %v17419_v9  ;;  %v17423_v16 = vld [vmem:[#allocation2 + $0x128] ss:$12 sps:$4 sm:$0xff]  }
 0x10d   :  { %13549 = vmatprep.subr.bf16.mxu1 %v19166_v0  ;;  %19298 = vst [vmem:[#allocation39_spill] sm:$0xff] %v17423_v16 }
 0x10f   :  { %1531 = vmatpush1.bf16.msra.mxu0 %v17141_v23 }
 0x110   :  { %13550 = vmatpush3.bf16.msra.mxu1 %v17145_v24  ;;  %1713 = vmatprep.subr.bf16.mxu0 %v15225_v21 }
 0x111   :  { %13540 = vmatmul.mubr.msk.bf16.gmra.mrb[16].mxu1 %vm177_vm2, %v16963_v30  ;;  %13563 = vmatprep.subr.bf16.mxu1 %v19166_v0 }
 0x112   :  { %12321 = vmatmul.mubr.msk.bf16.gmra.mrb[16].mxu0 %vm177_vm2, %v16963_v30  ;;  %13543 = vmatprep.mubr.msk.bf16.mxu1 %vm16768_vm0, %v19166_v0  ;;  %v17167_v30 = vld [vmem:[%s19158_s0 + $0x38] sm:$0xff]  }
 0x113   :  { %1413 = vmatprep.mubr.bf16.mxu0 %v19172_v1 }
 0x119   :  { %13544 = vmatmul.mubr.msk.bf16.gmra.mrb[20].mxu1 %vm177_vm2, %v16982_v32 }
 0x11a   :  { %12322 = vmatmul.mubr.msk.bf16.gmra.mrb[20].mxu0 %vm177_vm2, %v16982_v32  ;;  %13551 = vmatprep.mubr.msk.bf16.mxu1 %vm16768_vm0, %v19166_v0  ;;  %v15233_v32 = vld [vmem:[#allocation2 + $0x1b4] ss:$12 sps:$4 sm:$0xff]  }
 0x11b   :  { %1560 = vmatprep.mubr.bf16.mxu0 %v19172_v1 }
 0x121   :  { %13552 = vmatmul.mubr.msk.bf16.vlgmr.msra.gmra.mrb[12].mxu1 %vm177_vm2, %v17167_v30 }
 0x122   :  { %12333 = vmatmul.mubr.msk.bf16.vlgmr.msra.gmra.mrb[12].mxu0 %vm177_vm2, %v17167_v30  ;;  %13555 = vmatprep.mubr.msk.bf16.mxu1 %vm16768_vm0, %v19166_v0 }
 0x123   :  { %1714 = vmatpush1.bf16.msra.mxu0 %v15227_v22  ;;  %1570 = vmatprep.mubr.bf16.mxu0 %v19172_v1 }
 0x124   :  { %12345 = vmatprep.subr.msk.bf16.mxu0 %vm187_vm1, %v15228_v25  ;;  %13564 = vmatpush3.bf16.msra.mxu1 %v15231_v27 }
 0x125   :  { %13565 = vmatprep.subr.bf16.mxu1 %v19166_v0 }
 0x127   :  { %1716 = vmatpush1.bf16.msra.mxu0 %v17178_v33 }
 0x128   :  { %13566 = vmatpush3.bf16.msra.mxu1 %v17182_v34  ;;  %1898 = vmatprep.subr.bf16.mxu0 %v15233_v32  ;;  %v17465_v32 = vld [vmem:[#allocation2 + $0x180] ss:$12 sps:$4 sm:$0xff]  }
 0x129   :  { %13556 = vmatmul.mubr.msk.bf16.gmra.mrb[16].mxu1 %vm177_vm2, %v17189_v35  ;;  %13579 = vmatprep.subr.bf16.mxu1 %v19166_v0  ;;  %19301 = vst [vmem:[#allocation42_spill] sm:$0xff] %v17465_v32 }
 0x12a   :  { %12334 = vmatmul.mubr.msk.bf16.gmra.mrb[16].mxu0 %vm177_vm2, %v17189_v35  ;;  %13559 = vmatprep.mubr.msk.bf16.mxu1 %vm16768_vm0, %v19166_v0 }
 0x12b   :  { %1580 = vmatprep.mubr.bf16.mxu0 %v19172_v1 }
 0x131   :  { %13560 = vmatmul.mubr.msk.bf16.gmra.mrb[20].mxu1 %vm177_vm2, %v17202_v36 }
 0x132   :  { %12335 = vmatmul.mubr.msk.bf16.gmra.mrb[20].mxu0 %vm177_vm2, %v17202_v36  ;;  %13567 = vmatprep.mubr.msk.bf16.mxu1 %vm16768_vm0, %v19166_v0 }
 0x133   :  { %1745 = vmatprep.mubr.bf16.mxu0 %v19172_v1 }
 0x139   :  { %13568 = vmatmul.mubr.msk.bf16.vlgmr.msra.gmra.mrb[12].mxu1 %vm177_vm2, %v17220_v44 }
 0x13a   :  { %12346 = vmatmul.mubr.msk.bf16.vlgmr.msra.gmra.mrb[12].mxu0 %vm177_vm2, %v17220_v44  ;;  %13571 = vmatprep.mubr.msk.bf16.mxu1 %vm16768_vm0, %v19166_v0 }
 0x13b   :  { %1899 = vmatpush1.bf16.msra.mxu0 %v17211_v37  ;;  %1755 = vmatprep.mubr.bf16.mxu0 %v19172_v1 }
 0x13c   :  { %12358 = vmatprep.subr.msk.bf16.mxu0 %vm187_vm1, %v17213_v38  ;;  %13580 = vmatpush3.bf16.msra.mxu1 %v17215_v41 }
 0x13d   :  { %13581 = vmatprep.subr.bf16.mxu1 %v19166_v0 }
 0x13f   :  { %1901 = vmatpush1.bf16.msra.mxu0 %v17233_v45 }
 0x140   :  { %13582 = vmatpush3.bf16.msra.mxu1 %v17238_v46  ;;  %2036 = vmatprep.subr.bf16.mxu0 %v17242_v47 }
 0x141   :  { %13572 = vmatmul.mubr.msk.bf16.gmra.mrb[16].mxu1 %vm177_vm2, %v17248_v48  ;;  %13595 = vmatprep.subr.bf16.mxu1 %v19166_v0 }
 0x142   :  { %12347 = vmatmul.mubr.msk.bf16.gmra.mrb[16].mxu0 %vm177_vm2, %v17248_v48  ;;  %13575 = vmatprep.mubr.msk.bf16.mxu1 %vm16768_vm0, %v19166_v0 }
 0x143   :  { %1765 = vmatprep.mubr.bf16.mxu0 %v19172_v1 }
 0x149   :  { %13576 = vmatmul.mubr.msk.bf16.gmra.mrb[20].mxu1 %vm177_vm2, %v17261_v49 }
 0x14a   :  { %12348 = vmatmul.mubr.msk.bf16.gmra.mrb[20].mxu0 %vm177_vm2, %v17261_v49  ;;  %13583 = vmatprep.mubr.msk.bf16.mxu1 %vm16768_vm0, %v19166_v0 }
 0x14b   :  { %1930 = vmatprep.mubr.bf16.mxu0 %v19172_v1 }
 0x151   :  { %13584 = vmatmul.mubr.msk.bf16.vlgmr.msra.gmra.mrb[12].mxu1 %vm177_vm2, %v17273_v50 }
 0x152   :  { %12359 = vmatmul.mubr.msk.bf16.vlgmr.msra.gmra.mrb[12].mxu0 %vm177_vm2, %v17273_v50  ;;  %13587 = vmatprep.mubr.msk.bf16.mxu1 %vm16768_vm0, %v19166_v0 }
 0x153   :  { %2037 = vmatpush1.bf16.msra.mxu0 %v17281_v51  ;;  %1940 = vmatprep.mubr.bf16.mxu0 %v19172_v1 }
 0x154   :  { %12365 = vmatprep.subr.msk.bf16.mxu0 %vm187_vm1, %v17285_v54  ;;  %13596 = vmatpush3.bf16.msra.mxu1 %v17289_v55 }
 0x155   :  { %13597 = vmatprep.subr.bf16.mxu1 %v19166_v0 }
 0x157   :  { %2039 = vmatpush1.bf16.msra.mxu0 %v16898_v11 }
 0x158   :  { %13598 = vmatpush3.bf16.msra.mxu1 %v16889_v8  ;;  %2156 = vmatprep.subr.bf16.mxu0 %v17295_v56 }
 0x159   :  { %13588 = vmatmul.mubr.msk.bf16.gmra.mrb[16].mxu1 %vm177_vm2, %v17301_v57  ;;  %13611 = vmatprep.subr.bf16.mxu1 %v19166_v0 }
 0x15a   :  { %12360 = vmatmul.mubr.msk.bf16.gmra.mrb[16].mxu0 %vm177_vm2, %v17301_v57  ;;  %13591 = vmatprep.mubr.msk.bf16.mxu1 %vm16768_vm0, %v19166_v0 }
 0x15b   :  { %1950 = vmatprep.mubr.bf16.mxu0 %v19172_v1 }
 0x161   :  { %13592 = vmatmul.mubr.msk.bf16.gmra.mrb[20].mxu1 %vm177_vm2, %v17091_v3 }
 0x162   :  { %12361 = vmatmul.mubr.msk.bf16.gmra.mrb[20].mxu0 %vm177_vm2, %v17091_v3  ;;  %13599 = vmatprep.mubr.msk.bf16.mxu1 %vm16768_vm0, %v19166_v0  ;;  %v17367_v3 = vld [vmem:[#allocation2 + $0xc0] ss:$12 sps:$4 sm:$0xff]  }
 0x163   :  { %2068 = vmatprep.mubr.bf16.mxu0 %v19172_v1 }
 0x169   :  { %13600 = vmatmul.mubr.msk.bf16.vlgmr.msra.gmra.mrb[24].mxu1 %vm177_vm2, %v17167_v30 }
 0x16a   :  { %12366 = vmatmul.mubr.msk.bf16.vlgmr.msra.gmra.mrb[24].mxu0 %vm177_vm2, %v17167_v30  ;;  %13603 = vmatprep.mubr.msk.bf16.mxu1 %vm16768_vm0, %v19166_v0 }
 0x16b   :  { %2157 = vmatpush1.bf16.msra.mxu0 %v17324_v58  ;;  %2078 = vmatprep.mubr.bf16.mxu0 %v19172_v1 }
 0x16c   :  { %12372 = vmatprep.subr.msk.bf16.mxu0 %vm187_vm1, %v17328_v59  ;;  %13612 = vmatpush3.bf16.msra.mxu1 %v17332_v60 }
 0x16d   :  { %13613 = vmatprep.subr.bf16.mxu1 %v19166_v0 }
 0x16f   :  { %2159 = vmatpush1.bf16.msra.mxu0 %v16909_v15 }
 0x170   :  { %13614 = vmatpush3.bf16.msra.mxu1 %v16920_v20  ;;  %2276 = vmatprep.subr.bf16.mxu0 %v17338_v61 }
 0x171   :  { %13604 = vmatmul.mubr.msk.bf16.gmra.mrb[28].mxu1 %vm177_vm2, %v17189_v35  ;;  %13627 = vmatprep.subr.bf16.mxu1 %v19166_v0 }
 0x172   :  { %12367 = vmatmul.mubr.msk.bf16.gmra.mrb[28].mxu0 %vm177_vm2, %v17189_v35  ;;  %13607 = vmatprep.mubr.msk.bf16.mxu1 %vm16768_vm0, %v19166_v0 }
 0x173   :  { %2088 = vmatprep.mubr.bf16.mxu0 %v19172_v1 }
 0x179   :  { %13608 = vmatmul.mubr.msk.bf16.gmra.mrb[32].mxu1 %vm177_vm2, %v17202_v36 }
 0x17a   :  { %12368 = vmatmul.mubr.msk.bf16.gmra.mrb[32].mxu0 %vm177_vm2, %v17202_v36  ;;  %13615 = vmatprep.mubr.msk.bf16.mxu1 %vm16768_vm0, %v19166_v0 }
 0x17b   :  { %2188 = vmatprep.mubr.bf16.mxu0 %v19172_v1 }
 0x181   :  { %13616 = vmatmul.mubr.msk.bf16.vlgmr.msra.gmra.mrb[24].mxu1 %vm177_vm2, %v17359_v62 }
 0x182   :  { %12373 = vmatmul.mubr.msk.bf16.vlgmr.msra.gmra.mrb[24].mxu0 %vm177_vm2, %v17359_v62  ;;  %13619 = vmatprep.mubr.msk.bf16.mxu1 %vm16768_vm0, %v19166_v0 }
 0x183   :  { %2277 = vmatpush1.bf16.msra.mxu0 %v17367_v3  ;;  %2198 = vmatprep.mubr.bf16.mxu0 %v19172_v1 }
 0x184   :  { %12379 = vmatprep.subr.msk.bf16.mxu0 %vm187_vm1, %v17371_v4  ;;  %13628 = vmatpush3.bf16.msra.mxu1 %v17375_v5  ;;  %v17545_v5 = vld [vmem:[#allocation2 + $0x98] ss:$12 sps:$4 sm:$0xff]   ;;  %v17551_v4 = vld [vmem:[%s19158_s0 + $0x28] sm:$0xff]  }
 0x185   :  { %13629 = vmatprep.subr.bf16.mxu1 %v19166_v0  ;;  %19312 = vst [vmem:[#allocation51_spill] sm:$0xff] %v17545_v5 }
 0x187   :  { %2279 = vmatpush1.bf16.msra.mxu0 %v16958_v28  ;;  %v17541_v28 = vld [vmem:[#allocation2 + $0xac] ss:$12 sps:$4 sm:$0x3f]  }
 0x188   :  { %13630 = vmatpush3.bf16.msra.mxu1 %v16967_v31  ;;  %2414 = vmatprep.subr.bf16.mxu0 %v17381_v6  ;;  %v17517_v31 = vld [vmem:[%s19158_s0 + $0x14] sm:$0xff]  }
 0x189   :  { %13620 = vmatmul.mubr.msk.bf16.gmra.mrb[28].mxu1 %vm177_vm2, %v17387_v7  ;;  %13643 = vmatprep.subr.bf16.mxu1 %v19166_v0 }
 0x18a   :  { %12374 = vmatmul.mubr.msk.bf16.gmra.mrb[28].mxu0 %vm177_vm2, %v17387_v7  ;;  %13623 = vmatprep.mubr.msk.bf16.mxu1 %vm16768_vm0, %v19166_v0 }
 0x18b   :  { %2208 = vmatprep.mubr.bf16.mxu0 %v19172_v1 }
 0x191   :  { %13624 = vmatmul.mubr.msk.bf16.gmra.mrb[32].mxu1 %vm177_vm2, %v17400_v10 }
 0x192   :  { %12375 = vmatmul.mubr.msk.bf16.gmra.mrb[32].mxu0 %vm177_vm2, %v17400_v10  ;;  %13631 = vmatprep.mubr.msk.bf16.mxu1 %vm16768_vm0, %v19166_v0 }
 0x193   :  { %2308 = vmatprep.mubr.bf16.mxu0 %v19172_v1 }
 0x199   :  { %13632 = vmatmul.mubr.msk.bf16.vlgmr.msra.gmra.mrb[24].mxu1 %vm177_vm2, %v17220_v44 }
 0x19a   :  { %12380 = vmatmul.mubr.msk.bf16.vlgmr.msra.gmra.mrb[24].mxu0 %vm177_vm2, %v17220_v44  ;;  %13635 = vmatprep.mubr.msk.bf16.mxu1 %vm16768_vm0, %v19166_v0 }
 0x19b   :  { %2415 = vmatpush1.bf16.msra.mxu0 %v17415_v12  ;;  %2318 = vmatprep.mubr.bf16.mxu0 %v19172_v1 }
 0x19c   :  { %12386 = vmatprep.subr.msk.bf16.mxu0 %vm187_vm1, %v17419_v9  ;;  %13644 = vmatpush3.bf16.msra.mxu1 %v17423_v16 }
 0x19d   :  { %13645 = vmatprep.subr.bf16.mxu1 %v19166_v0 }
 0x19f   :  { %2417 = vmatpush1.bf16.msra.mxu0 %v16999_v39 }
 0x1a0   :  { %13646 = vmatpush3.bf16.msra.mxu1 %v17007_v42  ;;  %2583 = vmatprep.subr.bf16.mxu0 %v17429_v17  ;;  %v19304_v17 = vmov 0.0  }
 0x1a1   :  { %13636 = vmatmul.mubr.msk.bf16.gmra.mrb[28].mxu1 %vm177_vm2, %v17248_v48  ;;  %13659 = vmatprep.subr.bf16.mxu1 %v19166_v0 }
 0x1a2   :  { %12381 = vmatmul.mubr.msk.bf16.gmra.mrb[28].mxu0 %vm177_vm2, %v17248_v48  ;;  %13639 = vmatprep.mubr.msk.bf16.mxu1 %vm16768_vm0, %v19166_v0 }
 0x1a3   :  { %2328 = vmatprep.mubr.bf16.mxu0 %v19172_v1 }
 0x1a9   :  { %13640 = vmatmul.mubr.msk.bf16.gmra.mrb[32].mxu1 %vm177_vm2, %v17261_v49 }
 0x1aa   :  { %12382 = vmatmul.mubr.msk.bf16.gmra.mrb[32].mxu0 %vm177_vm2, %v17261_v49  ;;  %13647 = vmatprep.mubr.msk.bf16.mxu1 %vm16768_vm0, %v19166_v0 }
 0x1ab   :  { %2446 = vmatprep.mubr.bf16.mxu0 %v19172_v1 }
 0x1ac   :  { %v17447_v18 = vpop.f32.mrb[0].mxu1 }
 0x1ad   :  { %v17449_v19 = vpop.f32.mrb[0].mxu0  ;;  %v13505_v21 = vpop.f32.mrb[1].mxu1 }
 0x1ae   :  { %v17451_v22 = vpop.f32.mrb[1].mxu0  ;;  %v17453_v25 = vpop.f32.mrb[2].mxu1  ;;  %v17475_v21 = vld [vmem:[#allocation2 + $0x188] ss:$12 sps:$4 sm:$0xff]  }
 0x1af   :  { %v17455_v26 = vpop.f32.mrb[2].mxu0  ;;  %v13506_v27 = vpop.f32.mrb[3].mxu1  ;;  %19303 = vst [vmem:[#allocation44_spill] sm:$0xff] %v17475_v21 }
 0x1b0   :  { %v17457_v29 = vpop.f32.mrb[3].mxu0 }
 0x1b1   :  { %19300 = vst [vmem:[#allocation41_spill] sm:$0xff] %v17457_v29  ;;  %13648 = vmatmul.mubr.msk.bf16.vlgmr.msra.gmra.mrb[24].mxu1 %vm177_vm2, %v17273_v50 }
 0x1b2   :  { %12387 = vmatmul.mubr.msk.bf16.vlgmr.msra.gmra.mrb[24].mxu0 %vm177_vm2, %v17273_v50  ;;  %13651 = vmatprep.mubr.msk.bf16.mxu1 %vm16768_vm0, %v19166_v0 }
 0x1b3   :  { %2584 = vmatpush1.bf16.msra.mxu0 %v17465_v32  ;;  %2456 = vmatprep.mubr.bf16.mxu0 %v19172_v1 }
 0x1b4   :  { %v17469_v40 = vpop.f32.mrb[4].mxu1  ;;  %12402 = vmatprep.subr.msk.bf16.mxu0 %vm187_vm1, %v17471_v43  ;;  %13660 = vmatpush3.bf16.msra.mxu1 %v17475_v21  ;;  %v17491_v43 = vld [vmem:[#allocation2 + $0x94] ss:$12 sps:$4 sm:$0xff]  }
 0x1b5   :  { %v17478_v27 = vpop.f32.mrb[4].mxu0  ;;  %v13509_v0 = vpop.f32.mrb[5].mxu1  ;;  %13661 = vmatprep.subr.bf16.mxu1 %v19304_v17  ;;  %19307 = vst [vmem:[#allocation47_spill] sm:$0xff] %v17491_v43 }
 0x1b6   :  { %v17481_v42 = vpop.f32.mrb[5].mxu0  ;;  %v17483_v32 = vpop.f32.mrb[6].mxu1  ;;  %v19308_v0 = vmov 0  }
 0x1b7   :  { %v17485_v1 = vpop.f32.mrb[6].mxu0  ;;  %v13510_v39 = vpop.f32.mrb[7].mxu1  ;;  %2586 = vmatpush1.bf16.msra.mxu0 %v17039_v52 }
 0x1b8   :  { %19305 = vst [vmem:[#allocation45_spill] sm:$0xff] %v17485_v1  ;;  %v17488_v16 = vpop.f32.mrb[7].mxu0  ;;  %13662 = vmatpush3.bf16.msra.mxu1 %v17043_v53  ;;  %2721 = vmatprep.subr.bf16.mxu0 %v17491_v43 }
 0x1b9   :  { %19306 = vst [vmem:[#allocation46_spill] sm:$0xff] %v17488_v16  ;;  %13652 = vmatmul.mubr.msk.bf16.gmra.mrb[28].mxu1 %vm177_vm2, %v17301_v57  ;;  %13675 = vmatprep.subr.bf16.mxu1 %v19304_v17  ;;  %v19345_v16 = vld [vmem:[#allocation43_spill] sm:$0xff] }
 0x1ba   :  { %12388 = vmatmul.mubr.msk.bf16.gmra.mrb[28].mxu0 %vm177_vm2, %v17301_v57  ;;  %13655 = vmatprep.mubr.msk.bf16.mxu1 %vm16768_vm0, %v19304_v17 }
 0x1bb   :  { %2466 = vmatprep.mubr.bf16.mxu0 %v19308_v0 }
 0x1bc   :  { %v17502_v39 = vpop.f32.mrb[8].mxu1 }
 0x1bd   :  { %v17504_v53 = vpop.f32.mrb[8].mxu0  ;;  %v13513_v52 = vpop.f32.mrb[9].mxu1 }
 0x1be   :  { %v17506_v21 = vpop.f32.mrb[9].mxu0  ;;  %v17508_v43 = vpop.f32.mrb[10].mxu1  ;;  %v17529_v52 = vld [vmem:[%s19158_s0 + $0x20] sm:$0xff]  }
 0x1bf   :  { %v17510_v9 = vpop.f32.mrb[10].mxu0  ;;  %v13514_v12 = vpop.f32.mrb[11].mxu1 }
 0x1c0   :  { %19309 = vst [vmem:[#allocation48_spill] sm:$0xff] %v17510_v9  ;;  %v17512_v6 = vpop.f32.mrb[11].mxu0  ;;  %v17537_v12 = vld [vmem:[#allocation2 + $0x90] ss:$12 sps:$4 sm:$0xff]   ;;  %v19356_v9 = vld [vmem:[#allocation27_spill] sm:$0xff] }
 0x1c1   :  { %19310 = vst [vmem:[#allocation49_spill] sm:$0xff] %v17512_v6  ;;  %13656 = vmatmul.mubr.msk.bf16.gmra.mrb[32].mxu1 %vm177_vm2, %v17517_v31  ;;  %19311 = vst [vmem:[#allocation50_spill] sm:$0xff] %v17537_v12 }
 0x1c2   :  { %12389 = vmatmul.mubr.msk.bf16.gmra.mrb[32].mxu0 %vm177_vm2, %v17517_v31  ;;  %13663 = vmatprep.mubr.msk.bf16.mxu1 %vm16768_vm0, %v19304_v17 }
 0x1c3   :  { %2615 = vmatprep.mubr.bf16.mxu0 %v19308_v0 }
 0x1c9   :  { %13664 = vmatmul.mubr.msk.bf16.vlgmr.msra.gmra.mrb[24].mxu1 %vm177_vm2, %v17529_v52 }
 0x1ca   :  { %12403 = vmatmul.mubr.msk.bf16.vlgmr.msra.gmra.mrb[24].mxu0 %vm177_vm2, %v17529_v52  ;;  %13667 = vmatprep.mubr.msk.bf16.mxu1 %vm16768_vm0, %v19304_v17 }
 0x1cb   :  { %2722 = vmatpush1.bf16.msra.mxu0 %v17537_v12  ;;  %2625 = vmatprep.mubr.bf16.mxu0 %v19308_v0  ;;  %v17556_v12 = vld [vmem:[#allocation2 + $0x34] ss:$12 sps:$4 sm:$0xff]  }
 0x1cc   :  { %12409 = vmatprep.subr.msk.bf16.mxu0 %vm187_vm1, %v17541_v28  ;;  %13676 = vmatpush3.bf16.msra.mxu1 %v17545_v5  ;;  %19313 = vst [vmem:[#allocation52_spill] sm:$0xff] %v17556_v12  ;;  %v17593_v5 = vld [vmem:[#allocation2 + $0x38] ss:$12 sps:$4 sm:$0xff]  }
 0x1cd   :  { %13677 = vmatprep.subr.bf16.mxu1 %v19304_v17 }
 0x1cf   :  { %2724 = vmatpush1.bf16.msra.mxu0 %v17074_v63  ;;  %v17589_v63 = vld [vmem:[#allocation2 + $0x4c] ss:$12 sps:$4 sm:$0x3f]  }
 0x1d0   :  { %13678 = vmatpush3.bf16.msra.mxu1 %v17078_v2  ;;  %2841 = vmatprep.subr.bf16.mxu0 %v17556_v12  ;;  %v17570_v2 = vld [vmem:[%s19158_s0 + $0x30] sm:$0xff]  }
 0x1d1   :  { %13668 = vmatmul.mubr.msk.bf16.gmra.mrb[28].mxu1 %vm177_vm2, %v17551_v4  ;;  %13691 = vmatprep.subr.bf16.mxu1 %v19304_v17  ;;  %19314 = vst [vmem:[#allocation53_spill] sm:$0xff] %v17570_v2  ;;  %v17585_v12 = vld [vmem:[#allocation2 + $0x30] ss:$12 sps:$4 sm:$0xff]  }
 0x1d2   :  { %12404 = vmatmul.mubr.msk.bf16.gmra.mrb[28].mxu0 %vm177_vm2, %v17551_v4  ;;  %13671 = vmatprep.mubr.msk.bf16.mxu1 %vm16768_vm0, %v19304_v17 }
 0x1d3   :  { %2635 = vmatprep.mubr.bf16.mxu0 %v19308_v0 }
 0x1d9   :  { %13672 = vmatmul.mubr.msk.bf16.gmra.mrb[32].mxu1 %vm177_vm2, %v17570_v2 }
 0x1da   :  { %12405 = vmatmul.mubr.msk.bf16.gmra.mrb[32].mxu0 %vm177_vm2, %v17570_v2  ;;  %13679 = vmatprep.mubr.msk.bf16.mxu1 %vm16768_vm0, %v19304_v17 }
 0x1db   :  { %2753 = vmatprep.mubr.bf16.mxu0 %v19308_v0 }
 0x1e1   :  { %13680 = vmatmul.mubr.msk.bf16.vlgmr.msra.gmra.mrb[36].mxu1 %vm177_vm2, %v17167_v30 }
 0x1e2   :  { %12410 = vmatmul.mubr.msk.bf16.vlgmr.msra.gmra.mrb[36].mxu0 %vm177_vm2, %v17167_v30  ;;  %13683 = vmatprep.mubr.msk.bf16.mxu1 %vm16768_vm0, %v19304_v17  ;;  %v17599_v30 = vld [vmem:[#allocation2 + $0xf4] ss:$12 sps:$4 sm:$0xff]  }
 0x1e3   :  { %2842 = vmatpush1.bf16.msra.mxu0 %v17585_v12  ;;  %2763 = vmatprep.mubr.bf16.mxu0 %v19308_v0  ;;  %19315 = vst [vmem:[#allocation54_spill] sm:$0xff] %v17599_v30 }
 0x1e4   :  { %12416 = vmatprep.subr.msk.bf16.mxu0 %vm187_vm1, %v17589_v63  ;;  %13692 = vmatpush3.bf16.msra.mxu1 %v17593_v5 }
 0x1e5   :  { %13693 = vmatprep.subr.bf16.mxu1 %v19304_v17 }
 0x1e7   :  { %2844 = vmatpush1.bf16.msra.mxu0 %v17109_v13 }
 0x1e8   :  { %13694 = vmatpush3.bf16.msra.mxu1 %v17113_v14  ;;  %2961 = vmatprep.subr.bf16.mxu0 %v17599_v30  ;;  %v17631_v30 = vld [vmem:[#allocation2 + $0xf8] ss:$12 sps:$4 sm:$0xff]  }
 0x1e9   :  { %13684 = vmatmul.mubr.msk.bf16.gmra.mrb[40].mxu1 %vm177_vm2, %v17189_v35  ;;  %13707 = vmatprep.subr.bf16.mxu1 %v19304_v17  ;;  %19318 = vst [vmem:[#allocation57_spill] sm:$0xff] %v17631_v30 }
 0x1ea   :  { %12411 = vmatmul.mubr.msk.bf16.gmra.mrb[40].mxu0 %vm177_vm2, %v17189_v35  ;;  %13687 = vmatprep.mubr.msk.bf16.mxu1 %vm16768_vm0, %v19304_v17  ;;  %v17623_v35 = vld [vmem:[#allocation2 + $0xf0] ss:$12 sps:$4 sm:$0xff]  }
 0x1eb   :  { %2773 = vmatprep.mubr.bf16.mxu0 %v19308_v0  ;;  %19316 = vst [vmem:[#allocation55_spill] sm:$0xff] %v17623_v35 }
 0x1f1   :  { %13688 = vmatmul.mubr.msk.bf16.gmra.mrb[44].mxu1 %vm177_vm2, %v17202_v36 }
 0x1f2   :  { %12412 = vmatmul.mubr.msk.bf16.gmra.mrb[44].mxu0 %vm177_vm2, %v17202_v36  ;;  %13695 = vmatprep.mubr.msk.bf16.mxu1 %vm16768_vm0, %v19304_v17  ;;  %v17627_v36 = vld [vmem:[#allocation2 + $0x10c] ss:$12 sps:$4 sm:$0x3f]  }
 0x1f3   :  { %2873 = vmatprep.mubr.bf16.mxu0 %v19308_v0  ;;  %19317 = vst [vmem:[#allocation56_spill] sm:$0xff] %v17627_v36 }
 0x1f9   :  { %13696 = vmatmul.mubr.msk.bf16.vlgmr.msra.gmra.mrb[36].mxu1 %vm177_vm2, %v17359_v62 }
 0x1fa   :  { %12417 = vmatmul.mubr.msk.bf16.vlgmr.msra.gmra.mrb[36].mxu0 %vm177_vm2, %v17359_v62  ;;  %13699 = vmatprep.mubr.msk.bf16.mxu1 %vm16768_vm0, %v19304_v17  ;;  %v17637_v62 = vld [vmem:[#allocation2 + $0x154] ss:$12 sps:$4 sm:$0xff]  }
 0x1fb   :  { %2962 = vmatpush1.bf16.msra.mxu0 %v17623_v35  ;;  %2883 = vmatprep.mubr.bf16.mxu0 %v19308_v0  ;;  %19319 = vst [vmem:[#allocation58_spill] sm:$0xff] %v17637_v62 }
 0x1fc   :  { %12423 = vmatprep.subr.msk.bf16.mxu0 %vm187_vm1, %v17627_v36  ;;  %13708 = vmatpush3.bf16.msra.mxu1 %v17631_v30 }
 0x1fd   :  { %13709 = vmatprep.subr.bf16.mxu1 %v19304_v17 }
 0x1ff   :  { %2964 = vmatpush1.bf16.msra.mxu0 %v17141_v23 }
 0x200   :  { %13710 = vmatpush3.bf16.msra.mxu1 %v17145_v24  ;;  %3099 = vmatprep.subr.bf16.mxu0 %v17637_v62  ;;  %v17669_v62 = vld [vmem:[#allocation2 + $0x158] ss:$12 sps:$4 sm:$0xff]  }
 0x201   :  { %13700 = vmatmul.mubr.msk.bf16.gmra.mrb[40].mxu1 %vm177_vm2, %v17387_v7  ;;  %13723 = vmatprep.subr.bf16.mxu1 %v19304_v17  ;;  %19322 = vst [vmem:[#allocation61_spill] sm:$0xff] %v17669_v62 }
 0x202   :  { %12418 = vmatmul.mubr.msk.bf16.gmra.mrb[40].mxu0 %vm177_vm2, %v17387_v7  ;;  %13703 = vmatprep.mubr.msk.bf16.mxu1 %vm16768_vm0, %v19304_v17  ;;  %v17661_v7 = vld [vmem:[#allocation2 + $0x150] ss:$12 sps:$4 sm:$0xff]  }
 0x203   :  { %2893 = vmatprep.mubr.bf16.mxu0 %v19308_v0  ;;  %19320 = vst [vmem:[#allocation59_spill] sm:$0xff] %v17661_v7 }
 0x209   :  { %13704 = vmatmul.mubr.msk.bf16.gmra.mrb[44].mxu1 %vm177_vm2, %v17400_v10 }
 0x20a   :  { %12419 = vmatmul.mubr.msk.bf16.gmra.mrb[44].mxu0 %vm177_vm2, %v17400_v10  ;;  %13711 = vmatprep.mubr.msk.bf16.mxu1 %vm16768_vm0, %v19304_v17  ;;  %v17665_v10 = vld [vmem:[#allocation2 + $0x16c] ss:$12 sps:$4 sm:$0x3f]  }
 0x20b   :  { %2993 = vmatprep.mubr.bf16.mxu0 %v19308_v0  ;;  %19321 = vst [vmem:[#allocation60_spill] sm:$0xff] %v17665_v10 }
 0x211   :  { %13712 = vmatmul.mubr.msk.bf16.vlgmr.msra.gmra.mrb[36].mxu1 %vm177_vm2, %v17220_v44 }
 0x212   :  { %12424 = vmatmul.mubr.msk.bf16.vlgmr.msra.gmra.mrb[36].mxu0 %vm177_vm2, %v17220_v44  ;;  %13715 = vmatprep.mubr.msk.bf16.mxu1 %vm16768_vm0, %v19304_v17  ;;  %v17675_v44 = vld [vmem:[#allocation2 + $0x1b4] ss:$12 sps:$4 sm:$0xff]  }
 0x213   :  { %3100 = vmatpush1.bf16.msra.mxu0 %v17661_v7  ;;  %3003 = vmatprep.mubr.bf16.mxu0 %v19308_v0  ;;  %19323 = vst [vmem:[#allocation62_spill] sm:$0xff] %v17675_v44 }
 0x214   :  { %12430 = vmatprep.subr.msk.bf16.mxu0 %vm187_vm1, %v17665_v10  ;;  %13724 = vmatpush3.bf16.msra.mxu1 %v17669_v62 }
 0x215   :  { %13725 = vmatprep.subr.bf16.mxu1 %v19304_v17 }
 0x217   :  { %3102 = vmatpush1.bf16.msra.mxu0 %v17178_v33 }
 0x218   :  { %13726 = vmatpush3.bf16.msra.mxu1 %v17182_v34  ;;  %3237 = vmatprep.subr.bf16.mxu0 %v17675_v44 }
 0x219   :  { %13716 = vmatmul.mubr.msk.bf16.gmra.mrb[40].mxu1 %vm177_vm2, %v17248_v48  ;;  %13739 = vmatprep.subr.bf16.mxu1 %v19304_v17 }
 0x21a   :  { %12425 = vmatmul.mubr.msk.bf16.gmra.mrb[40].mxu0 %vm177_vm2, %v17248_v48  ;;  %13719 = vmatprep.mubr.msk.bf16.mxu1 %vm16768_vm0, %v19304_v17 }
 0x21b   :  { %3013 = vmatprep.mubr.bf16.mxu0 %v19308_v0 }
 0x221   :  { %13720 = vmatmul.mubr.msk.bf16.gmra.mrb[44].mxu1 %vm177_vm2, %v17261_v49 }
 0x222   :  { %12426 = vmatmul.mubr.msk.bf16.gmra.mrb[44].mxu0 %vm177_vm2, %v17261_v49  ;;  %13727 = vmatprep.mubr.msk.bf16.mxu1 %vm16768_vm0, %v19304_v17 }
 0x223   :  { %3131 = vmatprep.mubr.bf16.mxu0 %v19308_v0 }
 0x224   :  { %v17693_v44 = vpop.f32.mrb[12].mxu1 }
 0x225   :  { %v17697_v33 = vpop.f32.mrb[12].mxu0  ;;  %v13585_v62 = vpop.f32.mrb[13].mxu1 }
 0x226   :  { %v17701_v7 = vpop.f32.mrb[13].mxu0  ;;  %v17703_v24 = vpop.f32.mrb[14].mxu1 }
 0x227   :  { %v17709_v36 = vpop.f32.mrb[14].mxu0  ;;  %v13586_v35 = vpop.f32.mrb[15].mxu1 }
 0x228   :  { %v17713_v62 = vpop.f32.mrb[15].mxu0 }
 0x229   :  { %19324 = vst [vmem:[#allocation63_spill] sm:$0xff] %v17713_v62  ;;  %13728 = vmatmul.mubr.msk.bf16.vlgmr.msra.gmra.mrb[36].mxu1 %vm177_vm2, %v17273_v50 }
 0x22a   :  { %12431 = vmatmul.mubr.msk.bf16.vlgmr.msra.gmra.mrb[36].mxu0 %vm177_vm2, %v17273_v50  ;;  %13731 = vmatprep.mubr.msk.bf16.mxu1 %vm16768_vm0, %v19304_v17 }
 0x22b   :  { %3238 = vmatpush1.bf16.msra.mxu0 %v17211_v37  ;;  %3141 = vmatprep.mubr.bf16.mxu0 %v19308_v0 }
 0x22c   :  { %v17725_v35 = vpop.f32.mrb[16].mxu1  ;;  %12437 = vmatprep.subr.msk.bf16.mxu0 %vm187_vm1, %v17213_v38  ;;  %13740 = vmatpush3.bf16.msra.mxu1 %v17215_v41 }
 0x22d   :  { %19325 = vst [vmem:[#allocation64_spill] sm:$0xff] %v17725_v35  ;;  %v17732_v34 = vpop.f32.mrb[16].mxu0  ;;  %v13589_v30 = vpop.f32.mrb[17].mxu1  ;;  %13741 = vmatprep.subr.bf16.mxu1 %v19304_v17 }
 0x22e   :  { %v17737_v23 = vpop.f32.mrb[17].mxu0  ;;  %v17739_v62 = vpop.f32.mrb[18].mxu1 }
 0x22f   :  { %19326 = vst [vmem:[#allocation65_spill] sm:$0xff] %v17739_v62  ;;  %v17745_v29 = vpop.f32.mrb[18].mxu0  ;;  %v13590_v10 = vpop.f32.mrb[19].mxu1  ;;  %3240 = vmatpush1.bf16.msra.mxu0 %v17233_v45 }
 0x230   :  { %19327 = vst [vmem:[#allocation66_spill] sm:$0xff] %v17745_v29  ;;  %v17750_v35 = vpop.f32.mrb[19].mxu0  ;;  %13742 = vmatpush3.bf16.msra.mxu1 %v17238_v46  ;;  %3491 = vmatprep.subr.bf16.mxu0 %v17242_v47  ;;  %v19344_v29 = vld [vmem:[#allocation42_spill] sm:$0xff] }
 0x231   :  { %19328 = vst [vmem:[#allocation67_spill] sm:$0xff] %v17750_v35  ;;  %13732 = vmatmul.mubr.msk.bf16.gmra.mrb[40].mxu1 %vm177_vm2, %v17301_v57  ;;  %13755 = vmatprep.subr.bf16.mxu1 %v19304_v17 }
 0x232   :  { %12432 = vmatmul.mubr.msk.bf16.gmra.mrb[40].mxu0 %vm177_vm2, %v17301_v57  ;;  %13735 = vmatprep.mubr.msk.bf16.mxu1 %vm16768_vm0, %v19304_v17 }
 0x233   :  { %3151 = vmatprep.mubr.bf16.mxu0 %v19308_v0 }
 0x234   :  { %v17764_v10 = vpop.f32.mrb[20].mxu1 }
 0x235   :  { %v17768_v30 = vpop.f32.mrb[20].mxu0  ;;  %v13593_v38 = vpop.f32.mrb[21].mxu1 }
 0x236   :  { %v17772_v37 = vpop.f32.mrb[21].mxu0  ;;  %v17774_v35 = vpop.f32.mrb[22].mxu1 }
 0x237   :  { %19329 = vst [vmem:[#allocation68_spill] sm:$0xff] %v17774_v35  ;;  %v17780_v1 = vpop.f32.mrb[22].mxu0  ;;  %v13594_v62 = vpop.f32.mrb[23].mxu1 }
 0x238   :  { %19330 = vst [vmem:[#allocation69_spill] sm:$0xff] %v17780_v1  ;;  %v17784_v38 = vpop.f32.mrb[23].mxu0  ;;  %v19340_v62 = vld [vmem:[#allocation39_spill] sm:$0xff] }
 0x239   :  { %19331 = vst [vmem:[#allocation70_spill] sm:$0xff] %v17784_v38  ;;  %13736 = vmatmul.mubr.msk.bf16.gmra.mrb[44].mxu1 %vm177_vm2, %v17517_v31  ;;  %v18020_v1 = vld [vmem:[%s19158_s0 + $0x44] sm:$0xff]  }
 0x23a   :  { %12433 = vmatmul.mubr.msk.bf16.gmra.mrb[44].mxu0 %vm177_vm2, %v17517_v31  ;;  %13743 = vmatprep.mubr.msk.bf16.mxu1 %vm16768_vm0, %v19304_v17 }
 0x23b   :  { %3269 = vmatprep.mubr.bf16.mxu0 %v19308_v0 }
 0x241   :  { %13744 = vmatmul.mubr.msk.bf16.vlgmr.msra.gmra.mrb[36].mxu1 %vm177_vm2, %v17529_v52 }
 0x242   :  { %12438 = vmatmul.mubr.msk.bf16.vlgmr.msra.gmra.mrb[36].mxu0 %vm177_vm2, %v17529_v52  ;;  %13747 = vmatprep.mubr.msk.bf16.mxu1 %vm16768_vm0, %v19304_v17 }
 0x243   :  { %3492 = vmatpush1.bf16.msra.mxu0 %v17281_v51  ;;  %3279 = vmatprep.mubr.bf16.mxu0 %v19308_v0  ;;  %v17828_v51 = vld [vmem:[%s19158_s0 + $0x54] sm:$0xff]  }
 0x244   :  { %12444 = vmatprep.subr.msk.bf16.mxu0 %vm187_vm1, %v17285_v54  ;;  %13756 = vmatpush3.bf16.msra.mxu1 %v17289_v55  ;;  %19332 = vst [vmem:[#allocation71_spill] sm:$0xff] %v17828_v51  ;;  %v19334_v54 = vld [vmem:[#allocation35_spill] sm:$0xff]  ;;  %v19335_v55 = vld [vmem:[#allocation20_spill] sm:$0xff] }
 0x245   :  { %13757 = vmatprep.subr.bf16.mxu1 %v19304_v17 }
 0x247   :  { %3494 = vmatpush1.bf16.msra.mxu0 %v16898_v11  ;;  %v19348_v11 = vld [vmem:[#allocation25_spill] sm:$0xff] }
 0x248   :  { %13758 = vmatpush3.bf16.msra.mxu1 %v16889_v8  ;;  %3611 = vmatprep.subr.bf16.mxu0 %v17295_v56  ;;  %v19336_v56 = vld [vmem:[#allocation21_spill] sm:$0xff] }
 0x249   :  { %13748 = vmatmul.mubr.msk.bf16.gmra.mrb[40].mxu1 %vm177_vm2, %v17551_v4  ;;  %13771 = vmatprep.subr.bf16.mxu1 %v19304_v17 }
 0x24a   :  { %12439 = vmatmul.mubr.msk.bf16.gmra.mrb[40].mxu0 %vm177_vm2, %v17551_v4  ;;  %13751 = vmatprep.mubr.msk.bf16.mxu1 %vm16768_vm0, %v19304_v17 }
 0x24b   :  { %3289 = vmatprep.mubr.bf16.mxu0 %v19308_v0 }
 0x251   :  { %13752 = vmatmul.mubr.msk.bf16.gmra.mrb[44].mxu1 %vm177_vm2, %v17570_v2 }
 0x252   :  { %12440 = vmatmul.mubr.msk.bf16.gmra.mrb[44].mxu0 %vm177_vm2, %v17570_v2  ;;  %13759 = vmatprep.mubr.msk.bf16.mxu1 %vm16768_vm0, %v19304_v17 }
 0x253   :  { %3523 = vmatprep.mubr.bf16.mxu0 %v19308_v0 }
 0x259   :  { %13760 = vmatmul.mubr.msk.bf16.vlgmr.msra.gmra.mrb[48].mxu1 %vm177_vm2, %v17828_v51 }
 0x25a   :  { %12445 = vmatmul.mubr.msk.bf16.vlgmr.msra.gmra.mrb[48].mxu0 %vm177_vm2, %v17828_v51  ;;  %13763 = vmatprep.mubr.msk.bf16.mxu1 %vm16768_vm0, %v19304_v17 }
 0x25b   :  { %3612 = vmatpush1.bf16.msra.mxu0 %v17324_v58  ;;  %3533 = vmatprep.mubr.bf16.mxu0 %v19308_v0  ;;  %v19337_v58 = vld [vmem:[#allocation36_spill] sm:$0xff] }
 0x25c   :  { %12451 = vmatprep.subr.msk.bf16.mxu0 %vm187_vm1, %v17328_v59  ;;  %13772 = vmatpush3.bf16.msra.mxu1 %v17332_v60  ;;  %v17883_v59 = vld [vmem:[%s19158_s0 + $0x40] sm:$0xff]   ;;  %v17896_v60 = vld [vmem:[%s19158_s0 + $0x48] sm:$0xff]   ;;  %19354 = vst [vmem:[#allocation36_spill] sm:$0xff] %v18020_v1 }
 0x25d   :  { %13773 = vmatprep.subr.bf16.mxu1 %v19304_v17 }
 0x25f   :  { %3614 = vmatpush1.bf16.msra.mxu0 %v16909_v15  ;;  %v19347_v15 = vld [vmem:[#allocation24_spill] sm:$0xff] }
 0x260   :  { %13774 = vmatpush3.bf16.msra.mxu1 %v16920_v20  ;;  %3731 = vmatprep.subr.bf16.mxu0 %v17338_v61  ;;  %v19338_v61 = vld [vmem:[#allocation37_spill] sm:$0xff] }
 0x261   :  { %13764 = vmatmul.mubr.msk.bf16.gmra.mrb[52].mxu1 %vm177_vm2, %v17248_v48  ;;  %13787 = vmatprep.subr.bf16.mxu1 %v19304_v17 }
 0x262   :  { %12446 = vmatmul.mubr.msk.bf16.gmra.mrb[52].mxu0 %vm177_vm2, %v17248_v48  ;;  %13767 = vmatprep.mubr.msk.bf16.mxu1 %vm16768_vm0, %v19304_v17  ;;  %v17863_v48 = vld [vmem:[%s19158_s0 + $0x38] sm:$0xff]  }
 0x263   :  { %3543 = vmatprep.mubr.bf16.mxu0 %v19308_v0 }
 0x269   :  { %13768 = vmatmul.mubr.msk.bf16.gmra.mrb[56].mxu1 %vm177_vm2, %v17261_v49 }
 0x26a   :  { %12447 = vmatmul.mubr.msk.bf16.gmra.mrb[56].mxu0 %vm177_vm2, %v17261_v49  ;;  %13775 = vmatprep.mubr.msk.bf16.mxu1 %vm16768_vm0, %v19304_v17  ;;  %v19333_v49 = vld [vmem:[#allocation34_spill] sm:$0xff] }
 0x26b   :  { %3643 = vmatprep.mubr.bf16.mxu0 %v19308_v0 }
 0x271   :  { %13776 = vmatmul.mubr.msk.bf16.vlgmr.msra.gmra.mrb[48].mxu1 %vm177_vm2, %v17863_v48 }
 0x272   :  { %12452 = vmatmul.mubr.msk.bf16.vlgmr.msra.gmra.mrb[48].mxu0 %vm177_vm2, %v17863_v48  ;;  %13779 = vmatprep.mubr.msk.bf16.mxu1 %vm16768_vm0, %v19304_v17 }
 0x273   :  { %3732 = vmatpush1.bf16.msra.mxu0 %v17367_v3  ;;  %3653 = vmatprep.mubr.bf16.mxu0 %v19308_v0  ;;  %v19339_v3 = vld [vmem:[#allocation38_spill] sm:$0xff] }
 0x274   :  { %12458 = vmatprep.subr.msk.bf16.mxu0 %vm187_vm1, %v19333_v49  ;;  %13788 = vmatpush3.bf16.msra.mxu1 %v19334_v54  ;;  %v19341_v49 = vld [vmem:[#allocation22_spill] sm:$0xff]  ;;  %v19342_v54 = vld [vmem:[#allocation23_spill] sm:$0xff] }
 0x275   :  { %13789 = vmatprep.subr.bf16.mxu1 %v19304_v17 }
 0x277   :  { %3734 = vmatpush1.bf16.msra.mxu0 %v19335_v55 }
 0x278   :  { %13790 = vmatpush3.bf16.msra.mxu1 %v19336_v56  ;;  %3869 = vmatprep.subr.bf16.mxu0 %v19337_v58  ;;  %v19343_v58 = vld [vmem:[#allocation40_spill] sm:$0xff] }
 0x279   :  { %13780 = vmatmul.mubr.msk.bf16.gmra.mrb[52].mxu1 %vm177_vm2, %v17883_v59  ;;  %13803 = vmatprep.subr.bf16.mxu1 %v19304_v17 }
 0x27a   :  { %12453 = vmatmul.mubr.msk.bf16.gmra.mrb[52].mxu0 %vm177_vm2, %v17883_v59  ;;  %13783 = vmatprep.mubr.msk.bf16.mxu1 %vm16768_vm0, %v19304_v17 }
 0x27b   :  { %3663 = vmatprep.mubr.bf16.mxu0 %v19308_v0 }
 0x281   :  { %13784 = vmatmul.mubr.msk.bf16.gmra.mrb[56].mxu1 %vm177_vm2, %v17896_v60 }
 0x282   :  { %12454 = vmatmul.mubr.msk.bf16.gmra.mrb[56].mxu0 %vm177_vm2, %v17896_v60  ;;  %13791 = vmatprep.mubr.msk.bf16.mxu1 %vm16768_vm0, %v19304_v17 }
 0x283   :  { %3763 = vmatprep.mubr.bf16.mxu0 %v19308_v0 }
 0x289   :  { %13792 = vmatmul.mubr.msk.bf16.vlgmr.msra.gmra.mrb[48].mxu1 %vm177_vm2, %v17273_v50 }
 0x28a   :  { %12459 = vmatmul.mubr.msk.bf16.vlgmr.msra.gmra.mrb[48].mxu0 %vm177_vm2, %v17273_v50  ;;  %13795 = vmatprep.mubr.msk.bf16.mxu1 %vm16768_vm0, %v19304_v17 }
 0x28b   :  { %3870 = vmatpush1.bf16.msra.mxu0 %v19338_v61  ;;  %3773 = vmatprep.mubr.bf16.mxu0 %v19308_v0 }
 0x28c   :  { %12465 = vmatprep.subr.msk.bf16.mxu0 %vm187_vm1, %v19339_v3  ;;  %13804 = vmatpush3.bf16.msra.mxu1 %v19340_v62 }
 0x28d   :  { %13805 = vmatprep.subr.bf16.mxu1 %v19304_v17 }
 0x28f   :  { %3872 = vmatpush1.bf16.msra.mxu0 %v19341_v49 }
 0x290   :  { %13806 = vmatpush3.bf16.msra.mxu1 %v19342_v54  ;;  %4038 = vmatprep.subr.bf16.mxu0 %v19343_v58 }
 0x291   :  { %13796 = vmatmul.mubr.msk.bf16.gmra.mrb[52].mxu1 %vm177_vm2, %v17301_v57  ;;  %13819 = vmatprep.subr.bf16.mxu1 %v19304_v17 }
 0x292   :  { %12460 = vmatmul.mubr.msk.bf16.gmra.mrb[52].mxu0 %vm177_vm2, %v17301_v57  ;;  %13799 = vmatprep.mubr.msk.bf16.mxu1 %vm16768_vm0, %v19304_v17 }
 0x293   :  { %3783 = vmatprep.mubr.bf16.mxu0 %v19308_v0 }
 0x299   :  { %13800 = vmatmul.mubr.msk.bf16.gmra.mrb[56].mxu1 %vm177_vm2, %v17517_v31 }
 0x29a   :  { %12461 = vmatmul.mubr.msk.bf16.gmra.mrb[56].mxu0 %vm177_vm2, %v17517_v31  ;;  %13807 = vmatprep.mubr.msk.bf16.mxu1 %vm16768_vm0, %v19304_v17 }
 0x29b   :  { %3901 = vmatprep.mubr.bf16.mxu0 %v19308_v0 }
 0x29c   :  { %v17935_v50 = vpop.f32.mrb[24].mxu1 }
 0x29d   :  { %v17937_v61 = vpop.f32.mrb[24].mxu0  ;;  %v13665_v57 = vpop.f32.mrb[25].mxu1 }
 0x29e   :  { %v17939_v3 = vpop.f32.mrb[25].mxu0  ;;  %v17941_v62 = vpop.f32.mrb[26].mxu1 }
 0x29f   :  { %v17943_v58 = vpop.f32.mrb[26].mxu0  ;;  %v13666_v41 = vpop.f32.mrb[27].mxu1 }
 0x2a0   :  { %v17945_v47 = vpop.f32.mrb[27].mxu0  ;;  %v19346_v41 = vld [vmem:[#allocation44_spill] sm:$0xff] }
 0x2a1   :  { %13808 = vmatmul.mubr.msk.bf16.vlgmr.msra.gmra.mrb[48].mxu1 %vm177_vm2, %v17529_v52 }
 0x2a2   :  { %12466 = vmatmul.mubr.msk.bf16.vlgmr.msra.gmra.mrb[48].mxu0 %vm177_vm2, %v17529_v52  ;;  %13811 = vmatprep.mubr.msk.bf16.mxu1 %vm16768_vm0, %v19304_v17 }
 0x2a3   :  { %4039 = vmatpush1.bf16.msra.mxu0 %v19344_v29  ;;  %3911 = vmatprep.mubr.bf16.mxu0 %v19308_v0 }
 0x2a4   :  { %v17955_v57 = vpop.f32.mrb[28].mxu1  ;;  %12481 = vmatprep.subr.msk.bf16.mxu0 %vm187_vm1, %v19345_v16  ;;  %13820 = vmatpush3.bf16.msra.mxu1 %v19346_v41  ;;  %v19349_v16 = vld [vmem:[#allocation47_spill] sm:$0xff] }
 0x2a5   :  { %v17960_v54 = vpop.f32.mrb[28].mxu0  ;;  %v13669_v49 = vpop.f32.mrb[29].mxu1  ;;  %13821 = vmatprep.subr.bf16.mxu1 %v19304_v17 }
 0x2a6   :  { %v17963_v56 = vpop.f32.mrb[29].mxu0  ;;  %v17965_v55 = vpop.f32.mrb[30].mxu1 }
 0x2a7   :  { %v17967_v20 = vpop.f32.mrb[30].mxu0  ;;  %v13670_v29 = vpop.f32.mrb[31].mxu1  ;;  %4041 = vmatpush1.bf16.msra.mxu0 %v19347_v15 }
 0x2a8   :  { %v17970_v8 = vpop.f32.mrb[31].mxu0  ;;  %13822 = vmatpush3.bf16.msra.mxu1 %v19348_v11  ;;  %4176 = vmatprep.subr.bf16.mxu0 %v19349_v16 }
 0x2a9   :  { %13812 = vmatmul.mubr.msk.bf16.gmra.mrb[52].mxu1 %vm177_vm2, %v17551_v4  ;;  %13835 = vmatprep.subr.bf16.mxu1 %v19304_v17 }
 0x2aa   :  { %12467 = vmatmul.mubr.msk.bf16.gmra.mrb[52].mxu0 %vm177_vm2, %v17551_v4  ;;  %13815 = vmatprep.mubr.msk.bf16.mxu1 %vm16768_vm0, %v19304_v17 }
 0x2ab   :  { %3921 = vmatprep.mubr.bf16.mxu0 %v19308_v0 }
 0x2ac   :  { %v17982_v49 = vpop.f32.mrb[32].mxu1 }
 0x2ad   :  { %v17984_v41 = vpop.f32.mrb[32].mxu0  ;;  %v13673_v29 = vpop.f32.mrb[33].mxu1 }
 0x2ae   :  { %v17986_v11 = vpop.f32.mrb[33].mxu0  ;;  %v17988_v16 = vpop.f32.mrb[34].mxu1  ;;  %v18004_v29 = vld [vmem:[%s19158_s0 + $0x3c] sm:$0xff]  }
 0x2af   :  { %v17990_v15 = vpop.f32.mrb[34].mxu0  ;;  %v13674_v38 = vpop.f32.mrb[35].mxu1  ;;  %19351 = vst [vmem:[#allocation35_spill] sm:$0xff] %v18004_v29 }
 0x2b0   :  { %v17992_v6 = vpop.f32.mrb[35].mxu0  ;;  %v19352_v38 = vld [vmem:[#allocation50_spill] sm:$0xff] }
 0x2b1   :  { %19350 = vst [vmem:[#allocation34_spill] sm:$0xff] %v17992_v6  ;;  %13816 = vmatmul.mubr.msk.bf16.gmra.mrb[56].mxu1 %vm177_vm2, %v17570_v2  ;;  %v19353_v6 = vld [vmem:[#allocation51_spill] sm:$0xff] }
 0x2b2   :  { %12468 = vmatmul.mubr.msk.bf16.gmra.mrb[56].mxu0 %vm177_vm2, %v17570_v2  ;;  %13823 = vmatprep.mubr.msk.bf16.mxu1 %vm16768_vm0, %v19304_v17  ;;  %v19357_v2 = vld [vmem:[#allocation52_spill] sm:$0xff] }
 0x2b3   :  { %4070 = vmatprep.mubr.bf16.mxu0 %v19308_v0 }
 0x2b9   :  { %13824 = vmatmul.mubr.msk.bf16.vlgmr.msra.gmra.mrb[48].mxu1 %vm177_vm2, %v18004_v29 }
 0x2ba   :  { %12482 = vmatmul.mubr.msk.bf16.vlgmr.msra.gmra.mrb[48].mxu0 %vm177_vm2, %v18004_v29  ;;  %13827 = vmatprep.mubr.msk.bf16.mxu1 %vm16768_vm0, %v19304_v17  ;;  %v19355_v29 = vld [vmem:[#allocation26_spill] sm:$0xff] }
 0x2bb   :  { %4177 = vmatpush1.bf16.msra.mxu0 %v19352_v38  ;;  %4080 = vmatprep.mubr.bf16.mxu0 %v19308_v0  ;;  %v19364_v38 = vld [vmem:[#allocation57_spill] sm:$0xff] }
 0x2bc   :  { %12488 = vmatprep.subr.msk.bf16.mxu0 %vm187_vm1, %v17541_v28  ;;  %13836 = vmatpush3.bf16.msra.mxu1 %v19353_v6  ;;  %v18037_v28 = vld [vmem:[%s19158_s0 + $0x4c] sm:$0xff]   ;;  %v18064_v6 = vld [vmem:[%s19158_s0 + $0x5c] sm:$0xff]  }
 0x2bd   :  { %13837 = vmatprep.subr.bf16.mxu1 %v19304_v17  ;;  %19358 = vst [vmem:[#allocation37_spill] sm:$0xff] %v18037_v28  ;;  %19360 = vst [vmem:[#allocation38_spill] sm:$0xff] %v18064_v6 }
 0x2bf   :  { %4179 = vmatpush1.bf16.msra.mxu0 %v19355_v29 }
 0x2c0   :  { %13838 = vmatpush3.bf16.msra.mxu1 %v19356_v9  ;;  %4296 = vmatprep.subr.bf16.mxu0 %v19357_v2  ;;  %v19359_v2 = vld [vmem:[#allocation54_spill] sm:$0xff] }
 0x2c1   :  { %13828 = vmatmul.mubr.msk.bf16.gmra.mrb[52].mxu1 %vm177_vm2, %v18020_v1  ;;  %13851 = vmatprep.subr.bf16.mxu1 %v19304_v17 }
 0x2c2   :  { %12483 = vmatmul.mubr.msk.bf16.gmra.mrb[52].mxu0 %vm177_vm2, %v18020_v1  ;;  %13831 = vmatprep.mubr.msk.bf16.mxu1 %vm16768_vm0, %v19304_v17 }
 0x2c3   :  { %4090 = vmatprep.mubr.bf16.mxu0 %v19308_v0 }
 0x2c9   :  { %13832 = vmatmul.mubr.msk.bf16.gmra.mrb[56].mxu1 %vm177_vm2, %v18037_v28 }
 0x2ca   :  { %12484 = vmatmul.mubr.msk.bf16.gmra.mrb[56].mxu0 %vm177_vm2, %v18037_v28  ;;  %13839 = vmatprep.mubr.msk.bf16.mxu1 %vm16768_vm0, %v19304_v17 }
 0x2cb   :  { %4208 = vmatprep.mubr.bf16.mxu0 %v19308_v0 }
 0x2d1   :  { %13840 = vmatmul.mubr.msk.bf16.vlgmr.msra.gmra.mrb[60].mxu1 %vm177_vm2, %v17828_v51 }
 0x2d2   :  { %12489 = vmatmul.mubr.msk.bf16.vlgmr.msra.gmra.mrb[60].mxu0 %vm177_vm2, %v17828_v51  ;;  %13843 = vmatprep.mubr.msk.bf16.mxu1 %vm16768_vm0, %v19304_v17 }
 0x2d3   :  { %4297 = vmatpush1.bf16.msra.mxu0 %v17585_v12  ;;  %4218 = vmatprep.mubr.bf16.mxu0 %v19308_v0  ;;  %v19363_v12 = vld [vmem:[#allocation56_spill] sm:$0xff] }
 0x2d4   :  { %12495 = vmatprep.subr.msk.bf16.mxu0 %vm187_vm1, %v17589_v63  ;;  %13852 = vmatpush3.bf16.msra.mxu1 %v17593_v5  ;;  %v18077_v63 = vld [vmem:[%s19158_s0 + $0x64] sm:$0xff]  }
 0x2d5   :  { %13853 = vmatprep.subr.bf16.mxu1 %v19304_v17  ;;  %19361 = vst [vmem:[#allocation39_spill] sm:$0xff] %v18077_v63  ;;  %v19362_v5 = vld [vmem:[#allocation55_spill] sm:$0xff] }
 0x2d7   :  { %4299 = vmatpush1.bf16.msra.mxu0 %v17109_v13  ;;  %v19367_v13 = vld [vmem:[#allocation58_spill] sm:$0xff] }
 0x2d8   :  { %13854 = vmatpush3.bf16.msra.mxu1 %v17113_v14  ;;  %4416 = vmatprep.subr.bf16.mxu0 %v19359_v2  ;;  %v19365_v2 = vld [vmem:[#allocation30_spill] sm:$0xff]  ;;  %v19366_v14 = vld [vmem:[#allocation31_spill] sm:$0xff] }
 0x2d9   :  { %13844 = vmatmul.mubr.msk.bf16.gmra.mrb[64].mxu1 %vm177_vm2, %v18064_v6  ;;  %13867 = vmatprep.subr.bf16.mxu1 %v19304_v17 }
 0x2da   :  { %12490 = vmatmul.mubr.msk.bf16.gmra.mrb[64].mxu0 %vm177_vm2, %v18064_v6  ;;  %13847 = vmatprep.mubr.msk.bf16.mxu1 %vm16768_vm0, %v19304_v17 }
 0x2db   :  { %4228 = vmatprep.mubr.bf16.mxu0 %v19308_v0 }
 0x2e1   :  { %13848 = vmatmul.mubr.msk.bf16.gmra.mrb[68].mxu1 %vm177_vm2, %v18077_v63 }
 0x2e2   :  { %12491 = vmatmul.mubr.msk.bf16.gmra.mrb[68].mxu0 %vm177_vm2, %v18077_v63  ;;  %13855 = vmatprep.mubr.msk.bf16.mxu1 %vm16768_vm0, %v19304_v17 }
 0x2e3   :  { %4328 = vmatprep.mubr.bf16.mxu0 %v19308_v0 }
 0x2e9   :  { %13856 = vmatmul.mubr.msk.bf16.vlgmr.msra.gmra.mrb[60].mxu1 %vm177_vm2, %v17863_v48 }
 0x2ea   :  { %12496 = vmatmul.mubr.msk.bf16.vlgmr.msra.gmra.mrb[60].mxu0 %vm177_vm2, %v17863_v48  ;;  %13859 = vmatprep.mubr.msk.bf16.mxu1 %vm16768_vm0, %v19304_v17  ;;  %v19369_v48 = vld [vmem:[#allocation59_spill] sm:$0xff] }
 0x2eb   :  { %4417 = vmatpush1.bf16.msra.mxu0 %v19362_v5  ;;  %4338 = vmatprep.mubr.bf16.mxu0 %v19308_v0  ;;  %v19372_v5 = vld [vmem:[#allocation32_spill] sm:$0xff] }
 0x2ec   :  { %12502 = vmatprep.subr.msk.bf16.mxu0 %vm187_vm1, %v19363_v12  ;;  %13868 = vmatpush3.bf16.msra.mxu1 %v19364_v38  ;;  %v19373_v12 = vld [vmem:[#allocation33_spill] sm:$0xff]  ;;  %v19374_v38 = vld [vmem:[#allocation62_spill] sm:$0xff] }
 0x2ed   :  { %13869 = vmatprep.subr.bf16.mxu1 %v19304_v17 }
 0x2ef   :  { %4419 = vmatpush1.bf16.msra.mxu0 %v19365_v2 }
 0x2f0   :  { %13870 = vmatpush3.bf16.msra.mxu1 %v19366_v14  ;;  %4554 = vmatprep.subr.bf16.mxu0 %v19367_v13  ;;  %v18119_v13 = vld [vmem:[%s19158_s0 + $0x4] sm:$0xff]   ;;  %v18139_v14 = vld [vmem:[%s19158_s0 + $0xc] sm:$0xff]  }
 0x2f1   :  { %13860 = vmatmul.mubr.msk.bf16.gmra.mrb[64].mxu1 %vm177_vm2, %v17883_v59  ;;  %13883 = vmatprep.subr.bf16.mxu1 %v19304_v17  ;;  %19368 = vst [vmem:[#allocation40_spill] sm:$0xff] %v18119_v13  ;;  %19375 = vst [vmem:[#allocation42_spill] sm:$0xff] %v18139_v14 }
 0x2f2   :  { %12497 = vmatmul.mubr.msk.bf16.gmra.mrb[64].mxu0 %vm177_vm2, %v17883_v59  ;;  %13863 = vmatprep.mubr.msk.bf16.mxu1 %vm16768_vm0, %v19304_v17  ;;  %v19370_v59 = vld [vmem:[#allocation60_spill] sm:$0xff] }
 0x2f3   :  { %4348 = vmatprep.mubr.bf16.mxu0 %v19308_v0 }
 0x2f9   :  { %13864 = vmatmul.mubr.msk.bf16.gmra.mrb[68].mxu1 %vm177_vm2, %v17896_v60 }
 0x2fa   :  { %12498 = vmatmul.mubr.msk.bf16.gmra.mrb[68].mxu0 %vm177_vm2, %v17896_v60  ;;  %13871 = vmatprep.mubr.msk.bf16.mxu1 %vm16768_vm0, %v19304_v17  ;;  %v19371_v60 = vld [vmem:[#allocation61_spill] sm:$0xff] }
 0x2fb   :  { %4448 = vmatprep.mubr.bf16.mxu0 %v19308_v0 }
 0x301   :  { %13872 = vmatmul.mubr.msk.bf16.vlgmr.msra.gmra.mrb[60].mxu1 %vm177_vm2, %v18119_v13 }
 0x302   :  { %12503 = vmatmul.mubr.msk.bf16.vlgmr.msra.gmra.mrb[60].mxu0 %vm177_vm2, %v18119_v13  ;;  %13875 = vmatprep.mubr.msk.bf16.mxu1 %vm16768_vm0, %v19304_v17  ;;  %v19377_v13 = vmax.f32 %v17447_v18, %v17693_v44  ;;  %v19380_v44 = vmax.f32 %v17451_v22, %v17701_v7  ;;  %v19383_v22 = vld [vmem:[#allocation41_spill] sm:$0xff] }
 0x303   :  { %4555 = vmatpush1.bf16.msra.mxu0 %v19369_v48  ;;  %4458 = vmatprep.mubr.bf16.mxu0 %v19308_v0  ;;  %v3431_v48 = vlaneseq }
 0x304   :  { %12509 = vmatprep.subr.msk.bf16.mxu0 %vm187_vm1, %v19370_v59  ;;  %13884 = vmatpush3.bf16.msra.mxu1 %v19371_v60 }
 0x305   :  { %13885 = vmatprep.subr.bf16.mxu1 %v19304_v17  ;;  %v18149_v59 = vshrl.u32 %v3431_v48, 7 }
 0x307   :  { %4557 = vmatpush1.bf16.msra.mxu0 %v19372_v5  ;;  %19376 = vst [vmem:[#allocation43_spill] sm:$0xff] %v18149_v59  ;;  %v3441_v60 = vsub.s32 2, %v18149_v59 }
 0x308   :  { %13886 = vmatpush3.bf16.msra.mxu1 %v19373_v12  ;;  %4692 = vmatprep.subr.bf16.mxu0 %v19374_v38  ;;  %v3429_v38 = vld [vmem:[#allocation4] sm:$0x7]  ;;  %v19251_v12 = vsub.s32 0, %v18149_v59 }
 0x309   :  { %13876 = vmatmul.mubr.msk.bf16.gmra.mrb[64].mxu1 %vm177_vm2, %v18139_v14  ;;  %13899 = vmatprep.subr.bf16.mxu1 %v19304_v17  ;;  %v18162_v9 = vrot.slane %v3429_v38, %v3441_v60 }
 0x30a   :  { %12504 = vmatmul.mubr.msk.bf16.gmra.mrb[64].mxu0 %vm177_vm2, %v18139_v14  ;;  %13879 = vmatprep.mubr.msk.bf16.mxu1 %vm16768_vm0, %v19304_v17 }
 0x30b   :  { %4468 = vmatprep.mubr.bf16.mxu0 %v19308_v0 }
 0x311   :  { %13880 = vmatmul.mubr.msk.bf16.gmra.mrb[68].mxu1 %vm177_vm2, %v17517_v31 }
 0x312   :  { %12505 = vmatmul.mubr.msk.bf16.gmra.mrb[68].mxu0 %vm177_vm2, %v17517_v31  ;;  %13887 = vmatprep.mubr.msk.bf16.mxu1 %vm16768_vm0, %v19304_v17  ;;  %v18167_v31 = vrot.slane %v3429_v38, %v19251_v12 }
 0x313   :  { %4586 = vmatprep.mubr.bf16.mxu0 %v19308_v0 }
 0x314   :  { %v3334_v5 = vpop.f32.mrb[36].mxu1 }
 0x315   :  { %v3395_v2 = vmax.f32 %v17935_v50, %v3334_v5  ;;  %v3271_v29 = vpop.f32.mrb[36].mxu0  ;;  %v13745_v63 = vpop.f32.mrb[37].mxu1 }
 0x316   :  { %v3393_v6 = vmax.f32 %v17937_v61, %v3271_v29  ;;  %v3273_v51 = vpop.f32.mrb[37].mxu0  ;;  %v3337_v14 = vpop.f32.mrb[38].mxu1  ;;  %v19378_v63 = vmax.f32 %v17449_v19, %v17697_v33  ;;  %v19379_v29 = vsub.s32 1, %v18149_v59  ;;  %v15270_v59 = vld [vmem:[#allocation6 + $0x334] ss:$8 sps:$4 sm:$0xff]  }
 0x317   :  { %v3413_v28 = vmax.f32 %v19377_v13, %v3395_v2  ;;  %v3394_v48 = vmax.f32 %v17939_v3, %v3273_v51  ;;  %v3398_v50 = vmax.f32 %v17941_v62, %v3337_v14  ;;  %v3275_v5 = vpop.f32.mrb[38].mxu0  ;;  %v13746_v60 = vpop.f32.mrb[39].mxu1  ;;  %v19381_v14 = vmax.f32 %v17453_v25, %v17703_v24  ;;  %v19384_v25 = vld [vmem:[#allocation63_spill] sm:$0xff] }
 0x318   :  { %v3411_v61 = vmax.f32 %v19378_v63, %v3393_v6  ;;  %v18179_v12 = vrot.slane %v3429_v38, %v19379_v29  ;;  %v3396_v1 = vmax.f32 %v17943_v58, %v3275_v5  ;;  %v3277_v35 = vpop.f32.mrb[39].mxu0  ;;  %v19382_v62 = vmax.f32 %v17455_v26, %v17709_v36 }
 0x319   :  { %v3448_v18 = vadd.f32 %v18162_v9, %v3413_v28  ;;  %v3412_v51 = vmax.f32 %v19380_v44, %v3394_v48  ;;  %v3416_v3 = vmax.f32 %v19381_v14, %v3398_v50  ;;  %v3397_v33 = vmax.f32 %v17945_v47, %v3277_v35  ;;  %13888 = vmatmul.mubr.msk.bf16.vlgmr.msra.gmra.mrb[60].mxu1 %vm177_vm2, %v17529_v52  ;;  %v18204_v47 = vld [vmem:[#allocation2 + $0x1b0] ss:$12 sps:$4 sm:$0xff]   ;;  %v18213_v28 = vld [vmem:[#allocation2 + $0x1b8] ss:$12 sps:$4 sm:$0xff]  }
 0x31a   :  { %v3446_v19 = vadd.f32 %v18167_v31, %v3411_v61  ;;  %v3414_v58 = vmax.f32 %v19382_v62, %v3396_v1  ;;  %12510 = vmatmul.mubr.msk.bf16.vlgmr.msra.gmra.mrb[60].mxu0 %vm177_vm2, %v17529_v52  ;;  %13891 = vmatprep.mubr.msk.bf16.mxu1 %vm16768_vm0, %v19304_v17  ;;  %v19385_v7 = vmax.f32 %v19383_v22, %v19384_v25  ;;  %v18209_v52 = vld [vmem:[#allocation2 + $0x1cc] ss:$12 sps:$4 sm:$0x3f]  }
 0x31b   :  { %v3451_v24 = vadd.f32 %v18162_v9, %v3416_v3  ;;  %4693 = vmatpush1.bf16.msra.mxu0 %v18204_v47  ;;  %4596 = vmatprep.mubr.bf16.mxu0 %v19308_v0  ;;  %v3466_v26 = vmax.f32 %v3448_v18, 0.0  ;;  %v3447_v6 = vadd.f32 %v18179_v12, %v3412_v51  ;;  %v19387_v51 = vld [vmem:[#allocation64_spill] sm:$0xff] }
 0x31c   :  { %v3415_v35 = vmax.f32 %v19385_v7, %v3397_v33  ;;  %v3449_v1 = vadd.f32 %v18167_v31, %v3414_v58  ;;  %v3342_v36 = vpop.f32.mrb[40].mxu1  ;;  %12516 = vmatprep.subr.msk.bf16.mxu0 %vm187_vm1, %v18209_v52  ;;  %13900 = vmatpush3.bf16.msra.mxu1 %v18213_v28  ;;  %v3464_v5 = vmax.f32 %v3446_v19, 0.0  ;;  %v19388_v14 = vmax.f32 %v17469_v40, %v19387_v51 }
 0x31d   :  { %v3469_v2 = vmax.f32 %v3451_v24, 0.0  ;;  %v3401_v38 = vmax.f32 %v17955_v57, %v3342_v36  ;;  %v3281_v48 = vpop.f32.mrb[40].mxu0  ;;  %v13749_v50 = vpop.f32.mrb[41].mxu1  ;;  %13901 = vmatprep.subr.bf16.mxu1 %v19304_v17  ;;  %v3465_v40 = vmax.f32 %v3447_v6, 0.0  ;;  %v19391_v7 = vmax.f32 %v17481_v42, %v17737_v23  ;;  %v19394_v36 = vld [vmem:[#allocation45_spill] sm:$0xff]  ;;  %v19395_v6 = vld [vmem:[#allocation66_spill] sm:$0xff] }
 0x31e   :  { %v3450_v13 = vadd.f32 %v18179_v12, %v3415_v35  ;;  %v3467_v60 = vmax.f32 %v3449_v1, 0.0  ;;  %v3399_v63 = vmax.f32 %v17960_v54, %v3281_v48  ;;  %v3283_v61 = vpop.f32.mrb[41].mxu0  ;;  %v3345_v29 = vpop.f32.mrb[42].mxu1  ;;  %v19390_v54 = vmax.f32 %v17478_v27, %v17732_v34  ;;  %v16094_v34 = vld [vmem:[#allocation2 + $0x64] ss:$12 sps:$4 sm:$0xff]   ;;  %v19397_v42 = vld [vmem:[#allocation46_spill] sm:$0xff] }
 0x31f   :  { %v18221_v18 = vpack.c.bf16 %v3469_v2, %v3466_v26  ;;  %v3419_v3 = vmax.f32 %v19388_v14, %v3401_v38  ;;  %v3400_v33 = vmax.f32 %v17963_v56, %v3283_v61  ;;  %v3285_v57 = vpop.f32.mrb[42].mxu0  ;;  %v13750_v62 = vpop.f32.mrb[43].mxu1  ;;  %4695 = vmatpush1.bf16.msra.mxu0 %v17233_v45  ;;  %v3404_v24 = vmax.f32 %v17965_v55, %v3345_v29  ;;  %v19398_v23 = vld [vmem:[#allocation67_spill] sm:$0xff] }
 0x320   :  { %v3468_v44 = vmax.f32 %v3450_v13, 0.0  ;;  %v18228_v58 = vpack.c.bf16 %v3467_v60, %v3464_v5  ;;  %v3417_v19 = vmax.f32 %v19390_v54, %v3399_v63  ;;  %v3402_v22 = vmax.f32 %v17967_v20, %v3285_v57  ;;  %v3287_v25 = vpop.f32.mrb[43].mxu0  ;;  %13902 = vmatpush3.bf16.msra.mxu1 %v17238_v46  ;;  %4830 = vmatprep.subr.bf16.mxu0 %v16094_v34  ;;  %v19392_v20 = vld [vmem:[#allocation65_spill] sm:$0xff] }
 0x321   :  { %19386 = vst [vmem:[#allocation44_spill] sm:$0xff] %v18221_v18  ;;  %v3454_v56 = vadd.f32 %v18162_v9, %v3419_v3  ;;  %v3418_v35 = vmax.f32 %v19391_v7, %v3400_v33  ;;  %v3403_v26 = vmax.f32 %v17970_v8, %v3287_v25  ;;  %13892 = vmatmul.mubr.msk.bf16.gmra.mrb[64].mxu1 %vm177_vm2, %v17551_v4 }
 0x322   :  { %19389 = vst [vmem:[#allocation47_spill] sm:$0xff] %v18228_v58  ;;  %v3452_v27 = vadd.f32 %v18167_v31, %v3417_v19  ;;  %v19393_v55 = vmax.f32 %v17483_v32, %v19392_v20  ;;  %v19396_v2 = vmax.f32 %v19394_v36, %v19395_v6  ;;  %12511 = vmatmul.mubr.msk.bf16.gmra.mrb[64].mxu0 %vm177_vm2, %v17551_v4  ;;  %v19409_v36 = vld [vmem:[#allocation53_spill] sm:$0xff] }
 0x323   :  { %13895 = vmatprep.mubr.msk.bf16.mxu1 %vm16768_vm0, %v19304_v17  ;;  %v3453_v8 = vadd.f32 %v18179_v12, %v3418_v35  ;;  %v19399_v38 = vmax.f32 %v19397_v42, %v19398_v23  ;;  %4606 = vmatprep.mubr.bf16.mxu0 %v19308_v0  ;;  %v18260_v32 = vpack.c.bf16 %v3468_v44, %v3465_v40  ;;  %v3472_v60 = vmax.f32 %v3454_v56, 0.0  ;;  %v19414_v42 = vld [vmem:[#allocation49_spill] sm:$0xff]  ;;  %v19415_v23 = vld [vmem:[#allocation70_spill] sm:$0xff] }
 0x324   :  { %v3422_v1 = vmax.f32 %v19393_v55, %v3404_v24  ;;  %v3420_v13 = vmax.f32 %v19396_v2, %v3402_v22  ;;  %13915 = vmatprep.subr.bf16.mxu1 %v19304_v17  ;;  %v3350_v4 = vpop.f32.mrb[44].mxu1  ;;  %v3470_v63 = vmax.f32 %v3452_v27, 0.0  ;;  %v19401_v24 = vmax.f32 %v17502_v39, %v17764_v10 }
 0x325   :  { %v3421_v48 = vmax.f32 %v19399_v38, %v3403_v26  ;;  %19400 = vst [vmem:[#allocation50_spill] sm:$0xff] %v18260_v32  ;;  %v3407_v29 = vmax.f32 %v17982_v49, %v3350_v4  ;;  %v3291_v51 = vpop.f32.mrb[44].mxu0  ;;  %v13753_v14 = vpop.f32.mrb[45].mxu1  ;;  %v3471_v3 = vmax.f32 %v3453_v8, 0.0  ;;  %v19416_v38 = vmax.f32 %v19414_v42, %v19415_v23  ;;  %v16112_v42 = vld [vmem:[#allocation2 + $0x184] ss:$12 sps:$4 sm:$0xff]  }
 0x326   :  { %v3457_v50 = vadd.f32 %v18162_v9, %v3422_v1  ;;  %v3455_v5 = vadd.f32 %v18167_v31, %v3420_v13  ;;  %v3405_v62 = vmax.f32 %v17984_v41, %v3291_v51  ;;  %v3293_v44 = vpop.f32.mrb[45].mxu0  ;;  %v3353_v54 = vpop.f32.mrb[46].mxu1  ;;  %v19404_v41 = vmax.f32 %v17504_v53, %v17768_v30  ;;  %v19410_v30 = vld [vmem:[#allocation48_spill] sm:$0xff]  ;;  %v19413_v13 = vld [vmem:[#allocation34_spill] sm:$0xff] }
 0x327   :  { %v3456_v61 = vadd.f32 %v18179_v12, %v3421_v48  ;;  %v3425_v22 = vmax.f32 %v19401_v24, %v3407_v29  ;;  %v3406_v25 = vmax.f32 %v17986_v11, %v3293_v44  ;;  %v3410_v40 = vmax.f32 %v17988_v16, %v3353_v54  ;;  %v3295_v56 = vpop.f32.mrb[46].mxu0  ;;  %v13754_v49 = vpop.f32.mrb[47].mxu1  ;;  %v19407_v16 = vld [vmem:[#allocation68_spill] sm:$0xff]  ;;  %v19421_v54 = vld [vmem:[#allocation17_spill] sm:$0xff] }
 0x328   :  { %v3475_v33 = vmax.f32 %v3457_v50, 0.0  ;;  %v3473_v57 = vmax.f32 %v3455_v5, 0.0  ;;  %v3423_v26 = vmax.f32 %v19404_v41, %v3405_v62  ;;  %v3408_v34 = vmax.f32 %v17990_v15, %v3295_v56  ;;  %v3297_v27 = vpop.f32.mrb[47].mxu0  ;;  %v19411_v15 = vld [vmem:[#allocation69_spill] sm:$0xff]  ;;  %v16099_v56 = vld [vmem:[#allocation2] ss:$12 sps:$4 sm:$0xff]  }
 0x329   :  { %v3474_v19 = vmax.f32 %v3456_v61, 0.0  ;;  %v3460_v39 = vadd.f32 %v18162_v9, %v3425_v22  ;;  %v19406_v11 = vmax.f32 %v17506_v21, %v17772_v37  ;;  %v19408_v55 = vmax.f32 %v17508_v43, %v19407_v16  ;;  %13896 = vmatmul.mubr.msk.bf16.gmra.mrb[68].mxu1 %vm177_vm2, %v19409_v36  ;;  %v16096_v62 = vld [vmem:[#allocation2 + $0x7c] ss:$12 sps:$4 sm:$0x3f]   ;;  %v16098_v24 = vld [vmem:[#allocation2 + $0x4] ss:$12 sps:$4 sm:$0xff]  }
 0x32a   :  { %v18272_v7 = vpack.c.bf16 %v3475_v33, %v3472_v60  ;;  %v18274_v35 = vpack.c.bf16 %v3473_v57, %v3470_v63  ;;  %v3458_v53 = vadd.f32 %v18167_v31, %v3423_v26  ;;  %v19412_v6 = vmax.f32 %v19410_v30, %v19411_v15  ;;  %12512 = vmatmul.mubr.msk.bf16.gmra.mrb[68].mxu0 %vm177_vm2, %v19409_v36  ;;  %v16095_v57 = vld [vmem:[#allocation2 + $0x60] ss:$12 sps:$4 sm:$0xff]   ;;  %v16097_v44 = vld [vmem:[#allocation2 + $0x68] ss:$12 sps:$4 sm:$0xff]   ;;  %v19426_v26 = vld [vmem:[#allocation18_spill] sm:$0xff] }
 0x32b   :  { %v18280_v20 = vpack.c.bf16 %v3474_v19, %v3471_v3  ;;  %v3424_v10 = vmax.f32 %v19406_v11, %v3406_v25  ;;  %v3428_v1 = vmax.f32 %v19408_v55, %v3410_v40  ;;  %v3409_v8 = vmax.f32 %v19413_v13, %v3297_v27  ;;  %13903 = vmatprep.mubr.msk.bf16.mxu1 %vm16768_vm0, %v19304_v17  ;;  %v19419_v3 = vld [vmem:[#allocation35_spill] sm:$0xff]  ;;  %v19422_v19 = vld [vmem:[#allocation16_spill] sm:$0xff]  ;;  %v19424_v25 = vld [vmem:[#allocation37_spill] sm:$0xff] }
 0x32c   :  { %19402 = vst [vmem:[#allocation51_spill] sm:$0xff] %v18272_v7  ;;  %19403 = vst [vmem:[#allocation52_spill] sm:$0xff] %v18274_v35  ;;  %v3426_v2 = vmax.f32 %v19412_v6, %v3408_v34  ;;  %4724 = vmatprep.mubr.bf16.mxu0 %v19308_v0  ;;  %v3478_v50 = vmax.f32 %v3460_v39, 0.0  ;;  %v3476_v4 = vmax.f32 %v3458_v53, 0.0  ;;  %v19423_v22 = vld [vmem:[#allocation36_spill] sm:$0xff]  ;;  %v19427_v34 = vld [vmem:[#allocation19_spill] sm:$0xff] }
 0x32d   :  { %19405 = vst [vmem:[#allocation54_spill] sm:$0xff] %v18280_v20  ;;  %v3463_v43 = vadd.f32 %v18162_v9, %v3428_v1  ;;  %v3459_v21 = vadd.f32 %v18179_v12, %v3424_v10  ;;  %v3427_v48 = vmax.f32 %v19416_v38, %v3409_v8  ;;  %v19425_v40 = vld [vmem:[#allocation40_spill] sm:$0xff]  ;;  %v16102_v27 = vld [vmem:[#allocation2 + $0xc4] ss:$12 sps:$4 sm:$0xff]   ;;  %v19428_v39 = vld [vmem:[#allocation42_spill] sm:$0xff] }
 0x32e   :  { %v3461_v37 = vadd.f32 %v18167_v31, %v3426_v2  ;;  %v16100_v49 = vld [vmem:[#allocation2 + $0x1c] ss:$12 sps:$4 sm:$0x3f]   ;;  %v18362_v11 = vld [vmem:[%s19158_s0 + $0x14] sm:$0xff]   ;;  %v19429_v10 = vld [vmem:[#allocation71_spill] sm:$0xff] }
 0x32f   :  { %v3481_v5 = vmax.f32 %v3463_v43, 0.0  ;;  %v3462_v63 = vadd.f32 %v18179_v12, %v3427_v48  ;;  %v3477_v29 = vmax.f32 %v3459_v21, 0.0  ;;  %v16101_v41 = vld [vmem:[#allocation2 + $0x8] ss:$12 sps:$4 sm:$0xff]   ;;  %v16104_v16 = vld [vmem:[#allocation2 + $0xc0] ss:$12 sps:$4 sm:$0xff]  }
 0x330   :  { %v3479_v60 = vmax.f32 %v3461_v37, 0.0  ;;  %v16105_v55 = vld [vmem:[#allocation2 + $0xdc] ss:$12 sps:$4 sm:$0x3f]   ;;  %v19431_v53 = vld [vmem:[#allocation21_spill] sm:$0xff]  ;;  %v19433_v6 = vld [vmem:[#allocation39_spill] sm:$0xff] }
 0x331   :  { %v18308_v61 = vpack.c.bf16 %v3481_v5, %v3478_v50  ;;  %v3480_v14 = vmax.f32 %v3462_v63, 0.0  ;;  %13904 = vmatmul.mubr.msk.bf16.vlgmr.msra.gmra.mrb[60].mxu1 %vm177_vm2, %v19419_v3  ;;  %v16106_v1 = vld [vmem:[#allocation2 + $0xc8] ss:$12 sps:$4 sm:$0xff]   ;;  %v16107_v30 = vld [vmem:[#allocation2 + $0x124] ss:$12 sps:$4 sm:$0xff]   ;;  %v19432_v15 = vld [vmem:[#allocation38_spill] sm:$0xff] }
 0x332   :  { %v18310_v51 = vpack.c.bf16 %v3479_v60, %v3476_v4  ;;  %12517 = vmatmul.mubr.msk.bf16.vlgmr.msra.gmra.mrb[60].mxu0 %vm177_vm2, %v19419_v3  ;;  %13907 = vmatprep.mubr.msk.bf16.mxu1 %vm16768_vm0, %v19304_v17  ;;  %v19430_v36 = vld [vmem:[#allocation20_spill] sm:$0xff]  ;;  %v18400_v2 = vld [vmem:[%s19158_s0 + $0x20] sm:$0xff]   ;;  %v19434_v21 = vld [vmem:[#allocation22_spill] sm:$0xff] }
 0x333   :  { %19417 = vst [vmem:[#allocation55_spill] sm:$0xff] %v18308_v61  ;;  %v18314_v33 = vpack.c.bf16 %v3480_v14, %v3477_v29  ;;  %4831 = vmatpush1.bf16.msra.mxu0 %v16095_v57  ;;  %4734 = vmatprep.mubr.bf16.mxu0 %v19308_v0  ;;  %v16109_v13 = vld [vmem:[#allocation2 + $0x120] ss:$12 sps:$4 sm:$0xff]   ;;  %v16110_v8 = vld [vmem:[#allocation2 + $0x13c] ss:$12 sps:$4 sm:$0x3f]  }
 0x334   :  { %19418 = vst [vmem:[#allocation56_spill] sm:$0xff] %v18310_v51  ;;  %12523 = vmatprep.subr.msk.bf16.mxu0 %vm187_vm1, %v16096_v62  ;;  %13916 = vmatpush3.bf16.msra.mxu1 %v16097_v44  ;;  %v16111_v43 = vld [vmem:[#allocation2 + $0x128] ss:$12 sps:$4 sm:$0xff]   ;;  %v19435_v37 = vld [vmem:[#allocation23_spill] sm:$0xff] }
 0x335   :  { %19420 = vst [vmem:[#allocation57_spill] sm:$0xff] %v18314_v33  ;;  %13917 = vmatprep.subr.bf16.mxu1 %v19304_v17  ;;  %v18416_v23 = vld [vmem:[%s19158_s0 + $0x28] sm:$0xff]   ;;  %v18429_v38 = vld [vmem:[%s19158_s0 + $0x30] sm:$0xff]  }
 0x336   :  { %v16115_v57 = vld [vmem:[#allocation2 + $0x180] ss:$12 sps:$4 sm:$0xff]   ;;  %v16116_v44 = vld [vmem:[#allocation2 + $0x19c] ss:$12 sps:$4 sm:$0x3f]  }
 0x337   :  { %4833 = vmatpush1.bf16.msra.mxu0 %v19421_v54  ;;  %v16117_v54 = vld [vmem:[#allocation2 + $0x188] ss:$12 sps:$4 sm:$0xff]  }
 0x338   :  { %13918 = vmatpush3.bf16.msra.mxu1 %v19422_v19  ;;  %4950 = vmatprep.subr.bf16.mxu0 %v16098_v24  ;;  %v15348_v51 = vld [vmem:[#allocation6 + $0x404] ss:$8 sps:$4 sm:$0xff]  }
 0x339   :  { %13908 = vmatmul.mubr.msk.bf16.gmra.mrb[64].mxu1 %vm177_vm2, %v19423_v22  ;;  %13931 = vmatprep.subr.bf16.mxu1 %v19304_v17 }
 0x33a   :  { %12518 = vmatmul.mubr.msk.bf16.gmra.mrb[64].mxu0 %vm177_vm2, %v19423_v22  ;;  %13911 = vmatprep.mubr.msk.bf16.mxu1 %vm16768_vm0, %v19304_v17 }
 0x33b   :  { %4744 = vmatprep.mubr.bf16.mxu0 %v19308_v0 }
 0x341   :  { %13912 = vmatmul.mubr.msk.bf16.gmra.mrb[68].mxu1 %vm177_vm2, %v19424_v25 }
 0x342   :  { %12519 = vmatmul.mubr.msk.bf16.gmra.mrb[68].mxu0 %vm177_vm2, %v19424_v25  ;;  %13919 = vmatprep.mubr.msk.bf16.mxu1 %vm16768_vm0, %v19304_v17 }
 0x343   :  { %4862 = vmatprep.mubr.bf16.mxu0 %v19308_v0 }
 0x349   :  { %13920 = vmatmul.mubr.msk.bf16.vlgmr.msra.gmra.mrb[72].mxu1 %vm177_vm2, %v19425_v40 }
 0x34a   :  { %12524 = vmatmul.mubr.msk.bf16.vlgmr.msra.gmra.mrb[72].mxu0 %vm177_vm2, %v19425_v40  ;;  %13923 = vmatprep.mubr.msk.bf16.mxu1 %vm16768_vm0, %v19304_v17 }
 0x34b   :  { %4951 = vmatpush1.bf16.msra.mxu0 %v16099_v56  ;;  %4872 = vmatprep.mubr.bf16.mxu0 %v19308_v0 }
 0x34c   :  { %12530 = vmatprep.subr.msk.bf16.mxu0 %vm187_vm1, %v16100_v49  ;;  %13932 = vmatpush3.bf16.msra.mxu1 %v16101_v41 }
 0x34d   :  { %13933 = vmatprep.subr.bf16.mxu1 %v19304_v17 }
 0x34f   :  { %4953 = vmatpush1.bf16.msra.mxu0 %v19426_v26 }
 0x350   :  { %13934 = vmatpush3.bf16.msra.mxu1 %v19427_v34  ;;  %5070 = vmatprep.subr.bf16.mxu0 %v16102_v27  ;;  %v19436_v34 = vld [vmem:[#allocation24_spill] sm:$0xff] }
 0x351   :  { %13924 = vmatmul.mubr.msk.bf16.gmra.mrb[76].mxu1 %vm177_vm2, %v19428_v39  ;;  %13947 = vmatprep.subr.bf16.mxu1 %v19304_v17 }
 0x352   :  { %12525 = vmatmul.mubr.msk.bf16.gmra.mrb[76].mxu0 %vm177_vm2, %v19428_v39  ;;  %13927 = vmatprep.mubr.msk.bf16.mxu1 %vm16768_vm0, %v19304_v17 }
 0x353   :  { %4882 = vmatprep.mubr.bf16.mxu0 %v19308_v0 }
 0x359   :  { %13928 = vmatmul.mubr.msk.bf16.gmra.mrb[80].mxu1 %vm177_vm2, %v18362_v11 }
 0x35a   :  { %12526 = vmatmul.mubr.msk.bf16.gmra.mrb[80].mxu0 %vm177_vm2, %v18362_v11  ;;  %13935 = vmatprep.mubr.msk.bf16.mxu1 %vm16768_vm0, %v19304_v17 }
 0x35b   :  { %4982 = vmatprep.mubr.bf16.mxu0 %v19308_v0 }
 0x361   :  { %13936 = vmatmul.mubr.msk.bf16.vlgmr.msra.gmra.mrb[72].mxu1 %vm177_vm2, %v19429_v10 }
 0x362   :  { %12531 = vmatmul.mubr.msk.bf16.vlgmr.msra.gmra.mrb[72].mxu0 %vm177_vm2, %v19429_v10  ;;  %13939 = vmatprep.mubr.msk.bf16.mxu1 %vm16768_vm0, %v19304_v17 }
 0x363   :  { %5071 = vmatpush1.bf16.msra.mxu0 %v16104_v16  ;;  %4992 = vmatprep.mubr.bf16.mxu0 %v19308_v0  ;;  %v19437_v16 = vld [vmem:[#allocation25_spill] sm:$0xff] }
 0x364   :  { %12537 = vmatprep.subr.msk.bf16.mxu0 %vm187_vm1, %v16105_v55  ;;  %13948 = vmatpush3.bf16.msra.mxu1 %v16106_v1  ;;  %v16118_v55 = vld [vmem:[#allocation2 + $0x94] ss:$12 sps:$4 sm:$0xff]  }
 0x365   :  { %13949 = vmatprep.subr.bf16.mxu1 %v19304_v17 }
 0x367   :  { %5073 = vmatpush1.bf16.msra.mxu0 %v19430_v36 }
 0x368   :  { %13950 = vmatpush3.bf16.msra.mxu1 %v19431_v53  ;;  %5208 = vmatprep.subr.bf16.mxu0 %v16107_v30 }
 0x369   :  { %13940 = vmatmul.mubr.msk.bf16.gmra.mrb[76].mxu1 %vm177_vm2, %v19432_v15  ;;  %13963 = vmatprep.subr.bf16.mxu1 %v19304_v17 }
 0x36a   :  { %12532 = vmatmul.mubr.msk.bf16.gmra.mrb[76].mxu0 %vm177_vm2, %v19432_v15  ;;  %13943 = vmatprep.mubr.msk.bf16.mxu1 %vm16768_vm0, %v19304_v17 }
 0x36b   :  { %5002 = vmatprep.mubr.bf16.mxu0 %v19308_v0 }
 0x371   :  { %13944 = vmatmul.mubr.msk.bf16.gmra.mrb[80].mxu1 %vm177_vm2, %v19433_v6 }
 0x372   :  { %12533 = vmatmul.mubr.msk.bf16.gmra.mrb[80].mxu0 %vm177_vm2, %v19433_v6  ;;  %13951 = vmatprep.mubr.msk.bf16.mxu1 %vm16768_vm0, %v19304_v17 }
 0x373   :  { %5102 = vmatprep.mubr.bf16.mxu0 %v19308_v0 }
 0x379   :  { %13952 = vmatmul.mubr.msk.bf16.vlgmr.msra.gmra.mrb[72].mxu1 %vm177_vm2, %v18400_v2 }
 0x37a   :  { %12538 = vmatmul.mubr.msk.bf16.vlgmr.msra.gmra.mrb[72].mxu0 %vm177_vm2, %v18400_v2  ;;  %13955 = vmatprep.mubr.msk.bf16.mxu1 %vm16768_vm0, %v19304_v17 }
 0x37b   :  { %5209 = vmatpush1.bf16.msra.mxu0 %v16109_v13  ;;  %5112 = vmatprep.mubr.bf16.mxu0 %v19308_v0 }
 0x37c   :  { %12544 = vmatprep.subr.msk.bf16.mxu0 %vm187_vm1, %v16110_v8  ;;  %13964 = vmatpush3.bf16.msra.mxu1 %v16111_v43 }
 0x37d   :  { %13965 = vmatprep.subr.bf16.mxu1 %v19304_v17 }
 0x37f   :  { %5211 = vmatpush1.bf16.msra.mxu0 %v19434_v21 }
 0x380   :  { %13966 = vmatpush3.bf16.msra.mxu1 %v19435_v37  ;;  %5377 = vmatprep.subr.bf16.mxu0 %v16112_v42  ;;  %v18503_v37 = vld [vmem:[%s19158_s0 + $0x58] sm:$0xff]  }
 0x381   :  { %13956 = vmatmul.mubr.msk.bf16.gmra.mrb[76].mxu1 %vm177_vm2, %v18416_v23  ;;  %13979 = vmatprep.subr.bf16.mxu1 %v19304_v17  ;;  %v16119_v42 = vld [vmem:[#allocation2 + $0x90] ss:$12 sps:$4 sm:$0xff]  }
 0x382   :  { %12539 = vmatmul.mubr.msk.bf16.gmra.mrb[76].mxu0 %vm177_vm2, %v18416_v23  ;;  %13959 = vmatprep.mubr.msk.bf16.mxu1 %vm16768_vm0, %v19304_v17 }
 0x383   :  { %5122 = vmatprep.mubr.bf16.mxu0 %v19308_v0 }
 0x389   :  { %13960 = vmatmul.mubr.msk.bf16.gmra.mrb[80].mxu1 %vm177_vm2, %v18429_v38 }
 0x38a   :  { %12540 = vmatmul.mubr.msk.bf16.gmra.mrb[80].mxu0 %vm177_vm2, %v18429_v38  ;;  %13967 = vmatprep.mubr.msk.bf16.mxu1 %vm16768_vm0, %v19304_v17 }
 0x38b   :  { %5240 = vmatprep.mubr.bf16.mxu0 %v19308_v0 }
 0x38c   :  { %v18438_v48 = vpop.f32.mrb[48].mxu1 }
 0x38d   :  { %v18440_v50 = vpop.f32.mrb[48].mxu0  ;;  %v13825_v5 = vpop.f32.mrb[49].mxu1 }
 0x38e   :  { %v18442_v4 = vpop.f32.mrb[49].mxu0  ;;  %v18444_v60 = vpop.f32.mrb[50].mxu1  ;;  %v16120_v5 = vld [vmem:[#allocation2 + $0xac] ss:$12 sps:$4 sm:$0x3f]  }
 0x38f   :  { %v18446_v63 = vpop.f32.mrb[50].mxu0  ;;  %v13826_v29 = vpop.f32.mrb[51].mxu1 }
 0x390   :  { %v18448_v14 = vpop.f32.mrb[51].mxu0  ;;  %v16121_v29 = vld [vmem:[#allocation2 + $0x98] ss:$12 sps:$4 sm:$0xff]  }
 0x391   :  { %13968 = vmatmul.mubr.msk.bf16.vlgmr.msra.gmra.mrb[72].mxu1 %vm177_vm2, %v19419_v3 }
 0x392   :  { %12545 = vmatmul.mubr.msk.bf16.vlgmr.msra.gmra.mrb[72].mxu0 %vm177_vm2, %v19419_v3  ;;  %13971 = vmatprep.mubr.msk.bf16.mxu1 %vm16768_vm0, %v19304_v17 }
 0x393   :  { %5378 = vmatpush1.bf16.msra.mxu0 %v16115_v57  ;;  %5250 = vmatprep.mubr.bf16.mxu0 %v19308_v0  ;;  %v18516_v57 = vld [vmem:[%s19158_s0 + $0x60] sm:$0xff]  }
 0x394   :  { %v18457_v62 = vpop.f32.mrb[52].mxu1  ;;  %12560 = vmatprep.subr.msk.bf16.mxu0 %vm187_vm1, %v16116_v44  ;;  %13980 = vmatpush3.bf16.msra.mxu1 %v16117_v54  ;;  %v19442_v44 = vld [vmem:[#allocation26_spill] sm:$0xff]  ;;  %v19443_v54 = vld [vmem:[#allocation27_spill] sm:$0xff] }
 0x395   :  { %v18460_v19 = vpop.f32.mrb[52].mxu0  ;;  %v13829_v24 = vpop.f32.mrb[53].mxu1  ;;  %13981 = vmatprep.subr.bf16.mxu1 %v19304_v17 }
 0x396   :  { %v18463_v56 = vpop.f32.mrb[53].mxu0  ;;  %v18465_v49 = vpop.f32.mrb[54].mxu1  ;;  %v16122_v24 = vld [vmem:[#allocation2 + $0x34] ss:$12 sps:$4 sm:$0xff]  }
 0x397   :  { %v18467_v41 = vpop.f32.mrb[54].mxu0  ;;  %v13830_v26 = vpop.f32.mrb[55].mxu1  ;;  %5380 = vmatpush1.bf16.msra.mxu0 %v19436_v34  ;;  %v16123_v34 = vld [vmem:[#allocation2 + $0x30] ss:$12 sps:$4 sm:$0xff]  }
 0x398   :  { %v18470_v27 = vpop.f32.mrb[55].mxu0  ;;  %13982 = vmatpush3.bf16.msra.mxu1 %v19437_v16  ;;  %5515 = vmatprep.subr.bf16.mxu0 %v16118_v55  ;;  %v18532_v26 = vld [vmem:[%s19158_s0 + $0x68] sm:$0xff]   ;;  %v16125_v55 = vld [vmem:[#allocation2 + $0x38] ss:$12 sps:$4 sm:$0xff]  }
 0x399   :  { %13972 = vmatmul.mubr.msk.bf16.gmra.mrb[76].mxu1 %vm177_vm2, %v19423_v22  ;;  %13995 = vmatprep.subr.bf16.mxu1 %v19304_v17  ;;  %v16124_v16 = vld [vmem:[#allocation2 + $0x4c] ss:$12 sps:$4 sm:$0x3f]  }
 0x39a   :  { %12546 = vmatmul.mubr.msk.bf16.gmra.mrb[76].mxu0 %vm177_vm2, %v19423_v22  ;;  %13975 = vmatprep.mubr.msk.bf16.mxu1 %vm16768_vm0, %v19304_v17 }
 0x39b   :  { %5260 = vmatprep.mubr.bf16.mxu0 %v19308_v0 }
 0x39c   :  { %v18481_v1 = vpop.f32.mrb[56].mxu1 }
 0x39d   :  { %v18483_v36 = vpop.f32.mrb[56].mxu0  ;;  %v13833_v53 = vpop.f32.mrb[57].mxu1 }
 0x39e   :  { %v18485_v30 = vpop.f32.mrb[57].mxu0  ;;  %v18487_v13 = vpop.f32.mrb[58].mxu1  ;;  %v19444_v53 = vld [vmem:[#allocation28_spill] sm:$0xff] }
 0x39f   :  { %19438 = vst [vmem:[#allocation58_spill] sm:$0xff] %v18485_v30  ;;  %19439 = vst [vmem:[#allocation59_spill] sm:$0xff] %v18487_v13  ;;  %v18489_v8 = vpop.f32.mrb[58].mxu0  ;;  %v13834_v43 = vpop.f32.mrb[59].mxu1 }
 0x3a0   :  { %19440 = vst [vmem:[#allocation60_spill] sm:$0xff] %v18489_v8  ;;  %v18491_v21 = vpop.f32.mrb[59].mxu0  ;;  %v19445_v43 = vld [vmem:[#allocation29_spill] sm:$0xff] }
 0x3a1   :  { %19441 = vst [vmem:[#allocation61_spill] sm:$0xff] %v18491_v21  ;;  %13976 = vmatmul.mubr.msk.bf16.gmra.mrb[80].mxu1 %vm177_vm2, %v19424_v25 }
 0x3a2   :  { %12547 = vmatmul.mubr.msk.bf16.gmra.mrb[80].mxu0 %vm177_vm2, %v19424_v25  ;;  %13983 = vmatprep.mubr.msk.bf16.mxu1 %vm16768_vm0, %v19304_v17 }
 0x3a3   :  { %5409 = vmatprep.mubr.bf16.mxu0 %v19308_v0 }
 0x3a9   :  { %13984 = vmatmul.mubr.msk.bf16.vlgmr.msra.gmra.mrb[72].mxu1 %vm177_vm2, %v18503_v37 }
 0x3aa   :  { %12561 = vmatmul.mubr.msk.bf16.vlgmr.msra.gmra.mrb[72].mxu0 %vm177_vm2, %v18503_v37  ;;  %13987 = vmatprep.mubr.msk.bf16.mxu1 %vm16768_vm0, %v19304_v17 }
 0x3ab   :  { %5516 = vmatpush1.bf16.msra.mxu0 %v16119_v42  ;;  %5419 = vmatprep.mubr.bf16.mxu0 %v19308_v0  ;;  %v16126_v42 = vld [vmem:[#allocation2 + $0xf4] ss:$12 sps:$4 sm:$0xff]  }
 0x3ac   :  { %12567 = vmatprep.subr.msk.bf16.mxu0 %vm187_vm1, %v16120_v5  ;;  %13996 = vmatpush3.bf16.msra.mxu1 %v16121_v29  ;;  %v19446_v5 = vld [vmem:[#allocation30_spill] sm:$0xff]  ;;  %v19447_v29 = vld [vmem:[#allocation31_spill] sm:$0xff] }
 0x3ad   :  { %13997 = vmatprep.subr.bf16.mxu1 %v19304_v17 }
 0x3af   :  { %5518 = vmatpush1.bf16.msra.mxu0 %v19442_v44  ;;  %v16130_v44 = vld [vmem:[#allocation2 + $0x154] ss:$12 sps:$4 sm:$0xff]  }
 0x3b0   :  { %13998 = vmatpush3.bf16.msra.mxu1 %v19443_v54  ;;  %5635 = vmatprep.subr.bf16.mxu0 %v16122_v24  ;;  %v19448_v54 = vld [vmem:[#allocation32_spill] sm:$0xff]  ;;  %v19449_v24 = vld [vmem:[#allocation33_spill] sm:$0xff] }
 0x3b1   :  { %13988 = vmatmul.mubr.msk.bf16.gmra.mrb[76].mxu1 %vm177_vm2, %v18516_v57  ;;  %14011 = vmatprep.subr.bf16.mxu1 %v19304_v17 }
 0x3b2   :  { %12562 = vmatmul.mubr.msk.bf16.gmra.mrb[76].mxu0 %vm177_vm2, %v18516_v57  ;;  %13991 = vmatprep.mubr.msk.bf16.mxu1 %vm16768_vm0, %v19304_v17 }
 0x3b3   :  { %5429 = vmatprep.mubr.bf16.mxu0 %v19308_v0 }
 0x3b9   :  { %13992 = vmatmul.mubr.msk.bf16.gmra.mrb[80].mxu1 %vm177_vm2, %v18532_v26 }
 0x3ba   :  { %12563 = vmatmul.mubr.msk.bf16.gmra.mrb[80].mxu0 %vm177_vm2, %v18532_v26  ;;  %13999 = vmatprep.mubr.msk.bf16.mxu1 %vm16768_vm0, %v19304_v17 }
 0x3bb   :  { %5547 = vmatprep.mubr.bf16.mxu0 %v19308_v0 }
 0x3c1   :  { %14000 = vmatmul.mubr.msk.bf16.vlgmr.msra.gmra.mrb[84].mxu1 %vm177_vm2, %v19425_v40 }
 0x3c2   :  { %12568 = vmatmul.mubr.msk.bf16.vlgmr.msra.gmra.mrb[84].mxu0 %vm177_vm2, %v19425_v40  ;;  %14003 = vmatprep.mubr.msk.bf16.mxu1 %vm16768_vm0, %v19304_v17  ;;  %v16127_v40 = vld [vmem:[#allocation2 + $0xf0] ss:$12 sps:$4 sm:$0xff]  }
 0x3c3   :  { %5636 = vmatpush1.bf16.msra.mxu0 %v16123_v34  ;;  %5557 = vmatprep.mubr.bf16.mxu0 %v19308_v0  ;;  %v16134_v34 = vld [vmem:[#allocation2 + $0x1b4] ss:$12 sps:$4 sm:$0xff]  }
 0x3c4   :  { %12574 = vmatprep.subr.msk.bf16.mxu0 %vm187_vm1, %v16124_v16  ;;  %14012 = vmatpush3.bf16.msra.mxu1 %v16125_v55 }
 0x3c5   :  { %14013 = vmatprep.subr.bf16.mxu1 %v19304_v17 }
 0x3c7   :  { %5638 = vmatpush1.bf16.msra.mxu0 %v19444_v53  ;;  %v15262_v53 = vld [vmem:[#allocation6 + $0x320] ss:$8 sps:$4 sm:$0xff]  }
 0x3c8   :  { %14014 = vmatpush3.bf16.msra.mxu1 %v19445_v43  ;;  %5755 = vmatprep.subr.bf16.mxu0 %v16126_v42 }
 0x3c9   :  { %14004 = vmatmul.mubr.msk.bf16.gmra.mrb[88].mxu1 %vm177_vm2, %v19428_v39  ;;  %14027 = vmatprep.subr.bf16.mxu1 %v19304_v17 }
 0x3ca   :  { %12569 = vmatmul.mubr.msk.bf16.gmra.mrb[88].mxu0 %vm177_vm2, %v19428_v39  ;;  %14007 = vmatprep.mubr.msk.bf16.mxu1 %vm16768_vm0, %v19304_v17  ;;  %v16128_v39 = vld [vmem:[#allocation2 + $0x10c] ss:$12 sps:$4 sm:$0x3f]  }
 0x3cb   :  { %5567 = vmatprep.mubr.bf16.mxu0 %v19308_v0 }
 0x3d1   :  { %14008 = vmatmul.mubr.msk.bf16.gmra.mrb[92].mxu1 %vm177_vm2, %v18362_v11 }
 0x3d2   :  { %12570 = vmatmul.mubr.msk.bf16.gmra.mrb[92].mxu0 %vm177_vm2, %v18362_v11  ;;  %14015 = vmatprep.mubr.msk.bf16.mxu1 %vm16768_vm0, %v19304_v17  ;;  %v16129_v11 = vld [vmem:[#allocation2 + $0xf8] ss:$12 sps:$4 sm:$0xff]  }
 0x3d3   :  { %5667 = vmatprep.mubr.bf16.mxu0 %v19308_v0 }
 0x3d9   :  { %14016 = vmatmul.mubr.msk.bf16.vlgmr.msra.gmra.mrb[84].mxu1 %vm177_vm2, %v19429_v10 }
 0x3da   :  { %12575 = vmatmul.mubr.msk.bf16.vlgmr.msra.gmra.mrb[84].mxu0 %vm177_vm2, %v19429_v10  ;;  %14019 = vmatprep.mubr.msk.bf16.mxu1 %vm16768_vm0, %v19304_v17  ;;  %v16131_v10 = vld [vmem:[#allocation2 + $0x150] ss:$12 sps:$4 sm:$0xff]  }
 0x3db   :  { %5756 = vmatpush1.bf16.msra.mxu0 %v16127_v40  ;;  %5677 = vmatprep.mubr.bf16.mxu0 %v19308_v0  ;;  %v15264_v40 = vld [vmem:[#allocation6 + $0x324] ss:$8 sps:$4 sm:$0xff]  }
 0x3dc   :  { %12581 = vmatprep.subr.msk.bf16.mxu0 %vm187_vm1, %v16128_v39  ;;  %14028 = vmatpush3.bf16.msra.mxu1 %v16129_v11 }
 0x3dd   :  { %14029 = vmatprep.subr.bf16.mxu1 %v19304_v17 }
 0x3df   :  { %5758 = vmatpush1.bf16.msra.mxu0 %v19446_v5 }
 0x3e0   :  { %14030 = vmatpush3.bf16.msra.mxu1 %v19447_v29  ;;  %5893 = vmatprep.subr.bf16.mxu0 %v16130_v44  ;;  %v15258_v44 = vld [vmem:[#allocation6 + $0x314] ss:$8 sps:$4 sm:$0xff]  }
 0x3e1   :  { %14020 = vmatmul.mubr.msk.bf16.gmra.mrb[88].mxu1 %vm177_vm2, %v19432_v15  ;;  %14043 = vmatprep.subr.bf16.mxu1 %v19304_v17 }
 0x3e2   :  { %12576 = vmatmul.mubr.msk.bf16.gmra.mrb[88].mxu0 %vm177_vm2, %v19432_v15  ;;  %14023 = vmatprep.mubr.msk.bf16.mxu1 %vm16768_vm0, %v19304_v17  ;;  %v16132_v15 = vld [vmem:[#allocation2 + $0x16c] ss:$12 sps:$4 sm:$0x3f]  }
 0x3e3   :  { %5687 = vmatprep.mubr.bf16.mxu0 %v19308_v0 }
 0x3e9   :  { %14024 = vmatmul.mubr.msk.bf16.gmra.mrb[92].mxu1 %vm177_vm2, %v19433_v6 }
 0x3ea   :  { %12577 = vmatmul.mubr.msk.bf16.gmra.mrb[92].mxu0 %vm177_vm2, %v19433_v6  ;;  %14031 = vmatprep.mubr.msk.bf16.mxu1 %vm16768_vm0, %v19304_v17  ;;  %v16133_v6 = vld [vmem:[#allocation2 + $0x158] ss:$12 sps:$4 sm:$0xff]  }
 0x3eb   :  { %5787 = vmatprep.mubr.bf16.mxu0 %v19308_v0 }
 0x3f1   :  { %14032 = vmatmul.mubr.msk.bf16.vlgmr.msra.gmra.mrb[84].mxu1 %vm177_vm2, %v18400_v2 }
 0x3f2   :  { %12582 = vmatmul.mubr.msk.bf16.vlgmr.msra.gmra.mrb[84].mxu0 %vm177_vm2, %v18400_v2  ;;  %14035 = vmatprep.mubr.msk.bf16.mxu1 %vm16768_vm0, %v19304_v17 }
 0x3f3   :  { %5894 = vmatpush1.bf16.msra.mxu0 %v16131_v10  ;;  %5797 = vmatprep.mubr.bf16.mxu0 %v19308_v0 }
 0x3f4   :  { %12588 = vmatprep.subr.msk.bf16.mxu0 %vm187_vm1, %v16132_v15  ;;  %14044 = vmatpush3.bf16.msra.mxu1 %v16133_v6 }
 0x3f5   :  { %14045 = vmatprep.subr.bf16.mxu1 %v19304_v17 }
 0x3f7   :  { %5896 = vmatpush1.bf16.msra.mxu0 %v19448_v54 }
 0x3f8   :  { %14046 = vmatpush3.bf16.msra.mxu1 %v19449_v24  ;;  %6031 = vmatprep.subr.bf16.mxu0 %v16134_v34 }
 0x3f9   :  { %14036 = vmatmul.mubr.msk.bf16.gmra.mrb[88].mxu1 %vm177_vm2, %v18416_v23  ;;  %14059 = vmatprep.subr.bf16.mxu1 %v19304_v17 }
 0x3fa   :  { %12583 = vmatmul.mubr.msk.bf16.gmra.mrb[88].mxu0 %vm177_vm2, %v18416_v23  ;;  %14039 = vmatprep.mubr.msk.bf16.mxu1 %vm16768_vm0, %v19304_v17  ;;  %v15265_v23 = vld [vmem:[#allocation6 + $0x4a0] ss:$8 sps:$4 sm:$0xff]  }
 0x3fb   :  { %5807 = vmatprep.mubr.bf16.mxu0 %v19308_v0 }
 0x401   :  { %14040 = vmatmul.mubr.msk.bf16.gmra.mrb[92].mxu1 %vm177_vm2, %v18429_v38 }
 0x402   :  { %12584 = vmatmul.mubr.msk.bf16.gmra.mrb[92].mxu0 %vm177_vm2, %v18429_v38  ;;  %14047 = vmatprep.mubr.msk.bf16.mxu1 %vm16768_vm0, %v19304_v17  ;;  %v15267_v38 = vld [vmem:[#allocation6 + $0x4a4] ss:$8 sps:$4 sm:$0xff]  }
 0x403   :  { %5925 = vmatprep.mubr.bf16.mxu0 %v19308_v0 }
 0x404   :  { %v18619_v2 = vpop.f32.mrb[60].mxu1 }
 0x405   :  { %v18623_v16 = vpop.f32.mrb[60].mxu0  ;;  %v13905_v55 = vpop.f32.mrb[61].mxu1 }
 0x406   :  { %v18627_v43 = vpop.f32.mrb[61].mxu0  ;;  %v18629_v42 = vpop.f32.mrb[62].mxu1 }
 0x407   :  { %v18635_v39 = vpop.f32.mrb[62].mxu0  ;;  %v13906_v11 = vpop.f32.mrb[63].mxu1 }
 0x408   :  { %v18639_v29 = vpop.f32.mrb[63].mxu0  ;;  %v15259_v11 = vld [vmem:[#allocation6 + $0x490] ss:$8 sps:$4 sm:$0xff]  }
 0x409   :  { %14048 = vmatmul.mubr.msk.bf16.vlgmr.msra.gmra.mrb[84].mxu1 %vm177_vm2, %v19419_v3 }
 0x40a   :  { %12589 = vmatmul.mubr.msk.bf16.vlgmr.msra.gmra.mrb[84].mxu0 %vm177_vm2, %v19419_v3  ;;  %14051 = vmatprep.mubr.msk.bf16.mxu1 %vm16768_vm0, %v19304_v17 }
 0x40b   :  { %6032 = vmatpush1.bf16.msra.mxu0 %v18204_v47  ;;  %5935 = vmatprep.mubr.bf16.mxu0 %v19308_v0  ;;  %v15252_v47 = vld [vmem:[#allocation6 + $0x304] ss:$8 sps:$4 sm:$0xff]  }
 0x40c   :  { %v18651_v10 = vpop.f32.mrb[64].mxu1  ;;  %12595 = vmatprep.subr.msk.bf16.mxu0 %vm187_vm1, %v18209_v52  ;;  %14060 = vmatpush3.bf16.msra.mxu1 %v18213_v28  ;;  %v15255_v28 = vld [vmem:[#allocation6 + $0x484] ss:$8 sps:$4 sm:$0xff]  }
 0x40d   :  { %v18658_v6 = vpop.f32.mrb[64].mxu0  ;;  %v13909_v3 = vpop.f32.mrb[65].mxu1  ;;  %14061 = vmatprep.subr.bf16.mxu1 %v19304_v17 }
 0x40e   :  { %v18663_v54 = vpop.f32.mrb[65].mxu0  ;;  %v18665_v24 = vpop.f32.mrb[66].mxu1 }
 0x40f   :  { %v18671_v34 = vpop.f32.mrb[66].mxu0  ;;  %v13910_v55 = vpop.f32.mrb[67].mxu1  ;;  %6034 = vmatpush1.bf16.msra.mxu0 %v17233_v45 }
 0x410   :  { %v18676_v3 = vpop.f32.mrb[67].mxu0  ;;  %14062 = vmatpush3.bf16.msra.mxu1 %v17238_v46  ;;  %6605 = vmatprep.subr.bf16.mxu0 %v15252_v47  ;;  %v15253_v47 = vld [vmem:[#allocation6 + $0x480] ss:$8 sps:$4 sm:$0xff]   ;;  %v15261_v46 = vld [vmem:[#allocation6 + $0x494] ss:$8 sps:$4 sm:$0xff]  }
 0x411   :  { %14052 = vmatmul.mubr.msk.bf16.gmra.mrb[88].mxu1 %vm177_vm2, %v19423_v22  ;;  %8665 = vmatprep.subr.bf16.mxu1 %v15255_v28 }
 0x412   :  { %12590 = vmatmul.mubr.msk.bf16.gmra.mrb[88].mxu0 %vm177_vm2, %v19423_v22  ;;  %14055 = vmatprep.mubr.msk.bf16.mxu1 %vm16768_vm0, %v19304_v17 }
 0x413   :  { %5945 = vmatprep.mubr.bf16.mxu0 %v19308_v0 }
 0x414   :  { %v18688_v45 = vpop.f32.mrb[68].mxu1 }
 0x415   :  { %v18692_v55 = vpop.f32.mrb[68].mxu0  ;;  %v13913_v15 = vpop.f32.mrb[69].mxu1 }
 0x416   :  { %v18696_v52 = vpop.f32.mrb[69].mxu0  ;;  %v18698_v22 = vpop.f32.mrb[70].mxu1 }
 0x417   :  { %19450 = vst [vmem:[#allocation62_spill] sm:$0xff] %v18696_v52  ;;  %19451 = vst [vmem:[#allocation41_spill] sm:$0xff] %v18698_v22  ;;  %v18704_v28 = vpop.f32.mrb[70].mxu0  ;;  %v13914_v5 = vpop.f32.mrb[71].mxu1 }
 0x418   :  { %19452 = vst [vmem:[#allocation63_spill] sm:$0xff] %v18704_v28  ;;  %v18708_v15 = vpop.f32.mrb[71].mxu0  ;;  %v15250_v5 = vld [vmem:[#allocation6 + $0x300] ss:$8 sps:$4 sm:$0xff]   ;;  %v19456_v28 = vmax.f32 %v18438_v48, %v18619_v2  ;;  %v19459_v48 = vmax.f32 %v18444_v60, %v18629_v42 }
 0x419   :  { %19453 = vst [vmem:[#allocation64_spill] sm:$0xff] %v18708_v15  ;;  %14056 = vmatmul.mubr.msk.bf16.gmra.mrb[92].mxu1 %vm177_vm2, %v19424_v25 }
 0x41a   :  { %12591 = vmatmul.mubr.msk.bf16.gmra.mrb[92].mxu0 %vm177_vm2, %v19424_v25  ;;  %14063 = vmatprep.mubr.msk.bf16.mxu1 %vm16768_vm0, %v19304_v17  ;;  %v15256_v25 = vld [vmem:[#allocation6 + $0x310] ss:$8 sps:$4 sm:$0xff]  }
 0x41b   :  { %6063 = vmatprep.mubr.bf16.mxu0 %v19308_v0 }
 0x421   :  { %14064 = vmatmul.mubr.msk.bf16.vlgmr.msra.gmra.mrb[84].mxu1 %vm177_vm2, %v18503_v37 }
 0x422   :  { %12596 = vmatmul.mubr.msk.bf16.vlgmr.msra.gmra.mrb[84].mxu0 %vm177_vm2, %v18503_v37  ;;  %14067 = vmatprep.mubr.msk.bf16.mxu1 %vm16768_vm0, %v19304_v17  ;;  %v15273_v37 = vld [vmem:[#allocation6 + $0x4b4] ss:$8 sps:$4 sm:$0xff]  }
 0x423   :  { %6073 = vmatprep.mubr.bf16.mxu0 %v19308_v0  ;;  %6606 = vmatpush1.bf16.msra.mxu0 %v15250_v5  ;;  %v15282_v5 = vld [vmem:[#allocation6 + $0x354] ss:$8 sps:$4 sm:$0xff]  }
 0x424   :  { %8666 = vmatpush1.bf16.msra.mxu1 %v15253_v47  ;;  %6607 = vmatprep.subr.bf16.mxu0 %v15258_v44  ;;  %v15268_v44 = vld [vmem:[#allocation6 + $0x330] ss:$8 sps:$4 sm:$0xff]   ;;  %v15274_v47 = vld [vmem:[#allocation6 + $0x340] ss:$8 sps:$4 sm:$0xff]  }
 0x425   :  { %8667 = vmatprep.subr.bf16.mxu1 %v15261_v46  ;;  %v15279_v46 = vld [vmem:[#allocation6 + $0x4c4] ss:$8 sps:$4 sm:$0xff]  }
 0x427   :  { %6608 = vmatpush1.bf16.msra.mxu0 %v15256_v25  ;;  %v15286_v25 = vld [vmem:[#allocation6 + $0x360] ss:$8 sps:$4 sm:$0xff]  }
 0x428   :  { %8668 = vmatpush1.bf16.msra.mxu1 %v15259_v11  ;;  %6609 = vmatprep.subr.bf16.mxu0 %v15264_v40  ;;  %v15271_v40 = vld [vmem:[#allocation6 + $0x4b0] ss:$8 sps:$4 sm:$0xff]   ;;  %v15276_v11 = vld [vmem:[#allocation6 + $0x344] ss:$8 sps:$4 sm:$0xff]  }
 0x429   :  { %14068 = vmatmul.mubr.msk.bf16.gmra.mrb[88].mxu1 %vm177_vm2, %v18516_v57  ;;  %8669 = vmatprep.subr.bf16.mxu1 %v15267_v38  ;;  %v15277_v38 = vld [vmem:[#allocation6 + $0x4c0] ss:$8 sps:$4 sm:$0xff]  }
 0x42a   :  { %12597 = vmatmul.mubr.msk.bf16.gmra.mrb[88].mxu0 %vm177_vm2, %v18516_v57  ;;  %14071 = vmatprep.mubr.msk.bf16.mxu1 %vm16768_vm0, %v19304_v17  ;;  %v15285_v17 = vld [vmem:[#allocation6 + $0x4d4] ss:$8 sps:$4 sm:$0xff]   ;;  %v15283_v57 = vld [vmem:[#allocation6 + $0x4d0] ss:$8 sps:$4 sm:$0xff]  }
 0x42b   :  { %6083 = vmatprep.mubr.bf16.mxu0 %v19308_v0  ;;  %6610 = vmatpush1.bf16.msra.mxu0 %v15262_v53  ;;  %v15291_v53 = vld [vmem:[#allocation6 + $0x4e4] ss:$8 sps:$4 sm:$0xff]  }
 0x42c   :  { %8670 = vmatpush1.bf16.msra.mxu1 %v15265_v23  ;;  %6611 = vmatprep.subr.bf16.mxu0 %v15270_v59  ;;  %v15280_v59 = vld [vmem:[#allocation6 + $0x350] ss:$8 sps:$4 sm:$0xff]   ;;  %v15288_v23 = vld [vmem:[#allocation6 + $0x364] ss:$8 sps:$4 sm:$0xff]  }
 0x42d   :  { %8671 = vmatprep.subr.bf16.mxu1 %v15273_v37  ;;  %v15289_v37 = vld [vmem:[#allocation6 + $0x4e0] ss:$8 sps:$4 sm:$0xff]  }
 0x42f   :  { %6612 = vmatpush1.bf16.msra.mxu0 %v15268_v44  ;;  %v15294_v44 = vld [vmem:[#allocation6 + $0x374] ss:$8 sps:$4 sm:$0xff]  }
 0x430   :  { %8672 = vmatpush1.bf16.msra.mxu1 %v15271_v40  ;;  %6613 = vmatprep.subr.bf16.mxu0 %v15276_v11  ;;  %v15297_v40 = vld [vmem:[#allocation6 + $0x4f4] ss:$8 sps:$4 sm:$0xff]   ;;  %v15292_v11 = vld [vmem:[#allocation6 + $0x370] ss:$8 sps:$4 sm:$0xff]  }
 0x431   :  { %14072 = vmatmul.mubr.msk.bf16.gmra.mrb[92].mxu1 %vm177_vm2, %v18532_v26  ;;  %8673 = vmatprep.subr.bf16.mxu1 %v15279_v46  ;;  %v15300_v46 = vld [vmem:[#allocation6 + $0x384] ss:$8 sps:$4 sm:$0xff]  }
 0x432   :  { %12598 = vmatmul.mubr.msk.bf16.gmra.mrb[92].mxu0 %vm177_vm2, %v18532_v26  ;;  %v15295_v26 = vld [vmem:[#allocation6 + $0x4f0] ss:$8 sps:$4 sm:$0xff]  }
 0x433   :  { %6614 = vmatpush1.bf16.msra.mxu0 %v15274_v47  ;;  %v15303_v47 = vld [vmem:[#allocation6 + $0x504] ss:$8 sps:$4 sm:$0xff]  }
 0x434   :  { %8674 = vmatpush1.bf16.msra.mxu1 %v15277_v38  ;;  %6615 = vmatprep.subr.bf16.mxu0 %v15282_v5  ;;  %v15298_v38 = vld [vmem:[#allocation6 + $0x380] ss:$8 sps:$4 sm:$0xff]  }
 0x435   :  { %8675 = vmatprep.subr.bf16.mxu1 %v15285_v17  ;;  %v15301_v5 = vld [vmem:[#allocation6 + $0x500] ss:$8 sps:$4 sm:$0xff]   ;;  %v15306_v17 = vld [vmem:[#allocation6 + $0x394] ss:$8 sps:$4 sm:$0xff]  }
 0x437   :  { %6616 = vmatpush1.bf16.msra.mxu0 %v15280_v59  ;;  %v15309_v59 = vld [vmem:[#allocation6 + $0x514] ss:$8 sps:$4 sm:$0xff]  }
 0x438   :  { %8676 = vmatpush1.bf16.msra.mxu1 %v15283_v57  ;;  %6617 = vmatprep.subr.bf16.mxu0 %v15288_v23  ;;  %v15304_v57 = vld [vmem:[#allocation6 + $0x390] ss:$8 sps:$4 sm:$0xff]  }
 0x439   :  { %8677 = vmatprep.subr.bf16.mxu1 %v15291_v53  ;;  %v15307_v23 = vld [vmem:[#allocation6 + $0x510] ss:$8 sps:$4 sm:$0xff]   ;;  %v15312_v53 = vld [vmem:[#allocation6 + $0x3a4] ss:$8 sps:$4 sm:$0xff]  }
 0x43b   :  { %6618 = vmatpush1.bf16.msra.mxu0 %v15286_v25  ;;  %v15315_v25 = vld [vmem:[#allocation6 + $0x524] ss:$8 sps:$4 sm:$0xff]  }
 0x43c   :  { %8678 = vmatpush1.bf16.msra.mxu1 %v15289_v37  ;;  %6619 = vmatprep.subr.bf16.mxu0 %v15294_v44  ;;  %v15310_v37 = vld [vmem:[#allocation6 + $0x3a0] ss:$8 sps:$4 sm:$0xff]  }
 0x43d   :  { %8679 = vmatprep.subr.bf16.mxu1 %v15297_v40  ;;  %v15313_v44 = vld [vmem:[#allocation6 + $0x520] ss:$8 sps:$4 sm:$0xff]   ;;  %v15318_v40 = vld [vmem:[#allocation6 + $0x3b4] ss:$8 sps:$4 sm:$0xff]  }
 0x43f   :  { %6620 = vmatpush1.bf16.msra.mxu0 %v15292_v11  ;;  %v15321_v11 = vld [vmem:[#allocation6 + $0x534] ss:$8 sps:$4 sm:$0xff]  }
 0x440   :  { %8680 = vmatpush1.bf16.msra.mxu1 %v15295_v26  ;;  %6621 = vmatprep.subr.bf16.mxu0 %v15300_v46  ;;  %v15316_v26 = vld [vmem:[#allocation6 + $0x3b0] ss:$8 sps:$4 sm:$0xff]  }
 0x441   :  { %8681 = vmatprep.subr.bf16.mxu1 %v15303_v47  ;;  %v15319_v46 = vld [vmem:[#allocation6 + $0x530] ss:$8 sps:$4 sm:$0xff]   ;;  %v15324_v47 = vld [vmem:[#allocation6 + $0x3c4] ss:$8 sps:$4 sm:$0xff]  }
 0x443   :  { %6622 = vmatpush1.bf16.msra.mxu0 %v15298_v38  ;;  %v15327_v38 = vld [vmem:[#allocation6 + $0x544] ss:$8 sps:$4 sm:$0xff]  }
 0x444   :  { %8682 = vmatpush1.bf16.msra.mxu1 %v15301_v5  ;;  %6623 = vmatprep.subr.bf16.mxu0 %v15306_v17  ;;  %v15322_v5 = vld [vmem:[#allocation6 + $0x3c0] ss:$8 sps:$4 sm:$0xff]  }
 0x445   :  { %8683 = vmatprep.subr.bf16.mxu1 %v15309_v59  ;;  %v15325_v17 = vld [vmem:[#allocation6 + $0x540] ss:$8 sps:$4 sm:$0xff]   ;;  %v15330_v59 = vld [vmem:[#allocation6 + $0x3d4] ss:$8 sps:$4 sm:$0xff]  }
 0x447   :  { %6624 = vmatpush1.bf16.msra.mxu0 %v15304_v57  ;;  %v15333_v57 = vld [vmem:[#allocation6 + $0x554] ss:$8 sps:$4 sm:$0xff]  }
 0x448   :  { %8684 = vmatpush1.bf16.msra.mxu1 %v15307_v23  ;;  %6625 = vmatprep.subr.bf16.mxu0 %v15312_v53  ;;  %v15328_v23 = vld [vmem:[#allocation6 + $0x3d0] ss:$8 sps:$4 sm:$0xff]  }
 0x449   :  { %8685 = vmatprep.subr.bf16.mxu1 %v15315_v25  ;;  %v15331_v53 = vld [vmem:[#allocation6 + $0x550] ss:$8 sps:$4 sm:$0xff]   ;;  %v15336_v25 = vld [vmem:[#allocation6 + $0x3e4] ss:$8 sps:$4 sm:$0xff]  }
 0x44b   :  { %6626 = vmatpush1.bf16.msra.mxu0 %v15310_v37  ;;  %v15339_v37 = vld [vmem:[#allocation6 + $0x564] ss:$8 sps:$4 sm:$0xff]  }
 0x44c   :  { %8686 = vmatpush1.bf16.msra.mxu1 %v15313_v44  ;;  %6627 = vmatprep.subr.bf16.mxu0 %v15318_v40  ;;  %v15334_v44 = vld [vmem:[#allocation6 + $0x3e0] ss:$8 sps:$4 sm:$0xff]  }
 0x44d   :  { %8687 = vmatprep.subr.bf16.mxu1 %v15321_v11  ;;  %v15337_v40 = vld [vmem:[#allocation6 + $0x560] ss:$8 sps:$4 sm:$0xff]  }
 0x44f   :  { %6628 = vmatpush1.bf16.msra.mxu0 %v15316_v26 }
 0x450   :  { %8688 = vmatpush1.bf16.msra.mxu1 %v15319_v46  ;;  %6629 = vmatprep.subr.bf16.mxu0 %v15324_v47 }
 0x451   :  { %8689 = vmatprep.subr.bf16.mxu1 %v15327_v38 }
 0x453   :  { %6630 = vmatpush1.bf16.msra.mxu0 %v15322_v5  ;;  %v15342_v5 = vld [vmem:[#allocation6 + $0x3f4] ss:$8 sps:$4 sm:$0xff]  }
 0x454   :  { %8690 = vmatpush1.bf16.msra.mxu1 %v15325_v17  ;;  %6631 = vmatprep.subr.bf16.mxu0 %v15330_v59  ;;  %v15345_v17 = vld [vmem:[#allocation6 + $0x574] ss:$8 sps:$4 sm:$0xff]  }
 0x455   :  { %8691 = vmatprep.subr.bf16.mxu1 %v15333_v57  ;;  %v15340_v57 = vld [vmem:[#allocation6 + $0x3f0] ss:$8 sps:$4 sm:$0xff]  }
 0x457   :  { %6632 = vmatpush1.bf16.msra.mxu0 %v15328_v23  ;;  %v15343_v23 = vld [vmem:[#allocation6 + $0x570] ss:$8 sps:$4 sm:$0xff]  }
 0x458   :  { %8692 = vmatpush1.bf16.msra.mxu1 %v15331_v53  ;;  %6633 = vmatprep.subr.bf16.mxu0 %v15336_v25  ;;  %v15351_v25 = vld [vmem:[#allocation6 + $0x584] ss:$8 sps:$4 sm:$0xff]  }
 0x459   :  { %8693 = vmatprep.subr.bf16.mxu1 %v15339_v37 }
 0x45b   :  { %6634 = vmatpush1.bf16.msra.mxu0 %v15334_v44 }
 0x45c   :  { %8694 = vmatpush1.bf16.msra.mxu1 %v15337_v40  ;;  %6635 = vmatprep.subr.bf16.mxu0 %v15342_v5 }
 0x45d   :  { %8695 = vmatprep.subr.bf16.mxu1 %v15345_v17 }
 0x45f   :  { %6636 = vmatpush1.bf16.msra.mxu0 %v15340_v57 }
 0x460   :  { %8696 = vmatpush1.bf16.msra.mxu1 %v15343_v23  ;;  %6658 = vmatprep.subr.bf16.mxu0 %v15348_v51 }
 0x461   :  { %8718 = vmatprep.subr.bf16.mxu1 %v15351_v25 }
 0x47c   :  { %v5474_v11 = vpop.f32.mrb[72].mxu1 }
 0x47d   :  { %v5411_v26 = vpop.f32.mrb[72].mxu0  ;;  %v13985_v46 = vpop.f32.mrb[73].mxu1 }
 0x47e   :  { %v5413_v47 = vpop.f32.mrb[73].mxu0  ;;  %v5477_v38 = vpop.f32.mrb[74].mxu1 }
 0x47f   :  { %v5415_v61 = vpop.f32.mrb[74].mxu0  ;;  %v13986_v59 = vpop.f32.mrb[75].mxu1 }
 0x480   :  { %v5417_v53 = vpop.f32.mrb[75].mxu0 }
 0x484   :  { %v5482_v37 = vpop.f32.mrb[76].mxu1 }
 0x485   :  { %v5421_v44 = vpop.f32.mrb[76].mxu0  ;;  %v13989_v40 = vpop.f32.mrb[77].mxu1 }
 0x486   :  { %v18737_v46 = vpop.f32.mrb[77].mxu0  ;;  %v18739_v33 = vpop.f32.mrb[78].mxu1 }
 0x487   :  { %v18741_v7 = vpop.f32.mrb[78].mxu0  ;;  %v13990_v59 = vpop.f32.mrb[79].mxu1 }
 0x488   :  { %v18743_v18 = vpop.f32.mrb[79].mxu0 }
 0x48c   :  { %v18745_v5 = vpop.f32.mrb[80].mxu1 }
 0x48d   :  { %v18747_v17 = vpop.f32.mrb[80].mxu0  ;;  %v13993_v57 = vpop.f32.mrb[81].mxu1 }
 0x48e   :  { %v18749_v23 = vpop.f32.mrb[81].mxu0  ;;  %v18751_v51 = vpop.f32.mrb[82].mxu1 }
 0x48f   :  { %v18753_v25 = vpop.f32.mrb[82].mxu0  ;;  %v13994_v40 = vpop.f32.mrb[83].mxu1 }
 0x490   :  { %19454 = vst [vmem:[#allocation65_spill] sm:$0xff] %v18753_v25  ;;  %v18755_v35 = vpop.f32.mrb[83].mxu0  ;;  %v19457_v40 = vmax.f32 %v18440_v50, %v18623_v16 }
 0x491   :  { %19455 = vst [vmem:[#allocation45_spill] sm:$0xff] %v18755_v35 }
 0x4f4   :  { %v6128_v20 = vpop.f32.mrb[84].mxu1 }
 0x4f5   :  { %v6189_v58 = vmax.f32 %v5474_v11, %v6128_v20  ;;  %v6065_v32 = vpop.f32.mrb[84].mxu0  ;;  %v14065_v59 = vpop.f32.mrb[85].mxu1 }
 0x4f6   :  { %v6187_v0 = vmax.f32 %v5411_v26, %v6065_v32  ;;  %v6067_v15 = vpop.f32.mrb[85].mxu0  ;;  %v6131_v21 = vpop.f32.mrb[86].mxu1  ;;  %v19458_v32 = vmax.f32 %v18442_v4, %v18627_v43 }
 0x4f7   :  { %v6207_v57 = vmax.f32 %v19456_v28, %v6189_v58  ;;  %v6188_v8 = vmax.f32 %v5413_v47, %v6067_v15  ;;  %v6192_v22 = vmax.f32 %v5477_v38, %v6131_v21  ;;  %v6069_v13 = vpop.f32.mrb[86].mxu0  ;;  %v14066_v52 = vpop.f32.mrb[87].mxu1 }
 0x4f8   :  { %v6205_v30 = vmax.f32 %v19457_v40, %v6187_v0  ;;  %v6190_v35 = vmax.f32 %v5415_v61, %v6069_v13  ;;  %v6071_v25 = vpop.f32.mrb[87].mxu0  ;;  %v19460_v52 = vmax.f32 %v18446_v63, %v18635_v39  ;;  %v19461_v13 = vmax.f32 %v18448_v14, %v18639_v29 }
 0x4f9   :  { %v6225_v20 = vadd.f32 %v6207_v57, %v18162_v9  ;;  %v6206_v11 = vmax.f32 %v19458_v32, %v6188_v8  ;;  %v6210_v58 = vmax.f32 %v19459_v48, %v6192_v22  ;;  %v6191_v2 = vmax.f32 %v5417_v53, %v6071_v25 }
 0x4fa   :  { %v6223_v21 = vadd.f32 %v6205_v30, %v18167_v31  ;;  %v6208_v50 = vmax.f32 %v19460_v52, %v6190_v35  ;;  %v19462_v29 = vmax.f32 %v18457_v62, %v18651_v10  ;;  %v19463_v40 = vmax.f32 %v18460_v19, %v18658_v6 }
 0x4fb   :  { %v6224_v0 = vadd.f32 %v6206_v11, %v18179_v12  ;;  %v6228_v61 = vadd.f32 %v6210_v58, %v18162_v9  ;;  %v6209_v4 = vmax.f32 %v19461_v13, %v6191_v2  ;;  %v6243_v60 = vmax.f32 %v6225_v20, 0.0  ;;  %v15346_v2 = vld [vmem:[#allocation6 + $0x400] ss:$8 sps:$4 sm:$0xff]  }
 0x4fc   :  { %v6226_v8 = vadd.f32 %v6208_v50, %v18167_v31  ;;  %v6136_v16 = vpop.f32.mrb[88].mxu1  ;;  %v6241_v63 = vmax.f32 %v6223_v21, 0.0  ;;  %v19464_v10 = vmax.f32 %v18463_v56, %v18663_v54  ;;  %v15349_v21 = vld [vmem:[#allocation6 + $0x580] ss:$8 sps:$4 sm:$0xff]   ;;  %v15354_v50 = vld [vmem:[#allocation6 + $0x414] ss:$8 sps:$4 sm:$0xff]   ;;  %v19467_v56 = vmax.f32 %v18470_v27, %v18676_v3 }
 0x4fd   :  { %v6246_v43 = vmax.f32 %v6228_v61, 0.0  ;;  %v6227_v42 = vadd.f32 %v6209_v4, %v18179_v12  ;;  %v6195_v30 = vmax.f32 %v5482_v37, %v6136_v16  ;;  %v6075_v22 = vpop.f32.mrb[88].mxu0  ;;  %v14069_v28 = vpop.f32.mrb[89].mxu1  ;;  %v6242_v35 = vmax.f32 %v6224_v0, 0.0  ;;  %v15357_v0 = vld [vmem:[#allocation6 + $0x594] ss:$8 sps:$4 sm:$0xff]  }
 0x4fe   :  { %v6244_v39 = vmax.f32 %v6226_v8, 0.0  ;;  %v6193_v15 = vmax.f32 %v5421_v44, %v6075_v22  ;;  %v6077_v26 = vpop.f32.mrb[89].mxu0  ;;  %v6139_v47 = vpop.f32.mrb[90].mxu1 }
 0x4ff   :  { %v18781_v38 = vpack.c.bf16 %v6246_v43, %v6243_v60  ;;  %v6245_v14 = vmax.f32 %v6227_v42, 0.0  ;;  %v6213_v53 = vmax.f32 %v19462_v29, %v6195_v30  ;;  %v6194_v25 = vmax.f32 %v18737_v46, %v6077_v26  ;;  %v6079_v59 = vpop.f32.mrb[90].mxu0  ;;  %v14070_v57 = vpop.f32.mrb[91].mxu1  ;;  %v15360_v60 = vld [vmem:[#allocation6 + $0x424] ss:$8 sps:$4 sm:$0xff]  }
 0x500   :  { %v18787_v37 = vpack.c.bf16 %v6244_v39, %v6241_v63  ;;  %v6211_v20 = vmax.f32 %v19463_v40, %v6193_v15  ;;  %v6198_v44 = vmax.f32 %v18739_v33, %v6139_v47  ;;  %v6196_v32 = vmax.f32 %v18741_v7, %v6079_v59  ;;  %v6081_v11 = vpop.f32.mrb[91].mxu0  ;;  %v19470_v59 = vld [vmem:[#allocation65_spill] sm:$0xff] }
 0x501   :  { %v18794_v48 = vpack.c.bf16 %v6245_v14, %v6242_v35  ;;  %v6231_v62 = vadd.f32 %v6213_v53, %v18162_v9  ;;  %v6212_v46 = vmax.f32 %v19464_v10, %v6194_v25  ;;  %v6197_v58 = vmax.f32 %v18743_v18, %v6081_v11  ;;  %v19474_v11 = vld [vmem:[#allocation59_spill] sm:$0xff] }
 0x502   :  { %v6229_v19 = vadd.f32 %v6211_v20, %v18167_v31  ;;  %v19465_v33 = vmax.f32 %v18465_v49, %v18665_v24  ;;  %v19466_v7 = vmax.f32 %v18467_v41, %v18671_v34  ;;  %v15352_v41 = vld [vmem:[#allocation6 + $0x410] ss:$8 sps:$4 sm:$0xff]   ;;  %v19468_v39 = vmax.f32 %v18481_v1, %v18688_v45  ;;  %v15363_v20 = vld [vmem:[#allocation6 + $0x5a4] ss:$8 sps:$4 sm:$0xff]  }
 0x503   :  { %v6230_v61 = vadd.f32 %v6212_v46, %v18179_v12  ;;  %v6215_v18 = vmax.f32 %v19467_v56, %v6197_v58  ;;  %6637 = vmatprep.mubr.bf16.mxu0 %v18794_v48  ;;  %8697 = vmatprep.mubr.bf16.mxu1 %v18794_v48  ;;  %v15355_v34 = vld [vmem:[#allocation6 + $0x590] ss:$8 sps:$4 sm:$0xff]   ;;  %v6249_v13 = vmax.f32 %v6231_v62, 0.0  ;;  %v15358_v58 = vld [vmem:[#allocation6 + $0x420] ss:$8 sps:$4 sm:$0xff]  }
 0x504   :  { %v6216_v6 = vmax.f32 %v19465_v33, %v6198_v44  ;;  %v6214_v52 = vmax.f32 %v19466_v7, %v6196_v32  ;;  %v6144_v24 = vpop.f32.mrb[92].mxu1  ;;  %6638 = vmatmul.mubr.bf16.vlgmr.msra.gmra.mrb[96].mxu0 %v18787_v37  ;;  %8698 = vmatmul.mubr.bf16.vlgmr.msra.gmra.mrb[96].mxu1 %v18787_v37  ;;  %v6247_v4 = vmax.f32 %v6229_v19, 0.0  ;;  %v19475_v62 = vld [vmem:[#allocation41_spill] sm:$0xff]  ;;  %v15361_v7 = vld [vmem:[#allocation6 + $0x5a0] ss:$8 sps:$4 sm:$0xff]  }
 0x505   :  { %v6233_v27 = vadd.f32 %v6215_v18, %v18179_v12  ;;  %v6201_v3 = vmax.f32 %v18745_v5, %v6144_v24  ;;  %6659 = vmatpush1.bf16.msra.mxu0 %v15346_v2  ;;  %8719 = vmatpush1.bf16.msra.mxu1 %v15349_v21  ;;  %v6085_v8 = vpop.f32.mrb[92].mxu0  ;;  %v14073_v16 = vpop.f32.mrb[93].mxu1  ;;  %v6248_v43 = vmax.f32 %v6230_v61, 0.0  ;;  %v19476_v10 = vmax.f32 %v19474_v11, %v19475_v62  ;;  %v19478_v2 = vld [vmem:[#allocation63_spill] sm:$0xff]  ;;  %v19480_v33 = vld [vmem:[#allocation45_spill] sm:$0xff] }
 0x506   :  { %v6234_v54 = vadd.f32 %v6216_v6, %v18162_v9  ;;  %v6232_v49 = vadd.f32 %v6214_v52, %v18167_v31  ;;  %v6199_v22 = vmax.f32 %v18747_v17, %v6085_v8  ;;  %v6087_v28 = vpop.f32.mrb[93].mxu0  ;;  %v6147_v63 = vpop.f32.mrb[94].mxu1  ;;  %6660 = vmatprep.subr.bf16.mxu0 %v15354_v50  ;;  %8720 = vmatprep.subr.bf16.mxu1 %v15357_v0  ;;  %v15366_v52 = vld [vmem:[#allocation6 + $0x434] ss:$8 sps:$4 sm:$0xff]   ;;  %v19481_v18 = vld [vmem:[#allocation61_spill] sm:$0xff] }
 0x507   :  { %v6251_v35 = vmax.f32 %v6233_v27, 0.0  ;;  %v6219_v15 = vmax.f32 %v19468_v39, %v6201_v3  ;;  %v6200_v5 = vmax.f32 %v18749_v23, %v6087_v28  ;;  %v6204_v26 = vmax.f32 %v18751_v51, %v6147_v63  ;;  %v6089_v47 = vpop.f32.mrb[94].mxu0  ;;  %v14074_v14 = vpop.f32.mrb[95].mxu1  ;;  %v19471_v23 = vld [vmem:[#allocation58_spill] sm:$0xff]  ;;  %v15372_v3 = vld [vmem:[#allocation6 + $0x444] ss:$8 sps:$4 sm:$0xff]  }
 0x508   :  { %v6252_v42 = vmax.f32 %v6234_v54, 0.0  ;;  %v6250_v30 = vmax.f32 %v6232_v49, 0.0  ;;  %v19469_v17 = vmax.f32 %v18483_v36, %v18692_v55  ;;  %v6202_v57 = vmax.f32 %v19470_v59, %v6089_v47  ;;  %v6091_v40 = vpop.f32.mrb[95].mxu0  ;;  %v19472_v51 = vld [vmem:[#allocation62_spill] sm:$0xff]  ;;  %v19477_v55 = vld [vmem:[#allocation60_spill] sm:$0xff] }
 0x509   :  { %v18834_v1 = vpack.c.bf16 %v6251_v35, %v6248_v43  ;;  %v6237_v45 = vadd.f32 %v6219_v15, %v18162_v9  ;;  %v19473_v44 = vmax.f32 %v19471_v23, %v19472_v51  ;;  %v6222_v46 = vmax.f32 %v19476_v10, %v6204_v26  ;;  %6661 = vmatpush1.bf16.msra.mxu0 %v15352_v41  ;;  %v15369_v0 = vld [vmem:[#allocation6 + $0x5b4] ss:$8 sps:$4 sm:$0xff]   ;;  %v19482_v54 = vld [vmem:[#allocation64_spill] sm:$0xff]  ;;  %v15376_v39 = vld [vmem:[#allocation6 + $0x450] ss:$8 sps:$4 sm:$0xff]  }
 0x50a   :  { %v18826_v29 = vpack.c.bf16 %v6252_v42, %v6249_v13  ;;  %v18828_v53 = vpack.c.bf16 %v6250_v30, %v6247_v4  ;;  %v6217_v25 = vmax.f32 %v19469_v17, %v6199_v22  ;;  %v19479_v21 = vmax.f32 %v19477_v55, %v19478_v2  ;;  %8721 = vmatpush1.bf16.msra.mxu1 %v15355_v34  ;;  %v15375_v16 = vld [vmem:[#allocation6 + $0x5c4] ss:$8 sps:$4 sm:$0xff]   ;;  %v15370_v22 = vld [vmem:[#allocation6 + $0x440] ss:$8 sps:$4 sm:$0xff]   ;;  %v15378_v63 = vld [vmem:[#allocation6 + $0x454] ss:$8 sps:$4 sm:$0xff]  }
 0x50b   :  { %v6218_v32 = vmax.f32 %v19473_v44, %v6200_v5  ;;  %v6203_v6 = vmax.f32 %v19480_v33, %v6091_v40  ;;  %6662 = vmatprep.subr.bf16.mxu0 %v15360_v60  ;;  %v6240_v50 = vadd.f32 %v6222_v46, %v18162_v9  ;;  %6647 = vmatprep.mubr.bf16.mxu0 %v18834_v1  ;;  %v6255_v41 = vmax.f32 %v6237_v45, 0.0  ;;  %v15364_v9 = vld [vmem:[#allocation6 + $0x430] ss:$8 sps:$4 sm:$0xff]   ;;  %v15381_v35 = vld [vmem:[#allocation6 + $0x5d4] ss:$8 sps:$4 sm:$0xff]  }
 0x50c   :  { %v6235_v36 = vadd.f32 %v6217_v25, %v18167_v31  ;;  %v6220_v19 = vmax.f32 %v19479_v21, %v6202_v57  ;;  %8707 = vmatprep.mubr.bf16.mxu1 %v18834_v1  ;;  %v19483_v49 = vmax.f32 %v19481_v18, %v19482_v54  ;;  %8722 = vmatprep.subr.bf16.mxu1 %v15363_v20  ;;  %v19484_v60 = vmov 0   ;;  %v15379_v15 = vld [vmem:[#allocation6 + $0x5d0] ss:$8 sps:$4 sm:$0xff]   ;;  %v15384_v5 = vld [vmem:[#allocation6 + $0x464] ss:$8 sps:$4 sm:$0xff]  }
 0x50d   :  { %v6236_v61 = vadd.f32 %v6218_v32, %v18179_v12  ;;  %6648 = vmatmul.mubr.bf16.gmra.mrb[100].mxu0 %v18828_v53  ;;  %v6258_v34 = vmax.f32 %v6240_v50, 0.0  ;;  %8708 = vmatmul.mubr.bf16.gmra.mrb[100].mxu1 %v18828_v53  ;;  %v15387_v26 = vld [vmem:[#allocation6 + $0x5e4] ss:$8 sps:$4 sm:$0xff]   ;;  %v15382_v47 = vld [vmem:[#allocation6 + $0x460] ss:$8 sps:$4 sm:$0xff]   ;;  %v19485_v21 = vld [vmem:[#allocation50_spill] sm:$0xff] }
 0x50e   :  { %v6238_v56 = vadd.f32 %v6220_v19, %v18167_v31  ;;  %v6221_v24 = vmax.f32 %v19483_v49, %v6203_v6  ;;  %6663 = vmatpush1.bf16.msra.mxu0 %v15358_v58  ;;  %v6253_v13 = vmax.f32 %v6235_v36, 0.0  ;;  %8723 = vmatpush1.bf16.msra.mxu1 %v15361_v7  ;;  %v15367_v31 = vld [vmem:[#allocation6 + $0x5b0] ss:$8 sps:$4 sm:$0xff]   ;;  %v15385_v14 = vld [vmem:[#allocation6 + $0x5e0] ss:$8 sps:$4 sm:$0xff]  }
 0x50f   :  { %6664 = vmatprep.subr.bf16.mxu0 %v15366_v52  ;;  %v18859_v8 = vpack.c.bf16 %v6258_v34, %v6255_v41  ;;  %8724 = vmatprep.subr.bf16.mxu1 %v15369_v0  ;;  %v6254_v43 = vmax.f32 %v6236_v61, 0.0  ;;  %v15390_v17 = vld [vmem:[#allocation6 + $0x474] ss:$8 sps:$4 sm:$0xff]   ;;  %v15388_v59 = vld [vmem:[#allocation6 + $0x470] ss:$8 sps:$4 sm:$0xff]  }
 0x510   :  { %v6256_v4 = vmax.f32 %v6238_v56, 0.0  ;;  %v6239_v27 = vadd.f32 %v6221_v24, %v18179_v12  ;;  %6690 = vmatprep.mubr.bf16.mxu0 %v19484_v60  ;;  %8750 = vmatprep.mubr.bf16.mxu1 %v19484_v60  ;;  %v15373_v12 = vld [vmem:[#allocation6 + $0x5c0] ss:$8 sps:$4 sm:$0xff]   ;;  %v15393_v25 = vld [vmem:[#allocation6 + $0x5f4] ss:$8 sps:$4 sm:$0xff]  }
 0x511   :  { %v15391_v57 = vld [vmem:[#allocation6 + $0x5f0] ss:$8 sps:$4 sm:$0xff]   ;;  %v15396_v40 = vld [vmem:[#allocation6 + $0x4] ss:$8 sps:$4 sm:$0xff]   ;;  %v15394_v45 = vld [vmem:[#allocation6] ss:$8 sps:$4 sm:$0xff]  }
 0x512   :  { %v18862_v42 = vpack.c.bf16 %v6256_v4, %v6253_v13  ;;  %v6257_v30 = vmax.f32 %v6239_v27, 0.0  ;;  %6665 = vmatpush1.bf16.msra.mxu0 %v15364_v9  ;;  %8725 = vmatpush1.bf16.msra.mxu1 %v15367_v31  ;;  %v15399_v20 = vld [vmem:[#allocation6 + $0x184] ss:$8 sps:$4 sm:$0xff]   ;;  %v15397_v23 = vld [vmem:[#allocation6 + $0x180] ss:$8 sps:$4 sm:$0xff]  }
 0x513   :  { %6666 = vmatprep.subr.bf16.mxu0 %v15372_v3  ;;  %8726 = vmatprep.subr.bf16.mxu1 %v15375_v16  ;;  %v15402_v51 = vld [vmem:[#allocation6 + $0x14] ss:$8 sps:$4 sm:$0xff]   ;;  %v15400_v32 = vld [vmem:[#allocation6 + $0x10] ss:$8 sps:$4 sm:$0xff]   ;;  %v15408_v62 = vld [vmem:[#allocation6 + $0x24] ss:$8 sps:$4 sm:$0xff]  }
 0x514   :  { %v18865_v28 = vpack.c.bf16 %v6257_v30, %v6254_v43  ;;  %v15405_v44 = vld [vmem:[#allocation6 + $0x194] ss:$8 sps:$4 sm:$0xff]   ;;  %v15403_v11 = vld [vmem:[#allocation6 + $0x190] ss:$8 sps:$4 sm:$0xff]   ;;  %v15411_v10 = vld [vmem:[#allocation6 + $0x1a4] ss:$8 sps:$4 sm:$0xff]  }
 0x515   :  { %v15406_v46 = vld [vmem:[#allocation6 + $0x20] ss:$8 sps:$4 sm:$0xff]   ;;  %v15414_v36 = vld [vmem:[#allocation6 + $0x34] ss:$8 sps:$4 sm:$0xff]   ;;  %v15412_v2 = vld [vmem:[#allocation6 + $0x30] ss:$8 sps:$4 sm:$0xff]  }
 0x516   :  { %6667 = vmatpush1.bf16.msra.mxu0 %v15370_v22  ;;  %8727 = vmatpush1.bf16.msra.mxu1 %v15373_v12  ;;  %v15409_v58 = vld [vmem:[#allocation6 + $0x1a0] ss:$8 sps:$4 sm:$0xff]   ;;  %v15417_v55 = vld [vmem:[#allocation6 + $0x1b4] ss:$8 sps:$4 sm:$0xff]   ;;  %v15415_v19 = vld [vmem:[#allocation6 + $0x1b0] ss:$8 sps:$4 sm:$0xff]  }
 0x517   :  { %6668 = vmatprep.subr.bf16.mxu0 %v15378_v63  ;;  %8728 = vmatprep.subr.bf16.mxu1 %v15381_v35  ;;  %v15420_v33 = vld [vmem:[#allocation6 + $0x44] ss:$8 sps:$4 sm:$0xff]   ;;  %v15418_v7 = vld [vmem:[#allocation6 + $0x40] ss:$8 sps:$4 sm:$0xff]   ;;  %v15426_v50 = vld [vmem:[#allocation6 + $0x54] ss:$8 sps:$4 sm:$0xff]  }
 0x518   :  { %v15423_v6 = vld [vmem:[#allocation6 + $0x1c4] ss:$8 sps:$4 sm:$0xff]   ;;  %v15421_v52 = vld [vmem:[#allocation6 + $0x1c0] ss:$8 sps:$4 sm:$0xff]   ;;  %v15429_v0 = vld [vmem:[#allocation6 + $0x1d4] ss:$8 sps:$4 sm:$0xff]  }
 0x519   :  { %v15424_v61 = vld [vmem:[#allocation6 + $0x50] ss:$8 sps:$4 sm:$0xff]   ;;  %v15432_v18 = vld [vmem:[#allocation6 + $0x64] ss:$8 sps:$4 sm:$0xff]   ;;  %v15430_v49 = vld [vmem:[#allocation6 + $0x60] ss:$8 sps:$4 sm:$0xff]  }
 0x51a   :  { %6669 = vmatpush1.bf16.msra.mxu0 %v15376_v39  ;;  %8729 = vmatpush1.bf16.msra.mxu1 %v15379_v15  ;;  %v15427_v56 = vld [vmem:[#allocation6 + $0x1d0] ss:$8 sps:$4 sm:$0xff]   ;;  %v15435_v54 = vld [vmem:[#allocation6 + $0x1e4] ss:$8 sps:$4 sm:$0xff]   ;;  %v15433_v24 = vld [vmem:[#allocation6 + $0x1e0] ss:$8 sps:$4 sm:$0xff]  }
 0x51b   :  { %6670 = vmatprep.subr.bf16.mxu0 %v15384_v5  ;;  %8730 = vmatprep.subr.bf16.mxu1 %v15387_v26  ;;  %v15438_v41 = vld [vmem:[#allocation6 + $0x74] ss:$8 sps:$4 sm:$0xff]   ;;  %v15436_v9 = vld [vmem:[#allocation6 + $0x70] ss:$8 sps:$4 sm:$0xff]   ;;  %v15444_v4 = vld [vmem:[#allocation6 + $0x84] ss:$8 sps:$4 sm:$0xff]  }
 0x51c   :  { %v15441_v34 = vld [vmem:[#allocation6 + $0x1f4] ss:$8 sps:$4 sm:$0xff]   ;;  %v15439_v13 = vld [vmem:[#allocation6 + $0x1f0] ss:$8 sps:$4 sm:$0xff]   ;;  %v15447_v27 = vld [vmem:[#allocation6 + $0x204] ss:$8 sps:$4 sm:$0xff]  }
 0x51d   :  { %v15442_v31 = vld [vmem:[#allocation6 + $0x80] ss:$8 sps:$4 sm:$0xff]   ;;  %v15450_v16 = vld [vmem:[#allocation6 + $0x94] ss:$8 sps:$4 sm:$0xff]   ;;  %v15448_v30 = vld [vmem:[#allocation6 + $0x90] ss:$8 sps:$4 sm:$0xff]  }
 0x51e   :  { %6671 = vmatpush1.bf16.msra.mxu0 %v15382_v47  ;;  %8731 = vmatpush1.bf16.msra.mxu1 %v15385_v14  ;;  %v15445_v3 = vld [vmem:[#allocation6 + $0x200] ss:$8 sps:$4 sm:$0xff]   ;;  %v15453_v43 = vld [vmem:[#allocation6 + $0x214] ss:$8 sps:$4 sm:$0xff]   ;;  %v15451_v22 = vld [vmem:[#allocation6 + $0x210] ss:$8 sps:$4 sm:$0xff]  }
 0x51f   :  { %6672 = vmatprep.subr.bf16.mxu0 %v15390_v17  ;;  %8732 = vmatprep.subr.bf16.mxu1 %v15393_v25  ;;  %v15456_v12 = vld [vmem:[#allocation6 + $0xa4] ss:$8 sps:$4 sm:$0xff]   ;;  %v15454_v35 = vld [vmem:[#allocation6 + $0xa0] ss:$8 sps:$4 sm:$0xff]   ;;  %v15462_v15 = vld [vmem:[#allocation6 + $0xb4] ss:$8 sps:$4 sm:$0xff]  }
 0x520   :  { %v15459_v63 = vld [vmem:[#allocation6 + $0x224] ss:$8 sps:$4 sm:$0xff]   ;;  %v15457_v39 = vld [vmem:[#allocation6 + $0x220] ss:$8 sps:$4 sm:$0xff]   ;;  %v15465_v5 = vld [vmem:[#allocation6 + $0x234] ss:$8 sps:$4 sm:$0xff]  }
 0x521   :  { %v15460_v26 = vld [vmem:[#allocation6 + $0xb0] ss:$8 sps:$4 sm:$0xff]   ;;  %v15468_v14 = vld [vmem:[#allocation6 + $0xc4] ss:$8 sps:$4 sm:$0xff]   ;;  %v15466_v25 = vld [vmem:[#allocation6 + $0xc0] ss:$8 sps:$4 sm:$0xff]  }
 0x522   :  { %6673 = vmatpush1.bf16.msra.mxu0 %v15388_v59  ;;  %8733 = vmatpush1.bf16.msra.mxu1 %v15391_v57  ;;  %v15463_v47 = vld [vmem:[#allocation6 + $0x230] ss:$8 sps:$4 sm:$0xff]   ;;  %v15471_v17 = vld [vmem:[#allocation6 + $0x244] ss:$8 sps:$4 sm:$0xff]   ;;  %v15469_v59 = vld [vmem:[#allocation6 + $0x240] ss:$8 sps:$4 sm:$0xff]  }
 0x523   :  { %6951 = vmatprep.subr.bf16.mxu0 %v15396_v40  ;;  %9011 = vmatprep.subr.bf16.mxu1 %v15399_v20  ;;  %v15474_v57 = vld [vmem:[#allocation6 + $0xd4] ss:$8 sps:$4 sm:$0xff]   ;;  %v15472_v20 = vld [vmem:[#allocation6 + $0xd0] ss:$8 sps:$4 sm:$0xff]  }
 0x524   :  { %v15477_v40 = vld [vmem:[#allocation6 + $0x254] ss:$8 sps:$4 sm:$0xff]  }
 0x525   :  { %6691 = vmatmul.mubr.bf16.vlgmr.msra.gmra.mrb[96].mxu0 %v18781_v38  ;;  %8751 = vmatmul.mubr.bf16.vlgmr.msra.gmra.mrb[96].mxu1 %v18781_v38 }
 0x526   :  { %6952 = vmatpush1.bf16.msra.mxu0 %v15394_v45  ;;  %9012 = vmatpush1.bf16.msra.mxu1 %v15397_v23  ;;  %v15475_v45 = vld [vmem:[#allocation6 + $0x250] ss:$8 sps:$4 sm:$0xff]   ;;  %v15480_v23 = vld [vmem:[#allocation6 + $0xe4] ss:$8 sps:$4 sm:$0xff]  }
 0x527   :  { %6953 = vmatprep.subr.bf16.mxu0 %v15402_v51  ;;  %9013 = vmatprep.subr.bf16.mxu1 %v15405_v44  ;;  %v15483_v51 = vld [vmem:[#allocation6 + $0x264] ss:$8 sps:$4 sm:$0xff]   ;;  %v15478_v44 = vld [vmem:[#allocation6 + $0xe0] ss:$8 sps:$4 sm:$0xff]  }
 0x528   :  { %6700 = vmatprep.mubr.bf16.mxu0 %v19484_v60  ;;  %8760 = vmatprep.mubr.bf16.mxu1 %v19484_v60 }
 0x52a   :  { %6954 = vmatpush1.bf16.msra.mxu0 %v15400_v32  ;;  %9014 = vmatpush1.bf16.msra.mxu1 %v15403_v11  ;;  %v15481_v32 = vld [vmem:[#allocation6 + $0x260] ss:$8 sps:$4 sm:$0xff]   ;;  %v15486_v11 = vld [vmem:[#allocation6 + $0xf4] ss:$8 sps:$4 sm:$0xff]  }
 0x52b   :  { %6955 = vmatprep.subr.bf16.mxu0 %v15408_v62  ;;  %9015 = vmatprep.subr.bf16.mxu1 %v15411_v10  ;;  %v15489_v62 = vld [vmem:[#allocation6 + $0x274] ss:$8 sps:$4 sm:$0xff]   ;;  %v15484_v10 = vld [vmem:[#allocation6 + $0xf0] ss:$8 sps:$4 sm:$0xff]  }
 0x52d   :  { %6701 = vmatmul.mubr.bf16.gmra.mrb[100].mxu0 %v18826_v29  ;;  %8761 = vmatmul.mubr.bf16.gmra.mrb[100].mxu1 %v18826_v29 }
 0x52e   :  { %6956 = vmatpush1.bf16.msra.mxu0 %v15406_v46  ;;  %6983 = vmatprep.mubr.bf16.mxu0 %v19485_v21  ;;  %v15487_v46 = vld [vmem:[#allocation6 + $0x270] ss:$8 sps:$4 sm:$0xff]  }
 0x52f   :  { %9016 = vmatpush1.bf16.msra.mxu1 %v15409_v58  ;;  %9043 = vmatprep.mubr.bf16.mxu1 %v19485_v21  ;;  %v15492_v58 = vld [vmem:[#allocation6 + $0x104] ss:$8 sps:$4 sm:$0xff]  }
 0x530   :  { %6957 = vmatprep.subr.bf16.mxu0 %v15414_v36  ;;  %9017 = vmatprep.subr.bf16.mxu1 %v15417_v55  ;;  %v15495_v36 = vld [vmem:[#allocation6 + $0x284] ss:$8 sps:$4 sm:$0xff]   ;;  %v15490_v55 = vld [vmem:[#allocation6 + $0x100] ss:$8 sps:$4 sm:$0xff]  }
 0x532   :  { %6958 = vmatpush1.bf16.msra.mxu0 %v15412_v2  ;;  %v15493_v2 = vld [vmem:[#allocation6 + $0x280] ss:$8 sps:$4 sm:$0xff]  }
 0x533   :  { %9018 = vmatpush1.bf16.msra.mxu1 %v15415_v19  ;;  %6959 = vmatprep.subr.bf16.mxu0 %v15420_v33  ;;  %v15498_v19 = vld [vmem:[#allocation6 + $0x114] ss:$8 sps:$4 sm:$0xff]  }
 0x534   :  { %9019 = vmatprep.subr.bf16.mxu1 %v15423_v6  ;;  %v19486_v33 = vld [vmem:[#allocation47_spill] sm:$0xff] }
 0x535   :  { %v15501_v6 = vld [vmem:[#allocation6 + $0x294] ss:$8 sps:$4 sm:$0xff]  }
 0x536   :  { %6960 = vmatpush1.bf16.msra.mxu0 %v15418_v7  ;;  %v19487_v7 = vld [vmem:[#allocation54_spill] sm:$0xff] }
 0x537   :  { %9020 = vmatpush1.bf16.msra.mxu1 %v15421_v52  ;;  %6961 = vmatprep.subr.bf16.mxu0 %v15426_v50  ;;  %v15496_v52 = vld [vmem:[#allocation6 + $0x110] ss:$8 sps:$4 sm:$0xff]  }
 0x538   :  { %9021 = vmatprep.subr.bf16.mxu1 %v15429_v0  ;;  %v15499_v50 = vld [vmem:[#allocation6 + $0x290] ss:$8 sps:$4 sm:$0xff]   ;;  %v15504_v0 = vld [vmem:[#allocation6 + $0x124] ss:$8 sps:$4 sm:$0xff]  }
 0x53a   :  { %6962 = vmatpush1.bf16.msra.mxu0 %v15424_v61  ;;  %v15507_v61 = vld [vmem:[#allocation6 + $0x2a4] ss:$8 sps:$4 sm:$0xff]  }
 0x53b   :  { %9022 = vmatpush1.bf16.msra.mxu1 %v15427_v56  ;;  %6963 = vmatprep.subr.bf16.mxu0 %v15432_v18  ;;  %v15502_v56 = vld [vmem:[#allocation6 + $0x120] ss:$8 sps:$4 sm:$0xff]  }
 0x53c   :  { %9023 = vmatprep.subr.bf16.mxu1 %v15435_v54  ;;  %v15505_v18 = vld [vmem:[#allocation6 + $0x2a0] ss:$8 sps:$4 sm:$0xff]   ;;  %v15510_v54 = vld [vmem:[#allocation6 + $0x134] ss:$8 sps:$4 sm:$0xff]  }
 0x53e   :  { %6964 = vmatpush1.bf16.msra.mxu0 %v15430_v49  ;;  %v19488_v49 = vld [vmem:[#allocation52_spill] sm:$0xff] }
 0x53f   :  { %9024 = vmatpush1.bf16.msra.mxu1 %v15433_v24  ;;  %6965 = vmatprep.subr.bf16.mxu0 %v15438_v41  ;;  %v15513_v24 = vld [vmem:[#allocation6 + $0x2b4] ss:$8 sps:$4 sm:$0xff]   ;;  %v15508_v41 = vld [vmem:[#allocation6 + $0x130] ss:$8 sps:$4 sm:$0xff]  }
 0x540   :  { %9025 = vmatprep.subr.bf16.mxu1 %v15441_v34  ;;  %v15511_v34 = vld [vmem:[#allocation6 + $0x2b0] ss:$8 sps:$4 sm:$0xff]  }
 0x542   :  { %6966 = vmatpush1.bf16.msra.mxu0 %v15436_v9  ;;  %v15516_v9 = vld [vmem:[#allocation6 + $0x144] ss:$8 sps:$4 sm:$0xff]  }
 0x543   :  { %9026 = vmatpush1.bf16.msra.mxu1 %v15439_v13  ;;  %6967 = vmatprep.subr.bf16.mxu0 %v15444_v4  ;;  %v15519_v13 = vld [vmem:[#allocation6 + $0x2c4] ss:$8 sps:$4 sm:$0xff]   ;;  %v15514_v4 = vld [vmem:[#allocation6 + $0x140] ss:$8 sps:$4 sm:$0xff]  }
 0x544   :  { %9027 = vmatprep.subr.bf16.mxu1 %v15447_v27  ;;  %v15517_v27 = vld [vmem:[#allocation6 + $0x2c0] ss:$8 sps:$4 sm:$0xff]  }
 0x546   :  { %6968 = vmatpush1.bf16.msra.mxu0 %v15442_v31  ;;  %v15522_v31 = vld [vmem:[#allocation6 + $0x154] ss:$8 sps:$4 sm:$0xff]  }
 0x547   :  { %9028 = vmatpush1.bf16.msra.mxu1 %v15445_v3  ;;  %6969 = vmatprep.subr.bf16.mxu0 %v15450_v16  ;;  %v15525_v3 = vld [vmem:[#allocation6 + $0x2d4] ss:$8 sps:$4 sm:$0xff]   ;;  %v15520_v16 = vld [vmem:[#allocation6 + $0x150] ss:$8 sps:$4 sm:$0xff]  }
 0x548   :  { %9029 = vmatprep.subr.bf16.mxu1 %v15453_v43  ;;  %v15523_v43 = vld [vmem:[#allocation6 + $0x2d0] ss:$8 sps:$4 sm:$0xff]  }
 0x54a   :  { %6970 = vmatpush1.bf16.msra.mxu0 %v15448_v30  ;;  %v15528_v30 = vld [vmem:[#allocation6 + $0x164] ss:$8 sps:$4 sm:$0xff]  }
 0x54b   :  { %9030 = vmatpush1.bf16.msra.mxu1 %v15451_v22  ;;  %6971 = vmatprep.subr.bf16.mxu0 %v15456_v12  ;;  %v15531_v22 = vld [vmem:[#allocation6 + $0x2e4] ss:$8 sps:$4 sm:$0xff]   ;;  %v15526_v12 = vld [vmem:[#allocation6 + $0x160] ss:$8 sps:$4 sm:$0xff]  }
 0x54c   :  { %9031 = vmatprep.subr.bf16.mxu1 %v15459_v63  ;;  %v15529_v63 = vld [vmem:[#allocation6 + $0x2e0] ss:$8 sps:$4 sm:$0xff]  }
 0x54e   :  { %6972 = vmatpush1.bf16.msra.mxu0 %v15454_v35  ;;  %v15534_v35 = vld [vmem:[#allocation6 + $0x174] ss:$8 sps:$4 sm:$0xff]  }
 0x54f   :  { %9032 = vmatpush1.bf16.msra.mxu1 %v15457_v39  ;;  %6973 = vmatprep.subr.bf16.mxu0 %v15462_v15  ;;  %v15537_v39 = vld [vmem:[#allocation6 + $0x2f4] ss:$8 sps:$4 sm:$0xff]   ;;  %v15532_v15 = vld [vmem:[#allocation6 + $0x170] ss:$8 sps:$4 sm:$0xff]  }
 0x550   :  { %9033 = vmatprep.subr.bf16.mxu1 %v15465_v5  ;;  %v15535_v5 = vld [vmem:[#allocation6 + $0x2f0] ss:$8 sps:$4 sm:$0xff]  }
 0x552   :  { %6974 = vmatpush1.bf16.msra.mxu0 %v15460_v26  ;;  %v15540_v26 = vld [vmem:[#allocation6 + $0x604] ss:$8 sps:$4 sm:$0xff]  }
 0x553   :  { %9034 = vmatpush1.bf16.msra.mxu1 %v15463_v47  ;;  %6975 = vmatprep.subr.bf16.mxu0 %v15468_v14  ;;  %v15543_v47 = vld [vmem:[#allocation6 + $0x784] ss:$8 sps:$4 sm:$0xff]   ;;  %v15538_v14 = vld [vmem:[#allocation6 + $0x600] ss:$8 sps:$4 sm:$0xff]  }
 0x554   :  { %9035 = vmatprep.subr.bf16.mxu1 %v15471_v17  ;;  %v15541_v17 = vld [vmem:[#allocation6 + $0x780] ss:$8 sps:$4 sm:$0xff]  }
 0x556   :  { %6976 = vmatpush1.bf16.msra.mxu0 %v15466_v25  ;;  %v15546_v25 = vld [vmem:[#allocation6 + $0x614] ss:$8 sps:$4 sm:$0xff]  }
 0x557   :  { %9036 = vmatpush1.bf16.msra.mxu1 %v15469_v59  ;;  %6977 = vmatprep.subr.bf16.mxu0 %v15474_v57  ;;  %v15549_v59 = vld [vmem:[#allocation6 + $0x794] ss:$8 sps:$4 sm:$0xff]   ;;  %v19489_v57 = vld [vmem:[#allocation44_spill] sm:$0xff] }
 0x558   :  { %9037 = vmatprep.subr.bf16.mxu1 %v15477_v40  ;;  %v15544_v40 = vld [vmem:[#allocation6 + $0x610] ss:$8 sps:$4 sm:$0xff]  }
 0x55a   :  { %6978 = vmatpush1.bf16.msra.mxu0 %v15472_v20  ;;  %v15547_v20 = vld [vmem:[#allocation6 + $0x790] ss:$8 sps:$4 sm:$0xff]  }
 0x55b   :  { %9038 = vmatpush1.bf16.msra.mxu1 %v15475_v45  ;;  %6979 = vmatprep.subr.bf16.mxu0 %v15480_v23  ;;  %v15552_v45 = vld [vmem:[#allocation6 + $0x624] ss:$8 sps:$4 sm:$0xff]  }
 0x55c   :  { %9039 = vmatprep.subr.bf16.mxu1 %v15483_v51  ;;  %v15555_v23 = vld [vmem:[#allocation6 + $0x7a4] ss:$8 sps:$4 sm:$0xff]   ;;  %v15550_v51 = vld [vmem:[#allocation6 + $0x620] ss:$8 sps:$4 sm:$0xff]  }
 0x55e   :  { %6980 = vmatpush1.bf16.msra.mxu0 %v15478_v44  ;;  %v7120_v44 = vrot.slane %v19487_v7, 4 }
 0x55f   :  { %9040 = vmatpush1.bf16.msra.mxu1 %v15481_v32  ;;  %6981 = vmatprep.subr.bf16.mxu0 %v15486_v11  ;;  %v15553_v32 = vld [vmem:[#allocation6 + $0x7a0] ss:$8 sps:$4 sm:$0xff]   ;;  %v7119_v11 = vrot.slane %v19485_v21, 4  ;;  %v15567_v21 = vld [vmem:[#allocation6 + $0x7c4] ss:$8 sps:$4 sm:$0xff]  }
 0x560   :  { %9041 = vmatprep.subr.bf16.mxu1 %v15489_v62  ;;  %v15558_v62 = vld [vmem:[#allocation6 + $0x634] ss:$8 sps:$4 sm:$0xff]  }
 0x562   :  { %6982 = vmatpush1.bf16.msra.mxu0 %v15484_v10  ;;  %v19490_v10 = vld [vmem:[#allocation51_spill] sm:$0xff] }
 0x563   :  { %9042 = vmatpush1.bf16.msra.mxu1 %v15487_v46  ;;  %7004 = vmatprep.subr.bf16.mxu0 %v15492_v58  ;;  %v15561_v46 = vld [vmem:[#allocation6 + $0x7b4] ss:$8 sps:$4 sm:$0xff]   ;;  %v18894_v58 = vsel %vm7115_vm3, %v7119_v11, %v7120_v44  ;;  %v15622_v11 = vld [vmem:[#allocation6 + $0x6e0] ss:$8 sps:$4 sm:$0xff]  }
 0x564   :  { %9064 = vmatprep.subr.bf16.mxu1 %v15495_v36  ;;  %v15556_v36 = vld [vmem:[#allocation6 + $0x630] ss:$8 sps:$4 sm:$0xff]  }
 0x565   :  { %6984 = vmatmul.mubr.bf16.vlgmr.msra.gmra.mrb[96].mxu0 %v19486_v33 }
 0x566   :  { %9044 = vmatmul.mubr.bf16.vlgmr.msra.gmra.mrb[96].mxu1 %v19486_v33  ;;  %6993 = vmatprep.mubr.bf16.mxu0 %v19487_v7 }
 0x567   :  { %7005 = vmatpush1.bf16.msra.mxu0 %v15490_v55  ;;  %9053 = vmatprep.mubr.bf16.mxu1 %v19487_v7  ;;  %v15559_v55 = vld [vmem:[#allocation6 + $0x7b0] ss:$8 sps:$4 sm:$0xff]  }
 0x568   :  { %9065 = vmatpush1.bf16.msra.mxu1 %v15493_v2  ;;  %7006 = vmatprep.subr.bf16.mxu0 %v15498_v19  ;;  %v15564_v2 = vld [vmem:[#allocation6 + $0x644] ss:$8 sps:$4 sm:$0xff]   ;;  %v15562_v19 = vld [vmem:[#allocation6 + $0x640] ss:$8 sps:$4 sm:$0xff]  }
 0x569   :  { %9066 = vmatprep.subr.bf16.mxu1 %v15501_v6  ;;  %v15565_v6 = vld [vmem:[#allocation6 + $0x7c0] ss:$8 sps:$4 sm:$0xff]  }
 0x56b   :  { %7007 = vmatpush1.bf16.msra.mxu0 %v15496_v52  ;;  %v15570_v52 = vld [vmem:[#allocation6 + $0x654] ss:$8 sps:$4 sm:$0xff]  }
 0x56c   :  { %9067 = vmatpush1.bf16.msra.mxu1 %v15499_v50  ;;  %7008 = vmatprep.subr.bf16.mxu0 %v15504_v0  ;;  %v15573_v50 = vld [vmem:[#allocation6 + $0x7d4] ss:$8 sps:$4 sm:$0xff]   ;;  %v15568_v0 = vld [vmem:[#allocation6 + $0x650] ss:$8 sps:$4 sm:$0xff]  }
 0x56d   :  { %6994 = vmatmul.mubr.bf16.gmra.mrb[100].mxu0 %v19488_v49  ;;  %9068 = vmatprep.subr.bf16.mxu1 %v15507_v61  ;;  %v15571_v61 = vld [vmem:[#allocation6 + $0x7d0] ss:$8 sps:$4 sm:$0xff]  }
 0x56e   :  { %9054 = vmatmul.mubr.bf16.gmra.mrb[100].mxu1 %v19488_v49  ;;  %7036 = vmatprep.mubr.bf16.mxu0 %v19484_v60 }
 0x56f   :  { %7009 = vmatpush1.bf16.msra.mxu0 %v15502_v56  ;;  %9096 = vmatprep.mubr.bf16.mxu1 %v19484_v60  ;;  %v15576_v56 = vld [vmem:[#allocation6 + $0x664] ss:$8 sps:$4 sm:$0xff]  }
 0x570   :  { %9069 = vmatpush1.bf16.msra.mxu1 %v15505_v18  ;;  %7010 = vmatprep.subr.bf16.mxu0 %v15510_v54  ;;  %v15579_v18 = vld [vmem:[#allocation6 + $0x7e4] ss:$8 sps:$4 sm:$0xff]   ;;  %v15574_v54 = vld [vmem:[#allocation6 + $0x660] ss:$8 sps:$4 sm:$0xff]  }
 0x571   :  { %9070 = vmatprep.subr.bf16.mxu1 %v15513_v24  ;;  %v15577_v24 = vld [vmem:[#allocation6 + $0x7e0] ss:$8 sps:$4 sm:$0xff]  }
 0x573   :  { %7011 = vmatpush1.bf16.msra.mxu0 %v15508_v41  ;;  %v15582_v41 = vld [vmem:[#allocation6 + $0x674] ss:$8 sps:$4 sm:$0xff]  }
 0x574   :  { %9071 = vmatpush1.bf16.msra.mxu1 %v15511_v34  ;;  %7012 = vmatprep.subr.bf16.mxu0 %v15516_v9  ;;  %v15585_v34 = vld [vmem:[#allocation6 + $0x7f4] ss:$8 sps:$4 sm:$0xff]   ;;  %v15580_v9 = vld [vmem:[#allocation6 + $0x670] ss:$8 sps:$4 sm:$0xff]  }
 0x575   :  { %9072 = vmatprep.subr.bf16.mxu1 %v15519_v13  ;;  %v15583_v13 = vld [vmem:[#allocation6 + $0x7f0] ss:$8 sps:$4 sm:$0xff]  }
 0x577   :  { %7013 = vmatpush1.bf16.msra.mxu0 %v15514_v4  ;;  %v15588_v4 = vld [vmem:[#allocation6 + $0x684] ss:$8 sps:$4 sm:$0xff]  }
 0x578   :  { %9073 = vmatpush1.bf16.msra.mxu1 %v15517_v27  ;;  %7014 = vmatprep.subr.bf16.mxu0 %v15522_v31  ;;  %v15591_v27 = vld [vmem:[#allocation6 + $0x804] ss:$8 sps:$4 sm:$0xff]   ;;  %v15586_v31 = vld [vmem:[#allocation6 + $0x680] ss:$8 sps:$4 sm:$0xff]  }
 0x579   :  { %9074 = vmatprep.subr.bf16.mxu1 %v15525_v3  ;;  %v15589_v3 = vld [vmem:[#allocation6 + $0x800] ss:$8 sps:$4 sm:$0xff]  }
 0x57b   :  { %7015 = vmatpush1.bf16.msra.mxu0 %v15520_v16  ;;  %v15594_v16 = vld [vmem:[#allocation6 + $0x694] ss:$8 sps:$4 sm:$0xff]  }
 0x57c   :  { %9075 = vmatpush1.bf16.msra.mxu1 %v15523_v43  ;;  %7016 = vmatprep.subr.bf16.mxu0 %v15528_v30  ;;  %v15597_v43 = vld [vmem:[#allocation6 + $0x814] ss:$8 sps:$4 sm:$0xff]   ;;  %v15592_v30 = vld [vmem:[#allocation6 + $0x690] ss:$8 sps:$4 sm:$0xff]  }
 0x57d   :  { %9076 = vmatprep.subr.bf16.mxu1 %v15531_v22  ;;  %v15595_v22 = vld [vmem:[#allocation6 + $0x810] ss:$8 sps:$4 sm:$0xff]  }
 0x57f   :  { %7017 = vmatpush1.bf16.msra.mxu0 %v15526_v12  ;;  %v15600_v12 = vld [vmem:[#allocation6 + $0x6a4] ss:$8 sps:$4 sm:$0xff]  }
 0x580   :  { %9077 = vmatpush1.bf16.msra.mxu1 %v15529_v63  ;;  %7018 = vmatprep.subr.bf16.mxu0 %v15534_v35  ;;  %v15603_v63 = vld [vmem:[#allocation6 + $0x824] ss:$8 sps:$4 sm:$0xff]   ;;  %v15598_v35 = vld [vmem:[#allocation6 + $0x6a0] ss:$8 sps:$4 sm:$0xff]  }
 0x581   :  { %9078 = vmatprep.subr.bf16.mxu1 %v15537_v39  ;;  %v15601_v39 = vld [vmem:[#allocation6 + $0x820] ss:$8 sps:$4 sm:$0xff]  }
 0x583   :  { %7019 = vmatpush1.bf16.msra.mxu0 %v15532_v15  ;;  %v15606_v15 = vld [vmem:[#allocation6 + $0x6b4] ss:$8 sps:$4 sm:$0xff]  }
 0x584   :  { %9079 = vmatpush1.bf16.msra.mxu1 %v15535_v5  ;;  %7377 = vmatprep.subr.bf16.mxu0 %v15540_v26  ;;  %v15609_v5 = vld [vmem:[#allocation6 + $0x834] ss:$8 sps:$4 sm:$0xff]   ;;  %v15604_v26 = vld [vmem:[#allocation6 + $0x6b0] ss:$8 sps:$4 sm:$0xff]  }
 0x585   :  { %9406 = vmatprep.subr.bf16.mxu1 %v15543_v47  ;;  %v15607_v47 = vld [vmem:[#allocation6 + $0x830] ss:$8 sps:$4 sm:$0xff]  }
 0x586   :  { %7037 = vmatmul.mubr.bf16.vlgmr.msra.gmra.mrb[96].mxu0 %v19489_v57 }
 0x587   :  { %9097 = vmatmul.mubr.bf16.vlgmr.msra.gmra.mrb[96].mxu1 %v19489_v57  ;;  %7378 = vmatpush1.bf16.msra.mxu0 %v15538_v14  ;;  %v15612_v14 = vld [vmem:[#allocation6 + $0x6c4] ss:$8 sps:$4 sm:$0xff]  }
 0x588   :  { %9407 = vmatpush1.bf16.msra.mxu1 %v15541_v17  ;;  %7379 = vmatprep.subr.bf16.mxu0 %v15546_v25  ;;  %v15615_v17 = vld [vmem:[#allocation6 + $0x844] ss:$8 sps:$4 sm:$0xff]   ;;  %v15610_v25 = vld [vmem:[#allocation6 + $0x6c0] ss:$8 sps:$4 sm:$0xff]  }
 0x589   :  { %9408 = vmatprep.subr.bf16.mxu1 %v15549_v59  ;;  %7046 = vmatprep.mubr.bf16.mxu0 %v19484_v60  ;;  %v15613_v59 = vld [vmem:[#allocation6 + $0x840] ss:$8 sps:$4 sm:$0xff]  }
 0x58a   :  { %9106 = vmatprep.mubr.bf16.mxu1 %v19484_v60 }
 0x58b   :  { %7380 = vmatpush1.bf16.msra.mxu0 %v15544_v40  ;;  %v15618_v40 = vld [vmem:[#allocation6 + $0x6d4] ss:$8 sps:$4 sm:$0xff]  }
 0x58c   :  { %9409 = vmatpush1.bf16.msra.mxu1 %v15547_v20  ;;  %7381 = vmatprep.subr.bf16.mxu0 %v15552_v45  ;;  %v15621_v20 = vld [vmem:[#allocation6 + $0x854] ss:$8 sps:$4 sm:$0xff]   ;;  %v15616_v45 = vld [vmem:[#allocation6 + $0x6d0] ss:$8 sps:$4 sm:$0xff]  }
 0x58d   :  { %9410 = vmatprep.subr.bf16.mxu1 %v15555_v23  ;;  %v15619_v23 = vld [vmem:[#allocation6 + $0x850] ss:$8 sps:$4 sm:$0xff]  }
 0x58e   :  { %7047 = vmatmul.mubr.bf16.gmra.mrb[100].mxu0 %v19490_v10 }
 0x58f   :  { %9107 = vmatmul.mubr.bf16.gmra.mrb[100].mxu1 %v19490_v10  ;;  %7382 = vmatpush1.bf16.msra.mxu0 %v15550_v51  ;;  %v15624_v51 = vld [vmem:[#allocation6 + $0x6e4] ss:$8 sps:$4 sm:$0xff]  }
 0x590   :  { %7409 = vmatprep.mubr.bf16.mxu0 %v18894_v58  ;;  %9411 = vmatpush1.bf16.msra.mxu1 %v15553_v32  ;;  %v15627_v32 = vld [vmem:[#allocation6 + $0x864] ss:$8 sps:$4 sm:$0xff]  }
 0x591   :  { %9438 = vmatprep.mubr.bf16.mxu1 %v18894_v58  ;;  %7383 = vmatprep.subr.bf16.mxu0 %v15558_v62  ;;  %v15625_v62 = vld [vmem:[#allocation6 + $0x860] ss:$8 sps:$4 sm:$0xff]  }
 0x592   :  { %9412 = vmatprep.subr.bf16.mxu1 %v15561_v46  ;;  %v15630_v46 = vld [vmem:[#allocation6 + $0x6f4] ss:$8 sps:$4 sm:$0xff]  }
 0x593   :  { %7384 = vmatpush1.bf16.msra.mxu0 %v15556_v36  ;;  %v15633_v36 = vld [vmem:[#allocation6 + $0x874] ss:$8 sps:$4 sm:$0xff]  }
 0x594   :  { %9413 = vmatpush1.bf16.msra.mxu1 %v15559_v55  ;;  %7385 = vmatprep.subr.bf16.mxu0 %v15564_v2  ;;  %v15628_v55 = vld [vmem:[#allocation6 + $0x6f0] ss:$8 sps:$4 sm:$0xff]  }
 0x595   :  { %9414 = vmatprep.subr.bf16.mxu1 %v15567_v21  ;;  %v15631_v2 = vld [vmem:[#allocation6 + $0x870] ss:$8 sps:$4 sm:$0xff]   ;;  %v15636_v21 = vld [vmem:[#allocation6 + $0x704] ss:$8 sps:$4 sm:$0xff]  }
 0x597   :  { %7386 = vmatpush1.bf16.msra.mxu0 %v15562_v19  ;;  %v7117_v19 = vrot.slane %v19488_v49, 4 }
 0x598   :  { %9415 = vmatpush1.bf16.msra.mxu1 %v15565_v6  ;;  %7387 = vmatprep.subr.bf16.mxu0 %v15570_v52  ;;  %v15639_v6 = vld [vmem:[#allocation6 + $0x884] ss:$8 sps:$4 sm:$0xff]  }
 0x599   :  { %9416 = vmatprep.subr.bf16.mxu1 %v15573_v50  ;;  %v19491_v52 = vld [vmem:[#allocation57_spill] sm:$0xff] }
 0x59a   :  { %v7127_v50 = vrot.slane %v19491_v52, 4 }
 0x59b   :  { %7388 = vmatpush1.bf16.msra.mxu0 %v15568_v0  ;;  %v7116_v0 = vrot.slane %v19486_v33, 4  ;;  %v15640_v33 = vld [vmem:[#allocation6 + $0x710] ss:$8 sps:$4 sm:$0xff]  }
 0x59c   :  { %9417 = vmatpush1.bf16.msra.mxu1 %v15571_v61  ;;  %7389 = vmatprep.subr.bf16.mxu0 %v15576_v56  ;;  %v15634_v61 = vld [vmem:[#allocation6 + $0x700] ss:$8 sps:$4 sm:$0xff]  }
 0x59d   :  { %9418 = vmatprep.subr.bf16.mxu1 %v15579_v18  ;;  %v18902_v56 = vsel %vm7115_vm3, %v7116_v0, %v7117_v19  ;;  %v15637_v18 = vld [vmem:[#allocation6 + $0x880] ss:$8 sps:$4 sm:$0xff]  }
 0x59f   :  { %7390 = vmatpush1.bf16.msra.mxu0 %v15574_v54  ;;  %v15642_v54 = vld [vmem:[#allocation6 + $0x714] ss:$8 sps:$4 sm:$0xff]  }
 0x5a0   :  { %9419 = vmatpush1.bf16.msra.mxu1 %v15577_v24  ;;  %7391 = vmatprep.subr.bf16.mxu0 %v15582_v41  ;;  %v18908_v24 = vsel %vm7115_vm3, %v7120_v44, %v7127_v50  ;;  %v15645_v41 = vld [vmem:[#allocation6 + $0x894] ss:$8 sps:$4 sm:$0xff]   ;;  %v15646_v44 = vld [vmem:[#allocation6 + $0x720] ss:$8 sps:$4 sm:$0xff]  }
 0x5a1   :  { %9420 = vmatprep.subr.bf16.mxu1 %v15585_v34  ;;  %v15643_v34 = vld [vmem:[#allocation6 + $0x890] ss:$8 sps:$4 sm:$0xff]   ;;  %v19493_v50 = vld [vmem:[#allocation55_spill] sm:$0xff] }
 0x5a2   :  { %v7129_v0 = vrot.slane %v19493_v50, 4 }
 0x5a3   :  { %7392 = vmatpush1.bf16.msra.mxu0 %v15580_v9  ;;  %v19492_v9 = vld [vmem:[#allocation56_spill] sm:$0xff] }
 0x5a4   :  { %9421 = vmatpush1.bf16.msra.mxu1 %v15583_v13  ;;  %7393 = vmatprep.subr.bf16.mxu0 %v15588_v4  ;;  %v7125_v13 = vrot.slane %v19492_v9, 4  ;;  %v15648_v4 = vld [vmem:[#allocation6 + $0x724] ss:$8 sps:$4 sm:$0xff]  }
 0x5a5   :  { %9422 = vmatprep.subr.bf16.mxu1 %v15591_v27  ;;  %v15651_v27 = vld [vmem:[#allocation6 + $0x8a4] ss:$8 sps:$4 sm:$0xff]  }
 0x5a7   :  { %7394 = vmatpush1.bf16.msra.mxu0 %v15586_v31  ;;  %v18915_v31 = vsel %vm7115_vm3, %v7117_v19, %v7125_v13  ;;  %v15688_v19 = vld [vmem:[#allocation6 + $0x910] ss:$8 sps:$4 sm:$0xff]   ;;  %v15702_v13 = vld [vmem:[#allocation6 + $0x934] ss:$8 sps:$4 sm:$0xff]  }
 0x5a8   :  { %9423 = vmatpush1.bf16.msra.mxu1 %v15589_v3  ;;  %7395 = vmatprep.subr.bf16.mxu0 %v15594_v16  ;;  %v15649_v3 = vld [vmem:[#allocation6 + $0x8a0] ss:$8 sps:$4 sm:$0xff]   ;;  %v15654_v16 = vld [vmem:[#allocation6 + $0x734] ss:$8 sps:$4 sm:$0xff]  }
 0x5a9   :  { %9424 = vmatprep.subr.bf16.mxu1 %v15597_v43  ;;  %v15657_v43 = vld [vmem:[#allocation6 + $0x8b4] ss:$8 sps:$4 sm:$0xff]  }
 0x5ab   :  { %7396 = vmatpush1.bf16.msra.mxu0 %v15592_v30  ;;  %v15652_v30 = vld [vmem:[#allocation6 + $0x730] ss:$8 sps:$4 sm:$0xff]  }
 0x5ac   :  { %9425 = vmatpush1.bf16.msra.mxu1 %v15595_v22  ;;  %7397 = vmatprep.subr.bf16.mxu0 %v15600_v12  ;;  %v15655_v22 = vld [vmem:[#allocation6 + $0x8b0] ss:$8 sps:$4 sm:$0xff]   ;;  %v15660_v12 = vld [vmem:[#allocation6 + $0x744] ss:$8 sps:$4 sm:$0xff]  }
 0x5ad   :  { %9426 = vmatprep.subr.bf16.mxu1 %v15603_v63  ;;  %v15663_v63 = vld [vmem:[#allocation6 + $0x8c4] ss:$8 sps:$4 sm:$0xff]  }
 0x5af   :  { %7398 = vmatpush1.bf16.msra.mxu0 %v15598_v35  ;;  %v15658_v35 = vld [vmem:[#allocation6 + $0x740] ss:$8 sps:$4 sm:$0xff]  }
 0x5b0   :  { %9427 = vmatpush1.bf16.msra.mxu1 %v15601_v39  ;;  %7399 = vmatprep.subr.bf16.mxu0 %v15606_v15  ;;  %v15661_v39 = vld [vmem:[#allocation6 + $0x8c0] ss:$8 sps:$4 sm:$0xff]   ;;  %v15666_v15 = vld [vmem:[#allocation6 + $0x754] ss:$8 sps:$4 sm:$0xff]  }
 0x5b1   :  { %9428 = vmatprep.subr.bf16.mxu1 %v15609_v5  ;;  %v15669_v5 = vld [vmem:[#allocation6 + $0x8d4] ss:$8 sps:$4 sm:$0xff]  }
 0x5b3   :  { %7400 = vmatpush1.bf16.msra.mxu0 %v15604_v26  ;;  %v15664_v26 = vld [vmem:[#allocation6 + $0x750] ss:$8 sps:$4 sm:$0xff]  }
 0x5b4   :  { %9429 = vmatpush1.bf16.msra.mxu1 %v15607_v47  ;;  %7401 = vmatprep.subr.bf16.mxu0 %v15612_v14  ;;  %v15667_v47 = vld [vmem:[#allocation6 + $0x8d0] ss:$8 sps:$4 sm:$0xff]   ;;  %v15672_v14 = vld [vmem:[#allocation6 + $0x764] ss:$8 sps:$4 sm:$0xff]  }
 0x5b5   :  { %9430 = vmatprep.subr.bf16.mxu1 %v15615_v17  ;;  %v15675_v17 = vld [vmem:[#allocation6 + $0x8e4] ss:$8 sps:$4 sm:$0xff]  }
 0x5b7   :  { %7402 = vmatpush1.bf16.msra.mxu0 %v15610_v25  ;;  %v15670_v25 = vld [vmem:[#allocation6 + $0x760] ss:$8 sps:$4 sm:$0xff]  }
 0x5b8   :  { %9431 = vmatpush1.bf16.msra.mxu1 %v15613_v59  ;;  %7403 = vmatprep.subr.bf16.mxu0 %v15618_v40  ;;  %v15673_v59 = vld [vmem:[#allocation6 + $0x8e0] ss:$8 sps:$4 sm:$0xff]   ;;  %v15678_v40 = vld [vmem:[#allocation6 + $0x774] ss:$8 sps:$4 sm:$0xff]  }
 0x5b9   :  { %9432 = vmatprep.subr.bf16.mxu1 %v15621_v20  ;;  %v15681_v20 = vld [vmem:[#allocation6 + $0x8f4] ss:$8 sps:$4 sm:$0xff]  }
 0x5bb   :  { %7404 = vmatpush1.bf16.msra.mxu0 %v15616_v45  ;;  %v15676_v45 = vld [vmem:[#allocation6 + $0x770] ss:$8 sps:$4 sm:$0xff]  }
 0x5bc   :  { %9433 = vmatpush1.bf16.msra.mxu1 %v15619_v23  ;;  %7405 = vmatprep.subr.bf16.mxu0 %v15624_v51  ;;  %v15679_v23 = vld [vmem:[#allocation6 + $0x8f0] ss:$8 sps:$4 sm:$0xff]   ;;  %v15684_v51 = vld [vmem:[#allocation6 + $0x904] ss:$8 sps:$4 sm:$0xff]  }
 0x5bd   :  { %9434 = vmatprep.subr.bf16.mxu1 %v15627_v32  ;;  %v7123_v32 = vrot.slane %v19490_v10, 4 }
 0x5bf   :  { %7406 = vmatpush1.bf16.msra.mxu0 %v15622_v11  ;;  %v15687_v11 = vld [vmem:[#allocation6 + $0xa84] ss:$8 sps:$4 sm:$0xff]  }
 0x5c0   :  { %9435 = vmatpush1.bf16.msra.mxu1 %v15625_v62  ;;  %7407 = vmatprep.subr.bf16.mxu0 %v15630_v46  ;;  %v7122_v62 = vrot.slane %v19489_v57, 4  ;;  %v15682_v46 = vld [vmem:[#allocation6 + $0x900] ss:$8 sps:$4 sm:$0xff]   ;;  %v15696_v57 = vld [vmem:[#allocation6 + $0x924] ss:$8 sps:$4 sm:$0xff]  }
 0x5c1   :  { %9436 = vmatprep.subr.bf16.mxu1 %v15633_v36  ;;  %v15685_v36 = vld [vmem:[#allocation6 + $0xa80] ss:$8 sps:$4 sm:$0xff]  }
 0x5c3   :  { %7408 = vmatpush1.bf16.msra.mxu0 %v15628_v55  ;;  %v15690_v55 = vld [vmem:[#allocation6 + $0x914] ss:$8 sps:$4 sm:$0xff]  }
 0x5c4   :  { %9437 = vmatpush1.bf16.msra.mxu1 %v15631_v2  ;;  %7430 = vmatprep.subr.bf16.mxu0 %v15636_v21  ;;  %v18924_v2 = vsel %vm7115_vm3, %v7122_v62, %v7123_v32  ;;  %v15693_v21 = vld [vmem:[#allocation6 + $0xa94] ss:$8 sps:$4 sm:$0xff]   ;;  %v15739_v62 = vld [vmem:[#allocation6 + $0xb10] ss:$8 sps:$4 sm:$0xff]  }
 0x5c5   :  { %9459 = vmatprep.subr.bf16.mxu1 %v15639_v6  ;;  %v15691_v6 = vld [vmem:[#allocation6 + $0xa90] ss:$8 sps:$4 sm:$0xff]  }
 0x5c6   :  { %7410 = vmatmul.mubr.bf16.vlgmr.msra.gmra.mrb[96].mxu0 %v18902_v56 }
 0x5c7   :  { %9439 = vmatmul.mubr.bf16.vlgmr.msra.gmra.mrb[96].mxu1 %v18902_v56  ;;  %7419 = vmatprep.mubr.bf16.mxu0 %v18908_v24 }
 0x5c8   :  { %7431 = vmatpush1.bf16.msra.mxu0 %v15634_v61  ;;  %9448 = vmatprep.mubr.bf16.mxu1 %v18908_v24  ;;  %v15699_v61 = vld [vmem:[#allocation6 + $0xaa4] ss:$8 sps:$4 sm:$0xff]  }
 0x5c9   :  { %9460 = vmatpush1.bf16.msra.mxu1 %v15637_v18  ;;  %7432 = vmatprep.subr.bf16.mxu0 %v15642_v54  ;;  %v15694_v18 = vld [vmem:[#allocation6 + $0x920] ss:$8 sps:$4 sm:$0xff]   ;;  %v7553_v54 = vrot.slane %v18834_v1, 4 }
 0x5ca   :  { %9461 = vmatprep.subr.bf16.mxu1 %v15645_v41  ;;  %v15697_v41 = vld [vmem:[#allocation6 + $0xaa0] ss:$8 sps:$4 sm:$0xff]  }
 0x5cc   :  { %7433 = vmatpush1.bf16.msra.mxu0 %v15640_v33  ;;  %v18933_v33 = vsel %vm7115_vm3, %v7123_v32, %v7129_v0  ;;  %v15741_v32 = vld [vmem:[#allocation6 + $0xb14] ss:$8 sps:$4 sm:$0xff]   ;;  %v15751_v0 = vld [vmem:[#allocation6 + $0xb30] ss:$8 sps:$4 sm:$0xff]  }
 0x5cd   :  { %9462 = vmatpush1.bf16.msra.mxu1 %v15643_v34  ;;  %7434 = vmatprep.subr.bf16.mxu0 %v15648_v4  ;;  %v7552_v34 = vrot.slane %v18794_v48, 4  ;;  %v15705_v4 = vld [vmem:[#allocation6 + $0xab4] ss:$8 sps:$4 sm:$0xff]  }
 0x5ce   :  { %7420 = vmatmul.mubr.bf16.gmra.mrb[100].mxu0 %v18915_v31  ;;  %9463 = vmatprep.subr.bf16.mxu1 %v15651_v27 }
 0x5cf   :  { %9449 = vmatmul.mubr.bf16.gmra.mrb[100].mxu1 %v18915_v31  ;;  %7462 = vmatprep.mubr.bf16.mxu0 %v19484_v60  ;;  %v18941_v27 = vsel %vm7115_vm3, %v7552_v34, %v7553_v54  ;;  %v15757_v34 = vld [vmem:[#allocation6 + $0xb40] ss:$8 sps:$4 sm:$0xff]  }
 0x5d0   :  { %7435 = vmatpush1.bf16.msra.mxu0 %v15646_v44  ;;  %9491 = vmatprep.mubr.bf16.mxu1 %v19484_v60  ;;  %v15700_v44 = vld [vmem:[#allocation6 + $0x930] ss:$8 sps:$4 sm:$0xff]  }
 0x5d1   :  { %9464 = vmatpush1.bf16.msra.mxu1 %v15649_v3  ;;  %7436 = vmatprep.subr.bf16.mxu0 %v15654_v16  ;;  %v15703_v3 = vld [vmem:[#allocation6 + $0xab0] ss:$8 sps:$4 sm:$0xff]   ;;  %v15708_v16 = vld [vmem:[#allocation6 + $0x944] ss:$8 sps:$4 sm:$0xff]  }
 0x5d2   :  { %9465 = vmatprep.subr.bf16.mxu1 %v15657_v43  ;;  %v15711_v43 = vld [vmem:[#allocation6 + $0xac4] ss:$8 sps:$4 sm:$0xff]  }
 0x5d4   :  { %7437 = vmatpush1.bf16.msra.mxu0 %v15652_v30  ;;  %v15706_v30 = vld [vmem:[#allocation6 + $0x940] ss:$8 sps:$4 sm:$0xff]  }
 0x5d5   :  { %9466 = vmatpush1.bf16.msra.mxu1 %v15655_v22  ;;  %7438 = vmatprep.subr.bf16.mxu0 %v15660_v12  ;;  %v15709_v22 = vld [vmem:[#allocation6 + $0xac0] ss:$8 sps:$4 sm:$0xff]   ;;  %v15714_v12 = vld [vmem:[#allocation6 + $0x954] ss:$8 sps:$4 sm:$0xff]  }
 0x5d6   :  { %9467 = vmatprep.subr.bf16.mxu1 %v15663_v63  ;;  %v15717_v63 = vld [vmem:[#allocation6 + $0xad4] ss:$8 sps:$4 sm:$0xff]  }
 0x5d8   :  { %7439 = vmatpush1.bf16.msra.mxu0 %v15658_v35  ;;  %v15712_v35 = vld [vmem:[#allocation6 + $0x950] ss:$8 sps:$4 sm:$0xff]  }
 0x5d9   :  { %9468 = vmatpush1.bf16.msra.mxu1 %v15661_v39  ;;  %7440 = vmatprep.subr.bf16.mxu0 %v15666_v15  ;;  %v15715_v39 = vld [vmem:[#allocation6 + $0xad0] ss:$8 sps:$4 sm:$0xff]   ;;  %v15720_v15 = vld [vmem:[#allocation6 + $0x964] ss:$8 sps:$4 sm:$0xff]  }
 0x5da   :  { %9469 = vmatprep.subr.bf16.mxu1 %v15669_v5  ;;  %v15723_v5 = vld [vmem:[#allocation6 + $0xae4] ss:$8 sps:$4 sm:$0xff]  }
 0x5dc   :  { %7441 = vmatpush1.bf16.msra.mxu0 %v15664_v26  ;;  %v15718_v26 = vld [vmem:[#allocation6 + $0x960] ss:$8 sps:$4 sm:$0xff]  }
 0x5dd   :  { %9470 = vmatpush1.bf16.msra.mxu1 %v15667_v47  ;;  %7442 = vmatprep.subr.bf16.mxu0 %v15672_v14  ;;  %v15721_v47 = vld [vmem:[#allocation6 + $0xae0] ss:$8 sps:$4 sm:$0xff]   ;;  %v15726_v14 = vld [vmem:[#allocation6 + $0x974] ss:$8 sps:$4 sm:$0xff]  }
 0x5de   :  { %9471 = vmatprep.subr.bf16.mxu1 %v15675_v17  ;;  %v15729_v17 = vld [vmem:[#allocation6 + $0xaf4] ss:$8 sps:$4 sm:$0xff]  }
 0x5e0   :  { %7443 = vmatpush1.bf16.msra.mxu0 %v15670_v25  ;;  %v15724_v25 = vld [vmem:[#allocation6 + $0x970] ss:$8 sps:$4 sm:$0xff]  }
 0x5e1   :  { %9472 = vmatpush1.bf16.msra.mxu1 %v15673_v59  ;;  %7444 = vmatprep.subr.bf16.mxu0 %v15678_v40  ;;  %v15727_v59 = vld [vmem:[#allocation6 + $0xaf0] ss:$8 sps:$4 sm:$0xff]   ;;  %v15732_v40 = vld [vmem:[#allocation6 + $0x984] ss:$8 sps:$4 sm:$0xff]  }
 0x5e2   :  { %9473 = vmatprep.subr.bf16.mxu1 %v15681_v20  ;;  %v15735_v20 = vld [vmem:[#allocation6 + $0xb04] ss:$8 sps:$4 sm:$0xff]  }
 0x5e4   :  { %7445 = vmatpush1.bf16.msra.mxu0 %v15676_v45  ;;  %v15730_v45 = vld [vmem:[#allocation6 + $0x980] ss:$8 sps:$4 sm:$0xff]  }
 0x5e5   :  { %9474 = vmatpush1.bf16.msra.mxu1 %v15679_v23  ;;  %7810 = vmatprep.subr.bf16.mxu0 %v15684_v51  ;;  %v15733_v23 = vld [vmem:[#allocation6 + $0xb00] ss:$8 sps:$4 sm:$0xff]   ;;  %v15738_v51 = vld [vmem:[#allocation6 + $0x994] ss:$8 sps:$4 sm:$0xff]  }
 0x5e6   :  { %9809 = vmatprep.subr.bf16.mxu1 %v15687_v11  ;;  %v15736_v11 = vld [vmem:[#allocation6 + $0x990] ss:$8 sps:$4 sm:$0xff]  }
 0x5e7   :  { %7463 = vmatmul.mubr.bf16.vlgmr.msra.gmra.mrb[96].mxu0 %v18924_v2 }
 0x5e8   :  { %9492 = vmatmul.mubr.bf16.vlgmr.msra.gmra.mrb[96].mxu1 %v18924_v2  ;;  %7811 = vmatpush1.bf16.msra.mxu0 %v15682_v46  ;;  %v15744_v46 = vld [vmem:[#allocation6 + $0x9a4] ss:$8 sps:$4 sm:$0xff]  }
 0x5e9   :  { %9810 = vmatpush1.bf16.msra.mxu1 %v15685_v36  ;;  %7812 = vmatprep.subr.bf16.mxu0 %v15690_v55  ;;  %v15747_v36 = vld [vmem:[#allocation6 + $0xb24] ss:$8 sps:$4 sm:$0xff]   ;;  %v15742_v55 = vld [vmem:[#allocation6 + $0x9a0] ss:$8 sps:$4 sm:$0xff]  }
 0x5ea   :  { %9811 = vmatprep.subr.bf16.mxu1 %v15693_v21  ;;  %7472 = vmatprep.mubr.bf16.mxu0 %v19484_v60  ;;  %v15745_v21 = vld [vmem:[#allocation6 + $0xb20] ss:$8 sps:$4 sm:$0xff]  }
 0x5eb   :  { %9501 = vmatprep.mubr.bf16.mxu1 %v19484_v60 }
 0x5ec   :  { %7813 = vmatpush1.bf16.msra.mxu0 %v15688_v19  ;;  %v15750_v19 = vld [vmem:[#allocation6 + $0x9b4] ss:$8 sps:$4 sm:$0xff]  }
 0x5ed   :  { %9812 = vmatpush1.bf16.msra.mxu1 %v15691_v6  ;;  %7814 = vmatprep.subr.bf16.mxu0 %v15696_v57  ;;  %v15753_v6 = vld [vmem:[#allocation6 + $0xb34] ss:$8 sps:$4 sm:$0xff]   ;;  %v15748_v57 = vld [vmem:[#allocation6 + $0x9b0] ss:$8 sps:$4 sm:$0xff]  }
 0x5ee   :  { %9813 = vmatprep.subr.bf16.mxu1 %v15699_v61  ;;  %v15756_v61 = vld [vmem:[#allocation6 + $0x9c4] ss:$8 sps:$4 sm:$0xff]  }
 0x5ef   :  { %7473 = vmatmul.mubr.bf16.gmra.mrb[100].mxu0 %v18933_v33 }
 0x5f0   :  { %9502 = vmatmul.mubr.bf16.gmra.mrb[100].mxu1 %v18933_v33  ;;  %7815 = vmatpush1.bf16.msra.mxu0 %v15694_v18  ;;  %v15759_v18 = vld [vmem:[#allocation6 + $0xb44] ss:$8 sps:$4 sm:$0xff]  }
 0x5f1   :  { %7842 = vmatprep.mubr.bf16.mxu0 %v18941_v27  ;;  %9814 = vmatpush1.bf16.msra.mxu1 %v15697_v41  ;;  %v15754_v41 = vld [vmem:[#allocation6 + $0x9c0] ss:$8 sps:$4 sm:$0xff]  }
 0x5f2   :  { %9841 = vmatprep.mubr.bf16.mxu1 %v18941_v27  ;;  %7816 = vmatprep.subr.bf16.mxu0 %v15702_v13  ;;  %v15762_v13 = vld [vmem:[#allocation6 + $0x9d4] ss:$8 sps:$4 sm:$0xff]  }
 0x5f3   :  { %9815 = vmatprep.subr.bf16.mxu1 %v15705_v4  ;;  %v15765_v4 = vld [vmem:[#allocation6 + $0xb54] ss:$8 sps:$4 sm:$0xff]  }
 0x5f4   :  { %7817 = vmatpush1.bf16.msra.mxu0 %v15700_v44  ;;  %v15760_v44 = vld [vmem:[#allocation6 + $0x9d0] ss:$8 sps:$4 sm:$0xff]  }
 0x5f5   :  { %9816 = vmatpush1.bf16.msra.mxu1 %v15703_v3  ;;  %7818 = vmatprep.subr.bf16.mxu0 %v15708_v16  ;;  %v15763_v3 = vld [vmem:[#allocation6 + $0xb50] ss:$8 sps:$4 sm:$0xff]   ;;  %v15768_v16 = vld [vmem:[#allocation6 + $0x9e4] ss:$8 sps:$4 sm:$0xff]  }
 0x5f6   :  { %9817 = vmatprep.subr.bf16.mxu1 %v15711_v43  ;;  %v15771_v43 = vld [vmem:[#allocation6 + $0xb64] ss:$8 sps:$4 sm:$0xff]  }
 0x5f8   :  { %7819 = vmatpush1.bf16.msra.mxu0 %v15706_v30  ;;  %v15766_v30 = vld [vmem:[#allocation6 + $0x9e0] ss:$8 sps:$4 sm:$0xff]  }
 0x5f9   :  { %9818 = vmatpush1.bf16.msra.mxu1 %v15709_v22  ;;  %7820 = vmatprep.subr.bf16.mxu0 %v15714_v12  ;;  %v15769_v22 = vld [vmem:[#allocation6 + $0xb60] ss:$8 sps:$4 sm:$0xff]   ;;  %v15774_v12 = vld [vmem:[#allocation6 + $0x9f4] ss:$8 sps:$4 sm:$0xff]  }
 0x5fa   :  { %9819 = vmatprep.subr.bf16.mxu1 %v15717_v63  ;;  %v15777_v63 = vld [vmem:[#allocation6 + $0xb74] ss:$8 sps:$4 sm:$0xff]  }
 0x5fc   :  { %7821 = vmatpush1.bf16.msra.mxu0 %v15712_v35  ;;  %v15772_v35 = vld [vmem:[#allocation6 + $0x9f0] ss:$8 sps:$4 sm:$0xff]  }
 0x5fd   :  { %9820 = vmatpush1.bf16.msra.mxu1 %v15715_v39  ;;  %7822 = vmatprep.subr.bf16.mxu0 %v15720_v15  ;;  %v15775_v39 = vld [vmem:[#allocation6 + $0xb70] ss:$8 sps:$4 sm:$0xff]   ;;  %v15780_v15 = vld [vmem:[#allocation6 + $0xa04] ss:$8 sps:$4 sm:$0xff]  }
 0x5fe   :  { %9821 = vmatprep.subr.bf16.mxu1 %v15723_v5  ;;  %v7550_v5 = vrot.slane %v18828_v53, 4 }
 0x600   :  { %7823 = vmatpush1.bf16.msra.mxu0 %v15718_v26  ;;  %v15783_v26 = vld [vmem:[#allocation6 + $0xb84] ss:$8 sps:$4 sm:$0xff]  }
 0x601   :  { %9822 = vmatpush1.bf16.msra.mxu1 %v15721_v47  ;;  %7824 = vmatprep.subr.bf16.mxu0 %v15726_v14  ;;  %v7560_v47 = vrot.slane %v18865_v28, 4  ;;  %v7549_v14 = vrot.slane %v18787_v37, 4 }
 0x602   :  { %9823 = vmatprep.subr.bf16.mxu1 %v15729_v17  ;;  %v15778_v17 = vld [vmem:[#allocation6 + $0xa00] ss:$8 sps:$4 sm:$0xff]  }
 0x604   :  { %7825 = vmatpush1.bf16.msra.mxu0 %v15724_v25  ;;  %v18949_v25 = vsel %vm7115_vm3, %v7549_v14, %v7550_v5  ;;  %v15834_v14 = vld [vmem:[#allocation6 + $0xc14] ss:$8 sps:$4 sm:$0xff]  }
 0x605   :  { %9824 = vmatpush1.bf16.msra.mxu1 %v15727_v59  ;;  %7826 = vmatprep.subr.bf16.mxu0 %v15732_v40  ;;  %v15781_v59 = vld [vmem:[#allocation6 + $0xb80] ss:$8 sps:$4 sm:$0xff]   ;;  %v15786_v40 = vld [vmem:[#allocation6 + $0xa14] ss:$8 sps:$4 sm:$0xff]  }
 0x606   :  { %9825 = vmatprep.subr.bf16.mxu1 %v15735_v20  ;;  %v18955_v20 = vsel %vm7115_vm3, %v7553_v54, %v7560_v47  ;;  %v15790_v54 = vld [vmem:[#allocation6 + $0xa20] ss:$8 sps:$4 sm:$0xff]  }
 0x607   :  { %v15829_v47 = vld [vmem:[#allocation6 + $0xd80] ss:$8 sps:$4 sm:$0xff]  }
 0x608   :  { %7827 = vmatpush1.bf16.msra.mxu0 %v15730_v45  ;;  %v15789_v45 = vld [vmem:[#allocation6 + $0xb94] ss:$8 sps:$4 sm:$0xff]  }
 0x609   :  { %9826 = vmatpush1.bf16.msra.mxu1 %v15733_v23  ;;  %7828 = vmatprep.subr.bf16.mxu0 %v15738_v51  ;;  %v15784_v23 = vld [vmem:[#allocation6 + $0xa10] ss:$8 sps:$4 sm:$0xff]  }
 0x60a   :  { %9827 = vmatprep.subr.bf16.mxu1 %v15741_v32  ;;  %v15787_v51 = vld [vmem:[#allocation6 + $0xb90] ss:$8 sps:$4 sm:$0xff]   ;;  %v7558_v32 = vrot.slane %v18862_v42, 4 }
 0x60c   :  { %7829 = vmatpush1.bf16.msra.mxu0 %v15736_v11  ;;  %v15792_v11 = vld [vmem:[#allocation6 + $0xa24] ss:$8 sps:$4 sm:$0xff]  }
 0x60d   :  { %9828 = vmatpush1.bf16.msra.mxu1 %v15739_v62  ;;  %7830 = vmatprep.subr.bf16.mxu0 %v15744_v46  ;;  %v15795_v62 = vld [vmem:[#allocation6 + $0xba4] ss:$8 sps:$4 sm:$0xff]   ;;  %v18962_v46 = vsel %vm7115_vm3, %v7550_v5, %v7558_v32  ;;  %v7555_v5 = vrot.slane %v18781_v38, 4 }
 0x60e   :  { %9829 = vmatprep.subr.bf16.mxu1 %v15747_v36  ;;  %v15793_v36 = vld [vmem:[#allocation6 + $0xba0] ss:$8 sps:$4 sm:$0xff]   ;;  %v15843_v32 = vld [vmem:[#allocation6 + $0xda4] ss:$8 sps:$4 sm:$0xff]  }
 0x610   :  { %7831 = vmatpush1.bf16.msra.mxu0 %v15742_v55  ;;  %v15798_v55 = vld [vmem:[#allocation6 + $0xa34] ss:$8 sps:$4 sm:$0xff]  }
 0x611   :  { %9830 = vmatpush1.bf16.msra.mxu1 %v15745_v21  ;;  %7832 = vmatprep.subr.bf16.mxu0 %v15750_v19  ;;  %v15801_v21 = vld [vmem:[#allocation6 + $0xbb4] ss:$8 sps:$4 sm:$0xff]   ;;  %v15796_v19 = vld [vmem:[#allocation6 + $0xa30] ss:$8 sps:$4 sm:$0xff]  }
 0x612   :  { %9831 = vmatprep.subr.bf16.mxu1 %v15753_v6  ;;  %v15799_v6 = vld [vmem:[#allocation6 + $0xbb0] ss:$8 sps:$4 sm:$0xff]  }
 0x614   :  { %7833 = vmatpush1.bf16.msra.mxu0 %v15748_v57  ;;  %v15804_v57 = vld [vmem:[#allocation6 + $0xa44] ss:$8 sps:$4 sm:$0xff]  }
 0x615   :  { %9832 = vmatpush1.bf16.msra.mxu1 %v15751_v0  ;;  %7834 = vmatprep.subr.bf16.mxu0 %v15756_v61  ;;  %v15807_v0 = vld [vmem:[#allocation6 + $0xbc4] ss:$8 sps:$4 sm:$0xff]   ;;  %v15802_v61 = vld [vmem:[#allocation6 + $0xa40] ss:$8 sps:$4 sm:$0xff]  }
 0x616   :  { %9833 = vmatprep.subr.bf16.mxu1 %v15759_v18  ;;  %v15805_v18 = vld [vmem:[#allocation6 + $0xbc0] ss:$8 sps:$4 sm:$0xff]  }
 0x618   :  { %7835 = vmatpush1.bf16.msra.mxu0 %v15754_v41  ;;  %v15810_v41 = vld [vmem:[#allocation6 + $0xa54] ss:$8 sps:$4 sm:$0xff]  }
 0x619   :  { %9834 = vmatpush1.bf16.msra.mxu1 %v15757_v34  ;;  %7836 = vmatprep.subr.bf16.mxu0 %v15762_v13  ;;  %v15813_v34 = vld [vmem:[#allocation6 + $0xbd4] ss:$8 sps:$4 sm:$0xff]   ;;  %v15808_v13 = vld [vmem:[#allocation6 + $0xa50] ss:$8 sps:$4 sm:$0xff]  }
 0x61a   :  { %9835 = vmatprep.subr.bf16.mxu1 %v15765_v4  ;;  %v15811_v4 = vld [vmem:[#allocation6 + $0xbd0] ss:$8 sps:$4 sm:$0xff]  }
 0x61c   :  { %7837 = vmatpush1.bf16.msra.mxu0 %v15760_v44  ;;  %v15816_v44 = vld [vmem:[#allocation6 + $0xa64] ss:$8 sps:$4 sm:$0xff]  }
 0x61d   :  { %9836 = vmatpush1.bf16.msra.mxu1 %v15763_v3  ;;  %7838 = vmatprep.subr.bf16.mxu0 %v15768_v16  ;;  %v15819_v3 = vld [vmem:[#allocation6 + $0xbe4] ss:$8 sps:$4 sm:$0xff]   ;;  %v15814_v16 = vld [vmem:[#allocation6 + $0xa60] ss:$8 sps:$4 sm:$0xff]  }
 0x61e   :  { %9837 = vmatprep.subr.bf16.mxu1 %v15771_v43  ;;  %v15817_v43 = vld [vmem:[#allocation6 + $0xbe0] ss:$8 sps:$4 sm:$0xff]  }
 0x620   :  { %7839 = vmatpush1.bf16.msra.mxu0 %v15766_v30  ;;  %v15822_v30 = vld [vmem:[#allocation6 + $0xa74] ss:$8 sps:$4 sm:$0xff]  }
 0x621   :  { %9838 = vmatpush1.bf16.msra.mxu1 %v15769_v22  ;;  %7840 = vmatprep.subr.bf16.mxu0 %v15774_v12  ;;  %v15825_v22 = vld [vmem:[#allocation6 + $0xbf4] ss:$8 sps:$4 sm:$0xff]   ;;  %v15820_v12 = vld [vmem:[#allocation6 + $0xa70] ss:$8 sps:$4 sm:$0xff]  }
 0x622   :  { %9839 = vmatprep.subr.bf16.mxu1 %v15777_v63  ;;  %v15823_v63 = vld [vmem:[#allocation6 + $0xbf0] ss:$8 sps:$4 sm:$0xff]  }
 0x624   :  { %7841 = vmatpush1.bf16.msra.mxu0 %v15772_v35  ;;  %v15828_v35 = vld [vmem:[#allocation6 + $0xc04] ss:$8 sps:$4 sm:$0xff]  }
 0x625   :  { %9840 = vmatpush1.bf16.msra.mxu1 %v15775_v39  ;;  %7863 = vmatprep.subr.bf16.mxu0 %v15780_v15  ;;  %v7556_v39 = vrot.slane %v18826_v29, 4  ;;  %v15831_v15 = vld [vmem:[#allocation6 + $0xd84] ss:$8 sps:$4 sm:$0xff]  }
 0x626   :  { %9862 = vmatprep.subr.bf16.mxu1 %v15783_v26  ;;  %v15826_v26 = vld [vmem:[#allocation6 + $0xc00] ss:$8 sps:$4 sm:$0xff]  }
 0x627   :  { %7843 = vmatmul.mubr.bf16.vlgmr.msra.gmra.mrb[96].mxu0 %v18949_v25 }
 0x628   :  { %9842 = vmatmul.mubr.bf16.vlgmr.msra.gmra.mrb[96].mxu1 %v18949_v25  ;;  %7852 = vmatprep.mubr.bf16.mxu0 %v18955_v20 }
 0x629   :  { %7864 = vmatpush1.bf16.msra.mxu0 %v15778_v17  ;;  %9851 = vmatprep.mubr.bf16.mxu1 %v18955_v20  ;;  %v18971_v17 = vsel %vm7115_vm3, %v7555_v5, %v7556_v39  ;;  %v15882_v5 = vld [vmem:[#allocation6 + $0xc94] ss:$8 sps:$4 sm:$0xff]  }
 0x62a   :  { %9863 = vmatpush1.bf16.msra.mxu1 %v15781_v59  ;;  %7865 = vmatprep.subr.bf16.mxu0 %v15786_v40  ;;  %v15837_v59 = vld [vmem:[#allocation6 + $0xd94] ss:$8 sps:$4 sm:$0xff]   ;;  %v15832_v40 = vld [vmem:[#allocation6 + $0xc10] ss:$8 sps:$4 sm:$0xff]  }
 0x62b   :  { %9864 = vmatprep.subr.bf16.mxu1 %v15789_v45  ;;  %v15835_v45 = vld [vmem:[#allocation6 + $0xd90] ss:$8 sps:$4 sm:$0xff]  }
 0x62d   :  { %7866 = vmatpush1.bf16.msra.mxu0 %v15784_v23  ;;  %v15840_v23 = vld [vmem:[#allocation6 + $0xc24] ss:$8 sps:$4 sm:$0xff]  }
 0x62e   :  { %9865 = vmatpush1.bf16.msra.mxu1 %v15787_v51  ;;  %7867 = vmatprep.subr.bf16.mxu0 %v15792_v11  ;;  %v7562_v51 = vrot.slane %v18859_v8, 4  ;;  %v15838_v11 = vld [vmem:[#allocation6 + $0xc20] ss:$8 sps:$4 sm:$0xff]  }
 0x62f   :  { %7853 = vmatmul.mubr.bf16.gmra.mrb[100].mxu0 %v18962_v46  ;;  %9866 = vmatprep.subr.bf16.mxu1 %v15795_v62  ;;  %v15841_v62 = vld [vmem:[#allocation6 + $0xda0] ss:$8 sps:$4 sm:$0xff]  }
 0x630   :  { %9852 = vmatmul.mubr.bf16.gmra.mrb[100].mxu1 %v18962_v46  ;;  %7895 = vmatprep.mubr.bf16.mxu0 %v19484_v60 }
 0x631   :  { %7868 = vmatpush1.bf16.msra.mxu0 %v15790_v54  ;;  %9894 = vmatprep.mubr.bf16.mxu1 %v19484_v60  ;;  %v18979_v54 = vsel %vm7115_vm3, %v7556_v39, %v7562_v51  ;;  %v15874_v39 = vld [vmem:[#allocation6 + $0xc80] ss:$8 sps:$4 sm:$0xff]   ;;  %v15894_v51 = vld [vmem:[#allocation6 + $0xcb4] ss:$8 sps:$4 sm:$0xff]  }
 0x632   :  { %9867 = vmatpush1.bf16.msra.mxu1 %v15793_v36  ;;  %7869 = vmatprep.subr.bf16.mxu0 %v15798_v55  ;;  %v15846_v36 = vld [vmem:[#allocation6 + $0xc34] ss:$8 sps:$4 sm:$0xff]  }
 0x633   :  { %9868 = vmatprep.subr.bf16.mxu1 %v15801_v21  ;;  %v15849_v55 = vld [vmem:[#allocation6 + $0xdb4] ss:$8 sps:$4 sm:$0xff]   ;;  %v15844_v21 = vld [vmem:[#allocation6 + $0xc30] ss:$8 sps:$4 sm:$0xff]  }
 0x635   :  { %7870 = vmatpush1.bf16.msra.mxu0 %v15796_v19  ;;  %v15847_v19 = vld [vmem:[#allocation6 + $0xdb0] ss:$8 sps:$4 sm:$0xff]  }
 0x636   :  { %9869 = vmatpush1.bf16.msra.mxu1 %v15799_v6  ;;  %7871 = vmatprep.subr.bf16.mxu0 %v15804_v57  ;;  %v15852_v6 = vld [vmem:[#allocation6 + $0xc44] ss:$8 sps:$4 sm:$0xff]  }
 0x637   :  { %9870 = vmatprep.subr.bf16.mxu1 %v15807_v0  ;;  %v15855_v57 = vld [vmem:[#allocation6 + $0xdc4] ss:$8 sps:$4 sm:$0xff]   ;;  %v15850_v0 = vld [vmem:[#allocation6 + $0xc40] ss:$8 sps:$4 sm:$0xff]  }
 0x639   :  { %7872 = vmatpush1.bf16.msra.mxu0 %v15802_v61  ;;  %v15853_v61 = vld [vmem:[#allocation6 + $0xdc0] ss:$8 sps:$4 sm:$0xff]  }
 0x63a   :  { %9871 = vmatpush1.bf16.msra.mxu1 %v15805_v18  ;;  %7873 = vmatprep.subr.bf16.mxu0 %v15810_v41  ;;  %v15858_v18 = vld [vmem:[#allocation6 + $0xc54] ss:$8 sps:$4 sm:$0xff]  }
 0x63b   :  { %9872 = vmatprep.subr.bf16.mxu1 %v15813_v34  ;;  %v15861_v41 = vld [vmem:[#allocation6 + $0xdd4] ss:$8 sps:$4 sm:$0xff]   ;;  %v15856_v34 = vld [vmem:[#allocation6 + $0xc50] ss:$8 sps:$4 sm:$0xff]  }
 0x63d   :  { %7874 = vmatpush1.bf16.msra.mxu0 %v15808_v13  ;;  %v15859_v13 = vld [vmem:[#allocation6 + $0xdd0] ss:$8 sps:$4 sm:$0xff]  }
 0x63e   :  { %9873 = vmatpush1.bf16.msra.mxu1 %v15811_v4  ;;  %7875 = vmatprep.subr.bf16.mxu0 %v15816_v44  ;;  %v15864_v4 = vld [vmem:[#allocation6 + $0xc64] ss:$8 sps:$4 sm:$0xff]  }
 0x63f   :  { %9874 = vmatprep.subr.bf16.mxu1 %v15819_v3  ;;  %v15867_v44 = vld [vmem:[#allocation6 + $0xde4] ss:$8 sps:$4 sm:$0xff]   ;;  %v15862_v3 = vld [vmem:[#allocation6 + $0xc60] ss:$8 sps:$4 sm:$0xff]  }
 0x641   :  { %7876 = vmatpush1.bf16.msra.mxu0 %v15814_v16  ;;  %v15865_v16 = vld [vmem:[#allocation6 + $0xde0] ss:$8 sps:$4 sm:$0xff]  }
 0x642   :  { %9875 = vmatpush1.bf16.msra.mxu1 %v15817_v43  ;;  %7877 = vmatprep.subr.bf16.mxu0 %v15822_v30  ;;  %v15870_v43 = vld [vmem:[#allocation6 + $0xc74] ss:$8 sps:$4 sm:$0xff]  }
 0x643   :  { %9876 = vmatprep.subr.bf16.mxu1 %v15825_v22  ;;  %v15873_v30 = vld [vmem:[#allocation6 + $0xdf4] ss:$8 sps:$4 sm:$0xff]   ;;  %v15868_v22 = vld [vmem:[#allocation6 + $0xc70] ss:$8 sps:$4 sm:$0xff]  }
 0x645   :  { %7878 = vmatpush1.bf16.msra.mxu0 %v15820_v12  ;;  %v15871_v12 = vld [vmem:[#allocation6 + $0xdf0] ss:$8 sps:$4 sm:$0xff]  }
 0x646   :  { %9877 = vmatpush1.bf16.msra.mxu1 %v15823_v63  ;;  %8213 = vmatprep.subr.bf16.mxu0 %v15828_v35  ;;  %v15876_v63 = vld [vmem:[#allocation6 + $0xc84] ss:$8 sps:$4 sm:$0xff]  }
 0x647   :  { %10212 = vmatprep.subr.bf16.mxu1 %v15831_v15  ;;  %v15879_v35 = vld [vmem:[#allocation6 + $0xe04] ss:$8 sps:$4 sm:$0xff]   ;;  %v15877_v15 = vld [vmem:[#allocation6 + $0xe00] ss:$8 sps:$4 sm:$0xff]  }
 0x648   :  { %7896 = vmatmul.mubr.bf16.vlgmr.msra.gmra.mrb[96].mxu0 %v18971_v17 }
 0x649   :  { %9895 = vmatmul.mubr.bf16.vlgmr.msra.gmra.mrb[96].mxu1 %v18971_v17  ;;  %8214 = vmatpush1.bf16.msra.mxu0 %v15826_v26  ;;  %v15885_v26 = vld [vmem:[#allocation6 + $0xe14] ss:$8 sps:$4 sm:$0xff]  }
 0x64a   :  { %10213 = vmatpush1.bf16.msra.mxu1 %v15829_v47  ;;  %8215 = vmatprep.subr.bf16.mxu0 %v15834_v14  ;;  %v15880_v47 = vld [vmem:[#allocation6 + $0xc90] ss:$8 sps:$4 sm:$0xff]  }
 0x64b   :  { %10214 = vmatprep.subr.bf16.mxu1 %v15837_v59  ;;  %7905 = vmatprep.mubr.bf16.mxu0 %v19484_v60  ;;  %v15883_v14 = vld [vmem:[#allocation6 + $0xe10] ss:$8 sps:$4 sm:$0xff]   ;;  %v15888_v59 = vld [vmem:[#allocation6 + $0xca4] ss:$8 sps:$4 sm:$0xff]  }
 0x64c   :  { %9904 = vmatprep.mubr.bf16.mxu1 %v19484_v60 }
 0x64d   :  { %8216 = vmatpush1.bf16.msra.mxu0 %v15832_v40  ;;  %v15891_v40 = vld [vmem:[#allocation6 + $0xe24] ss:$8 sps:$4 sm:$0xff]  }
 0x64e   :  { %10215 = vmatpush1.bf16.msra.mxu1 %v15835_v45  ;;  %8217 = vmatprep.subr.bf16.mxu0 %v15840_v23  ;;  %v15886_v45 = vld [vmem:[#allocation6 + $0xca0] ss:$8 sps:$4 sm:$0xff]  }
 0x64f   :  { %10216 = vmatprep.subr.bf16.mxu1 %v15843_v32  ;;  %v15889_v23 = vld [vmem:[#allocation6 + $0xe20] ss:$8 sps:$4 sm:$0xff]   ;;  %v15897_v32 = vld [vmem:[#allocation6 + $0xe34] ss:$8 sps:$4 sm:$0xff]  }
 0x650   :  { %7906 = vmatmul.mubr.bf16.gmra.mrb[100].mxu0 %v18979_v54 }
 0x651   :  { %9905 = vmatmul.mubr.bf16.gmra.mrb[100].mxu1 %v18979_v54  ;;  %8218 = vmatpush1.bf16.msra.mxu0 %v15838_v11  ;;  %v15892_v11 = vld [vmem:[#allocation6 + $0xcb0] ss:$8 sps:$4 sm:$0xff]  }
 0x652   :  { %8245 = vmatprep.mubr.bf16.mxu0 %v19487_v7  ;;  %10217 = vmatpush1.bf16.msra.mxu1 %v15841_v62  ;;  %v15895_v62 = vld [vmem:[#allocation6 + $0xe30] ss:$8 sps:$4 sm:$0xff]  }
 0x653   :  { %10244 = vmatprep.mubr.bf16.mxu1 %v19487_v7  ;;  %8219 = vmatprep.subr.bf16.mxu0 %v15846_v36  ;;  %v15900_v36 = vld [vmem:[#allocation6 + $0xcc4] ss:$8 sps:$4 sm:$0xff]  }
 0x654   :  { %10218 = vmatprep.subr.bf16.mxu1 %v15849_v55  ;;  %v15903_v55 = vld [vmem:[#allocation6 + $0xe44] ss:$8 sps:$4 sm:$0xff]  }
 0x655   :  { %8220 = vmatpush1.bf16.msra.mxu0 %v15844_v21  ;;  %v15898_v21 = vld [vmem:[#allocation6 + $0xcc0] ss:$8 sps:$4 sm:$0xff]  }
 0x656   :  { %10219 = vmatpush1.bf16.msra.mxu1 %v15847_v19  ;;  %8221 = vmatprep.subr.bf16.mxu0 %v15852_v6  ;;  %v15901_v19 = vld [vmem:[#allocation6 + $0xe40] ss:$8 sps:$4 sm:$0xff]   ;;  %v15906_v6 = vld [vmem:[#allocation6 + $0xcd4] ss:$8 sps:$4 sm:$0xff]  }
 0x657   :  { %10220 = vmatprep.subr.bf16.mxu1 %v15855_v57  ;;  %v15909_v57 = vld [vmem:[#allocation6 + $0xe54] ss:$8 sps:$4 sm:$0xff]  }
 0x659   :  { %8222 = vmatpush1.bf16.msra.mxu0 %v15850_v0  ;;  %v15904_v0 = vld [vmem:[#allocation6 + $0xcd0] ss:$8 sps:$4 sm:$0xff]  }
 0x65a   :  { %10221 = vmatpush1.bf16.msra.mxu1 %v15853_v61  ;;  %8223 = vmatprep.subr.bf16.mxu0 %v15858_v18  ;;  %v15907_v61 = vld [vmem:[#allocation6 + $0xe50] ss:$8 sps:$4 sm:$0xff]   ;;  %v15912_v18 = vld [vmem:[#allocation6 + $0xce4] ss:$8 sps:$4 sm:$0xff]  }
 0x65b   :  { %10222 = vmatprep.subr.bf16.mxu1 %v15861_v41  ;;  %v15915_v41 = vld [vmem:[#allocation6 + $0xe64] ss:$8 sps:$4 sm:$0xff]  }
 0x65d   :  { %8224 = vmatpush1.bf16.msra.mxu0 %v15856_v34  ;;  %v15910_v34 = vld [vmem:[#allocation6 + $0xce0] ss:$8 sps:$4 sm:$0xff]  }
 0x65e   :  { %10223 = vmatpush1.bf16.msra.mxu1 %v15859_v13  ;;  %8225 = vmatprep.subr.bf16.mxu0 %v15864_v4  ;;  %v15913_v13 = vld [vmem:[#allocation6 + $0xe60] ss:$8 sps:$4 sm:$0xff]   ;;  %v15918_v4 = vld [vmem:[#allocation6 + $0xcf4] ss:$8 sps:$4 sm:$0xff]  }
 0x65f   :  { %10224 = vmatprep.subr.bf16.mxu1 %v15867_v44  ;;  %v15921_v44 = vld [vmem:[#allocation6 + $0xe74] ss:$8 sps:$4 sm:$0xff]  }
 0x661   :  { %8226 = vmatpush1.bf16.msra.mxu0 %v15862_v3  ;;  %v15916_v3 = vld [vmem:[#allocation6 + $0xcf0] ss:$8 sps:$4 sm:$0xff]  }
 0x662   :  { %10225 = vmatpush1.bf16.msra.mxu1 %v15865_v16  ;;  %8227 = vmatprep.subr.bf16.mxu0 %v15870_v43  ;;  %v15919_v16 = vld [vmem:[#allocation6 + $0xe70] ss:$8 sps:$4 sm:$0xff]   ;;  %v15924_v43 = vld [vmem:[#allocation6 + $0xd04] ss:$8 sps:$4 sm:$0xff]  }
 0x663   :  { %10226 = vmatprep.subr.bf16.mxu1 %v15873_v30  ;;  %v15927_v30 = vld [vmem:[#allocation6 + $0xe84] ss:$8 sps:$4 sm:$0xff]  }
 0x665   :  { %8228 = vmatpush1.bf16.msra.mxu0 %v15868_v22  ;;  %v15922_v22 = vld [vmem:[#allocation6 + $0xd00] ss:$8 sps:$4 sm:$0xff]  }
 0x666   :  { %10227 = vmatpush1.bf16.msra.mxu1 %v15871_v12  ;;  %8229 = vmatprep.subr.bf16.mxu0 %v15876_v63  ;;  %v15925_v12 = vld [vmem:[#allocation6 + $0xe80] ss:$8 sps:$4 sm:$0xff]   ;;  %v15930_v63 = vld [vmem:[#allocation6 + $0xd14] ss:$8 sps:$4 sm:$0xff]  }
 0x667   :  { %10228 = vmatprep.subr.bf16.mxu1 %v15879_v35  ;;  %v15933_v35 = vld [vmem:[#allocation6 + $0xe94] ss:$8 sps:$4 sm:$0xff]  }
 0x669   :  { %8230 = vmatpush1.bf16.msra.mxu0 %v15874_v39  ;;  %v15928_v39 = vld [vmem:[#allocation6 + $0xd10] ss:$8 sps:$4 sm:$0xff]  }
 0x66a   :  { %10229 = vmatpush1.bf16.msra.mxu1 %v15877_v15  ;;  %8231 = vmatprep.subr.bf16.mxu0 %v15882_v5  ;;  %v15931_v15 = vld [vmem:[#allocation6 + $0xe90] ss:$8 sps:$4 sm:$0xff]   ;;  %v15936_v5 = vld [vmem:[#allocation6 + $0xd24] ss:$8 sps:$4 sm:$0xff]  }
 0x66b   :  { %10230 = vmatprep.subr.bf16.mxu1 %v15885_v26  ;;  %v15939_v26 = vld [vmem:[#allocation6 + $0xea4] ss:$8 sps:$4 sm:$0xff]  }
 0x66d   :  { %8232 = vmatpush1.bf16.msra.mxu0 %v15880_v47  ;;  %v15934_v47 = vld [vmem:[#allocation6 + $0xd20] ss:$8 sps:$4 sm:$0xff]  }
 0x66e   :  { %10231 = vmatpush1.bf16.msra.mxu1 %v15883_v14  ;;  %8233 = vmatprep.subr.bf16.mxu0 %v15888_v59  ;;  %v15937_v14 = vld [vmem:[#allocation6 + $0xea0] ss:$8 sps:$4 sm:$0xff]   ;;  %v15942_v59 = vld [vmem:[#allocation6 + $0xd34] ss:$8 sps:$4 sm:$0xff]  }
 0x66f   :  { %10232 = vmatprep.subr.bf16.mxu1 %v15891_v40  ;;  %v15945_v40 = vld [vmem:[#allocation6 + $0xeb4] ss:$8 sps:$4 sm:$0xff]  }
 0x671   :  { %8234 = vmatpush1.bf16.msra.mxu0 %v15886_v45  ;;  %v15940_v45 = vld [vmem:[#allocation6 + $0xd30] ss:$8 sps:$4 sm:$0xff]  }
 0x672   :  { %10233 = vmatpush1.bf16.msra.mxu1 %v15889_v23  ;;  %8235 = vmatprep.subr.bf16.mxu0 %v15894_v51  ;;  %v15943_v23 = vld [vmem:[#allocation6 + $0xeb0] ss:$8 sps:$4 sm:$0xff]   ;;  %v15948_v51 = vld [vmem:[#allocation6 + $0xd44] ss:$8 sps:$4 sm:$0xff]  }
 0x673   :  { %10234 = vmatprep.subr.bf16.mxu1 %v15897_v32  ;;  %v15951_v32 = vld [vmem:[#allocation6 + $0xec4] ss:$8 sps:$4 sm:$0xff]  }
 0x675   :  { %8236 = vmatpush1.bf16.msra.mxu0 %v15892_v11  ;;  %v15946_v11 = vld [vmem:[#allocation6 + $0xd40] ss:$8 sps:$4 sm:$0xff]  }
 0x676   :  { %10235 = vmatpush1.bf16.msra.mxu1 %v15895_v62  ;;  %8237 = vmatprep.subr.bf16.mxu0 %v15900_v36  ;;  %v15949_v62 = vld [vmem:[#allocation6 + $0xec0] ss:$8 sps:$4 sm:$0xff]   ;;  %v15954_v36 = vld [vmem:[#allocation6 + $0xd54] ss:$8 sps:$4 sm:$0xff]  }
 0x677   :  { %10236 = vmatprep.subr.bf16.mxu1 %v15903_v55  ;;  %v15957_v55 = vld [vmem:[#allocation6 + $0xed4] ss:$8 sps:$4 sm:$0xff]  }
 0x679   :  { %8238 = vmatpush1.bf16.msra.mxu0 %v15898_v21  ;;  %v15952_v21 = vld [vmem:[#allocation6 + $0xd50] ss:$8 sps:$4 sm:$0xff]  }
 0x67a   :  { %10237 = vmatpush1.bf16.msra.mxu1 %v15901_v19  ;;  %8239 = vmatprep.subr.bf16.mxu0 %v15906_v6  ;;  %v15955_v19 = vld [vmem:[#allocation6 + $0xed0] ss:$8 sps:$4 sm:$0xff]   ;;  %v15960_v6 = vld [vmem:[#allocation6 + $0xd64] ss:$8 sps:$4 sm:$0xff]  }
 0x67b   :  { %10238 = vmatprep.subr.bf16.mxu1 %v15909_v57  ;;  %v15963_v57 = vld [vmem:[#allocation6 + $0xee4] ss:$8 sps:$4 sm:$0xff]  }
 0x67d   :  { %8240 = vmatpush1.bf16.msra.mxu0 %v15904_v0  ;;  %v15958_v0 = vld [vmem:[#allocation6 + $0xd60] ss:$8 sps:$4 sm:$0xff]  }
 0x67e   :  { %10239 = vmatpush1.bf16.msra.mxu1 %v15907_v61  ;;  %8241 = vmatprep.subr.bf16.mxu0 %v15912_v18  ;;  %v15961_v61 = vld [vmem:[#allocation6 + $0xee0] ss:$8 sps:$4 sm:$0xff]   ;;  %v15966_v18 = vld [vmem:[#allocation6 + $0xd74] ss:$8 sps:$4 sm:$0xff]  }
 0x67f   :  { %10240 = vmatprep.subr.bf16.mxu1 %v15915_v41  ;;  %v15969_v41 = vld [vmem:[#allocation6 + $0xef4] ss:$8 sps:$4 sm:$0xff]  }
 0x681   :  { %8242 = vmatpush1.bf16.msra.mxu0 %v15910_v34  ;;  %v15964_v34 = vld [vmem:[#allocation6 + $0xd70] ss:$8 sps:$4 sm:$0xff]  }
 0x682   :  { %10241 = vmatpush1.bf16.msra.mxu1 %v15913_v13  ;;  %8243 = vmatprep.subr.bf16.mxu0 %v15918_v4  ;;  %v15967_v13 = vld [vmem:[#allocation6 + $0xef0] ss:$8 sps:$4 sm:$0xff]   ;;  %v16135_v4 = vld [vmem:[#allocation6 + $0x304] ss:$8 sps:$4 sm:$0xff]  }
 0x683   :  { %10242 = vmatprep.subr.bf16.mxu1 %v15921_v44  ;;  %v16136_v44 = vld [vmem:[#allocation6 + $0x484] ss:$8 sps:$4 sm:$0xff]  }
 0x685   :  { %8244 = vmatpush1.bf16.msra.mxu0 %v15916_v3  ;;  %v16137_v3 = vld [vmem:[#allocation6 + $0x300] ss:$8 sps:$4 sm:$0xff]  }
 0x686   :  { %10243 = vmatpush1.bf16.msra.mxu1 %v15919_v16  ;;  %8266 = vmatprep.subr.bf16.mxu0 %v15924_v43  ;;  %v16138_v16 = vld [vmem:[#allocation6 + $0x480] ss:$8 sps:$4 sm:$0xff]   ;;  %v16139_v43 = vld [vmem:[#allocation6 + $0x314] ss:$8 sps:$4 sm:$0xff]  }
 0x687   :  { %10265 = vmatprep.subr.bf16.mxu1 %v15927_v30  ;;  %v16140_v30 = vld [vmem:[#allocation6 + $0x494] ss:$8 sps:$4 sm:$0xff]  }
 0x688   :  { %8246 = vmatmul.mubr.bf16.vlgmr.msra.gmra.mrb[96].mxu0 %v19488_v49 }
 0x689   :  { %10245 = vmatmul.mubr.bf16.vlgmr.msra.gmra.mrb[96].mxu1 %v19488_v49  ;;  %8255 = vmatprep.mubr.bf16.mxu0 %v19491_v52 }
 0x68a   :  { %8267 = vmatpush1.bf16.msra.mxu0 %v15922_v22  ;;  %10254 = vmatprep.mubr.bf16.mxu1 %v19491_v52  ;;  %v16141_v22 = vld [vmem:[#allocation6 + $0x310] ss:$8 sps:$4 sm:$0xff]  }
 0x68b   :  { %10266 = vmatpush1.bf16.msra.mxu1 %v15925_v12  ;;  %8268 = vmatprep.subr.bf16.mxu0 %v15930_v63  ;;  %v16142_v12 = vld [vmem:[#allocation6 + $0x490] ss:$8 sps:$4 sm:$0xff]   ;;  %v16143_v63 = vld [vmem:[#allocation6 + $0x324] ss:$8 sps:$4 sm:$0xff]  }
 0x68c   :  { %10267 = vmatprep.subr.bf16.mxu1 %v15933_v35  ;;  %v16144_v35 = vld [vmem:[#allocation6 + $0x4a4] ss:$8 sps:$4 sm:$0xff]  }
 0x68e   :  { %8269 = vmatpush1.bf16.msra.mxu0 %v15928_v39  ;;  %v16145_v39 = vld [vmem:[#allocation6 + $0x320] ss:$8 sps:$4 sm:$0xff]  }
 0x68f   :  { %10268 = vmatpush1.bf16.msra.mxu1 %v15931_v15  ;;  %8270 = vmatprep.subr.bf16.mxu0 %v15936_v5  ;;  %v16146_v15 = vld [vmem:[#allocation6 + $0x4a0] ss:$8 sps:$4 sm:$0xff]   ;;  %v16147_v5 = vld [vmem:[#allocation6 + $0x334] ss:$8 sps:$4 sm:$0xff]  }
 0x690   :  { %8256 = vmatmul.mubr.bf16.gmra.mrb[100].mxu0 %v19492_v9  ;;  %10269 = vmatprep.subr.bf16.mxu1 %v15939_v26  ;;  %v16148_v26 = vld [vmem:[#allocation6 + $0x4b4] ss:$8 sps:$4 sm:$0xff]  }
 0x691   :  { %10255 = vmatmul.mubr.bf16.gmra.mrb[100].mxu1 %v19492_v9  ;;  %8298 = vmatprep.mubr.bf16.mxu0 %v19484_v60 }
 0x692   :  { %8271 = vmatpush1.bf16.msra.mxu0 %v15934_v47  ;;  %10297 = vmatprep.mubr.bf16.mxu1 %v19484_v60  ;;  %v16149_v47 = vld [vmem:[#allocation6 + $0x330] ss:$8 sps:$4 sm:$0xff]  }
 0x693   :  { %10270 = vmatpush1.bf16.msra.mxu1 %v15937_v14  ;;  %8272 = vmatprep.subr.bf16.mxu0 %v15942_v59  ;;  %v16150_v14 = vld [vmem:[#allocation6 + $0x4b0] ss:$8 sps:$4 sm:$0xff]   ;;  %v16151_v59 = vld [vmem:[#allocation6 + $0x344] ss:$8 sps:$4 sm:$0xff]  }
 0x694   :  { %10271 = vmatprep.subr.bf16.mxu1 %v15945_v40  ;;  %v16152_v40 = vld [vmem:[#allocation6 + $0x4c4] ss:$8 sps:$4 sm:$0xff]  }
 0x696   :  { %8273 = vmatpush1.bf16.msra.mxu0 %v15940_v45  ;;  %v16153_v45 = vld [vmem:[#allocation6 + $0x340] ss:$8 sps:$4 sm:$0xff]  }
 0x697   :  { %10272 = vmatpush1.bf16.msra.mxu1 %v15943_v23  ;;  %8274 = vmatprep.subr.bf16.mxu0 %v15948_v51  ;;  %v16154_v23 = vld [vmem:[#allocation6 + $0x4c0] ss:$8 sps:$4 sm:$0xff]   ;;  %v16155_v51 = vld [vmem:[#allocation6 + $0x354] ss:$8 sps:$4 sm:$0xff]  }
 0x698   :  { %10273 = vmatprep.subr.bf16.mxu1 %v15951_v32  ;;  %v16156_v32 = vld [vmem:[#allocation6 + $0x4d4] ss:$8 sps:$4 sm:$0xff]  }
 0x69a   :  { %8275 = vmatpush1.bf16.msra.mxu0 %v15946_v11  ;;  %v16158_v11 = vld [vmem:[#allocation6 + $0x4d0] ss:$8 sps:$4 sm:$0xff]  }
 0x69b   :  { %10274 = vmatpush1.bf16.msra.mxu1 %v15949_v62  ;;  %8276 = vmatprep.subr.bf16.mxu0 %v15954_v36  ;;  %v16159_v62 = vld [vmem:[#allocation6 + $0x364] ss:$8 sps:$4 sm:$0xff]  }
 0x69c   :  { %10275 = vmatprep.subr.bf16.mxu1 %v15957_v55  ;;  %v16160_v36 = vld [vmem:[#allocation6 + $0x4e4] ss:$8 sps:$4 sm:$0xff]   ;;  %v16161_v55 = vld [vmem:[#allocation6 + $0x360] ss:$8 sps:$4 sm:$0xff]  }
 0x69e   :  { %8277 = vmatpush1.bf16.msra.mxu0 %v15952_v21  ;;  %v16162_v21 = vld [vmem:[#allocation6 + $0x4e0] ss:$8 sps:$4 sm:$0xff]  }
 0x69f   :  { %10276 = vmatpush1.bf16.msra.mxu1 %v15955_v19  ;;  %8278 = vmatprep.subr.bf16.mxu0 %v15960_v6  ;;  %v16163_v19 = vld [vmem:[#allocation6 + $0x374] ss:$8 sps:$4 sm:$0xff]  }
 0x6a0   :  { %10277 = vmatprep.subr.bf16.mxu1 %v15963_v57  ;;  %v16164_v6 = vld [vmem:[#allocation6 + $0x4f4] ss:$8 sps:$4 sm:$0xff]   ;;  %v16165_v57 = vld [vmem:[#allocation6 + $0x370] ss:$8 sps:$4 sm:$0xff]  }
 0x6a2   :  { %8279 = vmatpush1.bf16.msra.mxu0 %v15958_v0  ;;  %v16166_v0 = vld [vmem:[#allocation6 + $0x4f0] ss:$8 sps:$4 sm:$0xff]  }
 0x6a3   :  { %10278 = vmatpush1.bf16.msra.mxu1 %v15961_v61  ;;  %8280 = vmatprep.subr.bf16.mxu0 %v15966_v18  ;;  %v16167_v61 = vld [vmem:[#allocation6 + $0x384] ss:$8 sps:$4 sm:$0xff]  }
 0x6a4   :  { %10279 = vmatprep.subr.bf16.mxu1 %v15969_v41  ;;  %v16168_v18 = vld [vmem:[#allocation6 + $0x504] ss:$8 sps:$4 sm:$0xff]   ;;  %v16169_v41 = vld [vmem:[#allocation6 + $0x380] ss:$8 sps:$4 sm:$0xff]  }
 0x6a6   :  { %8281 = vmatpush1.bf16.msra.mxu0 %v15964_v34  ;;  %v16170_v34 = vld [vmem:[#allocation6 + $0x500] ss:$8 sps:$4 sm:$0xff]  }
 0x6a7   :  { %10280 = vmatpush1.bf16.msra.mxu1 %v15967_v13  ;;  %10326 = vmatprep.subr.bf16.mxu0 %v16135_v4  ;;  %v16171_v13 = vld [vmem:[#allocation6 + $0x394] ss:$8 sps:$4 sm:$0xff]  }
 0x6a8   :  { %10880 = vmatprep.subr.bf16.mxu1 %v16136_v44  ;;  %v16172_v4 = vld [vmem:[#allocation6 + $0x514] ss:$8 sps:$4 sm:$0xff]   ;;  %v16173_v44 = vld [vmem:[#allocation6 + $0x390] ss:$8 sps:$4 sm:$0xff]  }
 0x6a9   :  { %8299 = vmatmul.mubr.bf16.vlgmr.msra.gmra.mrb[96].mxu0 %v19490_v10 }
 0x6aa   :  { %10298 = vmatmul.mubr.bf16.vlgmr.msra.gmra.mrb[96].mxu1 %v19490_v10  ;;  %10327 = vmatpush1.bf16.msra.mxu0 %v16137_v3  ;;  %v16174_v3 = vld [vmem:[#allocation6 + $0x510] ss:$8 sps:$4 sm:$0xff]  }
 0x6ab   :  { %10881 = vmatpush1.bf16.msra.mxu1 %v16138_v16  ;;  %10328 = vmatprep.subr.bf16.mxu0 %v16139_v43  ;;  %v16175_v16 = vld [vmem:[#allocation6 + $0x3a4] ss:$8 sps:$4 sm:$0xff]  }
 0x6ac   :  { %10882 = vmatprep.subr.bf16.mxu1 %v16140_v30  ;;  %8308 = vmatprep.mubr.bf16.mxu0 %v19484_v60  ;;  %v16176_v43 = vld [vmem:[#allocation6 + $0x524] ss:$8 sps:$4 sm:$0xff]   ;;  %v16177_v30 = vld [vmem:[#allocation6 + $0x3a0] ss:$8 sps:$4 sm:$0xff]  }
 0x6ad   :  { %10307 = vmatprep.mubr.bf16.mxu1 %v19484_v60 }
 0x6ae   :  { %10329 = vmatpush1.bf16.msra.mxu0 %v16141_v22  ;;  %v16178_v22 = vld [vmem:[#allocation6 + $0x520] ss:$8 sps:$4 sm:$0xff]  }
 0x6af   :  { %10883 = vmatpush1.bf16.msra.mxu1 %v16142_v12  ;;  %10330 = vmatprep.subr.bf16.mxu0 %v16143_v63  ;;  %v16179_v12 = vld [vmem:[#allocation6 + $0x3b4] ss:$8 sps:$4 sm:$0xff]  }
 0x6b0   :  { %10884 = vmatprep.subr.bf16.mxu1 %v16144_v35  ;;  %v16180_v63 = vld [vmem:[#allocation6 + $0x534] ss:$8 sps:$4 sm:$0xff]   ;;  %v16181_v35 = vld [vmem:[#allocation6 + $0x3b0] ss:$8 sps:$4 sm:$0xff]  }
 0x6b1   :  { %8309 = vmatmul.mubr.bf16.gmra.mrb[100].mxu0 %v19493_v50 }
 0x6b2   :  { %10308 = vmatmul.mubr.bf16.gmra.mrb[100].mxu1 %v19493_v50  ;;  %10331 = vmatpush1.bf16.msra.mxu0 %v16145_v39  ;;  %v16182_v39 = vld [vmem:[#allocation6 + $0x530] ss:$8 sps:$4 sm:$0xff]  }
 0x6b3   :  { %10358 = vmatprep.mubr.bf16.mxu0 %v18894_v58  ;;  %10885 = vmatpush1.bf16.msra.mxu1 %v16146_v15  ;;  %v16183_v15 = vld [vmem:[#allocation6 + $0x3c4] ss:$8 sps:$4 sm:$0xff]  }
 0x6b4   :  { %10912 = vmatprep.mubr.bf16.mxu1 %v18894_v58  ;;  %10332 = vmatprep.subr.bf16.mxu0 %v16147_v5  ;;  %v16157_v58 = vld [vmem:[#allocation6 + $0x350] ss:$8 sps:$4 sm:$0xff]   ;;  %v16184_v5 = vld [vmem:[#allocation6 + $0x544] ss:$8 sps:$4 sm:$0xff]  }
 0x6b5   :  { %10886 = vmatprep.subr.bf16.mxu1 %v16148_v26  ;;  %v16185_v26 = vld [vmem:[#allocation6 + $0x3c0] ss:$8 sps:$4 sm:$0xff]  }
 0x6b6   :  { %10333 = vmatpush1.bf16.msra.mxu0 %v16149_v47  ;;  %v16186_v47 = vld [vmem:[#allocation6 + $0x540] ss:$8 sps:$4 sm:$0xff]  }
 0x6b7   :  { %10887 = vmatpush1.bf16.msra.mxu1 %v16150_v14  ;;  %10334 = vmatprep.subr.bf16.mxu0 %v16151_v59  ;;  %v16187_v14 = vld [vmem:[#allocation6 + $0x3d4] ss:$8 sps:$4 sm:$0xff]  }
 0x6b8   :  { %10888 = vmatprep.subr.bf16.mxu1 %v16152_v40  ;;  %v16188_v59 = vld [vmem:[#allocation6 + $0x554] ss:$8 sps:$4 sm:$0xff]   ;;  %v16189_v40 = vld [vmem:[#allocation6 + $0x3d0] ss:$8 sps:$4 sm:$0xff]  }
 0x6ba   :  { %10335 = vmatpush1.bf16.msra.mxu0 %v16153_v45  ;;  %v16190_v45 = vld [vmem:[#allocation6 + $0x550] ss:$8 sps:$4 sm:$0xff]  }
 0x6bb   :  { %10889 = vmatpush1.bf16.msra.mxu1 %v16154_v23  ;;  %10336 = vmatprep.subr.bf16.mxu0 %v16155_v51  ;;  %v16191_v23 = vld [vmem:[#allocation6 + $0x3e4] ss:$8 sps:$4 sm:$0xff]  }
 0x6bc   :  { %10890 = vmatprep.subr.bf16.mxu1 %v16156_v32  ;;  %v16192_v51 = vld [vmem:[#allocation6 + $0x564] ss:$8 sps:$4 sm:$0xff]   ;;  %v16193_v32 = vld [vmem:[#allocation6 + $0x3e0] ss:$8 sps:$4 sm:$0xff]  }
 0x6be   :  { %10337 = vmatpush1.bf16.msra.mxu0 %v16157_v58  ;;  %v16194_v58 = vld [vmem:[#allocation6 + $0x560] ss:$8 sps:$4 sm:$0xff]  }
 0x6bf   :  { %10891 = vmatpush1.bf16.msra.mxu1 %v16158_v11  ;;  %10338 = vmatprep.subr.bf16.mxu0 %v16159_v62  ;;  %v16195_v11 = vld [vmem:[#allocation6 + $0x3f4] ss:$8 sps:$4 sm:$0xff]  }
 0x6c0   :  { %10892 = vmatprep.subr.bf16.mxu1 %v16160_v36  ;;  %v16196_v62 = vld [vmem:[#allocation6 + $0x574] ss:$8 sps:$4 sm:$0xff]   ;;  %v16197_v36 = vld [vmem:[#allocation6 + $0x3f0] ss:$8 sps:$4 sm:$0xff]  }
 0x6c2   :  { %10339 = vmatpush1.bf16.msra.mxu0 %v16161_v55  ;;  %v16198_v55 = vld [vmem:[#allocation6 + $0x570] ss:$8 sps:$4 sm:$0xff]  }
 0x6c3   :  { %10893 = vmatpush1.bf16.msra.mxu1 %v16162_v21  ;;  %10340 = vmatprep.subr.bf16.mxu0 %v16163_v19  ;;  %v16199_v21 = vld [vmem:[#allocation6 + $0x404] ss:$8 sps:$4 sm:$0xff]  }
 0x6c4   :  { %10894 = vmatprep.subr.bf16.mxu1 %v16164_v6  ;;  %v16200_v19 = vld [vmem:[#allocation6 + $0x584] ss:$8 sps:$4 sm:$0xff]   ;;  %v16201_v6 = vld [vmem:[#allocation6 + $0x400] ss:$8 sps:$4 sm:$0xff]  }
 0x6c6   :  { %10341 = vmatpush1.bf16.msra.mxu0 %v16165_v57  ;;  %v16202_v57 = vld [vmem:[#allocation6 + $0x580] ss:$8 sps:$4 sm:$0xff]  }
 0x6c7   :  { %10895 = vmatpush1.bf16.msra.mxu1 %v16166_v0  ;;  %10342 = vmatprep.subr.bf16.mxu0 %v16167_v61  ;;  %v16203_v0 = vld [vmem:[#allocation6 + $0x414] ss:$8 sps:$4 sm:$0xff]  }
 0x6c8   :  { %10896 = vmatprep.subr.bf16.mxu1 %v16168_v18  ;;  %v16204_v61 = vld [vmem:[#allocation6 + $0x594] ss:$8 sps:$4 sm:$0xff]   ;;  %v16205_v18 = vld [vmem:[#allocation6 + $0x410] ss:$8 sps:$4 sm:$0xff]  }
 0x6ca   :  { %10343 = vmatpush1.bf16.msra.mxu0 %v16169_v41  ;;  %v16206_v41 = vld [vmem:[#allocation6 + $0x590] ss:$8 sps:$4 sm:$0xff]  }
 0x6cb   :  { %10897 = vmatpush1.bf16.msra.mxu1 %v16170_v34  ;;  %10344 = vmatprep.subr.bf16.mxu0 %v16171_v13  ;;  %v16207_v34 = vld [vmem:[#allocation6 + $0x424] ss:$8 sps:$4 sm:$0xff]   ;;  %v16210_v13 = vld [vmem:[#allocation6 + $0x5a0] ss:$8 sps:$4 sm:$0xff]  }
 0x6cc   :  { %10898 = vmatprep.subr.bf16.mxu1 %v16172_v4  ;;  %v16211_v4 = vld [vmem:[#allocation6 + $0x434] ss:$8 sps:$4 sm:$0xff]  }
 0x6ce   :  { %10345 = vmatpush1.bf16.msra.mxu0 %v16173_v44  ;;  %v16212_v44 = vld [vmem:[#allocation6 + $0x5b4] ss:$8 sps:$4 sm:$0xff]  }
 0x6cf   :  { %10899 = vmatpush1.bf16.msra.mxu1 %v16174_v3  ;;  %10346 = vmatprep.subr.bf16.mxu0 %v16175_v16  ;;  %v16213_v3 = vld [vmem:[#allocation6 + $0x430] ss:$8 sps:$4 sm:$0xff]  }
 0x6d0   :  { %10900 = vmatprep.subr.bf16.mxu1 %v16176_v43  ;;  %v16214_v16 = vld [vmem:[#allocation6 + $0x5b0] ss:$8 sps:$4 sm:$0xff]   ;;  %v16215_v43 = vld [vmem:[#allocation6 + $0x444] ss:$8 sps:$4 sm:$0xff]  }
 0x6d2   :  { %10347 = vmatpush1.bf16.msra.mxu0 %v16177_v30  ;;  %v16216_v30 = vld [vmem:[#allocation6 + $0x5c4] ss:$8 sps:$4 sm:$0xff]  }
 0x6d3   :  { %10901 = vmatpush1.bf16.msra.mxu1 %v16178_v22  ;;  %10348 = vmatprep.subr.bf16.mxu0 %v16179_v12  ;;  %v16218_v22 = vld [vmem:[#allocation6 + $0x5c0] ss:$8 sps:$4 sm:$0xff]   ;;  %v16219_v12 = vld [vmem:[#allocation6 + $0x454] ss:$8 sps:$4 sm:$0xff]  }
 0x6d4   :  { %10902 = vmatprep.subr.bf16.mxu1 %v16180_v63  ;;  %v16220_v63 = vld [vmem:[#allocation6 + $0x5d4] ss:$8 sps:$4 sm:$0xff]  }
 0x6d6   :  { %10349 = vmatpush1.bf16.msra.mxu0 %v16181_v35  ;;  %v16221_v35 = vld [vmem:[#allocation6 + $0x450] ss:$8 sps:$4 sm:$0xff]  }
 0x6d7   :  { %10903 = vmatpush1.bf16.msra.mxu1 %v16182_v39  ;;  %10350 = vmatprep.subr.bf16.mxu0 %v16183_v15  ;;  %v16222_v39 = vld [vmem:[#allocation6 + $0x5d0] ss:$8 sps:$4 sm:$0xff]   ;;  %v16223_v15 = vld [vmem:[#allocation6 + $0x464] ss:$8 sps:$4 sm:$0xff]  }
 0x6d8   :  { %10904 = vmatprep.subr.bf16.mxu1 %v16184_v5  ;;  %v16224_v5 = vld [vmem:[#allocation6 + $0x5e4] ss:$8 sps:$4 sm:$0xff]  }
 0x6da   :  { %10351 = vmatpush1.bf16.msra.mxu0 %v16185_v26  ;;  %v16225_v26 = vld [vmem:[#allocation6 + $0x460] ss:$8 sps:$4 sm:$0xff]  }
 0x6db   :  { %10905 = vmatpush1.bf16.msra.mxu1 %v16186_v47  ;;  %10352 = vmatprep.subr.bf16.mxu0 %v16187_v14  ;;  %v16226_v47 = vld [vmem:[#allocation6 + $0x5e0] ss:$8 sps:$4 sm:$0xff]   ;;  %v16227_v14 = vld [vmem:[#allocation6 + $0x474] ss:$8 sps:$4 sm:$0xff]  }
 0x6dc   :  { %10906 = vmatprep.subr.bf16.mxu1 %v16188_v59  ;;  %v16228_v59 = vld [vmem:[#allocation6 + $0x5f4] ss:$8 sps:$4 sm:$0xff]  }
 0x6de   :  { %10353 = vmatpush1.bf16.msra.mxu0 %v16189_v40  ;;  %v16229_v40 = vld [vmem:[#allocation6 + $0x470] ss:$8 sps:$4 sm:$0xff]  }
 0x6df   :  { %10907 = vmatpush1.bf16.msra.mxu1 %v16190_v45  ;;  %10354 = vmatprep.subr.bf16.mxu0 %v16191_v23  ;;  %v16230_v45 = vld [vmem:[#allocation6 + $0x5f0] ss:$8 sps:$4 sm:$0xff]   ;;  %v16231_v23 = vld [vmem:[#allocation6 + $0x4] ss:$8 sps:$4 sm:$0xff]  }
 0x6e0   :  { %10908 = vmatprep.subr.bf16.mxu1 %v16192_v51  ;;  %v16232_v51 = vld [vmem:[#allocation6 + $0x184] ss:$8 sps:$4 sm:$0xff]  }
 0x6e2   :  { %10355 = vmatpush1.bf16.msra.mxu0 %v16193_v32  ;;  %v16233_v32 = vld [vmem:[#allocation6] ss:$8 sps:$4 sm:$0xff]  }
 0x6e3   :  { %10909 = vmatpush1.bf16.msra.mxu1 %v16194_v58  ;;  %10356 = vmatprep.subr.bf16.mxu0 %v16195_v11  ;;  %v16234_v58 = vld [vmem:[#allocation6 + $0x180] ss:$8 sps:$4 sm:$0xff]   ;;  %v16235_v11 = vld [vmem:[#allocation6 + $0x14] ss:$8 sps:$4 sm:$0xff]  }
 0x6e4   :  { %10910 = vmatprep.subr.bf16.mxu1 %v16196_v62  ;;  %v16236_v62 = vld [vmem:[#allocation6 + $0x194] ss:$8 sps:$4 sm:$0xff]  }
 0x6e6   :  { %10357 = vmatpush1.bf16.msra.mxu0 %v16197_v36  ;;  %v16237_v36 = vld [vmem:[#allocation6 + $0x10] ss:$8 sps:$4 sm:$0xff]  }
 0x6e7   :  { %10911 = vmatpush1.bf16.msra.mxu1 %v16198_v55  ;;  %10379 = vmatprep.subr.bf16.mxu0 %v16199_v21  ;;  %v16238_v55 = vld [vmem:[#allocation6 + $0x190] ss:$8 sps:$4 sm:$0xff]   ;;  %v16239_v21 = vld [vmem:[#allocation6 + $0x24] ss:$8 sps:$4 sm:$0xff]  }
 0x6e8   :  { %10933 = vmatprep.subr.bf16.mxu1 %v16200_v19  ;;  %v16240_v19 = vld [vmem:[#allocation6 + $0x1a4] ss:$8 sps:$4 sm:$0xff]  }
 0x6e9   :  { %10359 = vmatmul.mubr.bf16.vlgmr.msra.gmra.mrb[104].mxu0 %v18902_v56 }
 0x6ea   :  { %10913 = vmatmul.mubr.bf16.vlgmr.msra.gmra.mrb[104].mxu1 %v18902_v56  ;;  %10368 = vmatprep.mubr.bf16.mxu0 %v18908_v24  ;;  %v16208_v56 = vld [vmem:[#allocation6 + $0x5a4] ss:$8 sps:$4 sm:$0xff]  }
 0x6eb   :  { %10380 = vmatpush1.bf16.msra.mxu0 %v16201_v6  ;;  %10922 = vmatprep.mubr.bf16.mxu1 %v18908_v24  ;;  %v16209_v24 = vld [vmem:[#allocation6 + $0x420] ss:$8 sps:$4 sm:$0xff]  }
 0x6ec   :  { %10934 = vmatpush1.bf16.msra.mxu1 %v16202_v57  ;;  %10381 = vmatprep.subr.bf16.mxu0 %v16203_v0  ;;  %v16242_v6 = vld [vmem:[#allocation6 + $0x1a0] ss:$8 sps:$4 sm:$0xff]   ;;  %v16243_v57 = vld [vmem:[#allocation6 + $0x34] ss:$8 sps:$4 sm:$0xff]  }
 0x6ed   :  { %10935 = vmatprep.subr.bf16.mxu1 %v16204_v61  ;;  %v16244_v0 = vld [vmem:[#allocation6 + $0x1b4] ss:$8 sps:$4 sm:$0xff]   ;;  %v16245_v61 = vld [vmem:[#allocation6 + $0x30] ss:$8 sps:$4 sm:$0xff]  }
 0x6ef   :  { %10382 = vmatpush1.bf16.msra.mxu0 %v16205_v18  ;;  %v16246_v18 = vld [vmem:[#allocation6 + $0x1b0] ss:$8 sps:$4 sm:$0xff]  }
 0x6f0   :  { %10936 = vmatpush1.bf16.msra.mxu1 %v16206_v41  ;;  %10383 = vmatprep.subr.bf16.mxu0 %v16207_v34  ;;  %v16247_v41 = vld [vmem:[#allocation6 + $0x44] ss:$8 sps:$4 sm:$0xff]  }
 0x6f1   :  { %10369 = vmatmul.mubr.bf16.gmra.mrb[108].mxu0 %v18915_v31  ;;  %10937 = vmatprep.subr.bf16.mxu1 %v16208_v56  ;;  %v16248_v34 = vld [vmem:[#allocation6 + $0x1c4] ss:$8 sps:$4 sm:$0xff]   ;;  %v16250_v56 = vld [vmem:[#allocation6 + $0x1c0] ss:$8 sps:$4 sm:$0xff]  }
 0x6f2   :  { %10923 = vmatmul.mubr.bf16.gmra.mrb[108].mxu1 %v18915_v31  ;;  %10411 = vmatprep.mubr.bf16.mxu0 %v19484_v60  ;;  %v16217_v31 = vld [vmem:[#allocation6 + $0x440] ss:$8 sps:$4 sm:$0xff]  }
 0x6f3   :  { %10384 = vmatpush1.bf16.msra.mxu0 %v16209_v24  ;;  %10965 = vmatprep.mubr.bf16.mxu1 %v19484_v60  ;;  %v16251_v24 = vld [vmem:[#allocation6 + $0x54] ss:$8 sps:$4 sm:$0xff]  }
 0x6f4   :  { %10938 = vmatpush1.bf16.msra.mxu1 %v16210_v13  ;;  %10385 = vmatprep.subr.bf16.mxu0 %v16211_v4  ;;  %v16252_v13 = vld [vmem:[#allocation6 + $0x1d4] ss:$8 sps:$4 sm:$0xff]   ;;  %v16254_v4 = vld [vmem:[#allocation6 + $0x1d0] ss:$8 sps:$4 sm:$0xff]  }
 0x6f5   :  { %10939 = vmatprep.subr.bf16.mxu1 %v16212_v44  ;;  %v16255_v44 = vld [vmem:[#allocation6 + $0x64] ss:$8 sps:$4 sm:$0xff]  }
 0x6f7   :  { %10386 = vmatpush1.bf16.msra.mxu0 %v16213_v3  ;;  %v16256_v3 = vld [vmem:[#allocation6 + $0x1e4] ss:$8 sps:$4 sm:$0xff]  }
 0x6f8   :  { %10940 = vmatpush1.bf16.msra.mxu1 %v16214_v16  ;;  %10387 = vmatprep.subr.bf16.mxu0 %v16215_v43  ;;  %v16257_v16 = vld [vmem:[#allocation6 + $0x60] ss:$8 sps:$4 sm:$0xff]  }
 0x6f9   :  { %10941 = vmatprep.subr.bf16.mxu1 %v16216_v30  ;;  %v16258_v43 = vld [vmem:[#allocation6 + $0x1e0] ss:$8 sps:$4 sm:$0xff]   ;;  %v16259_v30 = vld [vmem:[#allocation6 + $0x74] ss:$8 sps:$4 sm:$0xff]  }
 0x6fb   :  { %10388 = vmatpush1.bf16.msra.mxu0 %v16217_v31  ;;  %v16260_v31 = vld [vmem:[#allocation6 + $0x1f4] ss:$8 sps:$4 sm:$0xff]  }
 0x6fc   :  { %10942 = vmatpush1.bf16.msra.mxu1 %v16218_v22  ;;  %10389 = vmatprep.subr.bf16.mxu0 %v16219_v12  ;;  %v16261_v22 = vld [vmem:[#allocation6 + $0x70] ss:$8 sps:$4 sm:$0xff]  }
 0x6fd   :  { %10943 = vmatprep.subr.bf16.mxu1 %v16220_v63  ;;  %v16262_v12 = vld [vmem:[#allocation6 + $0x1f0] ss:$8 sps:$4 sm:$0xff]   ;;  %v16263_v63 = vld [vmem:[#allocation6 + $0x84] ss:$8 sps:$4 sm:$0xff]  }
 0x6ff   :  { %10390 = vmatpush1.bf16.msra.mxu0 %v16221_v35  ;;  %v16264_v35 = vld [vmem:[#allocation6 + $0x204] ss:$8 sps:$4 sm:$0xff]  }
 0x700   :  { %10944 = vmatpush1.bf16.msra.mxu1 %v16222_v39  ;;  %10391 = vmatprep.subr.bf16.mxu0 %v16223_v15  ;;  %v16265_v39 = vld [vmem:[#allocation6 + $0x80] ss:$8 sps:$4 sm:$0xff]  }
 0x701   :  { %10945 = vmatprep.subr.bf16.mxu1 %v16224_v5  ;;  %v16266_v15 = vld [vmem:[#allocation6 + $0x200] ss:$8 sps:$4 sm:$0xff]   ;;  %v16267_v5 = vld [vmem:[#allocation6 + $0x94] ss:$8 sps:$4 sm:$0xff]  }
 0x703   :  { %10392 = vmatpush1.bf16.msra.mxu0 %v16225_v26  ;;  %v16268_v26 = vld [vmem:[#allocation6 + $0x214] ss:$8 sps:$4 sm:$0xff]  }
 0x704   :  { %10946 = vmatpush1.bf16.msra.mxu1 %v16226_v47  ;;  %10393 = vmatprep.subr.bf16.mxu0 %v16227_v14  ;;  %v16269_v47 = vld [vmem:[#allocation6 + $0x90] ss:$8 sps:$4 sm:$0xff]  }
 0x705   :  { %10947 = vmatprep.subr.bf16.mxu1 %v16228_v59  ;;  %v16270_v14 = vld [vmem:[#allocation6 + $0x210] ss:$8 sps:$4 sm:$0xff]   ;;  %v16271_v59 = vld [vmem:[#allocation6 + $0xa4] ss:$8 sps:$4 sm:$0xff]  }
 0x707   :  { %10394 = vmatpush1.bf16.msra.mxu0 %v16229_v40  ;;  %v16272_v40 = vld [vmem:[#allocation6 + $0x224] ss:$8 sps:$4 sm:$0xff]  }
 0x708   :  { %10948 = vmatpush1.bf16.msra.mxu1 %v16230_v45  ;;  %10432 = vmatprep.subr.bf16.mxu0 %v16231_v23  ;;  %v16273_v45 = vld [vmem:[#allocation6 + $0xa0] ss:$8 sps:$4 sm:$0xff]  }
 0x709   :  { %10986 = vmatprep.subr.bf16.mxu1 %v16232_v51  ;;  %v16274_v23 = vld [vmem:[#allocation6 + $0x220] ss:$8 sps:$4 sm:$0xff]   ;;  %v16275_v51 = vld [vmem:[#allocation6 + $0xb4] ss:$8 sps:$4 sm:$0xff]  }
 0x70a   :  { %10412 = vmatmul.mubr.bf16.vlgmr.msra.gmra.mrb[104].mxu0 %v18924_v2 }
 0x70b   :  { %10966 = vmatmul.mubr.bf16.vlgmr.msra.gmra.mrb[104].mxu1 %v18924_v2  ;;  %10433 = vmatpush1.bf16.msra.mxu0 %v16233_v32  ;;  %v16241_v2 = vld [vmem:[#allocation6 + $0x20] ss:$8 sps:$4 sm:$0xff]   ;;  %v16276_v32 = vld [vmem:[#allocation6 + $0x234] ss:$8 sps:$4 sm:$0xff]  }
 0x70c   :  { %10987 = vmatpush1.bf16.msra.mxu1 %v16234_v58  ;;  %10434 = vmatprep.subr.bf16.mxu0 %v16235_v11  ;;  %v16277_v58 = vld [vmem:[#allocation6 + $0xb0] ss:$8 sps:$4 sm:$0xff]  }
 0x70d   :  { %10988 = vmatprep.subr.bf16.mxu1 %v16236_v62  ;;  %10421 = vmatprep.mubr.bf16.mxu0 %v19484_v60  ;;  %v16278_v11 = vld [vmem:[#allocation6 + $0x230] ss:$8 sps:$4 sm:$0xff]   ;;  %v16279_v62 = vld [vmem:[#allocation6 + $0xc4] ss:$8 sps:$4 sm:$0xff]  }
 0x70e   :  { %10975 = vmatprep.mubr.bf16.mxu1 %v19484_v60 }
 0x70f   :  { %10435 = vmatpush1.bf16.msra.mxu0 %v16237_v36  ;;  %v16280_v36 = vld [vmem:[#allocation6 + $0x244] ss:$8 sps:$4 sm:$0xff]  }
 0x710   :  { %10989 = vmatpush1.bf16.msra.mxu1 %v16238_v55  ;;  %10436 = vmatprep.subr.bf16.mxu0 %v16239_v21  ;;  %v16281_v55 = vld [vmem:[#allocation6 + $0xc0] ss:$8 sps:$4 sm:$0xff]  }
 0x711   :  { %10990 = vmatprep.subr.bf16.mxu1 %v16240_v19  ;;  %v16282_v21 = vld [vmem:[#allocation6 + $0x240] ss:$8 sps:$4 sm:$0xff]   ;;  %v16283_v19 = vld [vmem:[#allocation6 + $0xd4] ss:$8 sps:$4 sm:$0xff]  }
 0x712   :  { %10422 = vmatmul.mubr.bf16.gmra.mrb[108].mxu0 %v18933_v33 }
 0x713   :  { %10976 = vmatmul.mubr.bf16.gmra.mrb[108].mxu1 %v18933_v33  ;;  %10437 = vmatpush1.bf16.msra.mxu0 %v16241_v2  ;;  %v16249_v33 = vld [vmem:[#allocation6 + $0x40] ss:$8 sps:$4 sm:$0xff]   ;;  %v16284_v2 = vld [vmem:[#allocation6 + $0x254] ss:$8 sps:$4 sm:$0xff]  }
 0x714   :  { %10464 = vmatprep.mubr.bf16.mxu0 %v18794_v48  ;;  %10991 = vmatpush1.bf16.msra.mxu1 %v16242_v6  ;;  %v16285_v6 = vld [vmem:[#allocation6 + $0xd0] ss:$8 sps:$4 sm:$0xff]  }
 0x715   :  { %11018 = vmatprep.mubr.bf16.mxu1 %v18794_v48  ;;  %10438 = vmatprep.subr.bf16.mxu0 %v16243_v57  ;;  %v16253_v48 = vld [vmem:[#allocation6 + $0x50] ss:$8 sps:$4 sm:$0xff]  }
 0x716   :  { %10992 = vmatprep.subr.bf16.mxu1 %v16244_v0  ;;  %v16286_v57 = vld [vmem:[#allocation6 + $0x250] ss:$8 sps:$4 sm:$0xff]   ;;  %v16287_v0 = vld [vmem:[#allocation6 + $0xe4] ss:$8 sps:$4 sm:$0xff]  }
 0x717   :  { %10439 = vmatpush1.bf16.msra.mxu0 %v16245_v61  ;;  %v16288_v61 = vld [vmem:[#allocation6 + $0x264] ss:$8 sps:$4 sm:$0xff]  }
 0x718   :  { %10993 = vmatpush1.bf16.msra.mxu1 %v16246_v18  ;;  %10440 = vmatprep.subr.bf16.mxu0 %v16247_v41  ;;  %v16289_v18 = vld [vmem:[#allocation6 + $0xe0] ss:$8 sps:$4 sm:$0xff]  }
 0x719   :  { %10994 = vmatprep.subr.bf16.mxu1 %v16248_v34  ;;  %v16290_v41 = vld [vmem:[#allocation6 + $0x260] ss:$8 sps:$4 sm:$0xff]   ;;  %v16291_v34 = vld [vmem:[#allocation6 + $0xf4] ss:$8 sps:$4 sm:$0xff]  }
 0x71b   :  { %10441 = vmatpush1.bf16.msra.mxu0 %v16249_v33  ;;  %v16292_v33 = vld [vmem:[#allocation6 + $0x274] ss:$8 sps:$4 sm:$0xff]  }
 0x71c   :  { %10995 = vmatpush1.bf16.msra.mxu1 %v16250_v56  ;;  %10442 = vmatprep.subr.bf16.mxu0 %v16251_v24  ;;  %v16293_v56 = vld [vmem:[#allocation6 + $0xf0] ss:$8 sps:$4 sm:$0xff]  }
 0x71d   :  { %10996 = vmatprep.subr.bf16.mxu1 %v16252_v13  ;;  %v16294_v24 = vld [vmem:[#allocation6 + $0x270] ss:$8 sps:$4 sm:$0xff]   ;;  %v16295_v13 = vld [vmem:[#allocation6 + $0x104] ss:$8 sps:$4 sm:$0xff]  }
 0x71f   :  { %10443 = vmatpush1.bf16.msra.mxu0 %v16253_v48  ;;  %v16296_v48 = vld [vmem:[#allocation6 + $0x284] ss:$8 sps:$4 sm:$0xff]  }
 0x720   :  { %10997 = vmatpush1.bf16.msra.mxu1 %v16254_v4  ;;  %10444 = vmatprep.subr.bf16.mxu0 %v16255_v44  ;;  %v16297_v4 = vld [vmem:[#allocation6 + $0x100] ss:$8 sps:$4 sm:$0xff]  }
 0x721   :  { %10998 = vmatprep.subr.bf16.mxu1 %v16256_v3  ;;  %v16298_v44 = vld [vmem:[#allocation6 + $0x280] ss:$8 sps:$4 sm:$0xff]   ;;  %v16299_v3 = vld [vmem:[#allocation6 + $0x114] ss:$8 sps:$4 sm:$0xff]  }
 0x723   :  { %10445 = vmatpush1.bf16.msra.mxu0 %v16257_v16  ;;  %v16300_v16 = vld [vmem:[#allocation6 + $0x294] ss:$8 sps:$4 sm:$0xff]  }
 0x724   :  { %10999 = vmatpush1.bf16.msra.mxu1 %v16258_v43  ;;  %10446 = vmatprep.subr.bf16.mxu0 %v16259_v30  ;;  %v16301_v43 = vld [vmem:[#allocation6 + $0x110] ss:$8 sps:$4 sm:$0xff]  }
 0x725   :  { %11000 = vmatprep.subr.bf16.mxu1 %v16260_v31  ;;  %v16302_v30 = vld [vmem:[#allocation6 + $0x290] ss:$8 sps:$4 sm:$0xff]   ;;  %v16303_v31 = vld [vmem:[#allocation6 + $0x124] ss:$8 sps:$4 sm:$0xff]  }
 0x727   :  { %10447 = vmatpush1.bf16.msra.mxu0 %v16261_v22  ;;  %v16305_v22 = vld [vmem:[#allocation6 + $0x120] ss:$8 sps:$4 sm:$0xff]  }
 0x728   :  { %11001 = vmatpush1.bf16.msra.mxu1 %v16262_v12  ;;  %10448 = vmatprep.subr.bf16.mxu0 %v16263_v63  ;;  %v16306_v12 = vld [vmem:[#allocation6 + $0x2a0] ss:$8 sps:$4 sm:$0xff]   ;;  %v16307_v63 = vld [vmem:[#allocation6 + $0x134] ss:$8 sps:$4 sm:$0xff]  }
 0x729   :  { %11002 = vmatprep.subr.bf16.mxu1 %v16264_v35  ;;  %v16308_v35 = vld [vmem:[#allocation6 + $0x2b4] ss:$8 sps:$4 sm:$0xff]  }
 0x72b   :  { %10449 = vmatpush1.bf16.msra.mxu0 %v16265_v39  ;;  %v16309_v39 = vld [vmem:[#allocation6 + $0x130] ss:$8 sps:$4 sm:$0xff]  }
 0x72c   :  { %11003 = vmatpush1.bf16.msra.mxu1 %v16266_v15  ;;  %10450 = vmatprep.subr.bf16.mxu0 %v16267_v5  ;;  %v16310_v15 = vld [vmem:[#allocation6 + $0x2b0] ss:$8 sps:$4 sm:$0xff]   ;;  %v16311_v5 = vld [vmem:[#allocation6 + $0x144] ss:$8 sps:$4 sm:$0xff]  }
 0x72d   :  { %11004 = vmatprep.subr.bf16.mxu1 %v16268_v26  ;;  %v16312_v26 = vld [vmem:[#allocation6 + $0x2c4] ss:$8 sps:$4 sm:$0xff]  }
 0x72f   :  { %10451 = vmatpush1.bf16.msra.mxu0 %v16269_v47  ;;  %v16313_v47 = vld [vmem:[#allocation6 + $0x140] ss:$8 sps:$4 sm:$0xff]  }
 0x730   :  { %11005 = vmatpush1.bf16.msra.mxu1 %v16270_v14  ;;  %10452 = vmatprep.subr.bf16.mxu0 %v16271_v59  ;;  %v16314_v14 = vld [vmem:[#allocation6 + $0x2c0] ss:$8 sps:$4 sm:$0xff]   ;;  %v16315_v59 = vld [vmem:[#allocation6 + $0x154] ss:$8 sps:$4 sm:$0xff]  }
 0x731   :  { %11006 = vmatprep.subr.bf16.mxu1 %v16272_v40  ;;  %v16316_v40 = vld [vmem:[#allocation6 + $0x2d4] ss:$8 sps:$4 sm:$0xff]  }
 0x733   :  { %10453 = vmatpush1.bf16.msra.mxu0 %v16273_v45  ;;  %v16317_v45 = vld [vmem:[#allocation6 + $0x150] ss:$8 sps:$4 sm:$0xff]  }
 0x734   :  { %11007 = vmatpush1.bf16.msra.mxu1 %v16274_v23  ;;  %10454 = vmatprep.subr.bf16.mxu0 %v16275_v51  ;;  %v16318_v23 = vld [vmem:[#allocation6 + $0x2d0] ss:$8 sps:$4 sm:$0xff]   ;;  %v16319_v51 = vld [vmem:[#allocation6 + $0x164] ss:$8 sps:$4 sm:$0xff]  }
 0x735   :  { %11008 = vmatprep.subr.bf16.mxu1 %v16276_v32  ;;  %v16320_v32 = vld [vmem:[#allocation6 + $0x2e4] ss:$8 sps:$4 sm:$0xff]  }
 0x737   :  { %10455 = vmatpush1.bf16.msra.mxu0 %v16277_v58  ;;  %v16321_v58 = vld [vmem:[#allocation6 + $0x160] ss:$8 sps:$4 sm:$0xff]  }
 0x738   :  { %11009 = vmatpush1.bf16.msra.mxu1 %v16278_v11  ;;  %10456 = vmatprep.subr.bf16.mxu0 %v16279_v62  ;;  %v16322_v11 = vld [vmem:[#allocation6 + $0x2e0] ss:$8 sps:$4 sm:$0xff]   ;;  %v16323_v62 = vld [vmem:[#allocation6 + $0x174] ss:$8 sps:$4 sm:$0xff]  }
 0x739   :  { %11010 = vmatprep.subr.bf16.mxu1 %v16280_v36  ;;  %v16324_v36 = vld [vmem:[#allocation6 + $0x2f4] ss:$8 sps:$4 sm:$0xff]  }
 0x73b   :  { %10457 = vmatpush1.bf16.msra.mxu0 %v16281_v55  ;;  %v16325_v55 = vld [vmem:[#allocation6 + $0x170] ss:$8 sps:$4 sm:$0xff]  }
 0x73c   :  { %11011 = vmatpush1.bf16.msra.mxu1 %v16282_v21  ;;  %10458 = vmatprep.subr.bf16.mxu0 %v16283_v19  ;;  %v16326_v21 = vld [vmem:[#allocation6 + $0x2f0] ss:$8 sps:$4 sm:$0xff]   ;;  %v16327_v19 = vld [vmem:[#allocation6 + $0x604] ss:$8 sps:$4 sm:$0xff]  }
 0x73d   :  { %11012 = vmatprep.subr.bf16.mxu1 %v16284_v2  ;;  %v16328_v2 = vld [vmem:[#allocation6 + $0x784] ss:$8 sps:$4 sm:$0xff]  }
 0x73f   :  { %10459 = vmatpush1.bf16.msra.mxu0 %v16285_v6  ;;  %v16329_v6 = vld [vmem:[#allocation6 + $0x600] ss:$8 sps:$4 sm:$0xff]  }
 0x740   :  { %11013 = vmatpush1.bf16.msra.mxu1 %v16286_v57  ;;  %10460 = vmatprep.subr.bf16.mxu0 %v16287_v0  ;;  %v16330_v57 = vld [vmem:[#allocation6 + $0x780] ss:$8 sps:$4 sm:$0xff]   ;;  %v16331_v0 = vld [vmem:[#allocation6 + $0x614] ss:$8 sps:$4 sm:$0xff]  }
 0x741   :  { %11014 = vmatprep.subr.bf16.mxu1 %v16288_v61  ;;  %v16332_v61 = vld [vmem:[#allocation6 + $0x794] ss:$8 sps:$4 sm:$0xff]  }
 0x743   :  { %10461 = vmatpush1.bf16.msra.mxu0 %v16289_v18  ;;  %v16333_v18 = vld [vmem:[#allocation6 + $0x610] ss:$8 sps:$4 sm:$0xff]  }
 0x744   :  { %11015 = vmatpush1.bf16.msra.mxu1 %v16290_v41  ;;  %10462 = vmatprep.subr.bf16.mxu0 %v16291_v34  ;;  %v16334_v41 = vld [vmem:[#allocation6 + $0x790] ss:$8 sps:$4 sm:$0xff]   ;;  %v16335_v34 = vld [vmem:[#allocation6 + $0x624] ss:$8 sps:$4 sm:$0xff]  }
 0x745   :  { %11016 = vmatprep.subr.bf16.mxu1 %v16292_v33  ;;  %v16336_v33 = vld [vmem:[#allocation6 + $0x7a4] ss:$8 sps:$4 sm:$0xff]  }
 0x747   :  { %10463 = vmatpush1.bf16.msra.mxu0 %v16293_v56  ;;  %v16338_v56 = vld [vmem:[#allocation6 + $0x7a0] ss:$8 sps:$4 sm:$0xff]  }
 0x748   :  { %11017 = vmatpush1.bf16.msra.mxu1 %v16294_v24  ;;  %10485 = vmatprep.subr.bf16.mxu0 %v16295_v13  ;;  %v16339_v24 = vld [vmem:[#allocation6 + $0x634] ss:$8 sps:$4 sm:$0xff]  }
 0x749   :  { %11039 = vmatprep.subr.bf16.mxu1 %v16296_v48  ;;  %v16340_v13 = vld [vmem:[#allocation6 + $0x7b4] ss:$8 sps:$4 sm:$0xff]   ;;  %v16341_v48 = vld [vmem:[#allocation6 + $0x630] ss:$8 sps:$4 sm:$0xff]  }
 0x74a   :  { %10465 = vmatmul.mubr.bf16.vlgmr.msra.gmra.mrb[104].mxu0 %v18787_v37 }
 0x74b   :  { %11019 = vmatmul.mubr.bf16.vlgmr.msra.gmra.mrb[104].mxu1 %v18787_v37  ;;  %10474 = vmatprep.mubr.bf16.mxu0 %v18834_v1  ;;  %v16304_v37 = vld [vmem:[#allocation6 + $0x2a4] ss:$8 sps:$4 sm:$0xff]  }
 0x74c   :  { %10486 = vmatpush1.bf16.msra.mxu0 %v16297_v4  ;;  %11028 = vmatprep.mubr.bf16.mxu1 %v18834_v1  ;;  %v16342_v4 = vld [vmem:[#allocation6 + $0x7b0] ss:$8 sps:$4 sm:$0xff]  }
 0x74d   :  { %11040 = vmatpush1.bf16.msra.mxu1 %v16298_v44  ;;  %10487 = vmatprep.subr.bf16.mxu0 %v16299_v3  ;;  %v16343_v44 = vld [vmem:[#allocation6 + $0x644] ss:$8 sps:$4 sm:$0xff]  }
 0x74e   :  { %11041 = vmatprep.subr.bf16.mxu1 %v16300_v16  ;;  %v16344_v3 = vld [vmem:[#allocation6 + $0x7c4] ss:$8 sps:$4 sm:$0xff]   ;;  %v16345_v16 = vld [vmem:[#allocation6 + $0x640] ss:$8 sps:$4 sm:$0xff]  }
 0x750   :  { %10488 = vmatpush1.bf16.msra.mxu0 %v16301_v43 }
 0x751   :  { %11042 = vmatpush1.bf16.msra.mxu1 %v16302_v30  ;;  %10489 = vmatprep.subr.bf16.mxu0 %v16303_v31  ;;  %v16346_v30 = vld [vmem:[#allocation6 + $0x7c0] ss:$8 sps:$4 sm:$0xff]  }
 0x752   :  { %10475 = vmatmul.mubr.bf16.gmra.mrb[108].mxu0 %v18828_v53  ;;  %11043 = vmatprep.subr.bf16.mxu1 %v16304_v37  ;;  %v16347_v37 = vld [vmem:[#allocation6 + $0x654] ss:$8 sps:$4 sm:$0xff]  }
 0x753   :  { %11029 = vmatmul.mubr.bf16.gmra.mrb[108].mxu1 %v18828_v53  ;;  %10517 = vmatprep.mubr.bf16.mxu0 %v19484_v60 }
 0x754   :  { %10490 = vmatpush1.bf16.msra.mxu0 %v16305_v22  ;;  %11071 = vmatprep.mubr.bf16.mxu1 %v19484_v60 }
 0x755   :  { %11044 = vmatpush1.bf16.msra.mxu1 %v16306_v12  ;;  %10491 = vmatprep.subr.bf16.mxu0 %v16307_v63  ;;  %v16348_v63 = vld [vmem:[#allocation6 + $0x7d4] ss:$8 sps:$4 sm:$0xff]  }
 0x756   :  { %11045 = vmatprep.subr.bf16.mxu1 %v16308_v35 }
 0x758   :  { %10492 = vmatpush1.bf16.msra.mxu0 %v16309_v39 }
 0x759   :  { %11046 = vmatpush1.bf16.msra.mxu1 %v16310_v15  ;;  %10493 = vmatprep.subr.bf16.mxu0 %v16311_v5 }
 0x75a   :  { %11047 = vmatprep.subr.bf16.mxu1 %v16312_v26 }
 0x75c   :  { %10494 = vmatpush1.bf16.msra.mxu0 %v16313_v47  ;;  %v16349_v47 = vld [vmem:[#allocation6 + $0x650] ss:$8 sps:$4 sm:$0xff]  }
 0x75d   :  { %11048 = vmatpush1.bf16.msra.mxu1 %v16314_v14  ;;  %10495 = vmatprep.subr.bf16.mxu0 %v16315_v59  ;;  %v16350_v59 = vld [vmem:[#allocation6 + $0x7d0] ss:$8 sps:$4 sm:$0xff]  }
 0x75e   :  { %11049 = vmatprep.subr.bf16.mxu1 %v16316_v40 }
 0x760   :  { %10496 = vmatpush1.bf16.msra.mxu0 %v16317_v45  ;;  %v16351_v45 = vld [vmem:[#allocation6 + $0x664] ss:$8 sps:$4 sm:$0xff]  }
 0x761   :  { %11050 = vmatpush1.bf16.msra.mxu1 %v16318_v23  ;;  %10497 = vmatprep.subr.bf16.mxu0 %v16319_v51  ;;  %v16352_v23 = vld [vmem:[#allocation6 + $0x7e4] ss:$8 sps:$4 sm:$0xff]   ;;  %v16353_v51 = vld [vmem:[#allocation6 + $0x660] ss:$8 sps:$4 sm:$0xff]  }
 0x762   :  { %11051 = vmatprep.subr.bf16.mxu1 %v16320_v32 }
 0x764   :  { %10498 = vmatpush1.bf16.msra.mxu0 %v16321_v58  ;;  %v16354_v58 = vld [vmem:[#allocation6 + $0x7e0] ss:$8 sps:$4 sm:$0xff]  }
 0x765   :  { %11052 = vmatpush1.bf16.msra.mxu1 %v16322_v11  ;;  %10499 = vmatprep.subr.bf16.mxu0 %v16323_v62 }
 0x766   :  { %11053 = vmatprep.subr.bf16.mxu1 %v16324_v36  ;;  %v16355_v36 = vld [vmem:[#allocation6 + $0x674] ss:$8 sps:$4 sm:$0xff]  }
 0x768   :  { %10500 = vmatpush1.bf16.msra.mxu0 %v16325_v55 }
 0x769   :  { %11054 = vmatpush1.bf16.msra.mxu1 %v16326_v21  ;;  %10538 = vmatprep.subr.bf16.mxu0 %v16327_v19  ;;  %v16356_v19 = vld [vmem:[#allocation6 + $0x7f4] ss:$8 sps:$4 sm:$0xff]  }
 0x76a   :  { %11092 = vmatprep.subr.bf16.mxu1 %v16328_v2 }
 0x76b   :  { %10518 = vmatmul.mubr.bf16.vlgmr.msra.gmra.mrb[104].mxu0 %v18781_v38 }
 0x76c   :  { %11072 = vmatmul.mubr.bf16.vlgmr.msra.gmra.mrb[104].mxu1 %v18781_v38  ;;  %10539 = vmatpush1.bf16.msra.mxu0 %v16329_v6  ;;  %v16337_v38 = vld [vmem:[#allocation6 + $0x620] ss:$8 sps:$4 sm:$0xff]  }
 0x76d   :  { %11093 = vmatpush1.bf16.msra.mxu1 %v16330_v57  ;;  %10540 = vmatprep.subr.bf16.mxu0 %v16331_v0 }
 0x76e   :  { %11094 = vmatprep.subr.bf16.mxu1 %v16332_v61  ;;  %10527 = vmatprep.mubr.bf16.mxu0 %v19484_v60 }
 0x76f   :  { %11081 = vmatprep.mubr.bf16.mxu1 %v19484_v60 }
 0x770   :  { %10541 = vmatpush1.bf16.msra.mxu0 %v16333_v18  ;;  %v16357_v18 = vld [vmem:[#allocation6 + $0x670] ss:$8 sps:$4 sm:$0xff]  }
 0x771   :  { %11095 = vmatpush1.bf16.msra.mxu1 %v16334_v41  ;;  %10542 = vmatprep.subr.bf16.mxu0 %v16335_v34  ;;  %v16358_v34 = vld [vmem:[#allocation6 + $0x7f0] ss:$8 sps:$4 sm:$0xff]  }
 0x772   :  { %11096 = vmatprep.subr.bf16.mxu1 %v16336_v33 }
 0x773   :  { %10528 = vmatmul.mubr.bf16.gmra.mrb[108].mxu0 %v18826_v29 }
 0x774   :  { %11082 = vmatmul.mubr.bf16.gmra.mrb[108].mxu1 %v18826_v29  ;;  %10543 = vmatpush1.bf16.msra.mxu0 %v16337_v38  ;;  %v16359_v38 = vld [vmem:[#allocation6 + $0x684] ss:$8 sps:$4 sm:$0xff]  }
 0x775   :  { %10570 = vmatprep.mubr.bf16.mxu0 %v18941_v27  ;;  %11097 = vmatpush1.bf16.msra.mxu1 %v16338_v56  ;;  %v16360_v56 = vld [vmem:[#allocation6 + $0x804] ss:$8 sps:$4 sm:$0xff]  }
 0x776   :  { %11124 = vmatprep.mubr.bf16.mxu1 %v18941_v27  ;;  %10544 = vmatprep.subr.bf16.mxu0 %v16339_v24  ;;  %v16361_v24 = vld [vmem:[#allocation6 + $0x680] ss:$8 sps:$4 sm:$0xff]  }
 0x777   :  { %11098 = vmatprep.subr.bf16.mxu1 %v16340_v13  ;;  %v16362_v13 = vld [vmem:[#allocation6 + $0x800] ss:$8 sps:$4 sm:$0xff]  }
 0x778   :  { %10545 = vmatpush1.bf16.msra.mxu0 %v16341_v48  ;;  %v16363_v48 = vld [vmem:[#allocation6 + $0x694] ss:$8 sps:$4 sm:$0xff]  }
 0x779   :  { %11099 = vmatpush1.bf16.msra.mxu1 %v16342_v4  ;;  %10546 = vmatprep.subr.bf16.mxu0 %v16343_v44  ;;  %v16364_v4 = vld [vmem:[#allocation6 + $0x814] ss:$8 sps:$4 sm:$0xff]   ;;  %v16365_v44 = vld [vmem:[#allocation6 + $0x690] ss:$8 sps:$4 sm:$0xff]  }
 0x77a   :  { %11100 = vmatprep.subr.bf16.mxu1 %v16344_v3  ;;  %v16366_v3 = vld [vmem:[#allocation6 + $0x810] ss:$8 sps:$4 sm:$0xff]  }
 0x77c   :  { %10547 = vmatpush1.bf16.msra.mxu0 %v16345_v16  ;;  %v19033_v43 = vpop.f32.mrb[96].mxu0  ;;  %v16367_v16 = vld [vmem:[#allocation6 + $0x6a4] ss:$8 sps:$4 sm:$0xff]  }
 0x77d   :  { %11101 = vmatpush1.bf16.msra.mxu1 %v16346_v30  ;;  %v19035_v31 = vpop.f32.mrb[96].mxu1  ;;  %v19037_v27 = vpop.f32.mrb[97].mxu0  ;;  %10548 = vmatprep.subr.bf16.mxu0 %v16347_v37  ;;  %v16368_v30 = vld [vmem:[#allocation6 + $0x824] ss:$8 sps:$4 sm:$0xff]   ;;  %v16369_v37 = vld [vmem:[#allocation6 + $0x6a0] ss:$8 sps:$4 sm:$0xff]  }
 0x77e   :  { %v11434_v22 = vmax.f32 %v19033_v43, %v19035_v31  ;;  %v19041_v12 = vpop.f32.mrb[97].mxu1  ;;  %11102 = vmatprep.subr.bf16.mxu1 %v16348_v63  ;;  %v19043_v35 = vpop.f32.mrb[98].mxu0  ;;  %v16370_v63 = vld [vmem:[#allocation6 + $0x820] ss:$8 sps:$4 sm:$0xff]  }
 0x77f   :  { %v11435_v39 = vmax.f32 %v19037_v27, %v19041_v12  ;;  %v19047_v15 = vpop.f32.mrb[98].mxu1  ;;  %v19049_v5 = vpop.f32.mrb[99].mxu0 }
 0x780   :  { %v11436_v26 = vmax.f32 %v19043_v35, %v19047_v15  ;;  %10549 = vmatpush1.bf16.msra.mxu0 %v16349_v47  ;;  %v19053_v14 = vpop.f32.mrb[99].mxu1  ;;  %v16371_v47 = vld [vmem:[#allocation6 + $0x6b4] ss:$8 sps:$4 sm:$0xff]  }
 0x781   :  { %11103 = vmatpush1.bf16.msra.mxu1 %v16350_v59  ;;  %v11437_v40 = vmax.f32 %v19049_v5, %v19053_v14  ;;  %10550 = vmatprep.subr.bf16.mxu0 %v16351_v45  ;;  %v16372_v59 = vld [vmem:[#allocation6 + $0x834] ss:$8 sps:$4 sm:$0xff]   ;;  %v16373_v45 = vld [vmem:[#allocation6 + $0x6b0] ss:$8 sps:$4 sm:$0xff]  }
 0x782   :  { %11104 = vmatprep.subr.bf16.mxu1 %v16352_v23  ;;  %v16374_v23 = vld [vmem:[#allocation6 + $0x830] ss:$8 sps:$4 sm:$0xff]  }
 0x784   :  { %10551 = vmatpush1.bf16.msra.mxu0 %v16353_v51  ;;  %v19057_v32 = vpop.f32.mrb[100].mxu0  ;;  %v16375_v51 = vld [vmem:[#allocation6 + $0x6c4] ss:$8 sps:$4 sm:$0xff]  }
 0x785   :  { %11105 = vmatpush1.bf16.msra.mxu1 %v16354_v58  ;;  %v19059_v11 = vpop.f32.mrb[100].mxu1  ;;  %v19061_v62 = vpop.f32.mrb[101].mxu0  ;;  %10552 = vmatprep.subr.bf16.mxu0 %v16355_v36  ;;  %v16376_v58 = vld [vmem:[#allocation6 + $0x844] ss:$8 sps:$4 sm:$0xff]   ;;  %v16377_v36 = vld [vmem:[#allocation6 + $0x6c0] ss:$8 sps:$4 sm:$0xff]  }
 0x786   :  { %v11438_v55 = vmax.f32 %v19057_v32, %v19059_v11  ;;  %v19065_v21 = vpop.f32.mrb[101].mxu1  ;;  %11106 = vmatprep.subr.bf16.mxu1 %v16356_v19  ;;  %v19067_v2 = vpop.f32.mrb[102].mxu0  ;;  %v16378_v19 = vld [vmem:[#allocation6 + $0x840] ss:$8 sps:$4 sm:$0xff]  }
 0x787   :  { %v11439_v6 = vmax.f32 %v19061_v62, %v19065_v21  ;;  %v19071_v57 = vpop.f32.mrb[102].mxu1  ;;  %v19073_v0 = vpop.f32.mrb[103].mxu0  ;;  %v16008_v21 = vld [vmem:[#allocation9 + $0x148] sm:$0xff]  }
 0x788   :  { %v11440_v61 = vmax.f32 %v19067_v2, %v19071_v57  ;;  %10553 = vmatpush1.bf16.msra.mxu0 %v16357_v18  ;;  %v19077_v41 = vpop.f32.mrb[103].mxu1  ;;  %v16379_v18 = vld [vmem:[#allocation6 + $0x6d4] ss:$8 sps:$4 sm:$0xff]  }
 0x789   :  { %11107 = vmatpush1.bf16.msra.mxu1 %v16358_v34  ;;  %v11441_v33 = vmax.f32 %v19073_v0, %v19077_v41  ;;  %10554 = vmatprep.subr.bf16.mxu0 %v16359_v38  ;;  %v16380_v34 = vld [vmem:[#allocation6 + $0x854] ss:$8 sps:$4 sm:$0xff]   ;;  %v16381_v38 = vld [vmem:[#allocation6 + $0x6d0] ss:$8 sps:$4 sm:$0xff]  }
 0x78a   :  { %11108 = vmatprep.subr.bf16.mxu1 %v16360_v56  ;;  %v16382_v56 = vld [vmem:[#allocation6 + $0x850] ss:$8 sps:$4 sm:$0xff]  }
 0x78b   :  { %v16010_v57 = vld [vmem:[#allocation9 + $0x1d0] sm:$0xff]   ;;  %v16009_v0 = vld [vmem:[#allocation9 + $0x108] sm:$0xff]  }
 0x78c   :  { %10555 = vmatpush1.bf16.msra.mxu0 %v16361_v24  ;;  %v16383_v24 = vld [vmem:[#allocation6 + $0x6e4] ss:$8 sps:$4 sm:$0xff]  }
 0x78d   :  { %11109 = vmatpush1.bf16.msra.mxu1 %v16362_v13  ;;  %10556 = vmatprep.subr.bf16.mxu0 %v16363_v48  ;;  %v16384_v13 = vld [vmem:[#allocation6 + $0x864] ss:$8 sps:$4 sm:$0xff]   ;;  %v16385_v48 = vld [vmem:[#allocation6 + $0x6e0] ss:$8 sps:$4 sm:$0xff]  }
 0x78e   :  { %11110 = vmatprep.subr.bf16.mxu1 %v16364_v4  ;;  %v16386_v4 = vld [vmem:[#allocation6 + $0x860] ss:$8 sps:$4 sm:$0xff]  }
 0x790   :  { %10557 = vmatpush1.bf16.msra.mxu0 %v16365_v44  ;;  %v16387_v44 = vld [vmem:[#allocation6 + $0x6f4] ss:$8 sps:$4 sm:$0xff]  }
 0x791   :  { %11111 = vmatpush1.bf16.msra.mxu1 %v16366_v3  ;;  %10558 = vmatprep.subr.bf16.mxu0 %v16367_v16  ;;  %v16388_v3 = vld [vmem:[#allocation6 + $0x874] ss:$8 sps:$4 sm:$0xff]   ;;  %v16389_v16 = vld [vmem:[#allocation6 + $0x6f0] ss:$8 sps:$4 sm:$0xff]  }
 0x792   :  { %11112 = vmatprep.subr.bf16.mxu1 %v16368_v30  ;;  %v16390_v30 = vld [vmem:[#allocation6 + $0x870] ss:$8 sps:$4 sm:$0xff]  }
 0x794   :  { %10559 = vmatpush1.bf16.msra.mxu0 %v16369_v37  ;;  %v16391_v37 = vld [vmem:[#allocation6 + $0x704] ss:$8 sps:$4 sm:$0xff]  }
 0x795   :  { %11113 = vmatpush1.bf16.msra.mxu1 %v16370_v63  ;;  %10560 = vmatprep.subr.bf16.mxu0 %v16371_v47  ;;  %v16392_v63 = vld [vmem:[#allocation6 + $0x884] ss:$8 sps:$4 sm:$0xff]   ;;  %v16393_v47 = vld [vmem:[#allocation6 + $0x700] ss:$8 sps:$4 sm:$0xff]  }
 0x796   :  { %11114 = vmatprep.subr.bf16.mxu1 %v16372_v59  ;;  %v16394_v59 = vld [vmem:[#allocation6 + $0x880] ss:$8 sps:$4 sm:$0xff]  }
 0x798   :  { %10561 = vmatpush1.bf16.msra.mxu0 %v16373_v45  ;;  %v16395_v45 = vld [vmem:[#allocation6 + $0x714] ss:$8 sps:$4 sm:$0xff]  }
 0x799   :  { %11115 = vmatpush1.bf16.msra.mxu1 %v16374_v23  ;;  %10562 = vmatprep.subr.bf16.mxu0 %v16375_v51  ;;  %v16396_v23 = vld [vmem:[#allocation6 + $0x894] ss:$8 sps:$4 sm:$0xff]   ;;  %v16397_v51 = vld [vmem:[#allocation6 + $0x710] ss:$8 sps:$4 sm:$0xff]  }
 0x79a   :  { %11116 = vmatprep.subr.bf16.mxu1 %v16376_v58  ;;  %v16398_v58 = vld [vmem:[#allocation6 + $0x890] ss:$8 sps:$4 sm:$0xff]  }
 0x79c   :  { %10563 = vmatpush1.bf16.msra.mxu0 %v16377_v36  ;;  %v16399_v36 = vld [vmem:[#allocation6 + $0x724] ss:$8 sps:$4 sm:$0xff]  }
 0x79d   :  { %11117 = vmatpush1.bf16.msra.mxu1 %v16378_v19  ;;  %10564 = vmatprep.subr.bf16.mxu0 %v16379_v18  ;;  %v16402_v19 = vld [vmem:[#allocation6 + $0x8a0] ss:$8 sps:$4 sm:$0xff]   ;;  %v16403_v18 = vld [vmem:[#allocation6 + $0x734] ss:$8 sps:$4 sm:$0xff]  }
 0x79e   :  { %11118 = vmatprep.subr.bf16.mxu1 %v16380_v34  ;;  %v16404_v34 = vld [vmem:[#allocation6 + $0x8b4] ss:$8 sps:$4 sm:$0xff]  }
 0x7a0   :  { %10565 = vmatpush1.bf16.msra.mxu0 %v16381_v38  ;;  %v16405_v38 = vld [vmem:[#allocation6 + $0x730] ss:$8 sps:$4 sm:$0xff]  }
 0x7a1   :  { %11119 = vmatpush1.bf16.msra.mxu1 %v16382_v56  ;;  %10566 = vmatprep.subr.bf16.mxu0 %v16383_v24  ;;  %v16406_v56 = vld [vmem:[#allocation6 + $0x8b0] ss:$8 sps:$4 sm:$0xff]   ;;  %v16407_v24 = vld [vmem:[#allocation6 + $0x744] ss:$8 sps:$4 sm:$0xff]  }
 0x7a2   :  { %11120 = vmatprep.subr.bf16.mxu1 %v16384_v13  ;;  %v16408_v13 = vld [vmem:[#allocation6 + $0x8c4] ss:$8 sps:$4 sm:$0xff]  }
 0x7a4   :  { %10567 = vmatpush1.bf16.msra.mxu0 %v16385_v48  ;;  %v16410_v48 = vld [vmem:[#allocation6 + $0x8c0] ss:$8 sps:$4 sm:$0xff]  }
 0x7a5   :  { %11121 = vmatpush1.bf16.msra.mxu1 %v16386_v4  ;;  %10568 = vmatprep.subr.bf16.mxu0 %v16387_v44  ;;  %v16411_v4 = vld [vmem:[#allocation6 + $0x754] ss:$8 sps:$4 sm:$0xff]  }
 0x7a6   :  { %11122 = vmatprep.subr.bf16.mxu1 %v16388_v3  ;;  %v16412_v44 = vld [vmem:[#allocation6 + $0x8d4] ss:$8 sps:$4 sm:$0xff]   ;;  %v16413_v3 = vld [vmem:[#allocation6 + $0x750] ss:$8 sps:$4 sm:$0xff]  }
 0x7a8   :  { %10569 = vmatpush1.bf16.msra.mxu0 %v16389_v16  ;;  %v16414_v16 = vld [vmem:[#allocation6 + $0x8d0] ss:$8 sps:$4 sm:$0xff]  }
 0x7a9   :  { %11123 = vmatpush1.bf16.msra.mxu1 %v16390_v30  ;;  %10591 = vmatprep.subr.bf16.mxu0 %v16391_v37  ;;  %v16415_v30 = vld [vmem:[#allocation6 + $0x764] ss:$8 sps:$4 sm:$0xff]  }
 0x7aa   :  { %11145 = vmatprep.subr.bf16.mxu1 %v16392_v63  ;;  %v16416_v37 = vld [vmem:[#allocation6 + $0x8e4] ss:$8 sps:$4 sm:$0xff]   ;;  %v16417_v63 = vld [vmem:[#allocation6 + $0x760] ss:$8 sps:$4 sm:$0xff]  }
 0x7ab   :  { %10571 = vmatmul.mubr.bf16.vlgmr.msra.gmra.mrb[104].mxu0 %v18949_v25 }
 0x7ac   :  { %11125 = vmatmul.mubr.bf16.vlgmr.msra.gmra.mrb[104].mxu1 %v18949_v25  ;;  %10580 = vmatprep.mubr.bf16.mxu0 %v18955_v20  ;;  %v16400_v25 = vld [vmem:[#allocation6 + $0x8a4] ss:$8 sps:$4 sm:$0xff]  }
 0x7ad   :  { %10592 = vmatpush1.bf16.msra.mxu0 %v16393_v47  ;;  %11134 = vmatprep.mubr.bf16.mxu1 %v18955_v20  ;;  %v16401_v20 = vld [vmem:[#allocation6 + $0x720] ss:$8 sps:$4 sm:$0xff]  }
 0x7ae   :  { %11146 = vmatpush1.bf16.msra.mxu1 %v16394_v59  ;;  %10593 = vmatprep.subr.bf16.mxu0 %v16395_v45  ;;  %v16418_v47 = vld [vmem:[#allocation6 + $0x8e0] ss:$8 sps:$4 sm:$0xff]   ;;  %v16419_v59 = vld [vmem:[#allocation6 + $0x774] ss:$8 sps:$4 sm:$0xff]  }
 0x7af   :  { %11147 = vmatprep.subr.bf16.mxu1 %v16396_v23  ;;  %v16420_v45 = vld [vmem:[#allocation6 + $0x8f4] ss:$8 sps:$4 sm:$0xff]   ;;  %v16421_v23 = vld [vmem:[#allocation6 + $0x770] ss:$8 sps:$4 sm:$0xff]  }
 0x7b1   :  { %10594 = vmatpush1.bf16.msra.mxu0 %v16397_v51  ;;  %v16422_v51 = vld [vmem:[#allocation6 + $0x8f0] ss:$8 sps:$4 sm:$0xff]  }
 0x7b2   :  { %11148 = vmatpush1.bf16.msra.mxu1 %v16398_v58  ;;  %10595 = vmatprep.subr.bf16.mxu0 %v16399_v36  ;;  %v16423_v58 = vld [vmem:[#allocation6 + $0x904] ss:$8 sps:$4 sm:$0xff]  }
 0x7b3   :  { %10581 = vmatmul.mubr.bf16.gmra.mrb[108].mxu0 %v18962_v46  ;;  %11149 = vmatprep.subr.bf16.mxu1 %v16400_v25  ;;  %v16424_v36 = vld [vmem:[#allocation6 + $0xa84] ss:$8 sps:$4 sm:$0xff]   ;;  %v16425_v25 = vld [vmem:[#allocation6 + $0x900] ss:$8 sps:$4 sm:$0xff]  }
 0x7b4   :  { %11135 = vmatmul.mubr.bf16.gmra.mrb[108].mxu1 %v18962_v46  ;;  %10623 = vmatprep.mubr.bf16.mxu0 %v19484_v60  ;;  %v16409_v46 = vld [vmem:[#allocation6 + $0x740] ss:$8 sps:$4 sm:$0xff]  }
 0x7b5   :  { %10596 = vmatpush1.bf16.msra.mxu0 %v16401_v20  ;;  %11177 = vmatprep.mubr.bf16.mxu1 %v19484_v60  ;;  %v16426_v20 = vld [vmem:[#allocation6 + $0xa80] ss:$8 sps:$4 sm:$0xff]  }
 0x7b6   :  { %11150 = vmatpush1.bf16.msra.mxu1 %v16402_v19  ;;  %10597 = vmatprep.subr.bf16.mxu0 %v16403_v18  ;;  %v16427_v19 = vld [vmem:[#allocation6 + $0x914] ss:$8 sps:$4 sm:$0xff]  }
 0x7b7   :  { %11151 = vmatprep.subr.bf16.mxu1 %v16404_v34  ;;  %v16428_v18 = vld [vmem:[#allocation6 + $0xa94] ss:$8 sps:$4 sm:$0xff]   ;;  %v16429_v34 = vld [vmem:[#allocation6 + $0x910] ss:$8 sps:$4 sm:$0xff]  }
 0x7b9   :  { %10598 = vmatpush1.bf16.msra.mxu0 %v16405_v38  ;;  %v16430_v38 = vld [vmem:[#allocation6 + $0xa90] ss:$8 sps:$4 sm:$0xff]  }
 0x7ba   :  { %11152 = vmatpush1.bf16.msra.mxu1 %v16406_v56  ;;  %10599 = vmatprep.subr.bf16.mxu0 %v16407_v24  ;;  %v16431_v56 = vld [vmem:[#allocation6 + $0x924] ss:$8 sps:$4 sm:$0xff]  }
 0x7bb   :  { %11153 = vmatprep.subr.bf16.mxu1 %v16408_v13  ;;  %v16432_v24 = vld [vmem:[#allocation6 + $0xaa4] ss:$8 sps:$4 sm:$0xff]   ;;  %v16434_v13 = vld [vmem:[#allocation6 + $0xaa0] ss:$8 sps:$4 sm:$0xff]  }
 0x7bd   :  { %10600 = vmatpush1.bf16.msra.mxu0 %v16409_v46  ;;  %v16435_v46 = vld [vmem:[#allocation6 + $0x934] ss:$8 sps:$4 sm:$0xff]  }
 0x7be   :  { %11154 = vmatpush1.bf16.msra.mxu1 %v16410_v48  ;;  %10601 = vmatprep.subr.bf16.mxu0 %v16411_v4  ;;  %v16436_v48 = vld [vmem:[#allocation6 + $0xab4] ss:$8 sps:$4 sm:$0xff]   ;;  %v16437_v4 = vld [vmem:[#allocation6 + $0x930] ss:$8 sps:$4 sm:$0xff]  }
 0x7bf   :  { %11155 = vmatprep.subr.bf16.mxu1 %v16412_v44  ;;  %v16438_v44 = vld [vmem:[#allocation6 + $0xab0] ss:$8 sps:$4 sm:$0xff]  }
 0x7c1   :  { %10602 = vmatpush1.bf16.msra.mxu0 %v16413_v3  ;;  %v16439_v3 = vld [vmem:[#allocation6 + $0x944] ss:$8 sps:$4 sm:$0xff]  }
 0x7c2   :  { %11156 = vmatpush1.bf16.msra.mxu1 %v16414_v16  ;;  %10603 = vmatprep.subr.bf16.mxu0 %v16415_v30  ;;  %v16440_v16 = vld [vmem:[#allocation6 + $0xac4] ss:$8 sps:$4 sm:$0xff]   ;;  %v16442_v30 = vld [vmem:[#allocation6 + $0xac0] ss:$8 sps:$4 sm:$0xff]  }
 0x7c3   :  { %11157 = vmatprep.subr.bf16.mxu1 %v16416_v37  ;;  %v16443_v37 = vld [vmem:[#allocation6 + $0x954] ss:$8 sps:$4 sm:$0xff]  }
 0x7c5   :  { %10604 = vmatpush1.bf16.msra.mxu0 %v16417_v63  ;;  %v16444_v63 = vld [vmem:[#allocation6 + $0xad4] ss:$8 sps:$4 sm:$0xff]  }
 0x7c6   :  { %11158 = vmatpush1.bf16.msra.mxu1 %v16418_v47  ;;  %10605 = vmatprep.subr.bf16.mxu0 %v16419_v59  ;;  %v16446_v47 = vld [vmem:[#allocation6 + $0xad0] ss:$8 sps:$4 sm:$0xff]   ;;  %v16447_v59 = vld [vmem:[#allocation6 + $0x964] ss:$8 sps:$4 sm:$0xff]  }
 0x7c7   :  { %11159 = vmatprep.subr.bf16.mxu1 %v16420_v45  ;;  %v16448_v45 = vld [vmem:[#allocation6 + $0xae4] ss:$8 sps:$4 sm:$0xff]  }
 0x7c9   :  { %10606 = vmatpush1.bf16.msra.mxu0 %v16421_v23  ;;  %v16449_v23 = vld [vmem:[#allocation6 + $0x960] ss:$8 sps:$4 sm:$0xff]  }
 0x7ca   :  { %11160 = vmatpush1.bf16.msra.mxu1 %v16422_v51  ;;  %10652 = vmatprep.subr.bf16.mxu0 %v16423_v58  ;;  %v16450_v51 = vld [vmem:[#allocation6 + $0xae0] ss:$8 sps:$4 sm:$0xff]   ;;  %v16451_v58 = vld [vmem:[#allocation6 + $0x974] ss:$8 sps:$4 sm:$0xff]  }
 0x7cb   :  { %11206 = vmatprep.subr.bf16.mxu1 %v16424_v36  ;;  %v16452_v36 = vld [vmem:[#allocation6 + $0xaf4] ss:$8 sps:$4 sm:$0xff]  }
 0x7cc   :  { %10624 = vmatmul.mubr.bf16.vlgmr.msra.gmra.mrb[104].mxu0 %v18971_v17 }
 0x7cd   :  { %11178 = vmatmul.mubr.bf16.vlgmr.msra.gmra.mrb[104].mxu1 %v18971_v17  ;;  %10653 = vmatpush1.bf16.msra.mxu0 %v16425_v25  ;;  %v16433_v17 = vld [vmem:[#allocation6 + $0x920] ss:$8 sps:$4 sm:$0xff]   ;;  %v16453_v25 = vld [vmem:[#allocation6 + $0x970] ss:$8 sps:$4 sm:$0xff]  }
 0x7ce   :  { %11207 = vmatpush1.bf16.msra.mxu1 %v16426_v20  ;;  %10654 = vmatprep.subr.bf16.mxu0 %v16427_v19  ;;  %v16454_v20 = vld [vmem:[#allocation6 + $0xaf0] ss:$8 sps:$4 sm:$0xff]   ;;  %v16455_v19 = vld [vmem:[#allocation6 + $0x984] ss:$8 sps:$4 sm:$0xff]  }
 0x7cf   :  { %11208 = vmatprep.subr.bf16.mxu1 %v16428_v18  ;;  %10633 = vmatprep.mubr.bf16.mxu0 %v19484_v60  ;;  %v16456_v18 = vld [vmem:[#allocation6 + $0xb04] ss:$8 sps:$4 sm:$0xff]  }
 0x7d0   :  { %11187 = vmatprep.mubr.bf16.mxu1 %v19484_v60 }
 0x7d1   :  { %10655 = vmatpush1.bf16.msra.mxu0 %v16429_v34  ;;  %v16457_v34 = vld [vmem:[#allocation6 + $0x980] ss:$8 sps:$4 sm:$0xff]  }
 0x7d2   :  { %11209 = vmatpush1.bf16.msra.mxu1 %v16430_v38  ;;  %10656 = vmatprep.subr.bf16.mxu0 %v16431_v56  ;;  %v16458_v38 = vld [vmem:[#allocation6 + $0xb00] ss:$8 sps:$4 sm:$0xff]   ;;  %v16459_v56 = vld [vmem:[#allocation6 + $0x994] ss:$8 sps:$4 sm:$0xff]  }
 0x7d3   :  { %11210 = vmatprep.subr.bf16.mxu1 %v16432_v24  ;;  %v16460_v24 = vld [vmem:[#allocation6 + $0xb14] ss:$8 sps:$4 sm:$0xff]  }
 0x7d4   :  { %10634 = vmatmul.mubr.bf16.gmra.mrb[108].mxu0 %v18979_v54 }
 0x7d5   :  { %11188 = vmatmul.mubr.bf16.gmra.mrb[108].mxu1 %v18979_v54  ;;  %10657 = vmatpush1.bf16.msra.mxu0 %v16433_v17  ;;  %v16441_v54 = vld [vmem:[#allocation6 + $0x940] ss:$8 sps:$4 sm:$0xff]   ;;  %v16461_v17 = vld [vmem:[#allocation6 + $0x990] ss:$8 sps:$4 sm:$0xff]  }
 0x7d6   :  { %10684 = vmatprep.mubr.bf16.mxu0 %v19487_v7  ;;  %11211 = vmatpush1.bf16.msra.mxu1 %v16434_v13  ;;  %v16462_v13 = vld [vmem:[#allocation6 + $0xb10] ss:$8 sps:$4 sm:$0xff]  }
 0x7d7   :  { %11238 = vmatprep.mubr.bf16.mxu1 %v19487_v7  ;;  %10658 = vmatprep.subr.bf16.mxu0 %v16435_v46  ;;  %v16445_v7 = vld [vmem:[#allocation6 + $0x950] ss:$8 sps:$4 sm:$0xff]   ;;  %v16463_v46 = vld [vmem:[#allocation6 + $0x9a4] ss:$8 sps:$4 sm:$0xff]  }
 0x7d8   :  { %11212 = vmatprep.subr.bf16.mxu1 %v16436_v48  ;;  %v16464_v48 = vld [vmem:[#allocation6 + $0xb24] ss:$8 sps:$4 sm:$0xff]  }
 0x7d9   :  { %10659 = vmatpush1.bf16.msra.mxu0 %v16437_v4  ;;  %v16465_v4 = vld [vmem:[#allocation6 + $0x9a0] ss:$8 sps:$4 sm:$0xff]  }
 0x7da   :  { %11213 = vmatpush1.bf16.msra.mxu1 %v16438_v44  ;;  %10660 = vmatprep.subr.bf16.mxu0 %v16439_v3  ;;  %v16466_v44 = vld [vmem:[#allocation6 + $0xb20] ss:$8 sps:$4 sm:$0xff]   ;;  %v16467_v3 = vld [vmem:[#allocation6 + $0x9b4] ss:$8 sps:$4 sm:$0xff]  }
 0x7db   :  { %11214 = vmatprep.subr.bf16.mxu1 %v16440_v16  ;;  %v16468_v16 = vld [vmem:[#allocation6 + $0xb34] ss:$8 sps:$4 sm:$0xff]  }
 0x7dd   :  { %10661 = vmatpush1.bf16.msra.mxu0 %v16441_v54  ;;  %v16469_v54 = vld [vmem:[#allocation6 + $0x9b0] ss:$8 sps:$4 sm:$0xff]  }
 0x7de   :  { %11215 = vmatpush1.bf16.msra.mxu1 %v16442_v30  ;;  %10662 = vmatprep.subr.bf16.mxu0 %v16443_v37  ;;  %v16470_v30 = vld [vmem:[#allocation6 + $0xb30] ss:$8 sps:$4 sm:$0xff]   ;;  %v16471_v37 = vld [vmem:[#allocation6 + $0x9c4] ss:$8 sps:$4 sm:$0xff]  }
 0x7df   :  { %11216 = vmatprep.subr.bf16.mxu1 %v16444_v63  ;;  %v16472_v63 = vld [vmem:[#allocation6 + $0xb44] ss:$8 sps:$4 sm:$0xff]  }
 0x7e1   :  { %10663 = vmatpush1.bf16.msra.mxu0 %v16445_v7  ;;  %v16473_v7 = vld [vmem:[#allocation6 + $0x9c0] ss:$8 sps:$4 sm:$0xff]  }
 0x7e2   :  { %11217 = vmatpush1.bf16.msra.mxu1 %v16446_v47  ;;  %10664 = vmatprep.subr.bf16.mxu0 %v16447_v59  ;;  %v16474_v47 = vld [vmem:[#allocation6 + $0xb40] ss:$8 sps:$4 sm:$0xff]   ;;  %v16475_v59 = vld [vmem:[#allocation6 + $0x9d4] ss:$8 sps:$4 sm:$0xff]  }
 0x7e3   :  { %11218 = vmatprep.subr.bf16.mxu1 %v16448_v45  ;;  %v16476_v45 = vld [vmem:[#allocation6 + $0xb54] ss:$8 sps:$4 sm:$0xff]  }
 0x7e5   :  { %10665 = vmatpush1.bf16.msra.mxu0 %v16449_v23  ;;  %v16477_v23 = vld [vmem:[#allocation6 + $0x9d0] ss:$8 sps:$4 sm:$0xff]  }
 0x7e6   :  { %11219 = vmatpush1.bf16.msra.mxu1 %v16450_v51  ;;  %10666 = vmatprep.subr.bf16.mxu0 %v16451_v58  ;;  %v16478_v51 = vld [vmem:[#allocation6 + $0xb50] ss:$8 sps:$4 sm:$0xff]   ;;  %v16479_v58 = vld [vmem:[#allocation6 + $0x9e4] ss:$8 sps:$4 sm:$0xff]  }
 0x7e7   :  { %11220 = vmatprep.subr.bf16.mxu1 %v16452_v36  ;;  %v16480_v36 = vld [vmem:[#allocation6 + $0xb64] ss:$8 sps:$4 sm:$0xff]  }
 0x7e9   :  { %10667 = vmatpush1.bf16.msra.mxu0 %v16453_v25  ;;  %v16481_v25 = vld [vmem:[#allocation6 + $0x9e0] ss:$8 sps:$4 sm:$0xff]  }
 0x7ea   :  { %11221 = vmatpush1.bf16.msra.mxu1 %v16454_v20  ;;  %10668 = vmatprep.subr.bf16.mxu0 %v16455_v19  ;;  %v16482_v20 = vld [vmem:[#allocation6 + $0xb60] ss:$8 sps:$4 sm:$0xff]   ;;  %v16483_v19 = vld [vmem:[#allocation6 + $0x9f4] ss:$8 sps:$4 sm:$0xff]  }
 0x7eb   :  { %11222 = vmatprep.subr.bf16.mxu1 %v16456_v18  ;;  %v16484_v18 = vld [vmem:[#allocation6 + $0xb74] ss:$8 sps:$4 sm:$0xff]  }
 0x7ed   :  { %10669 = vmatpush1.bf16.msra.mxu0 %v16457_v34  ;;  %v16485_v34 = vld [vmem:[#allocation6 + $0x9f0] ss:$8 sps:$4 sm:$0xff]  }
 0x7ee   :  { %11223 = vmatpush1.bf16.msra.mxu1 %v16458_v38  ;;  %10670 = vmatprep.subr.bf16.mxu0 %v16459_v56  ;;  %v16486_v38 = vld [vmem:[#allocation6 + $0xb70] ss:$8 sps:$4 sm:$0xff]   ;;  %v16487_v56 = vld [vmem:[#allocation6 + $0xa04] ss:$8 sps:$4 sm:$0xff]  }
 0x7ef   :  { %11224 = vmatprep.subr.bf16.mxu1 %v16460_v24  ;;  %v16488_v24 = vld [vmem:[#allocation6 + $0xb84] ss:$8 sps:$4 sm:$0xff]  }
 0x7f1   :  { %10671 = vmatpush1.bf16.msra.mxu0 %v16461_v17  ;;  %v16489_v17 = vld [vmem:[#allocation6 + $0xa00] ss:$8 sps:$4 sm:$0xff]  }
 0x7f2   :  { %11225 = vmatpush1.bf16.msra.mxu1 %v16462_v13  ;;  %10672 = vmatprep.subr.bf16.mxu0 %v16463_v46  ;;  %v16490_v13 = vld [vmem:[#allocation6 + $0xb80] ss:$8 sps:$4 sm:$0xff]   ;;  %v16491_v46 = vld [vmem:[#allocation6 + $0xa14] ss:$8 sps:$4 sm:$0xff]  }
 0x7f3   :  { %11226 = vmatprep.subr.bf16.mxu1 %v16464_v48  ;;  %v16492_v48 = vld [vmem:[#allocation6 + $0xb94] ss:$8 sps:$4 sm:$0xff]  }
 0x7f5   :  { %10673 = vmatpush1.bf16.msra.mxu0 %v16465_v4  ;;  %v16493_v4 = vld [vmem:[#allocation6 + $0xa10] ss:$8 sps:$4 sm:$0xff]  }
 0x7f6   :  { %11227 = vmatpush1.bf16.msra.mxu1 %v16466_v44  ;;  %10674 = vmatprep.subr.bf16.mxu0 %v16467_v3  ;;  %v16494_v44 = vld [vmem:[#allocation6 + $0xb90] ss:$8 sps:$4 sm:$0xff]   ;;  %v16495_v3 = vld [vmem:[#allocation6 + $0xa24] ss:$8 sps:$4 sm:$0xff]  }
 0x7f7   :  { %11228 = vmatprep.subr.bf16.mxu1 %v16468_v16  ;;  %v16498_v16 = vld [vmem:[#allocation6 + $0xba0] ss:$8 sps:$4 sm:$0xff]  }
 0x7f9   :  { %10675 = vmatpush1.bf16.msra.mxu0 %v16469_v54  ;;  %v16499_v54 = vld [vmem:[#allocation6 + $0xa34] ss:$8 sps:$4 sm:$0xff]  }
 0x7fa   :  { %11229 = vmatpush1.bf16.msra.mxu1 %v16470_v30  ;;  %10676 = vmatprep.subr.bf16.mxu0 %v16471_v37  ;;  %v16500_v30 = vld [vmem:[#allocation6 + $0xbb4] ss:$8 sps:$4 sm:$0xff]   ;;  %v16501_v37 = vld [vmem:[#allocation6 + $0xa30] ss:$8 sps:$4 sm:$0xff]  }
 0x7fb   :  { %11230 = vmatprep.subr.bf16.mxu1 %v16472_v63  ;;  %v16502_v63 = vld [vmem:[#allocation6 + $0xbb0] ss:$8 sps:$4 sm:$0xff]  }
 0x7fd   :  { %10677 = vmatpush1.bf16.msra.mxu0 %v16473_v7  ;;  %v16503_v7 = vld [vmem:[#allocation6 + $0xa44] ss:$8 sps:$4 sm:$0xff]  }
 0x7fe   :  { %11231 = vmatpush1.bf16.msra.mxu1 %v16474_v47  ;;  %10678 = vmatprep.subr.bf16.mxu0 %v16475_v59  ;;  %v16504_v47 = vld [vmem:[#allocation6 + $0xbc4] ss:$8 sps:$4 sm:$0xff]   ;;  %v16506_v59 = vld [vmem:[#allocation6 + $0xbc0] ss:$8 sps:$4 sm:$0xff]  }
 0x7ff   :  { %11232 = vmatprep.subr.bf16.mxu1 %v16476_v45  ;;  %v16507_v45 = vld [vmem:[#allocation6 + $0xa54] ss:$8 sps:$4 sm:$0xff]  }
 0x801   :  { %10679 = vmatpush1.bf16.msra.mxu0 %v16477_v23  ;;  %v16508_v23 = vld [vmem:[#allocation6 + $0xbd4] ss:$8 sps:$4 sm:$0xff]  }
 0x802   :  { %11233 = vmatpush1.bf16.msra.mxu1 %v16478_v51  ;;  %10680 = vmatprep.subr.bf16.mxu0 %v16479_v58  ;;  %v16509_v51 = vld [vmem:[#allocation6 + $0xa50] ss:$8 sps:$4 sm:$0xff]  }
 0x803   :  { %11234 = vmatprep.subr.bf16.mxu1 %v16480_v36  ;;  %v16510_v58 = vld [vmem:[#allocation6 + $0xbd0] ss:$8 sps:$4 sm:$0xff]   ;;  %v16511_v36 = vld [vmem:[#allocation6 + $0xa64] ss:$8 sps:$4 sm:$0xff]  }
 0x805   :  { %10681 = vmatpush1.bf16.msra.mxu0 %v16481_v25  ;;  %v16512_v25 = vld [vmem:[#allocation6 + $0xbe4] ss:$8 sps:$4 sm:$0xff]  }
 0x806   :  { %11235 = vmatpush1.bf16.msra.mxu1 %v16482_v20  ;;  %10682 = vmatprep.subr.bf16.mxu0 %v16483_v19  ;;  %v16513_v20 = vld [vmem:[#allocation6 + $0xa60] ss:$8 sps:$4 sm:$0xff]  }
 0x807   :  { %11236 = vmatprep.subr.bf16.mxu1 %v16484_v18  ;;  %v16514_v19 = vld [vmem:[#allocation6 + $0xbe0] ss:$8 sps:$4 sm:$0xff]   ;;  %v16515_v18 = vld [vmem:[#allocation6 + $0xa74] ss:$8 sps:$4 sm:$0xff]  }
 0x809   :  { %10683 = vmatpush1.bf16.msra.mxu0 %v16485_v34  ;;  %v16516_v34 = vld [vmem:[#allocation6 + $0xbf4] ss:$8 sps:$4 sm:$0xff]  }
 0x80a   :  { %11237 = vmatpush1.bf16.msra.mxu1 %v16486_v38  ;;  %10705 = vmatprep.subr.bf16.mxu0 %v16487_v56  ;;  %v16517_v38 = vld [vmem:[#allocation6 + $0xa70] ss:$8 sps:$4 sm:$0xff]  }
 0x80b   :  { %11259 = vmatprep.subr.bf16.mxu1 %v16488_v24  ;;  %v16518_v56 = vld [vmem:[#allocation6 + $0xbf0] ss:$8 sps:$4 sm:$0xff]   ;;  %v16519_v24 = vld [vmem:[#allocation6 + $0xc04] ss:$8 sps:$4 sm:$0xff]  }
 0x80c   :  { %10685 = vmatmul.mubr.bf16.vlgmr.msra.gmra.mrb[104].mxu0 %v19488_v49 }
 0x80d   :  { %11239 = vmatmul.mubr.bf16.vlgmr.msra.gmra.mrb[104].mxu1 %v19488_v49  ;;  %10694 = vmatprep.mubr.bf16.mxu0 %v19491_v52  ;;  %v16496_v49 = vld [vmem:[#allocation6 + $0xba4] ss:$8 sps:$4 sm:$0xff]  }
 0x80e   :  { %10706 = vmatpush1.bf16.msra.mxu0 %v16489_v17  ;;  %11248 = vmatprep.mubr.bf16.mxu1 %v19491_v52  ;;  %v16497_v52 = vld [vmem:[#allocation6 + $0xa20] ss:$8 sps:$4 sm:$0xff]   ;;  %v16520_v17 = vld [vmem:[#allocation6 + $0xd84] ss:$8 sps:$4 sm:$0xff]  }
 0x80f   :  { %11260 = vmatpush1.bf16.msra.mxu1 %v16490_v13  ;;  %10707 = vmatprep.subr.bf16.mxu0 %v16491_v46  ;;  %v16521_v13 = vld [vmem:[#allocation6 + $0xc00] ss:$8 sps:$4 sm:$0xff]  }
 0x810   :  { %11261 = vmatprep.subr.bf16.mxu1 %v16492_v48  ;;  %v16522_v46 = vld [vmem:[#allocation6 + $0xd80] ss:$8 sps:$4 sm:$0xff]   ;;  %v16523_v48 = vld [vmem:[#allocation6 + $0xc14] ss:$8 sps:$4 sm:$0xff]  }
 0x812   :  { %10708 = vmatpush1.bf16.msra.mxu0 %v16493_v4  ;;  %v16524_v4 = vld [vmem:[#allocation6 + $0xd94] ss:$8 sps:$4 sm:$0xff]  }
 0x813   :  { %11262 = vmatpush1.bf16.msra.mxu1 %v16494_v44  ;;  %10709 = vmatprep.subr.bf16.mxu0 %v16495_v3  ;;  %v16525_v44 = vld [vmem:[#allocation6 + $0xc10] ss:$8 sps:$4 sm:$0xff]  }
 0x814   :  { %10695 = vmatmul.mubr.bf16.gmra.mrb[108].mxu0 %v19492_v9  ;;  %11263 = vmatprep.subr.bf16.mxu1 %v16496_v49  ;;  %v16526_v3 = vld [vmem:[#allocation6 + $0xd90] ss:$8 sps:$4 sm:$0xff]   ;;  %v16527_v49 = vld [vmem:[#allocation6 + $0xc24] ss:$8 sps:$4 sm:$0xff]  }
 0x815   :  { %11249 = vmatmul.mubr.bf16.gmra.mrb[108].mxu1 %v19492_v9  ;;  %10737 = vmatprep.mubr.bf16.mxu0 %v19484_v60  ;;  %v16505_v9 = vld [vmem:[#allocation6 + $0xa40] ss:$8 sps:$4 sm:$0xff]  }
 0x816   :  { %10710 = vmatpush1.bf16.msra.mxu0 %v16497_v52  ;;  %11291 = vmatprep.mubr.bf16.mxu1 %v19484_v60  ;;  %v16528_v52 = vld [vmem:[#allocation6 + $0xda4] ss:$8 sps:$4 sm:$0xff]  }
 0x817   :  { %11264 = vmatpush1.bf16.msra.mxu1 %v16498_v16  ;;  %10711 = vmatprep.subr.bf16.mxu0 %v16499_v54  ;;  %v16530_v16 = vld [vmem:[#allocation6 + $0xda0] ss:$8 sps:$4 sm:$0xff]   ;;  %v16531_v54 = vld [vmem:[#allocation6 + $0xc34] ss:$8 sps:$4 sm:$0xff]  }
 0x818   :  { %11265 = vmatprep.subr.bf16.mxu1 %v16500_v30  ;;  %v16532_v30 = vld [vmem:[#allocation6 + $0xdb4] ss:$8 sps:$4 sm:$0xff]  }
 0x81a   :  { %10712 = vmatpush1.bf16.msra.mxu0 %v16501_v37  ;;  %v16533_v37 = vld [vmem:[#allocation6 + $0xc30] ss:$8 sps:$4 sm:$0xff]  }
 0x81b   :  { %11266 = vmatpush1.bf16.msra.mxu1 %v16502_v63  ;;  %10713 = vmatprep.subr.bf16.mxu0 %v16503_v7  ;;  %v16534_v63 = vld [vmem:[#allocation6 + $0xdb0] ss:$8 sps:$4 sm:$0xff]   ;;  %v16535_v7 = vld [vmem:[#allocation6 + $0xc44] ss:$8 sps:$4 sm:$0xff]  }
 0x81c   :  { %11267 = vmatprep.subr.bf16.mxu1 %v16504_v47  ;;  %v16536_v47 = vld [vmem:[#allocation6 + $0xdc4] ss:$8 sps:$4 sm:$0xff]  }
 0x81e   :  { %10714 = vmatpush1.bf16.msra.mxu0 %v16505_v9  ;;  %v16538_v9 = vld [vmem:[#allocation6 + $0xdc0] ss:$8 sps:$4 sm:$0xff]  }
 0x81f   :  { %11268 = vmatpush1.bf16.msra.mxu1 %v16506_v59  ;;  %10715 = vmatprep.subr.bf16.mxu0 %v16507_v45  ;;  %v16539_v59 = vld [vmem:[#allocation6 + $0xc54] ss:$8 sps:$4 sm:$0xff]  }
 0x820   :  { %11269 = vmatprep.subr.bf16.mxu1 %v16508_v23  ;;  %v16540_v45 = vld [vmem:[#allocation6 + $0xdd4] ss:$8 sps:$4 sm:$0xff]   ;;  %v16542_v23 = vld [vmem:[#allocation6 + $0xdd0] ss:$8 sps:$4 sm:$0xff]  }
 0x822   :  { %10716 = vmatpush1.bf16.msra.mxu0 %v16509_v51  ;;  %v16543_v51 = vld [vmem:[#allocation6 + $0xc64] ss:$8 sps:$4 sm:$0xff]  }
 0x823   :  { %11270 = vmatpush1.bf16.msra.mxu1 %v16510_v58  ;;  %10717 = vmatprep.subr.bf16.mxu0 %v16511_v36  ;;  %v16544_v58 = vld [vmem:[#allocation6 + $0xde4] ss:$8 sps:$4 sm:$0xff]   ;;  %v16545_v36 = vld [vmem:[#allocation6 + $0xc60] ss:$8 sps:$4 sm:$0xff]  }
 0x824   :  { %11271 = vmatprep.subr.bf16.mxu1 %v16512_v25  ;;  %v16546_v25 = vld [vmem:[#allocation6 + $0xde0] ss:$8 sps:$4 sm:$0xff]  }
 0x826   :  { %10718 = vmatpush1.bf16.msra.mxu0 %v16513_v20  ;;  %v16547_v20 = vld [vmem:[#allocation6 + $0xc74] ss:$8 sps:$4 sm:$0xff]  }
 0x827   :  { %11272 = vmatpush1.bf16.msra.mxu1 %v16514_v19  ;;  %10719 = vmatprep.subr.bf16.mxu0 %v16515_v18  ;;  %v16548_v19 = vld [vmem:[#allocation6 + $0xdf4] ss:$8 sps:$4 sm:$0xff]   ;;  %v16549_v18 = vld [vmem:[#allocation6 + $0xc70] ss:$8 sps:$4 sm:$0xff]  }
 0x828   :  { %11273 = vmatprep.subr.bf16.mxu1 %v16516_v34  ;;  %v16550_v34 = vld [vmem:[#allocation6 + $0xdf0] ss:$8 sps:$4 sm:$0xff]  }
 0x82a   :  { %10720 = vmatpush1.bf16.msra.mxu0 %v16517_v38  ;;  %v16551_v38 = vld [vmem:[#allocation6 + $0xc84] ss:$8 sps:$4 sm:$0xff]  }
 0x82b   :  { %11274 = vmatpush1.bf16.msra.mxu1 %v16518_v56  ;;  %10766 = vmatprep.subr.bf16.mxu0 %v16519_v24  ;;  %v16552_v56 = vld [vmem:[#allocation6 + $0xe04] ss:$8 sps:$4 sm:$0xff]   ;;  %v16553_v24 = vld [vmem:[#allocation6 + $0xc80] ss:$8 sps:$4 sm:$0xff]  }
 0x82c   :  { %11320 = vmatprep.subr.bf16.mxu1 %v16520_v17  ;;  %v16554_v17 = vld [vmem:[#allocation6 + $0xe00] ss:$8 sps:$4 sm:$0xff]  }
 0x82d   :  { %10738 = vmatmul.mubr.bf16.vlgmr.msra.gmra.mrb[104].mxu0 %v19490_v10 }
 0x82e   :  { %11292 = vmatmul.mubr.bf16.vlgmr.msra.gmra.mrb[104].mxu1 %v19490_v10  ;;  %10767 = vmatpush1.bf16.msra.mxu0 %v16521_v13  ;;  %v16529_v10 = vld [vmem:[#allocation6 + $0xc20] ss:$8 sps:$4 sm:$0xff]   ;;  %v16555_v13 = vld [vmem:[#allocation6 + $0xc94] ss:$8 sps:$4 sm:$0xff]  }
 0x82f   :  { %11321 = vmatpush1.bf16.msra.mxu1 %v16522_v46  ;;  %10768 = vmatprep.subr.bf16.mxu0 %v16523_v48  ;;  %v16556_v46 = vld [vmem:[#allocation6 + $0xe14] ss:$8 sps:$4 sm:$0xff]   ;;  %v16557_v48 = vld [vmem:[#allocation6 + $0xc90] ss:$8 sps:$4 sm:$0xff]  }
 0x830   :  { %11322 = vmatprep.subr.bf16.mxu1 %v16524_v4  ;;  %10747 = vmatprep.mubr.bf16.mxu0 %v19484_v60  ;;  %v16558_v4 = vld [vmem:[#allocation6 + $0xe10] ss:$8 sps:$4 sm:$0xff]  }
 0x831   :  { %11301 = vmatprep.mubr.bf16.mxu1 %v19484_v60 }
 0x832   :  { %10769 = vmatpush1.bf16.msra.mxu0 %v16525_v44  ;;  %v16559_v44 = vld [vmem:[#allocation6 + $0xca4] ss:$8 sps:$4 sm:$0xff]  }
 0x833   :  { %11323 = vmatpush1.bf16.msra.mxu1 %v16526_v3  ;;  %10770 = vmatprep.subr.bf16.mxu0 %v16527_v49  ;;  %v16560_v3 = vld [vmem:[#allocation6 + $0xe24] ss:$8 sps:$4 sm:$0xff]   ;;  %v16561_v49 = vld [vmem:[#allocation6 + $0xca0] ss:$8 sps:$4 sm:$0xff]  }
 0x834   :  { %11324 = vmatprep.subr.bf16.mxu1 %v16528_v52  ;;  %v16562_v52 = vld [vmem:[#allocation6 + $0xe20] ss:$8 sps:$4 sm:$0xff]  }
 0x835   :  { %10748 = vmatmul.mubr.bf16.gmra.mrb[108].mxu0 %v19493_v50 }
 0x836   :  { %11302 = vmatmul.mubr.bf16.gmra.mrb[108].mxu1 %v19493_v50  ;;  %10771 = vmatpush1.bf16.msra.mxu0 %v16529_v10  ;;  %v16537_v50 = vld [vmem:[#allocation6 + $0xc40] ss:$8 sps:$4 sm:$0xff]   ;;  %v16563_v10 = vld [vmem:[#allocation6 + $0xcb4] ss:$8 sps:$4 sm:$0xff]  }
 0x837   :  { %10798 = vmatprep.mubr.bf16.mxu0 %v18834_v1  ;;  %11325 = vmatpush1.bf16.msra.mxu1 %v16530_v16  ;;  %v16564_v16 = vld [vmem:[#allocation6 + $0xe34] ss:$8 sps:$4 sm:$0xff]  }
 0x838   :  { %11352 = vmatprep.mubr.bf16.mxu1 %v18834_v1  ;;  %10772 = vmatprep.subr.bf16.mxu0 %v16531_v54  ;;  %v16541_v1 = vld [vmem:[#allocation6 + $0xc50] ss:$8 sps:$4 sm:$0xff]  }
 0x839   :  { %11326 = vmatprep.subr.bf16.mxu1 %v16532_v30  ;;  %v16565_v54 = vld [vmem:[#allocation6 + $0xcb0] ss:$8 sps:$4 sm:$0xff]  }
 0x83a   :  { %10773 = vmatpush1.bf16.msra.mxu0 %v16533_v37  ;;  %v16566_v30 = vld [vmem:[#allocation6 + $0xe30] ss:$8 sps:$4 sm:$0xff]   ;;  %v16567_v37 = vld [vmem:[#allocation6 + $0xcc4] ss:$8 sps:$4 sm:$0xff]  }
 0x83b   :  { %11327 = vmatpush1.bf16.msra.mxu1 %v16534_v63  ;;  %10774 = vmatprep.subr.bf16.mxu0 %v16535_v7  ;;  %v16568_v63 = vld [vmem:[#allocation6 + $0xe44] ss:$8 sps:$4 sm:$0xff]   ;;  %v16569_v7 = vld [vmem:[#allocation6 + $0xcc0] ss:$8 sps:$4 sm:$0xff]  }
 0x83c   :  { %11328 = vmatprep.subr.bf16.mxu1 %v16536_v47  ;;  %v16570_v47 = vld [vmem:[#allocation6 + $0xe40] ss:$8 sps:$4 sm:$0xff]  }
 0x83e   :  { %10775 = vmatpush1.bf16.msra.mxu0 %v16537_v50  ;;  %v16571_v50 = vld [vmem:[#allocation6 + $0xcd4] ss:$8 sps:$4 sm:$0xff]  }
 0x83f   :  { %11329 = vmatpush1.bf16.msra.mxu1 %v16538_v9  ;;  %10776 = vmatprep.subr.bf16.mxu0 %v16539_v59  ;;  %v16572_v9 = vld [vmem:[#allocation6 + $0xe54] ss:$8 sps:$4 sm:$0xff]   ;;  %v16573_v59 = vld [vmem:[#allocation6 + $0xcd0] ss:$8 sps:$4 sm:$0xff]  }
 0x840   :  { %11330 = vmatprep.subr.bf16.mxu1 %v16540_v45  ;;  %v16574_v45 = vld [vmem:[#allocation6 + $0xe50] ss:$8 sps:$4 sm:$0xff]  }
 0x842   :  { %10777 = vmatpush1.bf16.msra.mxu0 %v16541_v1  ;;  %v16575_v1 = vld [vmem:[#allocation6 + $0xce4] ss:$8 sps:$4 sm:$0xff]  }
 0x843   :  { %11331 = vmatpush1.bf16.msra.mxu1 %v16542_v23  ;;  %10778 = vmatprep.subr.bf16.mxu0 %v16543_v51  ;;  %v16576_v23 = vld [vmem:[#allocation6 + $0xe64] ss:$8 sps:$4 sm:$0xff]   ;;  %v16577_v51 = vld [vmem:[#allocation6 + $0xce0] ss:$8 sps:$4 sm:$0xff]  }
 0x844   :  { %11332 = vmatprep.subr.bf16.mxu1 %v16544_v58  ;;  %v16578_v58 = vld [vmem:[#allocation6 + $0xe60] ss:$8 sps:$4 sm:$0xff]  }
 0x846   :  { %10779 = vmatpush1.bf16.msra.mxu0 %v16545_v36  ;;  %v16579_v36 = vld [vmem:[#allocation6 + $0xcf4] ss:$8 sps:$4 sm:$0xff]  }
 0x847   :  { %11333 = vmatpush1.bf16.msra.mxu1 %v16546_v25  ;;  %10780 = vmatprep.subr.bf16.mxu0 %v16547_v20  ;;  %v16580_v25 = vld [vmem:[#allocation6 + $0xe74] ss:$8 sps:$4 sm:$0xff]   ;;  %v16581_v20 = vld [vmem:[#allocation6 + $0xcf0] ss:$8 sps:$4 sm:$0xff]  }
 0x848   :  { %11334 = vmatprep.subr.bf16.mxu1 %v16548_v19  ;;  %v16582_v19 = vld [vmem:[#allocation6 + $0xe70] ss:$8 sps:$4 sm:$0xff]  }
 0x84a   :  { %10781 = vmatpush1.bf16.msra.mxu0 %v16549_v18  ;;  %v16583_v18 = vld [vmem:[#allocation6 + $0xd04] ss:$8 sps:$4 sm:$0xff]  }
 0x84b   :  { %11335 = vmatpush1.bf16.msra.mxu1 %v16550_v34  ;;  %10782 = vmatprep.subr.bf16.mxu0 %v16551_v38  ;;  %v16584_v34 = vld [vmem:[#allocation6 + $0xe84] ss:$8 sps:$4 sm:$0xff]   ;;  %v16585_v38 = vld [vmem:[#allocation6 + $0xd00] ss:$8 sps:$4 sm:$0xff]  }
 0x84c   :  { %11336 = vmatprep.subr.bf16.mxu1 %v16552_v56  ;;  %v16586_v56 = vld [vmem:[#allocation6 + $0xe80] ss:$8 sps:$4 sm:$0xff]  }
 0x84e   :  { %10783 = vmatpush1.bf16.msra.mxu0 %v16553_v24  ;;  %v16587_v24 = vld [vmem:[#allocation6 + $0xd14] ss:$8 sps:$4 sm:$0xff]  }
 0x84f   :  { %11337 = vmatpush1.bf16.msra.mxu1 %v16554_v17  ;;  %10784 = vmatprep.subr.bf16.mxu0 %v16555_v13  ;;  %v16588_v17 = vld [vmem:[#allocation6 + $0xe94] ss:$8 sps:$4 sm:$0xff]   ;;  %v16589_v13 = vld [vmem:[#allocation6 + $0xd10] ss:$8 sps:$4 sm:$0xff]  }
 0x850   :  { %11338 = vmatprep.subr.bf16.mxu1 %v16556_v46  ;;  %v16590_v46 = vld [vmem:[#allocation6 + $0xe90] ss:$8 sps:$4 sm:$0xff]  }
 0x852   :  { %10785 = vmatpush1.bf16.msra.mxu0 %v16557_v48  ;;  %v16591_v48 = vld [vmem:[#allocation6 + $0xd24] ss:$8 sps:$4 sm:$0xff]  }
 0x853   :  { %11339 = vmatpush1.bf16.msra.mxu1 %v16558_v4  ;;  %10786 = vmatprep.subr.bf16.mxu0 %v16559_v44  ;;  %v16594_v4 = vld [vmem:[#allocation6 + $0xea0] ss:$8 sps:$4 sm:$0xff]   ;;  %v16595_v44 = vld [vmem:[#allocation6 + $0xd34] ss:$8 sps:$4 sm:$0xff]  }
 0x854   :  { %11340 = vmatprep.subr.bf16.mxu1 %v16560_v3  ;;  %v16596_v3 = vld [vmem:[#allocation6 + $0xeb4] ss:$8 sps:$4 sm:$0xff]  }
 0x856   :  { %10787 = vmatpush1.bf16.msra.mxu0 %v16561_v49  ;;  %v16597_v49 = vld [vmem:[#allocation6 + $0xd30] ss:$8 sps:$4 sm:$0xff]  }
 0x857   :  { %11341 = vmatpush1.bf16.msra.mxu1 %v16562_v52  ;;  %10788 = vmatprep.subr.bf16.mxu0 %v16563_v10  ;;  %v16598_v52 = vld [vmem:[#allocation6 + $0xeb0] ss:$8 sps:$4 sm:$0xff]   ;;  %v16599_v10 = vld [vmem:[#allocation6 + $0xd44] ss:$8 sps:$4 sm:$0xff]  }
 0x858   :  { %11342 = vmatprep.subr.bf16.mxu1 %v16564_v16  ;;  %v16600_v16 = vld [vmem:[#allocation6 + $0xec4] ss:$8 sps:$4 sm:$0xff]  }
 0x85a   :  { %10789 = vmatpush1.bf16.msra.mxu0 %v16565_v54  ;;  %v16602_v54 = vld [vmem:[#allocation6 + $0xec0] ss:$8 sps:$4 sm:$0xff]  }
 0x85b   :  { %11343 = vmatpush1.bf16.msra.mxu1 %v16566_v30  ;;  %10790 = vmatprep.subr.bf16.mxu0 %v16567_v37  ;;  %v16603_v30 = vld [vmem:[#allocation6 + $0xd54] ss:$8 sps:$4 sm:$0xff]  }
 0x85c   :  { %11344 = vmatprep.subr.bf16.mxu1 %v16568_v63  ;;  %v16604_v37 = vld [vmem:[#allocation6 + $0xed4] ss:$8 sps:$4 sm:$0xff]   ;;  %v16605_v63 = vld [vmem:[#allocation6 + $0xd50] ss:$8 sps:$4 sm:$0xff]  }
 0x85e   :  { %10791 = vmatpush1.bf16.msra.mxu0 %v16569_v7  ;;  %v16606_v7 = vld [vmem:[#allocation6 + $0xed0] ss:$8 sps:$4 sm:$0xff]  }
 0x85f   :  { %11345 = vmatpush1.bf16.msra.mxu1 %v16570_v47  ;;  %10792 = vmatprep.subr.bf16.mxu0 %v16571_v50  ;;  %v16607_v47 = vld [vmem:[#allocation6 + $0xd64] ss:$8 sps:$4 sm:$0xff]  }
 0x860   :  { %11346 = vmatprep.subr.bf16.mxu1 %v16572_v9  ;;  %v16608_v50 = vld [vmem:[#allocation6 + $0xee4] ss:$8 sps:$4 sm:$0xff]   ;;  %v16609_v9 = vld [vmem:[#allocation6 + $0xd60] ss:$8 sps:$4 sm:$0xff]  }
 0x862   :  { %10793 = vmatpush1.bf16.msra.mxu0 %v16573_v59  ;;  %v16610_v59 = vld [vmem:[#allocation6 + $0xee0] ss:$8 sps:$4 sm:$0xff]  }
 0x863   :  { %11347 = vmatpush1.bf16.msra.mxu1 %v16574_v45  ;;  %10794 = vmatprep.subr.bf16.mxu0 %v16575_v1  ;;  %v16611_v45 = vld [vmem:[#allocation6 + $0xd74] ss:$8 sps:$4 sm:$0xff]   ;;  %v15972_v1 = vld [vmem:[#allocation9 + $0xc0] sm:$0xff]  }
 0x864   :  { %11348 = vmatprep.subr.bf16.mxu1 %v16576_v23  ;;  %v16612_v23 = vld [vmem:[#allocation6 + $0xef4] ss:$8 sps:$4 sm:$0xff]  }
 0x866   :  { %10795 = vmatpush1.bf16.msra.mxu0 %v16577_v51  ;;  %v15970_v51 = vld [vmem:[#allocation9 + $0x40] sm:$0xff]  }
 0x867   :  { %11349 = vmatpush1.bf16.msra.mxu1 %v16578_v58  ;;  %10796 = vmatprep.subr.bf16.mxu0 %v16579_v36  ;;  %v16613_v58 = vld [vmem:[#allocation6 + $0xd70] ss:$8 sps:$4 sm:$0xff]  }
 0x868   :  { %11350 = vmatprep.subr.bf16.mxu1 %v16580_v25  ;;  %v16614_v36 = vld [vmem:[#allocation6 + $0xef0] ss:$8 sps:$4 sm:$0xff]   ;;  %v15971_v25 = vld [vmem:[#allocation9] sm:$0xff]  }
 0x86a   :  { %10797 = vmatpush1.bf16.msra.mxu0 %v16581_v20  ;;  %v15973_v20 = vld [vmem:[#allocation9 + $0x80] sm:$0xff]  }
 0x86b   :  { %11351 = vmatpush1.bf16.msra.mxu1 %v16582_v19  ;;  %10819 = vmatprep.subr.bf16.mxu0 %v16583_v18  ;;  %v15974_v19 = vld [vmem:[#allocation9 + $0x48] sm:$0xff]  }
 0x86c   :  { %11373 = vmatprep.subr.bf16.mxu1 %v16584_v34  ;;  %v15976_v18 = vld [vmem:[#allocation9 + $0xc8] sm:$0xff]  }
 0x86d   :  { %10799 = vmatmul.mubr.bf16.vlgmr.msra.gmra.mrb[104].mxu0 %v18828_v53  ;;  %v15975_v34 = vld [vmem:[#allocation9 + $0x8] sm:$0xff]  }
 0x86e   :  { %11353 = vmatmul.mubr.bf16.vlgmr.msra.gmra.mrb[104].mxu1 %v18828_v53  ;;  %10808 = vmatprep.mubr.bf16.mxu0 %v18865_v28  ;;  %v16592_v53 = vld [vmem:[#allocation6 + $0xea4] ss:$8 sps:$4 sm:$0xff]  }
 0x86f   :  { %10820 = vmatpush1.bf16.msra.mxu0 %v16585_v38  ;;  %11362 = vmatprep.mubr.bf16.mxu1 %v18865_v28  ;;  %v16593_v28 = vld [vmem:[#allocation6 + $0xd20] ss:$8 sps:$4 sm:$0xff]  }
 0x870   :  { %11374 = vmatpush1.bf16.msra.mxu1 %v16586_v56  ;;  %10821 = vmatprep.subr.bf16.mxu0 %v16587_v24  ;;  %v15977_v38 = vld [vmem:[#allocation9 + $0x88] sm:$0xff]   ;;  %v15978_v56 = vld [vmem:[#allocation9 + $0x50] sm:$0xff]  }
 0x871   :  { %11375 = vmatprep.subr.bf16.mxu1 %v16588_v17  ;;  %v15980_v24 = vld [vmem:[#allocation9 + $0xd0] sm:$0xff]  }
 0x872   :  { %v15979_v17 = vld [vmem:[#allocation9 + $0x10] sm:$0xff]  }
 0x873   :  { %10822 = vmatpush1.bf16.msra.mxu0 %v16589_v13  ;;  %v15981_v13 = vld [vmem:[#allocation9 + $0x90] sm:$0xff]  }
 0x874   :  { %11376 = vmatpush1.bf16.msra.mxu1 %v16590_v46  ;;  %10823 = vmatprep.subr.bf16.mxu0 %v16591_v48  ;;  %v15982_v46 = vld [vmem:[#allocation9 + $0x58] sm:$0xff]  }
 0x875   :  { %10809 = vmatmul.mubr.bf16.gmra.mrb[108].mxu0 %v18862_v42  ;;  %11377 = vmatprep.subr.bf16.mxu1 %v16592_v53  ;;  %v15985_v48 = vld [vmem:[#allocation9 + $0x98] sm:$0xff]   ;;  %v15986_v53 = vld [vmem:[#allocation9 + $0x60] sm:$0xff]  }
 0x876   :  { %11363 = vmatmul.mubr.bf16.gmra.mrb[108].mxu1 %v18862_v42  ;;  %10851 = vmatprep.mubr.bf16.mxu0 %v19484_v60  ;;  %v16601_v42 = vld [vmem:[#allocation6 + $0xd40] ss:$8 sps:$4 sm:$0xff]  }
 0x877   :  { %10824 = vmatpush1.bf16.msra.mxu0 %v16593_v28  ;;  %11405 = vmatprep.mubr.bf16.mxu1 %v19484_v60  ;;  %v15987_v28 = vld [vmem:[#allocation9 + $0x20] sm:$0xff]  }
 0x878   :  { %11378 = vmatpush1.bf16.msra.mxu1 %v16594_v4  ;;  %10825 = vmatprep.subr.bf16.mxu0 %v16595_v44  ;;  %v15988_v4 = vld [vmem:[#allocation9 + $0xe0] sm:$0xff]  }
 0x879   :  { %11379 = vmatprep.subr.bf16.mxu1 %v16596_v3  ;;  %v15989_v44 = vld [vmem:[#allocation9 + $0xa0] sm:$0xff]   ;;  %v15990_v3 = vld [vmem:[#allocation9 + $0x68] sm:$0xff]  }
 0x87b   :  { %10826 = vmatpush1.bf16.msra.mxu0 %v16597_v49  ;;  %v15991_v49 = vld [vmem:[#allocation9 + $0x28] sm:$0xff]  }
 0x87c   :  { %11380 = vmatpush1.bf16.msra.mxu1 %v16598_v52  ;;  %10827 = vmatprep.subr.bf16.mxu0 %v16599_v10  ;;  %v15993_v52 = vld [vmem:[#allocation9 + $0xa8] sm:$0xff]   ;;  %v15994_v10 = vld [vmem:[#allocation9 + $0x70] sm:$0xff]  }
 0x87d   :  { %11381 = vmatprep.subr.bf16.mxu1 %v16600_v16  ;;  %v15995_v16 = vld [vmem:[#allocation9 + $0x30] sm:$0xff]  }
 0x87f   :  { %10828 = vmatpush1.bf16.msra.mxu0 %v16601_v42  ;;  %v15996_v42 = vld [vmem:[#allocation9 + $0xf0] sm:$0xff]  }
 0x880   :  { %11382 = vmatpush1.bf16.msra.mxu1 %v16602_v54  ;;  %10829 = vmatprep.subr.bf16.mxu0 %v16603_v30  ;;  %v15997_v54 = vld [vmem:[#allocation9 + $0xb0] sm:$0xff]   ;;  %v15998_v30 = vld [vmem:[#allocation9 + $0x78] sm:$0xff]  }
 0x881   :  { %11383 = vmatprep.subr.bf16.mxu1 %v16604_v37  ;;  %v15999_v37 = vld [vmem:[#allocation9 + $0x38] sm:$0xff]  }
 0x883   :  { %10830 = vmatpush1.bf16.msra.mxu0 %v16605_v63  ;;  %v16000_v63 = vld [vmem:[#allocation9 + $0xf8] sm:$0xff]  }
 0x884   :  { %11384 = vmatpush1.bf16.msra.mxu1 %v16606_v7  ;;  %10831 = vmatprep.subr.bf16.mxu0 %v16607_v47  ;;  %v16001_v7 = vld [vmem:[#allocation9 + $0xb8] sm:$0xff]   ;;  %v16002_v47 = vld [vmem:[#allocation9 + $0x1c0] sm:$0xff]  }
 0x885   :  { %11385 = vmatprep.subr.bf16.mxu1 %v16608_v50  ;;  %v16004_v50 = vld [vmem:[#allocation9 + $0x140] sm:$0xff]  }
 0x887   :  { %10832 = vmatpush1.bf16.msra.mxu0 %v16609_v9  ;;  %v11458_v9 = vld [vmem:[#allocation7] sm:$0x3] }
 0x888   :  { %11386 = vmatpush1.bf16.msra.mxu1 %v16610_v59  ;;  %10833 = vmatprep.subr.bf16.mxu0 %v16611_v45 }
 0x889   :  { %11387 = vmatprep.subr.bf16.mxu1 %v16612_v23 }
 0x88b   :  { %10834 = vmatpush1.bf16.msra.mxu0 %v16613_v58 }
 0x88c   :  { %11388 = vmatpush1.bf16.msra.mxu1 %v16614_v36  ;;  %13347 = vmatprep.subr.bf16.mxu0 %v15972_v1 }
 0x88d   :  { %13369 = vmatprep.subr.bf16.mxu1 %v15970_v51  ;;  %v19494_v51 = vld [vmem:[#allocation43_spill] sm:$0xff] }
 0x88e   :  { %10852 = vmatmul.mubr.bf16.vlgmr.msra.gmra.mrb[104].mxu0 %v18826_v29  ;;  %v19495_v58 = vsub.s32 0, %v19494_v51 }
 0x88f   :  { %11406 = vmatmul.mubr.bf16.vlgmr.msra.gmra.mrb[104].mxu1 %v18826_v29  ;;  %10861 = vmatprep.mubr.bf16.mxu0 %v19484_v60  ;;  %v15984_v29 = vld [vmem:[#allocation9 + $0xd8] sm:$0xff]  }
 0x890   :  { %11415 = vmatprep.mubr.bf16.mxu1 %v19484_v60  ;;  %13370 = vmatpush3.bf16.msra.mxu1 %v15971_v25  ;;  %v15983_v60 = vld [vmem:[#allocation9 + $0x18] sm:$0xff]   ;;  %v11463_v36 = vrot.slane %v11458_v9, %v19495_v58 }
 0x891   :  { %13348 = vmatpush3.bf16.msra.mxu0 %v15973_v20  ;;  %13371 = vmatprep.subr.bf16.mxu1 %v15974_v19 }
 0x892   :  { %13349 = vmatprep.subr.bf16.mxu0 %v15976_v18  ;;  %v19496_v18 = vsub.s32 1, %v19494_v51  ;;  %v16014_v51 = vld [vmem:[#allocation9 + $0x1d8] sm:$0xff]  }
 0x894   :  { %13372 = vmatpush3.bf16.msra.mxu1 %v15975_v34  ;;  %v11467_v34 = vrot.slane %v11458_v9, %v19496_v18  ;;  %v16007_v9 = vld [vmem:[#allocation9 + $0x188] sm:$0xff]   ;;  %v16017_v18 = vld [vmem:[#allocation9 + $0x118] sm:$0xff]  }
 0x895   :  { %13350 = vmatpush3.bf16.msra.mxu0 %v15977_v38  ;;  %13373 = vmatprep.subr.bf16.mxu1 %v15978_v56 }
 0x896   :  { %10862 = vmatmul.mubr.bf16.gmra.mrb[108].mxu0 %v18859_v8  ;;  %13351 = vmatprep.subr.bf16.mxu0 %v15980_v24 }
 0x897   :  { %11416 = vmatmul.mubr.bf16.gmra.mrb[108].mxu1 %v18859_v8  ;;  %v15992_v8 = vld [vmem:[#allocation9 + $0xe8] sm:$0xff]  }
 0x898   :  { %13374 = vmatpush3.bf16.msra.mxu1 %v15979_v17 }
 0x899   :  { %13352 = vmatpush3.bf16.msra.mxu0 %v15981_v13  ;;  %13375 = vmatprep.subr.bf16.mxu1 %v15982_v46 }
 0x89a   :  { %13353 = vmatprep.subr.bf16.mxu0 %v15984_v29 }
 0x89c   :  { %13376 = vmatpush3.bf16.msra.mxu1 %v15983_v60 }
 0x89d   :  { %13354 = vmatpush3.bf16.msra.mxu0 %v15985_v48  ;;  %13377 = vmatprep.subr.bf16.mxu1 %v15986_v53 }
 0x89e   :  { %13355 = vmatprep.subr.bf16.mxu0 %v15988_v4 }
 0x8a0   :  { %13378 = vmatpush3.bf16.msra.mxu1 %v15987_v28 }
 0x8a1   :  { %13356 = vmatpush3.bf16.msra.mxu0 %v15989_v44  ;;  %13379 = vmatprep.subr.bf16.mxu1 %v15990_v3 }
 0x8a2   :  { %13357 = vmatprep.subr.bf16.mxu0 %v15992_v8 }
 0x8a4   :  { %13380 = vmatpush3.bf16.msra.mxu1 %v15991_v49 }
 0x8a5   :  { %13358 = vmatpush3.bf16.msra.mxu0 %v15993_v52  ;;  %13381 = vmatprep.subr.bf16.mxu1 %v15994_v10 }
 0x8a6   :  { %13359 = vmatprep.subr.bf16.mxu0 %v15996_v42 }
 0x8a8   :  { %13382 = vmatpush3.bf16.msra.mxu1 %v15995_v16 }
 0x8a9   :  { %13360 = vmatpush3.bf16.msra.mxu0 %v15997_v54  ;;  %13383 = vmatprep.subr.bf16.mxu1 %v15998_v30  ;;  %v16003_v30 = vld [vmem:[#allocation9 + $0x180] sm:$0xff]  }
 0x8aa   :  { %13361 = vmatprep.subr.bf16.mxu0 %v16000_v63 }
 0x8ac   :  { %13384 = vmatpush3.bf16.msra.mxu1 %v15999_v37 }
 0x8ad   :  { %13362 = vmatpush3.bf16.msra.mxu0 %v16001_v7  ;;  %13413 = vmatprep.subr.bf16.mxu1 %v16002_v47  ;;  %v16006_v7 = vld [vmem:[#allocation9 + $0x1c8] sm:$0xff]  }
 0x8ae   :  { %13391 = vmatprep.subr.bf16.mxu0 %v16004_v50 }
 0x961   :  { %v10853_v59 = vpop.f32.mrb[104].mxu0 }
 0x962   :  { %v11407_v45 = vpop.f32.mrb[104].mxu1  ;;  %v10855_v1 = vpop.f32.mrb[105].mxu0 }
 0x963   :  { %v11442_v23 = vmax.f32 %v10853_v59, %v11407_v45  ;;  %v11409_v25 = vpop.f32.mrb[105].mxu1  ;;  %v10857_v20 = vpop.f32.mrb[106].mxu0 }
 0x964   :  { %v11443_v19 = vmax.f32 %v10855_v1, %v11409_v25  ;;  %v11411_v38 = vpop.f32.mrb[106].mxu1  ;;  %v10859_v56 = vpop.f32.mrb[107].mxu0  ;;  %v16016_v25 = vld [vmem:[#allocation9 + $0x158] sm:$0xff]  }
 0x965   :  { %v11450_v24 = vmax.f32 %v11434_v22, %v11442_v23  ;;  %v11444_v17 = vmax.f32 %v10857_v20, %v11411_v38  ;;  %v11413_v13 = vpop.f32.mrb[107].mxu1  ;;  %v16011_v23 = vld [vmem:[#allocation9 + $0x190] sm:$0xff]   ;;  %v16015_v20 = vld [vmem:[#allocation9 + $0x198] sm:$0xff]   ;;  %v16019_v38 = vld [vmem:[#allocation9 + $0x1a0] sm:$0xff]  }
 0x966   :  { %v11451_v46 = vmax.f32 %v11435_v39, %v11443_v19  ;;  %v11445_v29 = vmax.f32 %v10859_v56, %v11413_v13  ;;  %v16018_v19 = vld [vmem:[#allocation9 + $0x1e0] sm:$0xff]   ;;  %v16022_v56 = vld [vmem:[#allocation9 + $0x1e8] sm:$0xff]  }
 0x967   :  { %v11470_v60 = vadd.f32 %v11463_v36, %v11450_v24  ;;  %v11452_v48 = vmax.f32 %v11436_v26, %v11444_v17  ;;  %v16021_v24 = vld [vmem:[#allocation9 + $0x120] sm:$0xff]   ;;  %v16024_v17 = vld [vmem:[#allocation9 + $0x168] sm:$0xff]  }
 0x968   :  { %v11471_v53 = vadd.f32 %v11467_v34, %v11451_v46  ;;  %v11453_v28 = vmax.f32 %v11437_v40, %v11445_v29  ;;  %v16023_v13 = vld [vmem:[#allocation9 + $0x1a8] sm:$0xff]   ;;  %v16026_v46 = vld [vmem:[#allocation9 + $0x1f0] sm:$0xff]  }
 0x969   :  { %v11472_v4 = vadd.f32 %v11463_v36, %v11452_v48  ;;  %v10863_v43 = vpop.f32.mrb[108].mxu0  ;;  %v11478_v3 = vmax.f32 %v11470_v60, 0.0  ;;  %v16025_v29 = vld [vmem:[#allocation9 + $0x128] sm:$0xff]   ;;  %v16028_v60 = vld [vmem:[#allocation9 + $0x170] sm:$0xff]  }
 0x96a   :  { %v11473_v31 = vadd.f32 %v11467_v34, %v11453_v28  ;;  %v11417_v22 = vpop.f32.mrb[108].mxu1  ;;  %v10865_v44 = vpop.f32.mrb[109].mxu0  ;;  %v11479_v8 = vmax.f32 %v11471_v53, 0.0  ;;  %v16027_v48 = vld [vmem:[#allocation9 + $0x1b0] sm:$0xff]   ;;  %v16030_v53 = vld [vmem:[#allocation9 + $0x1f8] sm:$0xff]  }
 0x96b   :  { %v11480_v49 = vmax.f32 %v11472_v4, 0.0  ;;  %v11446_v27 = vmax.f32 %v10863_v43, %v11417_v22  ;;  %v11419_v12 = vpop.f32.mrb[109].mxu1  ;;  %v10867_v39 = vpop.f32.mrb[110].mxu0  ;;  %v16029_v28 = vld [vmem:[#allocation9 + $0x130] sm:$0xff]   ;;  %v16032_v4 = vld [vmem:[#allocation9 + $0x178] sm:$0xff]  }
 0x96c   :  { %v11481_v52 = vmax.f32 %v11473_v31, 0.0  ;;  %v11447_v10 = vmax.f32 %v10865_v44, %v11419_v12  ;;  %v11421_v35 = vpop.f32.mrb[110].mxu1  ;;  %v10869_v15 = vpop.f32.mrb[111].mxu0  ;;  %v16031_v43 = vld [vmem:[#allocation9 + $0x1b8] sm:$0xff]  }
 0x96d   :  { %v11486_v26 = vpack.c.bf16 %v11480_v49, %v11478_v3  ;;  %v11454_v5 = vmax.f32 %v11438_v55, %v11446_v27  ;;  %v11448_v14 = vmax.f32 %v10867_v39, %v11421_v35  ;;  %v11423_v40 = vpop.f32.mrb[111].mxu1  ;;  %v16005_v55 = vld [vmem:[#allocation9 + $0x100] sm:$0xff]   ;;  %v16033_v31 = vld [vmem:[#allocation9 + $0x138] sm:$0xff]  }
 0x96e   :  { %v11455_v16 = vmax.f32 %v11439_v6, %v11447_v10  ;;  %v11449_v42 = vmax.f32 %v10869_v15, %v11423_v40  ;;  %v11487_v54 = vpack.c.bf16 %v11481_v52, %v11479_v8 }
 0x96f   :  { %v11474_v37 = vadd.f32 %v11463_v36, %v11454_v5  ;;  %v11456_v63 = vmax.f32 %v11440_v61, %v11448_v14  ;;  %v11557_v50 = vrot.slane %v11486_v26, 4 }
 0x970   :  { %v11475_v47 = vadd.f32 %v11467_v34, %v11455_v16  ;;  %v11457_v32 = vmax.f32 %v11441_v33, %v11449_v42  ;;  %11825 = vmatprep.mubr.bf16.mxu1 %v11487_v54  ;;  %v11558_v11 = vrot.slane %v11487_v54, 4  ;;  %v16012_v33 = vld [vmem:[#allocation9 + $0x150] sm:$0xff]  }
 0x971   :  { %v11476_v62 = vadd.f32 %v11463_v36, %v11456_v63  ;;  %11826 = vmatmul.mubr.bf16.vlgmr.msra.gmra.mrb[112].mxu1 %v11486_v26  ;;  %v11482_v59 = vmax.f32 %v11474_v37, 0.0  ;;  %v16013_v36 = vld [vmem:[#allocation9 + $0x110] sm:$0xff]  }
 0x972   :  { %v11477_v6 = vadd.f32 %v11467_v34, %v11457_v32  ;;  %13414 = vmatpush3.bf16.msra.mxu1 %v16003_v30  ;;  %11689 = vmatprep.mubr.bf16.mxu0 %v11558_v11  ;;  %v11483_v61 = vmax.f32 %v11475_v47, 0.0  ;;  %v16020_v34 = vld [vmem:[#allocation9 + $0x160] sm:$0xff]  }
 0x973   :  { %v11484_v2 = vmax.f32 %v11476_v62, 0.0  ;;  %11690 = vmatmul.mubr.bf16.vlgmr.msra.gmra.mrb[112].mxu0 %v11557_v50  ;;  %13415 = vmatprep.subr.bf16.mxu1 %v16006_v7  ;;  %v13146_v47 = vld [vmem:[#allocation10] ss:$0 sm:$0xff] }
 0x974   :  { %v11485_v45 = vmax.f32 %v11477_v6, 0.0  ;;  %13392 = vmatpush3.bf16.msra.mxu0 %v16005_v55 }
 0x975   :  { %v11488_v41 = vpack.c.bf16 %v11484_v2, %v11482_v59  ;;  %13393 = vmatprep.subr.bf16.mxu0 %v16008_v21 }
 0x976   :  { %13416 = vmatpush3.bf16.msra.mxu1 %v16007_v9  ;;  %v11489_v1 = vpack.c.bf16 %v11485_v45, %v11483_v61 }
 0x977   :  { %13417 = vmatprep.subr.bf16.mxu1 %v16010_v57  ;;  %v12038_v22 = vrot.slane %v11488_v41, 4 }
 0x978   :  { %13394 = vmatpush3.bf16.msra.mxu0 %v16009_v0  ;;  %11994 = vmatprep.mubr.bf16.mxu0 %v11489_v1  ;;  %v12039_v58 = vrot.slane %v11489_v1, 4 }
 0x979   :  { %13395 = vmatprep.subr.bf16.mxu0 %v16012_v33 }
 0x97a   :  { %13418 = vmatpush3.bf16.msra.mxu1 %v16011_v23  ;;  %12170 = vmatprep.mubr.bf16.mxu1 %v12039_v58 }
 0x97b   :  { %13419 = vmatprep.subr.bf16.mxu1 %v16014_v51 }
 0x97c   :  { %13396 = vmatpush3.bf16.msra.mxu0 %v16013_v36 }
 0x97d   :  { %13397 = vmatprep.subr.bf16.mxu0 %v16016_v25 }
 0x97e   :  { %13420 = vmatpush3.bf16.msra.mxu1 %v16015_v20 }
 0x97f   :  { %13421 = vmatprep.subr.bf16.mxu1 %v16018_v19 }
 0x980   :  { %13398 = vmatpush3.bf16.msra.mxu0 %v16017_v18 }
 0x981   :  { %13399 = vmatprep.subr.bf16.mxu0 %v16020_v34 }
 0x982   :  { %13422 = vmatpush3.bf16.msra.mxu1 %v16019_v38 }
 0x983   :  { %13423 = vmatprep.subr.bf16.mxu1 %v16022_v56 }
 0x984   :  { %13400 = vmatpush3.bf16.msra.mxu0 %v16021_v24 }
 0x985   :  { %13401 = vmatprep.subr.bf16.mxu0 %v16024_v17 }
 0x986   :  { %13424 = vmatpush3.bf16.msra.mxu1 %v16023_v13 }
 0x987   :  { %13425 = vmatprep.subr.bf16.mxu1 %v16026_v46 }
 0x988   :  { %13402 = vmatpush3.bf16.msra.mxu0 %v16025_v29 }
 0x989   :  { %13403 = vmatprep.subr.bf16.mxu0 %v16028_v60 }
 0x98a   :  { %13426 = vmatpush3.bf16.msra.mxu1 %v16027_v48 }
 0x98b   :  { %13427 = vmatprep.subr.bf16.mxu1 %v16030_v53 }
 0x98c   :  { %13404 = vmatpush3.bf16.msra.mxu0 %v16029_v28 }
 0x98d   :  { %13405 = vmatprep.subr.bf16.mxu0 %v16032_v4 }
 0x98e   :  { %13428 = vmatpush3.bf16.msra.mxu1 %v16031_v43 }
 0x990   :  { %13406 = vmatpush3.bf16.msra.mxu0 %v16033_v31 }
 0x991   :  { %12171 = vmatmul.mubr.bf16.vlgmr.msra.gmra.mrb[116].mxu1 %v12038_v22 }
 0x993   :  { %11995 = vmatmul.mubr.bf16.vlgmr.msra.gmra.mrb[116].mxu0 %v11488_v41 }
 0xa44   :  { %v13385_v44 = vpop.f32.mrb[112].mxu1 }
 0xa45   :  { %v13386_v3 = vpop.f32.mrb[113].mxu1 }
 0xa46   :  { %v13387_v49 = vadd.f32 %v13386_v3, %v13385_v44  ;;  %v13363_v27 = vpop.f32.mrb[112].mxu0  ;;  %v13388_v12 = vpop.f32.mrb[114].mxu1 }
 0xa47   :  { %v13364_v39 = vpop.f32.mrb[113].mxu0  ;;  %v13389_v8 = vpop.f32.mrb[115].mxu1 }
 0xa48   :  { %v13365_v52 = vadd.f32 %v13364_v39, %v13363_v27  ;;  %v13366_v10 = vpop.f32.mrb[114].mxu0 }
 0xa49   :  { %v13367_v35 = vpop.f32.mrb[115].mxu0 }
 0xa4a   :  { %v11828_v15 = vadd.f32 %v13387_v49, %v13365_v52 }
 0xa64   :  { %v13429_v26 = vpop.f32.mrb[116].mxu1 }
 0xa65   :  { %v13430_v5 = vpop.f32.mrb[117].mxu1 }
 0xa66   :  { %v13431_v14 = vadd.f32 %v13430_v5, %v13429_v26  ;;  %v13407_v40 = vpop.f32.mrb[116].mxu0  ;;  %v13432_v16 = vpop.f32.mrb[118].mxu1 }
 0xa67   :  { %v13408_v42 = vpop.f32.mrb[117].mxu0  ;;  %v13433_v54 = vpop.f32.mrb[119].mxu1 }
 0xa68   :  { %v13409_v30 = vadd.f32 %v13408_v42, %v13407_v40  ;;  %v13410_v37 = vpop.f32.mrb[118].mxu0 }
 0xa69   :  { %v13411_v63 = vpop.f32.mrb[119].mxu0 }
 0xa6a   :  { %v12002_v7 = vadd.f32 %v13409_v30, %v11828_v15 }
 0xa6c   :  { %v12178_v32 = vadd.f32 %v13431_v14, %v12002_v7 }
 0xa6e   :  { %v12186_v11 = vadd.f32 %v13146_v47, %v12178_v32 }
 0xa70   :  { %12187 = vst [vmem:[%s19165_s7] sm:$0xff] %v12186_v11 }
 0xa71   :  { %12192 = vsyncpa [#allocation3], 1 }
 0xa72   :  { %12193 = vsyncpa [#allocation5], 1 }
 0xa73   :  { %12194 = vsyncpa [#allocation8], 1 }
 0xa74   :  { %12195 = vsyncpa [#allocation11], 1 }

</bundles_post_ra>
